<compile_context>
chip_gen: v7x
topology: tpu7x:2x2x1
jax: 0.10.0
libtpu: 0.0.40
codegen_flags: <defaults>
</compile_context>

<pallas_src>
import functools

import jax
import jax.numpy as jnp
import numpy as np
from jax.experimental import pallas as pl
from jax.experimental.pallas import tpu as pltpu

_LANES = 128


def _round_up(x, m):
    return (x + m - 1) // m * m


# ---------------------------------------------------------------------------
# Fused kernel: conv1+BN1+ReLU -> conv2+BN2+identity+ReLU  (one image / step)
# ---------------------------------------------------------------------------
def basic_block_kernel(x_ref, w1_ref, b1_ref, w2_ref, b2_ref, o_ref, h1_ref,
                       *, H, W, A1):
    # x_ref : ((H+3)*(W+2), Cp) bf16  flat halo-padded input image
    # w*_ref: (3, 3*Cp, Cp)     bf16  BN-folded weights, kw stacked into K
    # b*_ref: (1, Cp)           f32   BN-folded bias
    # o_ref : (H*(W+2), Cp)     f32   flat output (junk cols stripped outside)
    # h1_ref: (ALLOC, Cp)       bf16  flat VMEM scratch for the intermediate
    Cp = o_ref.shape[-1]
    Wp = W + 2
    M = H * Wp            # flat rows spanning all interior output slots
    A0 = W + 3            # x-flat row of output slot m=0's center tap

    def conv3x3(src, center, w_ref):
        # src: flat 2-D ref; center: flat row offset of the (kh=1,kw=1) tap
        # for slot m=0.  Per kh: one contiguous-slice lhs (3 kw shifts stacked
        # along lanes) and one K=3*Cp MXU dot, f32 accumulation.
        acc = jnp.zeros((M, Cp), jnp.float32)
        for kh in range(3):
            r = center + (kh - 1) * Wp
            lhs = jnp.concatenate(
                [src[r - 1:r - 1 + M, :],
                 src[r:r + M, :],
                 src[r + 1:r + 1 + M, :]], axis=1)          # (M, 3*Cp) bf16
            acc = acc + jnp.dot(lhs, w_ref[kh],
                                preferred_element_type=jnp.float32)
        return acc

    # ---- conv1 + BN1 + ReLU ----
    acc1 = conv3x3(x_ref, A0, w1_ref)
    # Interleaved halo-column slots (flat col >= W) carry junk -> force to 0
    # so they act as conv2's left/right zero padding.
    col = jax.lax.broadcasted_iota(jnp.int32, (M, 1), 0) % Wp
    h1 = jnp.where(col < W, jnp.maximum(acc1 + b1_ref[...], 0.0), 0.0)

    # Stage h1 in bf16 VMEM (never touches HBM); zero only the top/bottom
    # halo strips, all three stores are 8-aligned and unmasked.
    n_rows = h1_ref.shape[0]
    h1_ref[0:A1, :] = jnp.zeros((A1, Cp), jnp.bfloat16)
    h1_ref[A1:A1 + M, :] = h1.astype(jnp.bfloat16)
    h1_ref[A1 + M:n_rows, :] = jnp.zeros((n_rows - A1 - M, Cp), jnp.bfloat16)

    # ---- conv2 + BN2 + identity add + ReLU ----
    acc2 = conv3x3(h1_ref, A1, w2_ref)
    res = x_ref[A0:A0 + M, :].astype(jnp.float32)   # identity, re-sliced from x
    o_ref[...] = jnp.maximum(acc2 + b2_ref[...] + res, 0.0).astype(o_ref.dtype)


# ---------------------------------------------------------------------------
# BN folding + weight packing (kw stacked into the contraction dim)
# ---------------------------------------------------------------------------
def _fold_bn_pack(w_oihw, gamma, beta, mean, var, cp, eps):
    scale = gamma / jnp.sqrt(var + eps)                 # (Co,)
    bias = beta - mean * scale                          # (Co,)
    w_eff = w_oihw * scale[:, None, None, None]         # fold BN scale into W
    co, ci = w_oihw.shape[0], w_oihw.shape[1]
    w_pack = jnp.transpose(w_eff, (2, 3, 1, 0))         # (kh, kw, Ci, Co)
    w_pack = jnp.pad(w_pack, ((0, 0), (0, 0), (0, cp - ci), (0, cp - co)))
    w_pack = w_pack.reshape(3, 3 * cp, cp).astype(jnp.bfloat16)
    b_pack = jnp.pad(bias, (0, cp - co)).reshape(1, cp).astype(jnp.float32)
    return w_pack, b_pack


# ---------------------------------------------------------------------------
# PyTorch-facing NCHW wrapper (downsample=None)
# ---------------------------------------------------------------------------
def basic_block_forward(x_nchw, params, stride=1, eps=1e-5):
    (w1, g1, b1, m1, v1, w2, g2, b2, m2, v2) = params
    cout1, cin = int(w1.shape[0]), int(w1.shape[1])
    cout2 = int(w2.shape[0])
    if stride != 1 or cin != cout2:
        raise ValueError(
            "downsample=None requires stride=1 and in_channels == "
            "out_channels * expansion so the identity add is well formed.")

    n, _, h, w = x_nchw.shape
    cp = _round_up(max(cin, cout1, cout2), _LANES)   # lane-dense channel pad
    wp = w + 2
    mpad = (h + 3) * wp           # flat rows per image (1 top + 2 bottom halo)
    mlen = h * wp                 # flat rows spanning all output slots
    a1 = _round_up(w + 3, 8)      # 8-aligned staging offset for h1
    alloc = _round_up(a1 + mlen + w + 3, 8)

    # NCHW f32 -> NHWC bf16 -> halo pad ((1,2),(1,1)) + channel pad -> flatten
    # (the reshape is free; no separate f32 residual copy is materialized).
    x_nhwc = jnp.transpose(x_nchw, (0, 2, 3, 1)).astype(jnp.bfloat16)
    x_pad = jnp.pad(x_nhwc, ((0, 0), (1, 2), (1, 1), (0, cp - cin)))
    x_flat = x_pad.reshape(n, mpad, cp)

    w1p, b1p = _fold_bn_pack(w1, g1, b1, m1, v1, cp, eps)
    w2p, b2p = _fold_bn_pack(w2, g2, b2, m2, v2, cp, eps)

    kernel = functools.partial(basic_block_kernel, H=h, W=w, A1=a1)

    # Rough per-step VMEM footprint (double-buffered inputs/output + scratch);
    # raise the scoped limit only when realistic channel counts need it.
    vmem_bytes = (2 * mpad * cp * 2            # x (bf16, 2 buffers)
                  + 2 * 2 * 9 * cp * cp * 2    # w1 + w2 (bf16, 2 buffers each)
                  + 2 * mlen * cp * 4          # output (f32, 2 buffers)
                  + alloc * cp * 2)            # h1 scratch (bf16)
    vmem_limit = None
    if vmem_bytes > 12 * 1024 * 1024:
        vmem_limit = min(int(vmem_bytes * 3 // 2), 64 * 1024 * 1024)

    out_flat = pl.pallas_call(
        kernel,
        out_shape=jax.ShapeDtypeStruct((n, mlen, cp), jnp.float32),
        grid_spec=pltpu.PrefetchScalarGridSpec(
            num_scalar_prefetch=0,
            grid=(n,),
            in_specs=[
                pl.BlockSpec((None, mpad, cp), lambda i: (i, 0, 0)),   # x
                pl.BlockSpec((3, 3 * cp, cp), lambda i: (0, 0, 0)),    # w1
                pl.BlockSpec((1, cp), lambda i: (0, 0)),               # b1
                pl.BlockSpec((3, 3 * cp, cp), lambda i: (0, 0, 0)),    # w2
                pl.BlockSpec((1, cp), lambda i: (0, 0)),               # b2
            ],
            out_specs=pl.BlockSpec((None, mlen, cp), lambda i: (i, 0, 0)),
            scratch_shapes=[pltpu.VMEM((alloc, cp), jnp.bfloat16)],
        ),
        compiler_params=pltpu.CompilerParams(
            dimension_semantics=("parallel",),
            vmem_limit_bytes=vmem_limit),
    )(x_flat, w1p, b1p, w2p, b2p)

    # Strip the interleaved junk columns, lane padding; back to NCHW.
    out = out_flat.reshape(n, h, wp, cp)[:, :, :w, :cout2]
    return jnp.transpose(out, (0, 3, 1, 2))


# ---------------------------------------------------------------------------
# Pure-JAX f32 reference (mirrors the PyTorch forward, eval-mode BN)
# ---------------------------------------------------------------------------
def _conv_nchw(x, w_oihw, stride):
    return jax.lax.conv_general_dilated(
        x, w_oihw, window_strides=(stride, stride),
        padding=((1, 1), (1, 1)),
        dimension_numbers=("NCHW", "OIHW", "NCHW"),
        precision=jax.lax.Precision.HIGHEST)


def reference_forward(x, params, stride=1, eps=1e-5):
    (w1, g1, b1, m1, v1, w2, g2, b2, m2, v2) = params
    out = _conv_nchw(x, w1, stride)
    out = (out - m1[None, :, None, None]) / jnp.sqrt(v1 + eps)[None, :, None, None]
    out = out * g1[None, :, None, None] + b1[None, :, None, None]
    out = jnp.maximum(out, 0.0)
    out = _conv_nchw(out, w2, 1)
    out = (out - m2[None, :, None, None]) / jnp.sqrt(v2 + eps)[None, :, None, None]
    out = out * g2[None, :, None, None] + b2[None, :, None, None]
    out = out + x
    return jnp.maximum(out, 0.0)


# ---------------------------------------------------------------------------
if __name__ == "__main__":
    # BasicBlock(in_channels=4, out_channels=4, stride=1, expansion=1,
    #            downsample=None)
    N, Cin, H, W = 2, 4, 16, 16
    Cout, expansion, stride = 4, 1, 1

    key = jax.random.PRNGKey(0)
    k1, k2, k3, k4, k5, k6 = jax.random.split(key, 6)

    x = jax.random.normal(k1, (N, Cin, H, W), dtype=jnp.float32)

    w1 = 0.1 * jax.random.normal(k2, (Cout, Cin, 3, 3), dtype=jnp.float32)
    w2 = 0.1 * jax.random.normal(k3, (Cout * expansion, Cout, 3, 3),
                                 dtype=jnp.float32)
    g1 = 1.0 + 0.1 * jax.random.normal(k4, (Cout,), dtype=jnp.float32)
    b1 = 0.1 * jax.random.normal(k5, (Cout,), dtype=jnp.float32)
    g2 = 1.0 + 0.1 * jax.random.normal(k6, (Cout * expansion,), dtype=jnp.float32)
    b2 = jnp.zeros((Cout * expansion,), dtype=jnp.float32)
    m1 = jnp.zeros((Cout,), jnp.float32)
    v1 = jnp.ones((Cout,), jnp.float32)
    m2 = jnp.zeros((Cout * expansion,), jnp.float32)
    v2 = jnp.ones((Cout * expansion,), jnp.float32)

    params = (w1, g1, b1, m1, v1, w2, g2, b2, m2, v2)

    fwd = jax.jit(basic_block_forward, static_argnames=("stride",))
    out = jax.block_until_ready(fwd(x, params, stride=stride))
    ref = jax.block_until_ready(reference_forward(x, params, stride=stride))

    assert out.shape == (N, Cout * expansion, H, W), out.shape
    # bf16 MXU operands / bf16 h1 staging / bf16 identity, f32 accumulation:
    # compare against the pure-f32 reference with a covering tolerance.
    np.testing.assert_allclose(np.asarray(out), np.asarray(ref),
                               rtol=1e-2, atol=1e-2)
    print("KERNEL_OK")
</pallas_src>

<mosaic_0001>
module attributes {stable_mosaic.version = 11 : i64} {
  func.func @basic_block_kernel(%arg0: i32, %arg1: memref<1x342x128xbf16, #tpu.memory_space<vmem>>, %arg2: memref<3x384x128xbf16, #tpu.memory_space<vmem>>, %arg3: memref<1x128xf32, #tpu.memory_space<vmem>>, %arg4: memref<3x384x128xbf16, #tpu.memory_space<vmem>>, %arg5: memref<1x128xf32, #tpu.memory_space<vmem>>, %arg6: memref<1x288x128xf32, #tpu.memory_space<vmem>>, %arg7: memref<336x128xbf16, #tpu.memory_space<vmem>>) attributes {dimension_semantics = [#tpu.dimension_semantics<parallel>], iteration_bounds = array<i64: 2>, scalar_prefetch = 0 : i64, scratch_operands = 1 : i64, tpu.core_type = #tpu.core_type<tc>, window_params = [{transform_indices = @transform_0, window_bounds = array<i64: 1, 342, 128>}, {pipeline_mode = #tpu.pipeline_mode<synchronous>, transform_indices = @transform_1, window_bounds = array<i64: 3, 384, 128>}, {pipeline_mode = #tpu.pipeline_mode<synchronous>, transform_indices = @transform_2, window_bounds = array<i64: 1, 128>}, {pipeline_mode = #tpu.pipeline_mode<synchronous>, transform_indices = @transform_3, window_bounds = array<i64: 3, 384, 128>}, {pipeline_mode = #tpu.pipeline_mode<synchronous>, transform_indices = @transform_4, window_bounds = array<i64: 1, 128>}, {transform_indices = @transform_5, window_bounds = array<i64: 1, 288, 128>}]} {
    %cst = arith.constant 0.000000e+00 : f32
    %0 = vector.broadcast %cst : f32 to vector<288x128xf32>
    %c0 = arith.constant 0 : index
    %c0_0 = arith.constant 0 : index
    %c0_1 = arith.constant 0 : index
    %1 = vector.load %arg1[%c0, %c0_0, %c0_1] : memref<1x342x128xbf16, #tpu.memory_space<vmem>>, vector<1x288x128xbf16>
    %2 = vector.shape_cast %1 : vector<1x288x128xbf16> to vector<288x128xbf16>
    %c0_2 = arith.constant 0 : index
    %c1 = arith.constant 1 : index
    %c0_3 = arith.constant 0 : index
    %3 = vector.load %arg1[%c0_2, %c1, %c0_3] : memref<1x342x128xbf16, #tpu.memory_space<vmem>>, vector<1x288x128xbf16>
    %4 = vector.shape_cast %3 : vector<1x288x128xbf16> to vector<288x128xbf16>
    %c0_4 = arith.constant 0 : index
    %c2 = arith.constant 2 : index
    %c0_5 = arith.constant 0 : index
    %5 = vector.load %arg1[%c0_4, %c2, %c0_5] : memref<1x342x128xbf16, #tpu.memory_space<vmem>>, vector<1x288x128xbf16>
    %6 = vector.shape_cast %5 : vector<1x288x128xbf16> to vector<288x128xbf16>
    %7 = tpu.concatenate %2, %4, %6 in 1 : vector<288x128xbf16>, vector<288x128xbf16>, vector<288x128xbf16> -> vector<288x384xbf16>
    %c0_6 = arith.constant 0 : index
    %c0_7 = arith.constant 0 : index
    %c0_8 = arith.constant 0 : index
    %8 = vector.load %arg2[%c0_6, %c0_7, %c0_8] : memref<3x384x128xbf16, #tpu.memory_space<vmem>>, vector<1x384x128xbf16>
    %9 = vector.shape_cast %8 : vector<1x384x128xbf16> to vector<384x128xbf16>
    %cst_9 = arith.constant dense<0.000000e+00> : vector<288x128xf32>
    %10 = tpu.matmul %7, %9, %cst_9 {dimension_numbers = #tpu.dot_dimension_numbers<[1], [0], [0], [1], [0, 0, 1, 1], [], []>} : vector<288x384xbf16>, vector<384x128xbf16>, vector<288x128xf32> -> vector<288x128xf32>
    %11 = arith.addf %0, %10 : vector<288x128xf32>
    %c0_10 = arith.constant 0 : index
    %c18 = arith.constant 18 : index
    %c0_11 = arith.constant 0 : index
    %12 = vector.load %arg1[%c0_10, %c18, %c0_11] : memref<1x342x128xbf16, #tpu.memory_space<vmem>>, vector<1x288x128xbf16>
    %13 = vector.shape_cast %12 : vector<1x288x128xbf16> to vector<288x128xbf16>
    %c0_12 = arith.constant 0 : index
    %c19 = arith.constant 19 : index
    %c0_13 = arith.constant 0 : index
    %14 = vector.load %arg1[%c0_12, %c19, %c0_13] : memref<1x342x128xbf16, #tpu.memory_space<vmem>>, vector<1x288x128xbf16>
    %15 = vector.shape_cast %14 : vector<1x288x128xbf16> to vector<288x128xbf16>
    %c0_14 = arith.constant 0 : index
    %c20 = arith.constant 20 : index
    %c0_15 = arith.constant 0 : index
    %16 = vector.load %arg1[%c0_14, %c20, %c0_15] : memref<1x342x128xbf16, #tpu.memory_space<vmem>>, vector<1x288x128xbf16>
    %17 = vector.shape_cast %16 : vector<1x288x128xbf16> to vector<288x128xbf16>
    %18 = tpu.concatenate %13, %15, %17 in 1 : vector<288x128xbf16>, vector<288x128xbf16>, vector<288x128xbf16> -> vector<288x384xbf16>
    %c1_16 = arith.constant 1 : index
    %c0_17 = arith.constant 0 : index
    %c0_18 = arith.constant 0 : index
    %19 = vector.load %arg2[%c1_16, %c0_17, %c0_18] : memref<3x384x128xbf16, #tpu.memory_space<vmem>>, vector<1x384x128xbf16>
    %20 = vector.shape_cast %19 : vector<1x384x128xbf16> to vector<384x128xbf16>
    %cst_19 = arith.constant dense<0.000000e+00> : vector<288x128xf32>
    %21 = tpu.matmul %18, %20, %cst_19 {dimension_numbers = #tpu.dot_dimension_numbers<[1], [0], [0], [1], [0, 0, 1, 1], [], []>} : vector<288x384xbf16>, vector<384x128xbf16>, vector<288x128xf32> -> vector<288x128xf32>
    %22 = arith.addf %11, %21 : vector<288x128xf32>
    %c0_20 = arith.constant 0 : index
    %c36 = arith.constant 36 : index
    %c0_21 = arith.constant 0 : index
    %23 = vector.load %arg1[%c0_20, %c36, %c0_21] : memref<1x342x128xbf16, #tpu.memory_space<vmem>>, vector<1x288x128xbf16>
    %24 = vector.shape_cast %23 : vector<1x288x128xbf16> to vector<288x128xbf16>
    %c0_22 = arith.constant 0 : index
    %c37 = arith.constant 37 : index
    %c0_23 = arith.constant 0 : index
    %25 = vector.load %arg1[%c0_22, %c37, %c0_23] : memref<1x342x128xbf16, #tpu.memory_space<vmem>>, vector<1x288x128xbf16>
    %26 = vector.shape_cast %25 : vector<1x288x128xbf16> to vector<288x128xbf16>
    %c0_24 = arith.constant 0 : index
    %c38 = arith.constant 38 : index
    %c0_25 = arith.constant 0 : index
    %27 = vector.load %arg1[%c0_24, %c38, %c0_25] : memref<1x342x128xbf16, #tpu.memory_space<vmem>>, vector<1x288x128xbf16>
    %28 = vector.shape_cast %27 : vector<1x288x128xbf16> to vector<288x128xbf16>
    %29 = tpu.concatenate %24, %26, %28 in 1 : vector<288x128xbf16>, vector<288x128xbf16>, vector<288x128xbf16> -> vector<288x384xbf16>
    %c2_26 = arith.constant 2 : index
    %c0_27 = arith.constant 0 : index
    %c0_28 = arith.constant 0 : index
    %30 = vector.load %arg2[%c2_26, %c0_27, %c0_28] : memref<3x384x128xbf16, #tpu.memory_space<vmem>>, vector<1x384x128xbf16>
    %31 = vector.shape_cast %30 : vector<1x384x128xbf16> to vector<384x128xbf16>
    %cst_29 = arith.constant dense<0.000000e+00> : vector<288x128xf32>
    %32 = tpu.matmul %29, %31, %cst_29 {dimension_numbers = #tpu.dot_dimension_numbers<[1], [0], [0], [1], [0, 0, 1, 1], [], []>} : vector<288x384xbf16>, vector<384x128xbf16>, vector<288x128xf32> -> vector<288x128xf32>
    %33 = arith.addf %22, %32 : vector<288x128xf32>
    %34 = tpu.iota {dimensions = array<i32: 0>} : vector<288x1xi32>
    %c18_i32 = arith.constant 18 : i32
    %c0_i32 = arith.constant 0 : i32
    %35 = arith.cmpi eq, %c18_i32, %c0_i32 : i32
    %c1_i32 = arith.constant 1 : i32
    %36 = arith.select %35, %c1_i32, %c18_i32 : i32
    %37 = vector.broadcast %36 : i32 to vector<288x1xi32>
    %38 = arith.remsi %34, %37 : vector<288x1xi32>
    %c0_i32_30 = arith.constant 0 : i32
    %39 = vector.broadcast %c0_i32_30 : i32 to vector<288x1xi32>
    %40 = arith.cmpi ne, %38, %39 : vector<288x1xi32>
    %c0_i32_31 = arith.constant 0 : i32
    %41 = vector.broadcast %c0_i32_31 : i32 to vector<288x1xi32>
    %42 = arith.cmpi slt, %38, %41 : vector<288x1xi32>
    %c0_i32_32 = arith.constant 0 : i32
    %43 = arith.cmpi slt, %36, %c0_i32_32 : i32
    %44 = vector.broadcast %43 : i1 to vector<288x1xi1>
    %45 = vector.broadcast %44 : vector<288x1xi1> to vector<288x1xi1>
    %46 = arith.xori %42, %45 : vector<288x1xi1>
    %47 = arith.andi %46, %40 : vector<288x1xi1>
    %48 = vector.broadcast %36 : i32 to vector<288x1xi32>
    %49 = arith.addi %38, %48 : vector<288x1xi32>
    %50 = arith.select %47, %49, %38 : vector<288x1xi1>, vector<288x1xi32>
    %c16_i32 = arith.constant 16 : i32
    %51 = vector.broadcast %c16_i32 : i32 to vector<288x1xi32>
    %52 = arith.cmpi slt, %50, %51 : vector<288x1xi32>
    %c0_33 = arith.constant 0 : index
    %c0_34 = arith.constant 0 : index
    %53 = vector.load %arg3[%c0_33, %c0_34] : memref<1x128xf32, #tpu.memory_space<vmem>>, vector<1x128xf32>
    %54 = vector.broadcast %53 : vector<1x128xf32> to vector<288x128xf32>
    %55 = arith.addf %33, %54 : vector<288x128xf32>
    %cst_35 = arith.constant 0.000000e+00 : f32
    %56 = vector.broadcast %cst_35 : f32 to vector<288x128xf32>
    %57 = arith.maximumf %55, %56 : vector<288x128xf32>
    %cst_36 = arith.constant 0.000000e+00 : f32
    %58 = vector.shape_cast %52 : vector<288x1xi1> to vector<288x1xi1>
    %59 = vector.broadcast %58 : vector<288x1xi1> to vector<288x128xi1>
    %60 = vector.broadcast %cst_36 : f32 to vector<288x128xf32>
    %61 = arith.select %59, %57, %60 : vector<288x128xi1>, vector<288x128xf32>
    %cst_37 = arith.constant 0.000000e+00 : bf16
    %62 = vector.broadcast %cst_37 : bf16 to vector<24x128xbf16>
    %c0_38 = arith.constant 0 : index
    %c0_39 = arith.constant 0 : index
    %63 = vector.load %arg7[%c0_38, %c0_39] : memref<336x128xbf16, #tpu.memory_space<vmem>>, vector<24x128xbf16>
    tpu.vector_store %arg7[%c0_38, %c0_39], %62 {strides = array<i32>} : memref<336x128xbf16, #tpu.memory_space<vmem>>, vector<24x128xbf16>,
    %64 = arith.truncf %61 : vector<288x128xf32> to vector<288x128xbf16>
    %c24 = arith.constant 24 : index
    %c0_40 = arith.constant 0 : index
    %65 = vector.load %arg7[%c24, %c0_40] : memref<336x128xbf16, #tpu.memory_space<vmem>>, vector<288x128xbf16>
    tpu.vector_store %arg7[%c24, %c0_40], %64 {strides = array<i32>} : memref<336x128xbf16, #tpu.memory_space<vmem>>, vector<288x128xbf16>,
    %cst_41 = arith.constant 0.000000e+00 : bf16
    %66 = vector.broadcast %cst_41 : bf16 to vector<24x128xbf16>
    %c312 = arith.constant 312 : index
    %c0_42 = arith.constant 0 : index
    %67 = vector.load %arg7[%c312, %c0_42] : memref<336x128xbf16, #tpu.memory_space<vmem>>, vector<24x128xbf16>
    tpu.vector_store %arg7[%c312, %c0_42], %66 {strides = array<i32>} : memref<336x128xbf16, #tpu.memory_space<vmem>>, vector<24x128xbf16>,
    %cst_43 = arith.constant 0.000000e+00 : f32
    %68 = vector.broadcast %cst_43 : f32 to vector<288x128xf32>
    %c5 = arith.constant 5 : index
    %c0_44 = arith.constant 0 : index
    %69 = vector.load %arg7[%c5, %c0_44] : memref<336x128xbf16, #tpu.memory_space<vmem>>, vector<288x128xbf16>
    %c6 = arith.constant 6 : index
    %c0_45 = arith.constant 0 : index
    %70 = vector.load %arg7[%c6, %c0_45] : memref<336x128xbf16, #tpu.memory_space<vmem>>, vector<288x128xbf16>
    %c7 = arith.constant 7 : index
    %c0_46 = arith.constant 0 : index
    %71 = vector.load %arg7[%c7, %c0_46] : memref<336x128xbf16, #tpu.memory_space<vmem>>, vector<288x128xbf16>
    %72 = tpu.concatenate %69, %70, %71 in 1 : vector<288x128xbf16>, vector<288x128xbf16>, vector<288x128xbf16> -> vector<288x384xbf16>
    %c0_47 = arith.constant 0 : index
    %c0_48 = arith.constant 0 : index
    %c0_49 = arith.constant 0 : index
    %73 = vector.load %arg4[%c0_47, %c0_48, %c0_49] : memref<3x384x128xbf16, #tpu.memory_space<vmem>>, vector<1x384x128xbf16>
    %74 = vector.shape_cast %73 : vector<1x384x128xbf16> to vector<384x128xbf16>
    %cst_50 = arith.constant dense<0.000000e+00> : vector<288x128xf32>
    %75 = tpu.matmul %72, %74, %cst_50 {dimension_numbers = #tpu.dot_dimension_numbers<[1], [0], [0], [1], [0, 0, 1, 1], [], []>} : vector<288x384xbf16>, vector<384x128xbf16>, vector<288x128xf32> -> vector<288x128xf32>
    %76 = arith.addf %68, %75 : vector<288x128xf32>
    %c23 = arith.constant 23 : index
    %c0_51 = arith.constant 0 : index
    %77 = vector.load %arg7[%c23, %c0_51] : memref<336x128xbf16, #tpu.memory_space<vmem>>, vector<288x128xbf16>
    %c24_52 = arith.constant 24 : index
    %c0_53 = arith.constant 0 : index
    %78 = vector.load %arg7[%c24_52, %c0_53] : memref<336x128xbf16, #tpu.memory_space<vmem>>, vector<288x128xbf16>
    %c25 = arith.constant 25 : index
    %c0_54 = arith.constant 0 : index
    %79 = vector.load %arg7[%c25, %c0_54] : memref<336x128xbf16, #tpu.memory_space<vmem>>, vector<288x128xbf16>
    %80 = tpu.concatenate %77, %78, %79 in 1 : vector<288x128xbf16>, vector<288x128xbf16>, vector<288x128xbf16> -> vector<288x384xbf16>
    %c1_55 = arith.constant 1 : index
    %c0_56 = arith.constant 0 : index
    %c0_57 = arith.constant 0 : index
    %81 = vector.load %arg4[%c1_55, %c0_56, %c0_57] : memref<3x384x128xbf16, #tpu.memory_space<vmem>>, vector<1x384x128xbf16>
    %82 = vector.shape_cast %81 : vector<1x384x128xbf16> to vector<384x128xbf16>
    %cst_58 = arith.constant dense<0.000000e+00> : vector<288x128xf32>
    %83 = tpu.matmul %80, %82, %cst_58 {dimension_numbers = #tpu.dot_dimension_numbers<[1], [0], [0], [1], [0, 0, 1, 1], [], []>} : vector<288x384xbf16>, vector<384x128xbf16>, vector<288x128xf32> -> vector<288x128xf32>
    %84 = arith.addf %76, %83 : vector<288x128xf32>
    %c41 = arith.constant 41 : index
    %c0_59 = arith.constant 0 : index
    %85 = vector.load %arg7[%c41, %c0_59] : memref<336x128xbf16, #tpu.memory_space<vmem>>, vector<288x128xbf16>
    %c42 = arith.constant 42 : index
    %c0_60 = arith.constant 0 : index
    %86 = vector.load %arg7[%c42, %c0_60] : memref<336x128xbf16, #tpu.memory_space<vmem>>, vector<288x128xbf16>
    %c43 = arith.constant 43 : index
    %c0_61 = arith.constant 0 : index
    %87 = vector.load %arg7[%c43, %c0_61] : memref<336x128xbf16, #tpu.memory_space<vmem>>, vector<288x128xbf16>
    %88 = tpu.concatenate %85, %86, %87 in 1 : vector<288x128xbf16>, vector<288x128xbf16>, vector<288x128xbf16> -> vector<288x384xbf16>
    %c2_62 = arith.constant 2 : index
    %c0_63 = arith.constant 0 : index
    %c0_64 = arith.constant 0 : index
    %89 = vector.load %arg4[%c2_62, %c0_63, %c0_64] : memref<3x384x128xbf16, #tpu.memory_space<vmem>>, vector<1x384x128xbf16>
    %90 = vector.shape_cast %89 : vector<1x384x128xbf16> to vector<384x128xbf16>
    %cst_65 = arith.constant dense<0.000000e+00> : vector<288x128xf32>
    %91 = tpu.matmul %88, %90, %cst_65 {dimension_numbers = #tpu.dot_dimension_numbers<[1], [0], [0], [1], [0, 0, 1, 1], [], []>} : vector<288x384xbf16>, vector<384x128xbf16>, vector<288x128xf32> -> vector<288x128xf32>
    %92 = arith.addf %84, %91 : vector<288x128xf32>
    %c0_66 = arith.constant 0 : index
    %c19_67 = arith.constant 19 : index
    %c0_68 = arith.constant 0 : index
    %93 = vector.load %arg1[%c0_66, %c19_67, %c0_68] : memref<1x342x128xbf16, #tpu.memory_space<vmem>>, vector<1x288x128xbf16>
    %94 = vector.shape_cast %93 : vector<1x288x128xbf16> to vector<288x128xbf16>
    %95 = arith.extf %94 : vector<288x128xbf16> to vector<288x128xf32>
    %c0_69 = arith.constant 0 : index
    %c0_70 = arith.constant 0 : index
    %96 = vector.load %arg5[%c0_69, %c0_70] : memref<1x128xf32, #tpu.memory_space<vmem>>, vector<1x128xf32>
    %97 = vector.broadcast %96 : vector<1x128xf32> to vector<288x128xf32>
    %98 = arith.addf %92, %97 : vector<288x128xf32>
    %99 = arith.addf %98, %95 : vector<288x128xf32>
    %cst_71 = arith.constant 0.000000e+00 : f32
    %100 = vector.broadcast %cst_71 : f32 to vector<288x128xf32>
    %101 = arith.maximumf %99, %100 : vector<288x128xf32>
    %c0_72 = arith.constant 0 : index
    %c0_73 = arith.constant 0 : index
    %c0_74 = arith.constant 0 : index
    %102 = vector.load %arg6[%c0_72, %c0_73, %c0_74] : memref<1x288x128xf32, #tpu.memory_space<vmem>>, vector<1x288x128xf32>
    %103 = vector.shape_cast %102 : vector<1x288x128xf32> to vector<288x128xf32>
    %104 = vector.shape_cast %101 : vector<288x128xf32> to vector<1x288x128xf32>
    tpu.vector_store %arg6[%c0_72, %c0_73, %c0_74], %104 {strides = array<i32>} : memref<1x288x128xf32, #tpu.memory_space<vmem>>, vector<1x288x128xf32>,
    return
  }
  func.func @transform_0(%arg0: i32) -> (i32, i32, i32) {
    %c0_i32 = arith.constant 0 : i32
    %c0_i32_0 = arith.constant 0 : i32
    %c0_i32_1 = arith.constant 0 : i32
    return %arg0, %c0_i32, %c0_i32_0 : i32, i32, i32
  }
  func.func @transform_1(%arg0: i32) -> (i32, i32, i32) {
    %c0_i32 = arith.constant 0 : i32
    %c0_i32_0 = arith.constant 0 : i32
    %c0_i32_1 = arith.constant 0 : i32
    %c0_i32_2 = arith.constant 0 : i32
    return %c0_i32, %c0_i32_0, %c0_i32_1 : i32, i32, i32
  }
  func.func @transform_2(%arg0: i32) -> (i32, i32) {
    %c0_i32 = arith.constant 0 : i32
    %c0_i32_0 = arith.constant 0 : i32
    %c0_i32_1 = arith.constant 0 : i32
    return %c0_i32, %c0_i32_0 : i32, i32
  }
  func.func @transform_3(%arg0: i32) -> (i32, i32, i32) {
    %c0_i32 = arith.constant 0 : i32
    %c0_i32_0 = arith.constant 0 : i32
    %c0_i32_1 = arith.constant 0 : i32
    %c0_i32_2 = arith.constant 0 : i32
    return %c0_i32, %c0_i32_0, %c0_i32_1 : i32, i32, i32
  }
  func.func @transform_4(%arg0: i32) -> (i32, i32) {
    %c0_i32 = arith.constant 0 : i32
    %c0_i32_0 = arith.constant 0 : i32
    %c0_i32_1 = arith.constant 0 : i32
    return %c0_i32, %c0_i32_0 : i32, i32
  }
  func.func @transform_5(%arg0: i32) -> (i32, i32, i32) {
    %c0_i32 = arith.constant 0 : i32
    %c0_i32_0 = arith.constant 0 : i32
    %c0_i32_1 = arith.constant 0 : i32
    return %arg0, %c0_i32, %c0_i32_0 : i32, i32, i32
  }
}

</mosaic_0001>

<bundles_post_ra>
// kernel: basic_block_forward.1
= control target key start
LH: loop header
LB: loop body
LE: loop exit
PB: predicated region body
PF: predicated region fallthrough
CT: control target
= control target key end

     0   :  { %s9042_s18 = smov 0   ;;  %s14212_s0 = inlined_call_operand.vmem [shape: bf16[2,342,128], index: 0, kind: input, shape index: {}]   ;;  %s14213_s1 = inlined_call_operand.vmem [shape: bf16[3,384,128], index: 1, kind: input, shape index: {}]   ;;  %s14214_s2 = inlined_call_operand.vmem [shape: f32[1,128], index: 2, kind: input, shape index: {}]   ;;  %s14215_s3 = inlined_call_operand.vmem [shape: bf16[3,384,128], index: 3, kind: input, shape index: {}]   ;;  %s14216_s4 = inlined_call_operand.vmem [shape: f32[1,128], index: 4, kind: input, shape index: {}]   ;;  %s14217_s5 = inlined_call_operand.vmem [shape: f32[2,288,128], index: 5, kind: output, shape index: {}]  }
   0x1 LB: > { %s7761_s19 = sadd.s32 4294967295, %s9009_s18   ;;  %p7765_p0 = scmp.ge.s32.totalorder %s9009_s18, 1  ;;  %s9009_s18 = sphi %s9042_s18, %s15_s18  }
   0x2   : > { %p187_p1 = scmp.lt.s32.totalorder %s9009_s18, 3 }
   0x4   : > { %p188_p2 = pnand %p7765_p0, %p187_p1 }
   0x6   : > { %191 = sbr.rel (%p188_p2) target bundleno = 1187 (0x4a3), region = 40 }
   0xd   : > { %v8790_v0 = vld [vmem:[%s14213_s1 + $0xc0] sm:$0xff]   ;;  %v14218_v1 = vmov 0   ;;  %p215_p3 = scmp.lt.s32.totalorder %s7761_s19, 1  ;;  %v8792_v3 = vld [vmem:[%s14213_s1 + $0xc8] sm:$0xff]   ;;  %v8795_v5 = vld [vmem:[%s14213_s1 + $0x150] sm:$0xff]   ;;  %vm14239_vm0 = vcmask 1046528  }
   0xe   : > { %1012 = vmatprep.subr.bf16.mxu0 %v14218_v1  ;;  %3775 = vst [vmem:[#allocation2] sm:$0xff] %v14218_v1  ;;  %3776 = vst [vmem:[#allocation2 + $0x8] sm:$0xf] %v14218_v1  ;;  %v8791_v2 = vld [vmem:[%s14213_s1 + $0x140] sm:$0xff]   ;;  %v8793_v4 = vld [vmem:[%s14213_s1 + $0x148] sm:$0xff]   ;;  %vm2239_vm2 = vcmask 1045504  }
   0xf   : > { %3887 = vst [vmem:[#allocation2 + $0x98] sm:$0xf0] %v14218_v1  ;;  %3888 = vst [vmem:[#allocation2 + $0xa0] sm:$0xff] %v14218_v1  ;;  %1013 = vmatpush1.bf16.msra.mxu0 %v8790_v0  ;;  %8395 = vmatprep.subr.bf16.mxu1 %v8791_v2  ;;  %s15155_s19 = smov (!%p215_p3, %s7761_s19), 1  ;;  %v8794_v6 = vld [vmem:[%s14213_s1 + $0xd0] sm:$0xff]   ;;  %v8797_v7 = vld [vmem:[%s14213_s1 + $0x158] sm:$0xff]  }
  0x10   : > { %1014 = vmatprep.subr.bf16.mxu0 %v14218_v1  ;;  %8396 = vmatpush3.bf16.msra.mxu1 %v8791_v2  ;;  %s8707_s9 = smul.u32 172, %s15155_s19  ;;  %v8796_v8 = vld [vmem:[%s14213_s1 + $0xd8] sm:$0xff]   ;;  %v8799_v9 = vld [vmem:[%s14213_s1 + $0x160] sm:$0xff]   ;;  %v8801_v11 = vld [vmem:[%s14213_s1 + $0x168] sm:$0xff]   ;;  %vm14238_vm1 = vsmask.f32 7424 }
  0x11   : > { %8397 = vmatprep.subr.bf16.mxu1 %v8793_v4  ;;  %v8798_v10 = vld [vmem:[%s14213_s1 + $0xe0] sm:$0xff]   ;;  %v8800_v13 = vld [vmem:[%s14213_s1 + $0xe8] sm:$0xff]   ;;  %v8803_v17 = vld [vmem:[%s14213_s1 + $0x170] sm:$0xff]   ;;  %s8708_s8 = smul.u32 288, %s15155_s19 }
  0x12   : > { %s9091_s16 = scalar_lea.vmem %s14212_s0, %s8707_s9  ;;  %v8802_v22 = vld [vmem:[%s14213_s1 + $0xf0] sm:$0xff]   ;;  %v8805_v31 = vld [vmem:[%s14213_s1 + $0x178] sm:$0xff]   ;;  %v8811_v41 = vld [vmem:[%s14213_s1 + $0x100] sm:$0xff]  }
  0x13   : > { %1015 = vmatpush1.bf16.msra.mxu0 %v8792_v3  ;;  %v9101_v12 = vld [vmem:[%s9091_s16 + $0xc] sm:$0xf]  ;;  %v9107_v14 = vld [vmem:[%s9091_s16 + $0x10] sm:$0xff]   ;;  %v9110_v15 = vld [vmem:[%s9091_s16 + $0x18] sm:$0xff]   ;;  %s14006_s10 = scalar_lea.vmem %s14217_s5, %s8708_s8 }
  0x14   : > { %1016 = vmatprep.subr.bf16.mxu0 %v14218_v1  ;;  %8398 = vmatpush3.bf16.msra.mxu1 %v8793_v4  ;;  %v654_v16 = vld [vmem:[%s9091_s16 + $0x8] sm:$0xc]  ;;  %v9118_v18 = vrot.slane %v9107_v14, 1  ;;  %v551_v19 = vrot.slane %v9110_v15, 1  ;;  %v9123_v21 = vld [vmem:[%s9091_s16 + $0x20] sm:$0xff]   ;;  %v9142_v30 = vld [vmem:[%s9091_s16 + $0x30] sm:$0xff]  }
  0x15   : > { %8399 = vmatprep.subr.bf16.mxu1 %v8795_v5  ;;  %v7792_v20 = vcombine.low %v654_v16, %v9101_v12  ;;  %v553_v25 = vrot.slane %v9123_v21, 1  ;;  %v9134_v26 = vld [vmem:[%s9091_s16 + $0x28] sm:$0xff]   ;;  %v8804_v34 = vld [vmem:[%s14213_s1 + $0xf8] sm:$0xff]   ;;  %v557_v38 = vrot.slane %v9142_v30, 1  ;;  %v392_v42 = vshll.u32 %v9107_v14, 16  ;;  %v8817_v47 = vld [vmem:[%s14213_s1] sm:$0xff]  }
  0x16   : > { %v9130_v23 = vsel %vm14239_vm0, %v9118_v18, %v551_v19  ;;  %v555_v29 = vrot.slane %v9134_v26, 1  ;;  %v9162_v40 = vld [vmem:[%s9091_s16 + $0x38] sm:$0xff]   ;;  %v649_v43 = vld [vmem:[%s9091_s16 + $0x8] sm:$0xe]  ;;  %v9184_v50 = vld [vmem:[%s9091_s16 + $0x40] sm:$0xff]   ;;  %v396_v53 = vshrl.u32 %v9107_v14, 16 }
  0x17   : > { %1017 = vmatpush1.bf16.msra.mxu0 %v8794_v6  ;;  %14435 = vst [vmem:[#allocation3_spill] sm:$0xff] %v9130_v23  ;;  %v696_v24 = vrot.slane %v7792_v20, 1  ;;  %v757_v27 = vrot.slane %v9130_v23, 1  ;;  %v9148_v33 = vsel %vm14239_vm0, %v551_v19, %v553_v25  ;;  %v559_v44 = vrot.slane %v9162_v40, 1  ;;  %v8813_v46 = vld [vmem:[%s14213_s1 + $0x108] sm:$0xff]   ;;  %v8815_v57 = vld [vmem:[%s14213_s1 + $0x110] sm:$0xff]  }
  0x18   : > { %1018 = vmatprep.subr.bf16.mxu0 %v14218_v1  ;;  %8400 = vmatpush3.bf16.msra.mxu1 %v8795_v5  ;;  %14436 = vst [vmem:[#allocation4_spill] sm:$0xff] %v9148_v33  ;;  %v9154_v35 = vsel %vm14239_vm0, %v553_v25, %v555_v29  ;;  %v761_v37 = vrot.slane %v9148_v33, 1  ;;  %v9180_v49 = vsel %vm14239_vm0, %v555_v29, %v557_v38  ;;  %v9189_v52 = vrot.slane %v392_v42, 1  ;;  %v9194_v54 = vld [vmem:[%s9091_s16 + $0x48] sm:$0xff]   ;;  %v8823_v3 = vld [vmem:[%s14213_s1 + $0x10] sm:$0xff]   ;;  %v9240_v16 = vld [vmem:[%s9091_s16 + $0x58] sm:$0xff]  }
  0x19   : > { %8401 = vmatprep.subr.bf16.mxu1 %v8797_v7  ;;  %v697_v28 = vsel %vm14239_vm0, %v696_v24, %v9118_v18  ;;  %14437 = vst [vmem:[#allocation5_spill] sm:$0xff] %v9154_v35  ;;  %v765_v39 = vrot.slane %v9154_v35, 1  ;;  %v9187_v51 = vsel %vm14239_vm0, %v557_v38, %v559_v44  ;;  %v400_v55 = vshll.u32 %v9110_v15, 16  ;;  %v8819_v59 = vld [vmem:[%s14213_s1 + $0x8] sm:$0xff]   ;;  %v9218_v4 = vld [vmem:[%s9091_s16 + $0x50] sm:$0xff]   ;;  %v8821_v25 = vld [vmem:[%s14213_s1 + $0x120] sm:$0xff]  }
  0x1a   : > { %v756_v32 = vrot.slane %v697_v28, 1  ;;  %v762_v45 = vsel %vm14239_vm0, %v757_v27, %v761_v37  ;;  %v9198_v56 = vcombine.low %v649_v43, %v9101_v12  ;;  %v769_v58 = vrot.slane %v9180_v49, 1  ;;  %v9255_v29 = vld [vmem:[%s9091_s16 + $0x60] sm:$0xff]  }
  0x1b   : > { %1019 = vmatpush1.bf16.msra.mxu0 %v8796_v8  ;;  %v766_v48 = vsel %vm14239_vm0, %v761_v37, %v765_v39  ;;  %v773_v60 = vrot.slane %v9187_v51, 1  ;;  %v561_v61 = vrot.slane %v9184_v50, 1  ;;  %v563_v62 = vrot.slane %v9194_v54, 1  ;;  %v8829_v37 = vld [vmem:[%s14213_s1 + $0x20] sm:$0xff]  }
  0x1c   : > { %1020 = vmatprep.subr.bf16.mxu0 %v14218_v1  ;;  %8402 = vmatpush3.bf16.msra.mxu1 %v8797_v7  ;;  %v758_v36 = vsel %vm14239_vm0, %v756_v32, %v757_v27  ;;  %v398_v63 = vor.u32 %v396_v53, %v9189_v52  ;;  %v402_v0 = vrot.slane %v400_v55, 1  ;;  %v770_v2 = vsel %vm14239_vm0, %v765_v39, %v769_v58  ;;  %v8818_v7 = vld [vmem:[%s14213_s1 + $0x118] sm:$0xff]   ;;  %v8824_v39 = vld [vmem:[%s14213_s1 + $0x128] sm:$0xff]   ;;  %v8827_v55 = vld [vmem:[%s14213_s1 + $0x130] sm:$0xff]  }
  0x1d   : > { %8403 = vmatprep.subr.bf16.mxu1 %v8799_v9  ;;  %8411 = vmatprep.mubr.bf16.mxu1 %v758_v36  ;;  %v670_v5 = vshrl.u32 %v9198_v56, 16  ;;  %v672_v6 = vshll.u32 %v9198_v56, 16  ;;  %v774_v8 = vsel %vm14239_vm0, %v769_v58, %v773_v60  ;;  %v565_v19 = vrot.slane %v9218_v4, 1 }
  0x1e   : > { %v567_v28 = vrot.slane %v9240_v16, 1  ;;  %v408_v32 = vshll.u32 %v9123_v21, 16  ;;  %v404_v38 = vshrl.u32 %v9110_v15, 16 }
  0x1f   : > { %1021 = vmatpush1.bf16.msra.mxu0 %v8798_v10  ;;  %v8825_v10 = vld [vmem:[%s14213_s1 + $0x18] sm:$0xff]   ;;  %v674_v14 = vrot.slane %v672_v6, 1  ;;  %v9261_v36 = vsel %vm14239_vm0, %v563_v62, %v565_v19  ;;  %v8833_v6 = vld [vmem:[%s14213_s1 + $0x80] sm:$0xff]  }
  0x20   : > { %1022 = vmatprep.subr.bf16.mxu0 %v14218_v1  ;;  %8404 = vmatpush3.bf16.msra.mxu1 %v8799_v9  ;;  %v9227_v9 = vsel %vm14239_vm0, %v559_v44, %v561_v61  ;;  %v9276_v43 = vsel %vm14239_vm0, %v565_v19, %v567_v28  ;;  %v9279_v44 = vld [vmem:[%s9091_s16 + $0x68] sm:$0xff]   ;;  %v785_v15 = vrot.slane %v9261_v36, 1 }
  0x21   : > { %8405 = vmatprep.subr.bf16.mxu1 %v8801_v11  ;;  %v675_v20 = vor.u32 %v674_v14, %v670_v5  ;;  %v789_v53 = vrot.slane %v9276_v43, 1 }
  0x23   : > { %1023 = vmatpush1.bf16.msra.mxu0 %v8800_v13  ;;  %v9237_v13 = vsel %vm14238_vm1, %v398_v63, %v402_v0  ;;  %v676_v27 = vsel %vm14238_vm1, %v675_v20, %v9189_v52  ;;  %v790_v5 = vsel %vm14239_vm0, %v785_v15, %v789_v53 }
  0x24   : > { %1024 = vmatprep.subr.bf16.mxu0 %v14218_v1  ;;  %8406 = vmatpush3.bf16.msra.mxu1 %v8801_v11  ;;  %v9234_v11 = vsel %vm14239_vm0, %v561_v61, %v563_v62  ;;  %v754_v24 = vrot.slane %v9237_v13, 1  ;;  %v8835_v62 = vld [vmem:[%s14213_s1 + $0x30] sm:$0xff]  }
  0x25   : > { %8407 = vmatprep.subr.bf16.mxu1 %v8803_v17 }
  0x27   : > { %1025 = vmatpush1.bf16.msra.mxu0 %v8802_v22  ;;  %v781_v22 = vrot.slane %v9234_v11, 1 }
  0x28   : > { %1026 = vmatprep.subr.bf16.mxu0 %v14218_v1  ;;  %8408 = vmatpush3.bf16.msra.mxu1 %v8803_v17  ;;  %v777_v17 = vrot.slane %v9227_v9, 1 }
  0x29   : > { %8409 = vmatprep.subr.bf16.mxu1 %v8805_v31  ;;  %v786_v58 = vsel %vm14239_vm0, %v781_v22, %v785_v15 }
  0x2b   : > { %1027 = vmatpush1.bf16.msra.mxu0 %v8804_v34  ;;  %v778_v34 = vsel %vm14239_vm0, %v773_v60, %v777_v17  ;;  %v8830_v60 = vld [vmem:[%s14213_s1 + $0x138] sm:$0xff]  }
  0x2c   : > { %1028 = vmatprep.subr.bf16.mxu0 %v14218_v1  ;;  %8410 = vmatpush3.bf16.msra.mxu1 %v8805_v31  ;;  %v753_v31 = vrot.slane %v676_v27, 1 }
  0x2d   : > { %1510 = vmatprep.subr.bf16.mxu1 %v14218_v1 }
  0x2e   : > { %v755_v42 = vsel %vm14239_vm0, %v753_v31, %v754_v24  ;;  %v8839_v31 = vld [vmem:[%s14213_s1 + $0x40] sm:$0xff]  }
  0x2f   : > { %1029 = vmatpush1.bf16.msra.mxu0 %v8811_v41  ;;  %8412 = vmatmul.mubr.bf16.vlgmr.msra.gmra.mrb[0].mxu1 %v762_v45  ;;  %v782_v41 = vsel %vm14239_vm0, %v777_v17, %v781_v22  ;;  %v8831_v45 = vld [vmem:[%s14213_s1 + $0x28] sm:$0xff]  }
  0x30   : > { %1030 = vmatprep.subr.bf16.mxu0 %v14218_v1  ;;  %8415 = vmatprep.mubr.bf16.mxu1 %v766_v48  ;;  %v406_v48 = vor.u32 %v404_v38, %v402_v0  ;;  %v9309_v0 = vld [vmem:[%s9091_s16 + $0x70] sm:$0xff]  }
  0x31   : > { %1511 = vmatpush1.bf16.msra.mxu1 %v8817_v47  ;;  %1044 = vmatprep.mubr.bf16.mxu0 %v755_v42  ;;  %v410_v47 = vrot.slane %v408_v32, 1  ;;  %v573_v19 = vrot.slane %v9309_v0, 1  ;;  %v9359_v42 = vld [vmem:[%s9091_s16 + $0x80] sm:$0xff]  }
  0x32   : > { %1512 = vmatprep.subr.bf16.mxu1 %v14218_v1 }
  0x33   : > { %1031 = vmatpush1.bf16.msra.mxu0 %v8813_v46  ;;  %v569_v46 = vrot.slane %v9255_v29, 1  ;;  %v9306_v63 = vsel %vm14238_vm1, %v406_v48, %v410_v47 }
  0x34   : > { %1032 = vmatprep.subr.bf16.mxu0 %v14218_v1  ;;  %v759_v17 = vrot.slane %v9306_v63, 1 }
  0x35   : > { %1513 = vmatpush1.bf16.msra.mxu1 %v8819_v59  ;;  %v228_v59 = vld [vmem:[%s9091_s16 + $0x8] sm:$0xf]  ;;  %v9300_v61 = vsel %vm14239_vm0, %v567_v28, %v569_v46 }
  0x36   : > { %1514 = vmatprep.subr.bf16.mxu1 %v14218_v1  ;;  %v793_v14 = vrot.slane %v9300_v61, 1  ;;  %v9333_v22 = vcombine.low %v228_v59, %v9101_v12  ;;  %v8844_v12 = vld [vmem:[%s14213_s1 + $0x88] sm:$0xff]   ;;  %v760_v32 = vsel %vm14239_vm0, %v754_v24, %v759_v17  ;;  %v577_v59 = vrot.slane %v9359_v42, 1 }
  0x37   : > { %1033 = vmatpush1.bf16.msra.mxu0 %v8815_v57  ;;  %8416 = vmatmul.mubr.bf16.gmra.mrb[4].mxu1 %v770_v2  ;;  %v571_v57 = vrot.slane %v9279_v44, 1  ;;  %v412_v2 = vshrl.u32 %v9123_v21, 16  ;;  %v9367_v24 = vld [vmem:[%s9091_s16 + $0x88] sm:$0xff]  }
  0x38   : > { %1034 = vmatprep.subr.bf16.mxu0 %v14218_v1  ;;  %8419 = vmatprep.mubr.bf16.mxu1 %v774_v8  ;;  %v751_v8 = vrot.slane %v9198_v56, 1  ;;  %v794_v38 = vsel %vm14239_vm0, %v789_v53, %v793_v14 }
  0x39   : > { %1515 = vmatpush1.bf16.msra.mxu1 %v8823_v3  ;;  %v416_v3 = vshll.u32 %v9134_v26, 16  ;;  %v9326_v21 = vsel %vm14239_vm0, %v569_v46, %v571_v57  ;;  %v414_v20 = vor.u32 %v412_v2, %v410_v47  ;;  %v8840_v46 = vld [vmem:[%s14213_s1 + $0x48] sm:$0xff]   ;;  %v9386_v2 = vrot.slane %v9367_v24, 1 }
  0x3a   : > { %1516 = vmatprep.subr.bf16.mxu1 %v14218_v1  ;;  %v752_v28 = vsel %vm14239_vm0, %v751_v8, %v9118_v18 }
  0x3b   : > { %1035 = vmatpush1.bf16.msra.mxu0 %v8818_v7  ;;  %v9319_v7 = vld [vmem:[%s9091_s16 + $0x78] sm:$0xff]   ;;  %v418_v56 = vrot.slane %v416_v3, 1  ;;  %14438 = vst [vmem:[#allocation6_spill] sm:$0xff] %v9386_v2 }
  0x3c   : > { %1036 = vmatprep.subr.bf16.mxu0 %v14218_v1  ;;  %v575_v27 = vrot.slane %v9319_v7, 1 }
  0x3d   : > { %1517 = vmatpush1.bf16.msra.mxu1 %v8825_v10  ;;  %v8836_v10 = vld [vmem:[%s14213_s1 + $0x38] sm:$0xff]  }
  0x3e   : > { %1518 = vmatprep.subr.bf16.mxu1 %v14218_v1 }
  0x3f   : > { %1037 = vmatpush1.bf16.msra.mxu0 %v8821_v25  ;;  %8420 = vmatmul.mubr.bf16.gmra.mrb[8].mxu1 %v778_v34  ;;  %v797_v25 = vrot.slane %v9326_v21, 1  ;;  %v420_v34 = vshrl.u32 %v9134_v26, 16  ;;  %v9364_v26 = vsel %vm14239_vm0, %v573_v19, %v575_v27 }
  0x40   : > { %1038 = vmatprep.subr.bf16.mxu0 %v14218_v1  ;;  %8423 = vmatprep.mubr.bf16.mxu1 %v782_v41  ;;  %v9356_v41 = vsel %vm14238_vm1, %v414_v20, %v418_v56  ;;  %v8855_v20 = vld [vmem:[%s14213_s1 + $0x98] sm:$0xff]  }
  0x41   : > { %1519 = vmatpush1.bf16.msra.mxu1 %v8829_v37  ;;  %v424_v37 = vshll.u32 %v9142_v30, 16  ;;  %v798_v15 = vsel %vm14239_vm0, %v793_v14, %v797_v25  ;;  %v763_v48 = vrot.slane %v9356_v41, 1  ;;  %v422_v53 = vor.u32 %v420_v34, %v418_v56  ;;  %v9397_v14 = vld [vmem:[%s9091_s16 + $0x98] ss:$0 sps:$4 sm:$0x33]  }
  0x42   : > { %1520 = vmatprep.subr.bf16.mxu1 %v14218_v1 }
  0x43   : > { %1039 = vmatpush1.bf16.msra.mxu0 %v8824_v39  ;;  %v9353_v39 = vsel %vm14239_vm0, %v571_v57, %v573_v19  ;;  %v8852_v57 = vld [vmem:[%s14213_s1 + $0x90] sm:$0xff]   ;;  %v764_v8 = vsel %vm14239_vm0, %v759_v17, %v763_v48 }
  0x44   : > { %1040 = vmatprep.subr.bf16.mxu0 %v14218_v1  ;;  %v801_v47 = vrot.slane %v9353_v39, 1  ;;  %v8843_v17 = vld [vmem:[%s14213_s1 + $0x50] sm:$0xff]  }
  0x45   : > { %1521 = vmatpush1.bf16.msra.mxu1 %v8831_v45  ;;  %v384_v45 = vshll.u32 %v9333_v22, 16 }
  0x46   : > { %1522 = vmatprep.subr.bf16.mxu1 %v14218_v1  ;;  %v802_v56 = vsel %vm14239_vm0, %v797_v25, %v801_v47 }
  0x47   : > { %1041 = vmatpush1.bf16.msra.mxu0 %v8827_v55  ;;  %8424 = vmatmul.mubr.bf16.gmra.mrb[12].mxu1 %v786_v58  ;;  %v426_v55 = vrot.slane %v424_v37, 1  ;;  %v805_v58 = vrot.slane %v9364_v26, 1  ;;  %v9388_v3 = vrot.slane %v384_v45, 1 }
  0x48   : > { %1042 = vmatprep.subr.bf16.mxu0 %v14218_v1  ;;  %8427 = vmatprep.mubr.bf16.mxu1 %v790_v5  ;;  %v428_v5 = vshrl.u32 %v9142_v30, 16  ;;  %v9405_v30 = vsel %vm14239_vm0, %v575_v27, %v577_v59 }
  0x49   : > { %1523 = vmatpush1.bf16.msra.mxu1 %v8835_v62  ;;  %v388_v62 = vshrl.u32 %v9333_v22, 16 }
  0x4a   : > { %1524 = vmatprep.subr.bf16.mxu1 %v14218_v1  ;;  %v430_v37 = vor.u32 %v428_v5, %v426_v55 }
  0x4b   : > { %1043 = vmatpush1.bf16.msra.mxu0 %v8830_v60  ;;  %v9381_v60 = vld [vmem:[%s9091_s16 + $0x90] sm:$0xff]   ;;  %v390_v19 = vor.u32 %v388_v62, %v9388_v3 }
  0x4c   : > { %8447 = vmatprep.subr.bf16.mxu0 %v8833_v6  ;;  %v9418_v25 = vrot.slane %v9381_v60, 1 }
  0x4d   : > { %1525 = vmatpush1.bf16.msra.mxu1 %v8836_v10  ;;  %v9394_v10 = vsel %vm14238_vm1, %v422_v53, %v426_v55  ;;  %v9422_v27 = vsel %vm14238_vm1, %v390_v19, %v9189_v52  ;;  %v8857_v52 = vld [vmem:[%s14213_s1 + $0xa0] sm:$0xff]   ;;  %v440_v53 = vshll.u32 %v9184_v50, 16 }
  0x4e   : > { %1045 = vmatmul.mubr.bf16.vlgmr.msra.gmra.mrb[0].mxu0 %v752_v28  ;;  %1526 = vmatprep.subr.bf16.mxu1 %v14218_v1  ;;  %v806_v28 = vsel %vm14239_vm0, %v801_v47, %v805_v58  ;;  %v436_v47 = vshrl.u32 %v9162_v40, 16  ;;  %v226_v55 = vld [vmem:[%s9091_s16] sm:$0xf] }
  0x4f   : > { %8448 = vmatpush3.bf16.msra.mxu0 %v8833_v6  ;;  %1052 = vmatprep.mubr.bf16.mxu0 %v760_v32  ;;  %v432_v6 = vshll.u32 %v9162_v40, 16  ;;  %v767_v32 = vrot.slane %v9394_v10, 1  ;;  %v8860_v40 = vld [vmem:[%s14213_s1 + $0xa8] sm:$0xff]  }
  0x50   : > { %8428 = vmatmul.mubr.bf16.gmra.mrb[16].mxu1 %v794_v38  ;;  %8449 = vmatprep.subr.bf16.mxu0 %v8844_v12  ;;  %v700_v38 = vrot.slane %v9397_v14, 1 }
  0x51   : > { %8431 = vmatprep.mubr.bf16.mxu1 %v798_v15  ;;  %1527 = vmatpush1.bf16.msra.mxu1 %v8839_v31  ;;  %v9415_v31 = vsel %vm14239_vm0, %v577_v59, %v9386_v2  ;;  %v434_v34 = vrot.slane %v432_v6, 1  ;;  %v809_v15 = vrot.slane %v9405_v30, 1  ;;  %v768_v59 = vsel %vm14239_vm0, %v763_v48, %v767_v32  ;;  %v8848_v48 = vld [vmem:[%s14213_s1 + $0x60] sm:$0xff]  }
  0x52   : > { %1528 = vmatprep.subr.bf16.mxu1 %v14218_v1  ;;  %v813_v45 = vrot.slane %v9415_v31, 1  ;;  %v9452_v5 = vsel %vm14239_vm0, %v9418_v25, %v700_v38 }
  0x53   : > { %8450 = vmatpush3.bf16.msra.mxu0 %v8844_v12  ;;  %v8845_v12 = vld [vmem:[%s14213_s1 + $0x58] sm:$0xff]   ;;  %v9448_v62 = vsel %vm14238_vm1, %v430_v37, %v434_v34  ;;  %v810_v6 = vsel %vm14239_vm0, %v805_v58, %v809_v15  ;;  %v512_v37 = vshll.u32 %v9367_v24, 16 }
  0x54   : > { %8451 = vmatprep.subr.bf16.mxu0 %v8852_v57  ;;  %v814_v19 = vsel %vm14239_vm0, %v809_v15, %v813_v45  ;;  %v14220_v58 = vrot.slane %v9448_v62, 1  ;;  %v678_v15 = vshll.u32 %v9381_v60, 16 }
  0x55   : > { %1529 = vmatpush1.bf16.msra.mxu1 %v8840_v46  ;;  %v9438_v46 = vsel %vm14239_vm0, %v9386_v2, %v9418_v25 }
  0x56   : > { %1053 = vmatmul.mubr.bf16.gmra.mrb[4].mxu0 %v9130_v23  ;;  %1530 = vmatprep.subr.bf16.mxu1 %v14218_v1 }
  0x57   : > { %1060 = vmatprep.mubr.bf16.mxu0 %v764_v8  ;;  %8452 = vmatpush3.bf16.msra.mxu0 %v8852_v57  ;;  %v9444_v57 = vld [vmem:[%s9091_s16 + $0x4] sm:$0xf]  ;;  %v817_v8 = vrot.slane %v9438_v46, 1 }
  0x58   : > { %8432 = vmatmul.mubr.bf16.gmra.mrb[20].mxu1 %v802_v56  ;;  %8453 = vmatprep.subr.bf16.mxu0 %v8855_v20  ;;  %v442_v56 = vrot.slane %v440_v53, 1  ;;  %v448_v53 = vshll.u32 %v9194_v54, 16 }
  0x59   : > { %8435 = vmatprep.mubr.bf16.mxu1 %v806_v28  ;;  %1531 = vmatpush1.bf16.msra.mxu1 %v8843_v17  ;;  %v9466_v17 = vcombine.low %v226_v55, %v9444_v57  ;;  %v686_v28 = vshll.u32 %v9397_v14, 16 }
  0x5a   : > { %1532 = vmatprep.subr.bf16.mxu1 %v14218_v1 }
  0x5b   : > { %8454 = vmatpush3.bf16.msra.mxu0 %v8855_v20  ;;  %v438_v20 = vor.u32 %v436_v47, %v434_v34  ;;  %v516_v34 = vshrl.u32 %v9367_v24, 16  ;;  %v818_v47 = vsel %vm14239_vm0, %v813_v45, %v817_v8  ;;  %v9486_v24 = vrot.slane %v512_v37, 1 }
  0x5c   : > { %8455 = vmatprep.subr.bf16.mxu0 %v8857_v52  ;;  %v444_v45 = vshrl.u32 %v9184_v50, 16  ;;  %v377_v37 = vshrl.u32 %v9466_v17, 16  ;;  %v8866_v50 = vld [vmem:[%s14213_s1 + $0xb8] sm:$0xff]  }
  0x5d   : > { %1533 = vmatpush1.bf16.msra.mxu1 %v8845_v12  ;;  %v8863_v12 = vld [vmem:[%s14213_s1 + $0xb0] sm:$0xff]   ;;  %v9483_v55 = vsel %vm14238_vm1, %v438_v20, %v442_v56  ;;  %v14439_v20 = vrot.slane %v9452_v5, 1 }
  0x5e   : > { %1061 = vmatmul.mubr.bf16.gmra.mrb[8].mxu0 %v9148_v33  ;;  %1534 = vmatprep.subr.bf16.mxu1 %v14218_v1  ;;  %v450_v33 = vrot.slane %v448_v53, 1  ;;  %v9525_v53 = vld [vmem:[%s14213_s1 + $0x200] sm:$0xff]  }
  0x5f   : > { %1068 = vmatprep.mubr.bf16.mxu0 %v768_v59  ;;  %8456 = vmatpush3.bf16.msra.mxu0 %v8857_v52  ;;  %v8849_v52 = vld [vmem:[%s14213_s1 + $0x68] sm:$0xff]   ;;  %v379_v59 = vshll.u32 %v9466_v17, 16  ;;  %v822_v2 = vsel %vm14239_vm0, %v817_v8, %v14439_v20  ;;  %v690_v8 = vshrl.u32 %v9397_v14, 16  ;;  %v263_v20 = vld [vmem:[%s9091_s16] sm:$0xe]  ;;  %v452_v14 = vshrl.u32 %v9194_v54, 16 }
  0x60   : > { %8436 = vmatmul.mubr.bf16.gmra.mrb[24].mxu1 %v810_v6  ;;  %8457 = vmatprep.subr.bf16.mxu0 %v8860_v40  ;;  %v680_v6 = vrot.slane %v678_v15, 1  ;;  %v688_v15 = vrot.slane %v686_v28, 1  ;;  %v7787_v23 = vcombine.low %v263_v20, %v9444_v57  ;;  %v8853_v28 = vld [vmem:[%s14213_s1 + $0x78] sm:$0xff]   ;;  %v446_v54 = vor.u32 %v444_v45, %v442_v56 }
  0x61   : > { %8439 = vmatprep.mubr.bf16.mxu1 %v814_v19  ;;  %1535 = vmatpush1.bf16.msra.mxu1 %v8848_v48  ;;  %v827_v19 = vrot.slane %v700_v38, 1  ;;  %v682_v48 = vshrl.u32 %v9381_v60, 16  ;;  %v9499_v38 = vor.u32 %v516_v34, %v9486_v24  ;;  %v8851_v60 = vld [vmem:[%s14213_s1 + $0x70] sm:$0xff]   ;;  %v14440_v34 = vmov 0  }
  0x62   : > { %1536 = vmatprep.subr.bf16.mxu1 %v14218_v1  ;;  %v772_v1 = vsel %vm14239_vm0, %v767_v32, %v14220_v58  ;;  %v775_v32 = vrot.slane %v9483_v55, 1  ;;  %v381_v58 = vrot.slane %v379_v59, 1  ;;  %v546_v57 = vrot.slane %v7787_v23, 1 }
  0x63   : > { %8458 = vmatpush3.bf16.msra.mxu0 %v8860_v40  ;;  %v684_v40 = vor.u32 %v682_v48, %v680_v6 }
  0x64   : > { %8459 = vmatprep.subr.bf16.mxu0 %v8863_v12 }
  0x65   : > { %1537 = vmatpush1.bf16.msra.mxu1 %v8849_v52  ;;  %v9514_v52 = vsel %vm14238_vm1, %v9499_v38, %v680_v6  ;;  %v689_v48 = vsel %vm14238_vm1, %v684_v40, %v688_v15  ;;  %v547_v6 = vrot.slane %v9333_v22, 1 }
  0x66   : > { %1069 = vmatmul.mubr.bf16.gmra.mrb[12].mxu0 %v9154_v35  ;;  %1538 = vmatprep.subr.bf16.mxu1 %v14440_v34  ;;  %v692_v35 = vor.u32 %v690_v8, %v688_v15  ;;  %v815_v59 = vrot.slane %v9514_v52, 1  ;;  %v9530_v15 = vld [vmem:[#allocation2] sm:$0xff]  ;;  %v382_v8 = vor.u32 %v381_v58, %v377_v37  ;;  %v14442_v58 = vrot.slane %v9452_v5, 1  ;;  %v8868_v52 = vld [vmem:[%s9091_s16 + $0x98] ss:$0 sps:$4 sm:$0x11]  }
  0x67   : > { %1076 = vmatprep.mubr.bf16.mxu0 %v772_v1  ;;  %8460 = vmatpush3.bf16.msra.mxu0 %v8863_v12  ;;  %v819_v1 = vrot.slane %v689_v48, 1  ;;  %v456_v12 = vshll.u32 %v9218_v4, 16  ;;  %v9541_v23 = vsel %vm14239_vm0, %v546_v57, %v547_v6  ;;  %v9554_v37 = vsel %vm14238_vm1, %v446_v54, %v450_v33 }
  0x68   : > { %8440 = vmatmul.mubr.bf16.gmra.mrb[28].mxu1 %v818_v47  ;;  %8461 = vmatprep.subr.bf16.mxu0 %v8866_v50  ;;  %v825_v40 = vrot.slane %v692_v35, 1  ;;  %v14441_v35 = vrot.slane %v9448_v62, 1  ;;  %v828_v45 = vsel %vm14239_vm0, %v14442_v58, %v827_v19  ;;  %v460_v5 = vshrl.u32 %v9218_v4, 16 }
  0x69   : > { %8443 = vmatprep.mubr.bf16.mxu1 %v822_v2  ;;  %1539 = vmatpush1.bf16.msra.mxu1 %v8851_v60  ;;  %v9536_v47 = vsel %vm14239_vm0, %v815_v59, %v819_v1  ;;  %v779_v60 = vrot.slane %v9554_v37, 1  ;;  %v458_v20 = vrot.slane %v456_v12, 1  ;;  %v464_v19 = vshll.u32 %v9240_v16, 16  ;;  %v8859_v12 = vld [vmem:[%s14213_s1 + $0x190] sm:$0xff]  }
  0x6a   : > { %1540 = vmatprep.subr.bf16.mxu1 %v9530_v15  ;;  %v9544_v2 = vsel %vm14239_vm0, %v819_v1, %v825_v40  ;;  %v776_v56 = vsel %vm14239_vm0, %v14441_v35, %v775_v32  ;;  %v454_v34 = vor.u32 %v452_v14, %v450_v33  ;;  %v8858_v33 = vld [vmem:[%s14213_s1 + $0x188] sm:$0xff]   ;;  %v472_v57 = vshll.u32 %v9255_v29, 16 }
  0x6b   : > { %8462 = vmatpush3.bf16.msra.mxu0 %v8866_v50  ;;  %v387_v50 = vsel %vm14238_vm1, %v382_v8, %v9388_v3  ;;  %v780_v48 = vsel %vm14239_vm0, %v775_v32, %v779_v60  ;;  %v466_v1 = vrot.slane %v464_v19, 1  ;;  %v462_v14 = vor.u32 %v460_v5, %v458_v20  ;;  %v8864_v5 = vld [vmem:[%s14213_s1 + $0x1a8] sm:$0xff]  }
  0x6c   : > { %8499 = vmatprep.subr.bf16.mxu0 %v9525_v53  ;;  %v9568_v3 = vsel %vm14238_vm1, %v454_v34, %v458_v20  ;;  %v474_v40 = vrot.slane %v472_v57, 1  ;;  %v476_v58 = vshrl.u32 %v9255_v29, 16  ;;  %v484_v34 = vshrl.u32 %v9279_v44, 16 }
  0x6d   : > { %1541 = vmatpush1.bf16.msra.mxu1 %v8853_v28  ;;  %v8856_v28 = vld [vmem:[%s14213_s1 + $0x180] sm:$0xff]   ;;  %v783_v4 = vrot.slane %v9568_v3, 1  ;;  %v9581_v54 = vsel %vm14238_vm1, %v462_v14, %v466_v1  ;;  %v8867_v14 = vld [vmem:[%s14213_s1 + $0x1b8] sm:$0xff]   ;;  %v492_v57 = vshrl.u32 %v9309_v0, 16 }
  0x6e   : > { %1077 = vmatmul.mubr.bf16.gmra.mrb[16].mxu0 %v9180_v49  ;;  %2549 = vmatprep.subr.bf16.mxu1 %v9530_v15  ;;  %v478_v29 = vor.u32 %v476_v58, %v474_v40 }
  0x6f   : > { %1084 = vmatprep.mubr.bf16.mxu0 %v776_v56  ;;  %v784_v32 = vsel %vm14239_vm0, %v779_v60, %v783_v4 }
  0x70   : > { %8444 = vmatmul.mubr.bf16.gmra.mrb[32].mxu1 %v828_v45  ;;  %v480_v45 = vshll.u32 %v9279_v44, 16 }
  0x71   : > { %1542 = vmatprep.mubr.bf16.mxu1 %v387_v50  ;;  %v8862_v50 = vld [vmem:[%s14213_s1 + $0x1a0] sm:$0xff]  }
  0x72   : > { %v482_v20 = vrot.slane %v480_v45, 1  ;;  %v500_v45 = vshrl.u32 %v9319_v7, 16 }
  0x74   : > { %v486_v44 = vor.u32 %v484_v34, %v482_v20  ;;  %v508_v34 = vshrl.u32 %v9359_v42, 16 }
  0x76   : > { %1085 = vmatmul.mubr.bf16.gmra.mrb[20].mxu0 %v9187_v51 }
  0x77   : > { %1092 = vmatprep.mubr.bf16.mxu0 %v780_v48  ;;  %v488_v48 = vshll.u32 %v9309_v0, 16 }
  0x78   : > { %1543 = vmatmul.mubr.bf16.vlgmr.msra.gmra.mrb[36].mxu1 %v9466_v17  ;;  %v468_v17 = vshrl.u32 %v9240_v16, 16  ;;  %v8861_v16 = vld [vmem:[%s14213_s1 + $0x198] sm:$0xff]  }
  0x79   : > { %1550 = vmatprep.mubr.bf16.mxu1 %v9422_v27  ;;  %2550 = vmatpush1.bf16.msra.mxu1 %v8856_v28  ;;  %v787_v27 = vrot.slane %v9581_v54, 1  ;;  %v9617_v28 = vsel %vm14238_vm1, %v478_v29, %v482_v20  ;;  %v8876_v20 = vld [vmem:[%s14213_s1 + $0x1d8] sm:$0xff]  }
  0x7a   : > { %2551 = vmatprep.subr.bf16.mxu1 %v9530_v15  ;;  %v470_v8 = vor.u32 %v468_v17, %v466_v1  ;;  %v795_v1 = vrot.slane %v9617_v28, 1 }
  0x7b   : > { %v788_v35 = vsel %vm14239_vm0, %v783_v4, %v787_v27  ;;  %v8982_v4 = vld [vmem:[%s9091_s16 + $0x18] sm:$0xff]  }
  0x7c   : > { %v9598_v56 = vsel %vm14238_vm1, %v470_v8, %v474_v40  ;;  %v8872_v8 = vld [vmem:[%s14213_s1 + $0x1c8] sm:$0xff]  }
  0x7d   : > { %2552 = vmatpush1.bf16.msra.mxu1 %v8858_v33  ;;  %v791_v60 = vrot.slane %v9598_v56, 1  ;;  %v490_v33 = vrot.slane %v488_v48, 1  ;;  %v8985_v48 = vld [vmem:[%s9091_s16 + $0x30] sm:$0xff]  }
  0x7e   : > { %1093 = vmatmul.mubr.bf16.gmra.mrb[24].mxu0 %v9227_v9  ;;  %2553 = vmatprep.subr.bf16.mxu1 %v9530_v15 }
  0x7f   : > { %1100 = vmatprep.mubr.bf16.mxu0 %v784_v32  ;;  %v792_v19 = vsel %vm14239_vm0, %v787_v27, %v791_v60  ;;  %v796_v32 = vsel %vm14239_vm0, %v791_v60, %v795_v1  ;;  %v9635_v17 = vsel %vm14238_vm1, %v486_v44, %v490_v33  ;;  %v8983_v27 = vld [vmem:[%s9091_s16 + $0x20] sm:$0xff]   ;;  %v494_v0 = vor.u32 %v492_v57, %v490_v33  ;;  %v8986_v33 = vld [vmem:[%s9091_s16 + $0x38] sm:$0xff]  }
  0x80   : > { %1551 = vmatmul.mubr.bf16.gmra.mrb[40].mxu1 %v9333_v22  ;;  %v799_v40 = vrot.slane %v9635_v17, 1  ;;  %v8987_v57 = vld [vmem:[%s9091_s16 + $0x40] sm:$0xff]   ;;  %v8875_v22 = vld [vmem:[%s14213_s1 + $0x210] sm:$0xff]  }
  0x81   : > { %1558 = vmatprep.mubr.bf16.mxu1 %v9237_v13  ;;  %2554 = vmatpush1.bf16.msra.mxu1 %v8859_v12  ;;  %v8981_v13 = vld [vmem:[%s9091_s16 + $0x10] sm:$0xff]   ;;  %v496_v12 = vshll.u32 %v9319_v7, 16 }
  0x82   : > { %2555 = vmatprep.subr.bf16.mxu1 %v9530_v15 }
  0x85   : > { %2556 = vmatpush1.bf16.msra.mxu1 %v8861_v16  ;;  %v498_v16 = vrot.slane %v496_v12, 1  ;;  %v8988_v12 = vld [vmem:[%s9091_s16 + $0x48] sm:$0xff]  }
  0x86   : > { %1101 = vmatmul.mubr.bf16.gmra.mrb[28].mxu0 %v9234_v11  ;;  %2557 = vmatprep.subr.bf16.mxu1 %v9530_v15 }
  0x87   : > { %1108 = vmatprep.mubr.bf16.mxu0 %v788_v35  ;;  %v800_v35 = vsel %vm14239_vm0, %v795_v1, %v799_v40  ;;  %v9652_v58 = vsel %vm14238_vm1, %v494_v0, %v498_v16  ;;  %v502_v7 = vor.u32 %v500_v45, %v498_v16  ;;  %v8882_v0 = vld [vmem:[%s14213_s1 + $0x220] sm:$0xff]   ;;  %v9761_v16 = vld [vmem:[%s9091_s16 + $0x90] ss:$0 sps:$4 sm:$0x11]   ;;  %v8887_v45 = vld [vmem:[%s14213_s1 + $0x228] sm:$0xff]  }
  0x88   : > { %1559 = vmatmul.mubr.bf16.gmra.mrb[44].mxu1 %v8981_v13  ;;  %v8984_v13 = vld [vmem:[%s9091_s16 + $0x28] sm:$0xff]   ;;  %v803_v60 = vrot.slane %v9652_v58, 1 }
  0x89   : > { %1566 = vmatprep.mubr.bf16.mxu1 %v9306_v63  ;;  %2558 = vmatpush1.bf16.msra.mxu1 %v8862_v50  ;;  %v8865_v63 = vld [vmem:[%s14213_s1 + $0x1b0] sm:$0xff]   ;;  %v504_v50 = vshll.u32 %v9359_v42, 16  ;;  %v8879_v42 = vld [vmem:[%s14213_s1 + $0x1e8] sm:$0xff]  }
  0x8a   : > { %2559 = vmatprep.subr.bf16.mxu1 %v9530_v15 }
  0x8b   : > { %v506_v29 = vrot.slane %v504_v50, 1  ;;  %v520_v50 = vshll.u32 %v9761_v16, 16 }
  0x8d   : > { %2560 = vmatpush1.bf16.msra.mxu1 %v8864_v5  ;;  %v804_v5 = vsel %vm14239_vm0, %v799_v40, %v803_v60  ;;  %v8993_v40 = vld [vmem:[%s9091_s16 + $0x70] sm:$0xff]  }
  0x8e   : > { %1109 = vmatmul.mubr.bf16.gmra.mrb[32].mxu0 %v9261_v36  ;;  %2561 = vmatprep.subr.bf16.mxu1 %v9530_v15 }
  0x8f   : > { %1116 = vmatprep.mubr.bf16.mxu0 %v792_v19  ;;  %v9670_v19 = vsel %vm14238_vm1, %v502_v7, %v506_v29 }
  0x90   : > { %1567 = vmatmul.mubr.bf16.gmra.mrb[48].mxu1 %v8982_v4  ;;  %v510_v4 = vor.u32 %v508_v34, %v506_v29 }
  0x91   : > { %1574 = vmatprep.mubr.bf16.mxu1 %v9356_v41  ;;  %2562 = vmatpush1.bf16.msra.mxu1 %v8865_v63  ;;  %v8869_v41 = vld [vmem:[%s14213_s1 + $0x1c0] sm:$0xff]   ;;  %v807_v63 = vrot.slane %v9670_v19, 1 }
  0x92   : > { %2563 = vmatprep.subr.bf16.mxu1 %v9530_v15  ;;  %v9688_v44 = vsel %vm14238_vm1, %v510_v4, %v9486_v24  ;;  %v8883_v24 = vld [vmem:[%s14213_s1 + $0x1f8] sm:$0xff]  }
  0x93   : > { %v808_v1 = vsel %vm14239_vm0, %v803_v60, %v807_v63 }
  0x95   : > { %2564 = vmatpush1.bf16.msra.mxu1 %v8867_v14  ;;  %v811_v14 = vrot.slane %v9688_v44, 1 }
  0x96   : > { %1117 = vmatmul.mubr.bf16.gmra.mrb[36].mxu0 %v9276_v43  ;;  %2565 = vmatprep.subr.bf16.mxu1 %v9530_v15 }
  0x97   : > { %1124 = vmatprep.mubr.bf16.mxu0 %v796_v32  ;;  %v812_v32 = vsel %vm14239_vm0, %v807_v63, %v811_v14 }
  0x98   : > { %1575 = vmatmul.mubr.bf16.gmra.mrb[52].mxu1 %v8983_v27  ;;  %v9753_v27 = vld [vmem:[%s9091_s16 + $0x18] sm:$0xff]  }
  0x99   : > { %1582 = vmatprep.mubr.bf16.mxu1 %v9394_v10  ;;  %2566 = vmatpush1.bf16.msra.mxu1 %v8869_v41  ;;  %v8874_v10 = vld [vmem:[%s14213_s1 + $0x1d0] sm:$0xff]   ;;  %v2011_v7 = vshrl.u32 %v9753_v27, 16 }
  0x9a   : > { %2567 = vmatprep.subr.bf16.mxu1 %v9530_v15  ;;  %v8989_v41 = vld [vmem:[%s9091_s16 + $0x50] sm:$0xff]  }
  0x9d   : > { %2568 = vmatpush1.bf16.msra.mxu1 %v8872_v8  ;;  %v9764_v8 = vld [vmem:[%s9091_s16 + $0x20] sm:$0xff]  }
  0x9e   : > { %1125 = vmatmul.mubr.bf16.gmra.mrb[40].mxu0 %v9300_v61  ;;  %2569 = vmatprep.subr.bf16.mxu1 %v9530_v15  ;;  %v2015_v29 = vshll.u32 %v9764_v8, 16 }
  0x9f   : > { %1132 = vmatprep.mubr.bf16.mxu0 %v800_v35 }
  0xa0   : > { %1583 = vmatmul.mubr.bf16.gmra.mrb[56].mxu1 %v8984_v13  ;;  %v2017_v34 = vrot.slane %v2015_v29, 1 }
  0xa1   : > { %1590 = vmatprep.mubr.bf16.mxu1 %v9448_v62  ;;  %2570 = vmatpush1.bf16.msra.mxu1 %v8874_v10  ;;  %v8877_v62 = vld [vmem:[%s14213_s1 + $0x1e0] sm:$0xff]  }
  0xa2   : > { %2571 = vmatprep.subr.bf16.mxu1 %v9530_v15 }
  0xa5   : > { %2572 = vmatpush1.bf16.msra.mxu1 %v8876_v20  ;;  %v8994_v20 = vld [vmem:[%s9091_s16 + $0x78] sm:$0xff]  }
  0xa6   : > { %1133 = vmatmul.mubr.bf16.gmra.mrb[44].mxu0 %v9326_v21  ;;  %2573 = vmatprep.subr.bf16.mxu1 %v9530_v15 }
  0xa7   : > { %1140 = vmatprep.mubr.bf16.mxu0 %v804_v5  ;;  %v522_v5 = vrot.slane %v520_v50, 1 }
  0xa8   : > { %1591 = vmatmul.mubr.bf16.gmra.mrb[60].mxu1 %v8985_v48  ;;  %v8891_v48 = vld [vmem:[%s14213_s1 + $0x238] sm:$0xff]  }
  0xa9   : > { %1598 = vmatprep.mubr.bf16.mxu1 %v9483_v55  ;;  %2574 = vmatpush1.bf16.msra.mxu1 %v8877_v62  ;;  %v8881_v55 = vld [vmem:[%s14213_s1 + $0x1f0] sm:$0xff]   ;;  %v9783_v62 = vld [vmem:[%s9091_s16 + $0x28] sm:$0xff]   ;;  %v523_v63 = vsel %vm14238_vm1, %v9499_v38, %v522_v5 }
  0xaa   : > { %2575 = vmatprep.subr.bf16.mxu1 %v9530_v15  ;;  %v2255_v29 = vrot.slane %v9783_v62, 2 }
  0xad   : > { %2576 = vmatpush1.bf16.msra.mxu1 %v8879_v42 }
  0xae   : > { %1141 = vmatmul.mubr.bf16.gmra.mrb[48].mxu0 %v9353_v39  ;;  %2577 = vmatprep.subr.bf16.mxu1 %v9530_v15 }
  0xaf   : > { %1148 = vmatprep.mubr.bf16.mxu0 %v808_v1  ;;  %v2019_v1 = vshrl.u32 %v9764_v8, 16 }
  0xb0   : > { %1599 = vmatmul.mubr.bf16.gmra.mrb[64].mxu1 %v8986_v33 }
  0xb1   : > { %1606 = vmatprep.mubr.bf16.mxu1 %v9554_v37  ;;  %2578 = vmatpush1.bf16.msra.mxu1 %v8881_v55  ;;  %v816_v37 = vsel %vm14239_vm0, %v811_v14, %v815_v59  ;;  %v823_v59 = vrot.slane %v8868_v52, 1  ;;  %v8995_v55 = vld [vmem:[%s9091_s16 + $0x80] sm:$0xff]   ;;  %v2021_v38 = vor.u32 %v2019_v1, %v2017_v34  ;;  %v581_v1 = vrot.slane %v9761_v16, 1 }
  0xb2   : > { %2579 = vmatprep.subr.bf16.mxu1 %v9530_v15 }
  0xb5   : > { %2580 = vmatpush1.bf16.msra.mxu1 %v8883_v24 }
  0xb6   : > { %1149 = vmatmul.mubr.bf16.gmra.mrb[52].mxu0 %v9364_v26 }
  0xb7   : > { %1156 = vmatprep.mubr.bf16.mxu0 %v812_v32 }
  0xb8   : > { %1607 = vmatmul.mubr.bf16.gmra.mrb[68].mxu1 %v8987_v57  ;;  %v2027_v57 = vshrl.u32 %v9783_v62, 16 }
  0xb9   : > { %1614 = vmatprep.mubr.bf16.mxu1 %v9568_v3  ;;  %v8990_v3 = vld [vmem:[%s9091_s16 + $0x58] sm:$0xff]  }
  0xbe   : > { %1157 = vmatmul.mubr.bf16.gmra.mrb[56].mxu0 %v9405_v30 }
  0xbf   : > { %1164 = vmatprep.mubr.bf16.mxu0 %v816_v37 }
  0xc0   : > { %1615 = vmatmul.mubr.bf16.gmra.mrb[72].mxu1 %v8988_v12  ;;  %v8996_v12 = vld [vmem:[%s9091_s16 + $0x88] sm:$0xff]  }
  0xc1   : > { %1622 = vmatprep.mubr.bf16.mxu1 %v9581_v54  ;;  %v824_v54 = vsel %vm14239_vm0, %v9418_v25, %v823_v59  ;;  %v14443_v25 = vld [vmem:[#allocation3_spill] sm:$0xff] }
  0xc6   : > { %1165 = vmatmul.mubr.bf16.gmra.mrb[60].mxu0 %v9415_v31 }
  0xc7   : > { %1172 = vmatprep.mubr.bf16.mxu0 %v9536_v47  ;;  %v8991_v47 = vld [vmem:[%s9091_s16 + $0x60] sm:$0xff]  }
  0xc8   : > { %1623 = vmatmul.mubr.bf16.gmra.mrb[76].mxu1 %v8989_v41 }
  0xc9   : > { %1630 = vmatprep.mubr.bf16.mxu1 %v9598_v56  ;;  %v14444_v56 = vld [vmem:[#allocation4_spill] sm:$0xff] }
  0xce   : > { %1173 = vmatmul.mubr.bf16.gmra.mrb[64].mxu0 %v9438_v46  ;;  %v550_v46 = vsel %vm14239_vm0, %v547_v6, %v9118_v18  ;;  %v8878_v18 = vld [vmem:[%s14213_s1 + $0x218] sm:$0xff]   ;;  %v9745_v6 = vld [vmem:[%s9091_s16 + $0x14] sm:$0xf] }
  0xcf   : > { %1180 = vmatprep.mubr.bf16.mxu0 %v9544_v2  ;;  %v8873_v2 = vld [vmem:[%s14213_s1 + $0x208] sm:$0xff]  }
  0xd0   : > { %1631 = vmatmul.mubr.bf16.gmra.mrb[80].mxu1 %v8990_v3 }
  0xd1   : > { %1638 = vmatprep.mubr.bf16.mxu1 %v9617_v28  ;;  %v14445_v28 = vld [vmem:[#allocation5_spill] sm:$0xff] }
  0xd6   : > { %1181 = vmatmul.mubr.bf16.gmra.mrb[68].mxu0 %v824_v54 }
  0xd7   : > { %8463 = vmatprep.mubr.bf16.mxu0 %v9541_v23  ;;  %v8992_v23 = vld [vmem:[%s9091_s16 + $0x68] sm:$0xff]  }
  0xd8   : > { %1639 = vmatmul.mubr.bf16.gmra.mrb[84].mxu1 %v8991_v47 }
  0xd9   : > { %1646 = vmatprep.mubr.bf16.mxu1 %v9635_v17 }
  0xde   : > { %8464 = vmatmul.mubr.bf16.vlgmr.msra.gmra.mrb[72].mxu0 %v550_v46 }
  0xdf   : > { %8500 = vmatpush3.bf16.msra.mxu0 %v9525_v53  ;;  %8467 = vmatprep.mubr.bf16.mxu0 %v14443_v25  ;;  %v1864_v53 = vld [vmem:[%s9091_s16 + $0x10] sm:$0xc] }
  0xe0   : > { %1647 = vmatmul.mubr.bf16.gmra.mrb[88].mxu1 %v8992_v23  ;;  %8501 = vmatprep.subr.bf16.mxu0 %v8873_v2  ;;  %v9750_v17 = vcombine.low %v1864_v53, %v9745_v6  ;;  %v2249_v53 = vrot.slane %v9764_v8, 2 }
  0xe1   : > { %1654 = vmatprep.mubr.bf16.mxu1 %v9652_v58  ;;  %v2007_v58 = vshll.u32 %v9753_v27, 16 }
  0xe2   : > { %v2002_v35 = vshll.u32 %v9750_v17, 16  ;;  %v2000_v10 = vshrl.u32 %v9750_v17, 16  ;;  %v2240_v41 = vrot.slane %v9750_v17, 2 }
  0xe3   : > { %8502 = vmatpush3.bf16.msra.mxu0 %v8873_v2  ;;  %v2009_v60 = vrot.slane %v2007_v58, 1 }
  0xe4   : > { %8503 = vmatprep.subr.bf16.mxu0 %v8875_v22  ;;  %v2004_v13 = vrot.slane %v2002_v35, 1 }
  0xe6   : > { %8468 = vmatmul.mubr.bf16.gmra.mrb[76].mxu0 %v14444_v56 }
  0xe7   : > { %8471 = vmatprep.mubr.bf16.mxu0 %v14445_v28  ;;  %8504 = vmatpush3.bf16.msra.mxu0 %v8875_v22  ;;  %v1902_v28 = vld [vmem:[%s9091_s16 + $0x10] sm:$0x8] }
  0xe8   : > { %1655 = vmatmul.mubr.bf16.gmra.mrb[92].mxu1 %v8993_v40  ;;  %8505 = vmatprep.subr.bf16.mxu0 %v8878_v18 }
  0xe9   : > { %1662 = vmatprep.mubr.bf16.mxu1 %v9670_v19  ;;  %v2013_v19 = vor.u32 %v2011_v7, %v2009_v60 }
  0xeb   : > { %8506 = vmatpush3.bf16.msra.mxu0 %v8878_v18  ;;  %v2018_v42 = vsel %vm14238_vm1, %v2013_v19, %v2017_v34 }
  0xec   : > { %8507 = vmatprep.subr.bf16.mxu0 %v8882_v0  ;;  %v2244_v33 = vrot.slane %v2018_v42, 2 }
  0xee   : > { %8472 = vmatmul.mubr.bf16.gmra.mrb[80].mxu0 %v9180_v49  ;;  %v8889_v49 = vld [vmem:[%s14213_s1 + $0x230] sm:$0xff]  }
  0xef   : > { %8475 = vmatprep.mubr.bf16.mxu0 %v9187_v51  ;;  %8508 = vmatpush3.bf16.msra.mxu0 %v8882_v0  ;;  %v2005_v51 = vor.u32 %v2004_v13, %v2000_v10  ;;  %v9833_v0 = vld [vmem:[%s9091_s16 + $0x40] sm:$0xff]  }
  0xf0   : > { %1663 = vmatmul.mubr.bf16.gmra.mrb[96].mxu1 %v8994_v20  ;;  %8509 = vmatprep.subr.bf16.mxu0 %v8887_v45  ;;  %v2047_v7 = vshll.u32 %v9833_v0, 16  ;;  %v2156_v20 = vrot.slane %v9764_v8, 1 }
  0xf1   : > { %1670 = vmatprep.mubr.bf16.mxu1 %v9688_v44  ;;  %v2010_v4 = vsel %vm14238_vm1, %v2005_v51, %v2009_v60  ;;  %v2023_v44 = vshll.u32 %v9783_v62, 16 }
  0xf2   : > { %v2049_v51 = vrot.slane %v2047_v7, 1 }
  0xf3   : > { %8510 = vmatpush3.bf16.msra.mxu0 %v8887_v45  ;;  %v2025_v14 = vrot.slane %v2023_v44, 1  ;;  %v7909_v45 = vcombine.low %v1902_v28, %v9745_v6 }
  0xf4   : > { %8511 = vmatprep.subr.bf16.mxu0 %v8889_v49 }
  0xf5   : > { %v2026_v32 = vsel %vm14238_vm1, %v2021_v38, %v2025_v14  ;;  %v2029_v59 = vor.u32 %v2027_v57, %v2025_v14  ;;  %v2153_v6 = vrot.slane %v7909_v45, 1 }
  0xf6   : > { %8476 = vmatmul.mubr.bf16.gmra.mrb[84].mxu0 %v9227_v9  ;;  %v2243_v9 = vrot.slane %v2010_v4, 2  ;;  %v2251_v52 = vrot.slane %v2026_v32, 2  ;;  %v14446_v32 = vld [vmem:[#allocation6_spill] sm:$0xff] }
  0xf7   : > { %8479 = vmatprep.mubr.bf16.mxu0 %v9234_v11  ;;  %8512 = vmatpush3.bf16.msra.mxu0 %v8889_v49  ;;  %v9798_v11 = vld [vmem:[%s9091_s16 + $0x30] sm:$0xff]   ;;  %v582_v16 = vsel %vm14239_vm0, %v14446_v32, %v581_v1 }
  0xf8   : > { %1671 = vmatmul.mubr.bf16.gmra.mrb[100].mxu1 %v8995_v55  ;;  %8513 = vmatprep.subr.bf16.mxu0 %v8891_v48  ;;  %v2245_v24 = vsel %vm2239_vm2, %v2243_v9, %v2244_v33  ;;  %v2031_v37 = vshll.u32 %v9798_v11, 16  ;;  %v2252_v2 = vsel %vm2239_vm2, %v2244_v33, %v2251_v52  ;;  %v2035_v22 = vshrl.u32 %v9798_v11, 16 }
  0xf9   : > { %1678 = vmatprep.mubr.bf16.mxu1 %v523_v63  ;;  %v2051_v55 = vshrl.u32 %v9833_v0, 16  ;;  %v2261_v14 = vrot.slane %v9798_v11, 2 }
  0xfb   : > { %8514 = vmatpush3.bf16.msra.mxu0 %v8891_v48  ;;  %v2256_v48 = vsel %vm2239_vm2, %v2249_v53, %v2255_v29  ;;  %v2053_v57 = vor.u32 %v2051_v55, %v2049_v51 }
  0xfc   : > { %4871 = vmatprep.subr.bf16.mxu0 %v9530_v15  ;;  %v2241_v15 = vrot.slane %v9753_v27, 2 }
  0xfe   : > { %8480 = vmatmul.mubr.bf16.gmra.mrb[88].mxu0 %v9261_v36  ;;  %v2033_v36 = vrot.slane %v2031_v37, 1  ;;  %v2242_v47 = vsel %vm2239_vm2, %v2240_v41, %v2241_v15  ;;  %v9881_v41 = vld [vmem:[%s9091_s16 + $0x50] sm:$0xff]  }
  0xff   : > { %8483 = vmatprep.mubr.bf16.mxu0 %v9276_v43  ;;  %v9813_v43 = vld [vmem:[%s9091_s16 + $0x38] sm:$0xff]   ;;  %v2067_v55 = vshrl.u32 %v9881_v41, 16 }
 0x100   : > { %1679 = vmatmul.mubr.bf16.gmra.mrb[104].mxu1 %v8996_v12  ;;  %v2034_v23 = vsel %vm14238_vm1, %v2029_v59, %v2033_v36  ;;  %v2039_v18 = vshll.u32 %v9813_v43, 16  ;;  %v2037_v17 = vor.u32 %v2035_v22, %v2033_v36  ;;  %v2043_v60 = vshrl.u32 %v9813_v43, 16 }
 0x101   : > { %2581 = vmatprep.mubr.bf16.mxu1 %v2245_v24  ;;  %v2257_v56 = vrot.slane %v2034_v23, 2  ;;  %v2160_v24 = vrot.slane %v9798_v11, 1  ;;  %v2262_v59 = vsel %vm2239_vm2, %v2255_v29, %v2261_v14  ;;  %v2162_v28 = vrot.slane %v9813_v43, 1 }
 0x102   : > { %v9810_v3 = vpop.f32.mrb[0].mxu1 }
 0x103   : > { %v9815_v54 = vpop.f32.mrb[1].mxu1  ;;  %v2258_v50 = vsel %vm2239_vm2, %v2251_v52, %v2257_v56 }
 0x104   : > { %v9818_v46 = vpop.f32.mrb[2].mxu1 }
 0x105   : > { %v9822_v25 = vpop.f32.mrb[3].mxu1 }
 0x106   : > { %8484 = vmatmul.mubr.bf16.gmra.mrb[92].mxu0 %v9300_v61  ;;  %v2041_v61 = vrot.slane %v2039_v18, 1 }
 0x107   : > { %8487 = vmatprep.mubr.bf16.mxu0 %v9326_v21  ;;  %v2250_v21 = vsel %vm2239_vm2, %v2241_v15, %v2249_v53  ;;  %v2063_v53 = vshll.u32 %v9881_v41, 16 }
 0x108   : > { %2582 = vmatmul.mubr.bf16.vlgmr.msra.gmra.mrb[108].mxu1 %v2242_v47  ;;  %v2042_v13 = vsel %vm14238_vm1, %v2037_v17, %v2041_v61  ;;  %v2045_v5 = vor.u32 %v2043_v60, %v2041_v61  ;;  %v2267_v61 = vrot.slane %v9813_v43, 2 }
 0x109   : > { %2589 = vmatprep.mubr.bf16.mxu1 %v2252_v2  ;;  %v2263_v49 = vrot.slane %v2042_v13, 2 }
 0x10a   : > { %v9830_v40 = vpop.f32.mrb[4].mxu1  ;;  %v2050_v44 = vsel %vm14238_vm1, %v2045_v5, %v2049_v51 }
 0x10b   : > { %v9835_v35 = vpop.f32.mrb[5].mxu1 }
 0x10c   : > { %v9838_v58 = vpop.f32.mrb[6].mxu1 }
 0x10d   : > { %v9843_v10 = vpop.f32.mrb[7].mxu1 }
 0x10e   : > { %8488 = vmatmul.mubr.bf16.gmra.mrb[96].mxu0 %v9353_v39  ;;  %v2154_v39 = vrot.slane %v9753_v27, 1  ;;  %v2264_v27 = vsel %vm2239_vm2, %v2257_v56, %v2263_v49 }
 0x10f   : > { %8491 = vmatprep.mubr.bf16.mxu0 %v9364_v26  ;;  %v9855_v26 = vld [vmem:[%s9091_s16 + $0x48] sm:$0xff]  }
 0x110   : > { %2590 = vmatmul.mubr.bf16.gmra.mrb[112].mxu1 %v2250_v21  ;;  %v2155_v63 = vsel %vm14239_vm0, %v2153_v6, %v2154_v39  ;;  %v2157_v4 = vsel %vm14239_vm0, %v2154_v39, %v2156_v20  ;;  %v2055_v9 = vshll.u32 %v9855_v26, 16  ;;  %v2059_v18 = vshrl.u32 %v9855_v26, 16 }
 0x111   : > { %2597 = vmatprep.mubr.bf16.mxu1 %v2258_v50  ;;  %v2246_v33 = vrot.slane %v2155_v63, 2  ;;  %v2247_v38 = vrot.slane %v2157_v4, 2  ;;  %v2164_v21 = vrot.slane %v9833_v0, 1  ;;  %v2065_v39 = vrot.slane %v2063_v53, 1 }
 0x112   : > { %v9852_v19 = vpop.f32.mrb[8].mxu1  ;;  %v2057_v37 = vrot.slane %v2055_v9, 1 }
 0x113   : > { %v9857_v34 = vpop.f32.mrb[9].mxu1  ;;  %v2248_v15 = vsel %vm2239_vm2, %v2246_v33, %v2247_v38  ;;  %v2165_v63 = vsel %vm14239_vm0, %v2162_v28, %v2164_v21 }
 0x114   : > { %v9862_v42 = vpop.f32.mrb[10].mxu1  ;;  %v2058_v22 = vsel %vm14238_vm1, %v2053_v57, %v2057_v37  ;;  %v2061_v6 = vor.u32 %v2059_v18, %v2057_v37  ;;  %v2271_v33 = vrot.slane %v2165_v63, 2 }
 0x115   : > { %v9866_v8 = vpop.f32.mrb[11].mxu1  ;;  %v2275_v13 = vrot.slane %v2058_v22, 2 }
 0x116   : > { %8492 = vmatmul.mubr.bf16.gmra.mrb[100].mxu0 %v9405_v30  ;;  %v2158_v30 = vrot.slane %v9783_v62, 1 }
 0x117   : > { %8495 = vmatprep.mubr.bf16.mxu0 %v9415_v31  ;;  %v2269_v31 = vrot.slane %v2050_v44, 2  ;;  %v9924_v44 = vsel %vm14238_vm1, %v2061_v6, %v2065_v39 }
 0x118   : > { %2598 = vmatmul.mubr.bf16.gmra.mrb[116].mxu1 %v2256_v48  ;;  %v2159_v52 = vsel %vm14239_vm0, %v2156_v20, %v2158_v30  ;;  %v2161_v11 = vsel %vm14239_vm0, %v2158_v30, %v2160_v24  ;;  %v9907_v20 = vld [vmem:[%s9091_s16 + $0x58] sm:$0xff]   ;;  %v2268_v48 = vsel %vm2239_vm2, %v2261_v14, %v2267_v61  ;;  %v2273_v14 = vrot.slane %v9833_v0, 2 }
 0x119   : > { %2605 = vmatprep.mubr.bf16.mxu1 %v2264_v27  ;;  %v2270_v47 = vsel %vm2239_vm2, %v2263_v49, %v2269_v31  ;;  %v2253_v23 = vrot.slane %v2159_v52, 2  ;;  %v2259_v56 = vrot.slane %v2161_v11, 2  ;;  %v2276_v27 = vsel %vm2239_vm2, %v2269_v31, %v2275_v13  ;;  %v9939_v11 = vld [vmem:[%s9091_s16 + $0x60] sm:$0xff]  }
 0x11a   : > { %v9878_v12 = vpop.f32.mrb[12].mxu1  ;;  %v2071_v9 = vshll.u32 %v9907_v20, 16  ;;  %v2069_v52 = vor.u32 %v2067_v55, %v2065_v39  ;;  %v2274_v18 = vsel %vm2239_vm2, %v2267_v61, %v2273_v14  ;;  %v2172_v39 = vrot.slane %v9939_v11, 1 }
 0x11b   : > { %v9885_v62 = vpop.f32.mrb[13].mxu1  ;;  %v2254_v7 = vsel %vm2239_vm2, %v2247_v38, %v2253_v23  ;;  %v2260_v5 = vsel %vm2239_vm2, %v2253_v23, %v2259_v56  ;;  %v2166_v38 = vrot.slane %v9855_v26, 1 }
 0x11c   : > { %v9889_v36 = vpop.f32.mrb[14].mxu1 }
 0x11d   : > { %v9892_v2 = vpop.f32.mrb[15].mxu1 }
 0x11e   : > { %8496 = vmatmul.mubr.bf16.gmra.mrb[104].mxu0 %v582_v16  ;;  %v2281_v16 = vrot.slane %v9924_v44, 2 }
 0x11f   : > { %8515 = vmatprep.mubr.bf16.mxu0 %v2248_v15 }
 0x120   : > { %2606 = vmatmul.mubr.bf16.gmra.mrb[120].mxu1 %v2262_v59  ;;  %v2073_v59 = vrot.slane %v2071_v9, 1 }
 0x121   : > { %v1046_v17 = vpop.f32.mrb[0].mxu0  ;;  %2613 = vmatprep.mubr.bf16.mxu1 %v2270_v47 }
 0x122   : > { %v9901_v45 = vadd.f32 %v9815_v54, %v1046_v17  ;;  %v1048_v50 = vpop.f32.mrb[1].mxu0  ;;  %v2163_v54 = vsel %vm14239_vm0, %v2160_v24, %v2162_v28  ;;  %v2168_v24 = vrot.slane %v9881_v41, 1  ;;  %v2282_v28 = vsel %vm2239_vm2, %v2275_v13, %v2281_v16 }
 0x123   : > { %v1049_v60 = vpop.f32.mrb[2].mxu0  ;;  %v9904_v29 = vpop.f32.mrb[16].mxu1  ;;  %v9956_v50 = vsel %vm14238_vm1, %v2069_v52, %v2073_v59  ;;  %v2279_v13 = vrot.slane %v9855_v26, 2 }
 0x124   : > { %v9910_v49 = vadd.f32 %v9822_v25, %v1049_v60  ;;  %v1051_v43 = vpop.f32.mrb[3].mxu0  ;;  %v9914_v51 = vpop.f32.mrb[17].mxu1  ;;  %v2265_v25 = vrot.slane %v2163_v54, 2  ;;  %v2079_v60 = vshll.u32 %v9939_v11, 16  ;;  %v2287_v54 = vrot.slane %v9956_v50, 2 }
 0x125   : > { %v9918_v4 = vpop.f32.mrb[18].mxu1 }
 0x126   : > { %8516 = vmatmul.mubr.bf16.vlgmr.msra.gmra.mrb[108].mxu0 %v2254_v7  ;;  %v9921_v1 = vpop.f32.mrb[19].mxu1  ;;  %v2266_v37 = vsel %vm2239_vm2, %v2259_v56, %v2265_v25  ;;  %v2272_v23 = vsel %vm2239_vm2, %v2265_v25, %v2271_v33  ;;  %v2169_v56 = vsel %vm14239_vm0, %v2166_v38, %v2168_v24  ;;  %v2170_v7 = vrot.slane %v9907_v20, 1 }
 0x127   : > { %8519 = vmatprep.mubr.bf16.mxu0 %v2260_v5  ;;  %v2283_v61 = vrot.slane %v2169_v56, 2  ;;  %v2081_v44 = vrot.slane %v2079_v60, 1 }
 0x128   : > { %2614 = vmatmul.mubr.bf16.gmra.mrb[124].mxu1 %v2268_v48 }
 0x129   : > { %v1054_v30 = vpop.f32.mrb[4].mxu0  ;;  %2621 = vmatprep.mubr.bf16.mxu1 %v2276_v27 }
 0x12a   : > { %v9932_v31 = vadd.f32 %v9810_v3, %v1054_v30  ;;  %v1056_v32 = vpop.f32.mrb[5].mxu0  ;;  %v2167_v3 = vsel %vm14239_vm0, %v2164_v21, %v2166_v38  ;;  %v2075_v21 = vshrl.u32 %v9907_v20, 16  ;;  %v9978_v30 = vld [vmem:[%s9091_s16 + $0x68] sm:$0xff]  }
 0x12b   : > { %v1057_v57 = vpop.f32.mrb[6].mxu0  ;;  %v9936_v15 = vpop.f32.mrb[20].mxu1  ;;  %v2280_v32 = vsel %vm2239_vm2, %v2273_v14, %v2279_v13  ;;  %v2087_v14 = vshll.u32 %v9978_v30, 16 }
 0x12c   : > { %v9942_v47 = vadd.f32 %v9818_v46, %v1057_v57  ;;  %v1059_v0 = vpop.f32.mrb[7].mxu0  ;;  %v9946_v22 = vpop.f32.mrb[21].mxu1  ;;  %v2277_v46 = vrot.slane %v2167_v3, 2  ;;  %v2077_v25 = vor.u32 %v2075_v21, %v2073_v59  ;;  %v2174_v3 = vrot.slane %v9978_v30, 1 }
 0x12d   : > { %v9949_v53 = vpop.f32.mrb[22].mxu1  ;;  %v2083_v0 = vshrl.u32 %v9939_v11, 16 }
 0x12e   : > { %8520 = vmatmul.mubr.bf16.gmra.mrb[112].mxu0 %v2266_v37  ;;  %v9953_v17 = vpop.f32.mrb[23].mxu1  ;;  %v2278_v63 = vsel %vm2239_vm2, %v2271_v33, %v2277_v46  ;;  %v2284_v9 = vsel %vm2239_vm2, %v2277_v46, %v2283_v61  ;;  %v2173_v33 = vsel %vm14239_vm0, %v2170_v7, %v2172_v39  ;;  %v9985_v37 = vld [vmem:[%s9091_s16 + $0x70] sm:$0xff]  }
 0x12f   : > { %8523 = vmatprep.mubr.bf16.mxu0 %v2272_v23  ;;  %v2295_v23 = vrot.slane %v2173_v33, 2  ;;  %v2176_v56 = vrot.slane %v9985_v37, 1 }
 0x130   : > { %2622 = vmatmul.mubr.bf16.gmra.mrb[128].mxu1 %v2274_v18 }
 0x131   : > { %v1062_v6 = vpop.f32.mrb[8].mxu0  ;;  %2629 = vmatprep.mubr.bf16.mxu1 %v2282_v28 }
 0x132   : > { %v9964_v43 = vadd.f32 %v9835_v35, %v1062_v6  ;;  %v1064_v5 = vpop.f32.mrb[9].mxu0  ;;  %v2171_v35 = vsel %vm14239_vm0, %v2168_v24, %v2170_v7  ;;  %v9991_v24 = vsel %vm14238_vm1, %v2077_v25, %v2081_v44  ;;  %v2085_v6 = vor.u32 %v2083_v0, %v2081_v44  ;;  %v10020_v44 = vld [vmem:[%s9091_s16 + $0x80] sm:$0xff]  }
 0x133   : > { %v1065_v48 = vpop.f32.mrb[10].mxu0  ;;  %v9968_v27 = vpop.f32.mrb[24].mxu1  ;;  %v2289_v59 = vrot.slane %v2171_v35, 2  ;;  %v2293_v50 = vrot.slane %v9991_v24, 2  ;;  %v2089_v5 = vrot.slane %v2087_v14, 1  ;;  %v2175_v25 = vsel %vm14239_vm0, %v2172_v39, %v2174_v3 }
 0x134   : > { %v9971_v55 = vadd.f32 %v9843_v10, %v1065_v48  ;;  %v1067_v26 = vpop.f32.mrb[11].mxu0  ;;  %v9975_v38 = vpop.f32.mrb[25].mxu1  ;;  %v2288_v10 = vsel %vm2239_vm2, %v2281_v16, %v2287_v54  ;;  %v2285_v16 = vrot.slane %v9881_v41, 2  ;;  %v2301_v33 = vrot.slane %v2175_v25, 2 }
 0x135   : > { %v9981_v57 = vpop.f32.mrb[26].mxu1  ;;  %v2290_v60 = vsel %vm2239_vm2, %v2283_v61, %v2289_v59  ;;  %v10013_v26 = vld [vmem:[%s9091_s16 + $0x78] sm:$0xff]   ;;  %v2177_v61 = vsel %vm14239_vm0, %v2174_v3, %v2176_v56  ;;  %v2091_v39 = vshrl.u32 %v9978_v30, 16  ;;  %v2291_v14 = vrot.slane %v9907_v20, 2 }
 0x136   : > { %8524 = vmatmul.mubr.bf16.gmra.mrb[116].mxu0 %v2278_v63  ;;  %v9988_v52 = vpop.f32.mrb[27].mxu1  ;;  %v2178_v24 = vrot.slane %v10013_v26, 1 }
 0x137   : > { %8527 = vmatprep.mubr.bf16.mxu0 %v2284_v9  ;;  %v2286_v9 = vsel %vm2239_vm2, %v2279_v13, %v2285_v16  ;;  %v2095_v13 = vshll.u32 %v9985_v37, 16 }
 0x138   : > { %2630 = vmatmul.mubr.bf16.gmra.mrb[132].mxu1 %v2280_v32  ;;  %v2294_v32 = vsel %vm2239_vm2, %v2287_v54, %v2293_v50  ;;  %v2180_v54 = vrot.slane %v10020_v44, 1 }
 0x139   : > { %v1070_v18 = vpop.f32.mrb[12].mxu0  ;;  %2637 = vmatprep.mubr.bf16.mxu1 %v2288_v10  ;;  %v10026_v10 = vsel %vm14238_vm1, %v2085_v6, %v2089_v5  ;;  %v2302_v6 = vsel %vm2239_vm2, %v2295_v23, %v2301_v33 }
 0x13a   : > { %v9999_v28 = vadd.f32 %v9830_v40, %v1070_v18  ;;  %v1072_v46 = vpop.f32.mrb[13].mxu0  ;;  %v2296_v40 = vsel %vm2239_vm2, %v2289_v59, %v2295_v23  ;;  %v2307_v59 = vrot.slane %v2177_v61, 2  ;;  %v2179_v61 = vsel %vm14239_vm0, %v2176_v56, %v2178_v24 }
 0x13b   : > { %v1073_v21 = vpop.f32.mrb[14].mxu0  ;;  %v10003_v7 = vpop.f32.mrb[28].mxu1  ;;  %v2299_v46 = vrot.slane %v10026_v10, 2  ;;  %v2292_v10 = vsel %vm2239_vm2, %v2285_v16, %v2291_v14  ;;  %v2181_v23 = vsel %vm14239_vm0, %v2178_v24, %v2180_v54  ;;  %v2313_v56 = vrot.slane %v2179_v61, 2 }
 0x13c   : > { %v10006_v48 = vadd.f32 %v9838_v58, %v1073_v21  ;;  %v1075_v41 = vpop.f32.mrb[15].mxu0  ;;  %v10008_v63 = vpop.f32.mrb[29].mxu1  ;;  %v2103_v16 = vshll.u32 %v10013_v26, 16 }
 0x13d   : > { %v10016_v35 = vpop.f32.mrb[30].mxu1  ;;  %v2093_v41 = vor.u32 %v2091_v39, %v2089_v5  ;;  %v10055_v5 = vld [vmem:[%s9091_s16 + $0x90] sm:$0xff]   ;;  %v2300_v39 = vsel %vm2239_vm2, %v2293_v50, %v2299_v46 }
 0x13e   : > { %14447 = vst [vmem:[#allocation3_spill] sm:$0xff] %v10016_v35  ;;  %8528 = vmatmul.mubr.bf16.gmra.mrb[120].mxu0 %v2290_v60  ;;  %v10022_v58 = vpop.f32.mrb[31].mxu1  ;;  %v2184_v50 = vrot.slane %v10055_v5, 1 }
 0x13f   : > { %8531 = vmatprep.mubr.bf16.mxu0 %v2296_v40  ;;  %v2097_v40 = vrot.slane %v2095_v13, 1  ;;  %v2099_v13 = vshrl.u32 %v9985_v37, 16 }
 0x140   : > { %2638 = vmatmul.mubr.bf16.gmra.mrb[136].mxu1 %v2286_v9 }
 0x141   : > { %v1078_v0 = vpop.f32.mrb[16].mxu0  ;;  %2645 = vmatprep.mubr.bf16.mxu1 %v2294_v32  ;;  %v10048_v32 = vld [vmem:[%s9091_s16 + $0x88] sm:$0xff]  }
 0x142   : > { %v10034_v3 = vadd.f32 %v9857_v34, %v1078_v0  ;;  %v1080_v18 = vpop.f32.mrb[17].mxu0  ;;  %v2308_v34 = vsel %vm2239_vm2, %v2301_v33, %v2307_v59  ;;  %v10061_v33 = vsel %vm14238_vm1, %v2093_v41, %v2097_v40  ;;  %v2182_v24 = vrot.slane %v10048_v32, 1 }
 0x143   : > { %v1081_v21 = vpop.f32.mrb[18].mxu0  ;;  %v10037_v60 = vpop.f32.mrb[32].mxu1  ;;  %v2319_v18 = vrot.slane %v2181_v23, 2  ;;  %v2101_v23 = vor.u32 %v2099_v13, %v2097_v40  ;;  %v10087_v40 = vld [vmem:[%s9091_s16 + $0xa0] ss:$0 sps:$4 sm:$0x77]  }
 0x144   : > { %14448 = vst [vmem:[#allocation4_spill] sm:$0xff] %v10037_v60  ;;  %v10041_v25 = vadd.f32 %v9866_v8, %v1081_v21  ;;  %v1083_v20 = vpop.f32.mrb[19].mxu0  ;;  %v10043_v9 = vpop.f32.mrb[33].mxu1  ;;  %v2105_v60 = vrot.slane %v2103_v16, 1 }
 0x145   : > { %14449 = vst [vmem:[#allocation5_spill] sm:$0xff] %v10043_v9  ;;  %v10051_v0 = vpop.f32.mrb[34].mxu1  ;;  %v2320_v9 = vsel %vm2239_vm2, %v2313_v56, %v2319_v18 }
 0x146   : > { %14450 = vst [vmem:[#allocation6_spill] sm:$0xff] %v10051_v0  ;;  %8532 = vmatmul.mubr.bf16.gmra.mrb[124].mxu0 %v2302_v6  ;;  %v10057_v8 = vpop.f32.mrb[35].mxu1  ;;  %v2297_v6 = vrot.slane %v9939_v11, 2 }
 0x147   : > { %14451 = vst [vmem:[#allocation7_spill] sm:$0xff] %v10057_v8  ;;  %8535 = vmatprep.mubr.bf16.mxu0 %v2308_v34  ;;  %v2305_v34 = vrot.slane %v10061_v33, 2 }
 0x148   : > { %2646 = vmatmul.mubr.bf16.gmra.mrb[140].mxu1 %v2292_v10  ;;  %v2314_v10 = vsel %vm2239_vm2, %v2307_v59, %v2313_v56  ;;  %v2298_v35 = vsel %vm2239_vm2, %v2291_v14, %v2297_v6  ;;  %v2185_v59 = vsel %vm14239_vm0, %v2182_v24, %v2184_v50  ;;  %v2111_v56 = vshll.u32 %v10020_v44, 16 }
 0x149   : > { %v1086_v21 = vpop.f32.mrb[20].mxu0  ;;  %2653 = vmatprep.mubr.bf16.mxu1 %v2300_v39  ;;  %v2331_v14 = vrot.slane %v2185_v59, 2 }
 0x14a   : > { %v10069_v20 = vadd.f32 %v9852_v19, %v1086_v21  ;;  %v1088_v41 = vpop.f32.mrb[21].mxu0  ;;  %v2183_v19 = vsel %vm14239_vm0, %v2180_v54, %v2182_v24  ;;  %v10079_v21 = vld [vmem:[%s9091_s16 + $0x98] sm:$0xff]   ;;  %v2106_v54 = vsel %vm14238_vm1, %v2101_v23, %v2105_v60 }
 0x14b   : > { %v1544_v61 = vpop.f32.mrb[36].mxu1  ;;  %v1089_v0 = vpop.f32.mrb[22].mxu0  ;;  %v2325_v13 = vrot.slane %v2183_v19, 2  ;;  %v2186_v16 = vrot.slane %v10079_v21, 1 }
 0x14c   : > { %v10074_v39 = vadd.f32 %v9862_v42, %v1089_v0  ;;  %v1546_v8 = vpop.f32.mrb[37].mxu1  ;;  %v1091_v11 = vpop.f32.mrb[23].mxu0  ;;  %v10082_v33 = vadd.f32 %v1544_v61, %v9901_v45  ;;  %v2306_v0 = vsel %vm2239_vm2, %v2299_v46, %v2305_v34  ;;  %v2107_v45 = vshrl.u32 %v10013_v26, 16 }
 0x14d   : > { %v1547_v41 = vpop.f32.mrb[38].mxu1  ;;  %v2303_v46 = vrot.slane %v9978_v30, 2  ;;  %v2188_v61 = vrot.slane %v10087_v40, 1  ;;  %v2332_v30 = vsel %vm2239_vm2, %v2325_v13, %v2331_v14 }
 0x14e   : > { %v1549_v42 = vpop.f32.mrb[39].mxu1  ;;  %8536 = vmatmul.mubr.bf16.gmra.mrb[128].mxu0 %v2314_v10  ;;  %v10091_v8 = vadd.f32 %v1547_v41, %v9910_v49  ;;  %v2109_v41 = vor.u32 %v2107_v45, %v2105_v60 }
 0x14f   : > { %8539 = vmatprep.mubr.bf16.mxu0 %v2320_v9  ;;  %v2311_v9 = vrot.slane %v2106_v54, 2  ;;  %v2113_v42 = vrot.slane %v2111_v56, 1  ;;  %v2304_v54 = vsel %vm2239_vm2, %v2297_v6, %v2303_v46  ;;  %v2189_v60 = vsel %vm14239_vm0, %v2186_v16, %v2188_v61 }
 0x150   : > { %14452 = vst [vmem:[#allocation8_spill] sm:$0xff] %v10091_v8  ;;  %2654 = vmatmul.mubr.bf16.gmra.mrb[144].mxu1 %v2298_v35  ;;  %v2326_v35 = vsel %vm2239_vm2, %v2319_v18, %v2325_v13  ;;  %v2187_v8 = vsel %vm14239_vm0, %v2184_v50, %v2186_v16  ;;  %v2115_v50 = vshrl.u32 %v10020_v44, 16  ;;  %v2343_v6 = vrot.slane %v2189_v60, 2 }
 0x151   : > { %v1094_v24 = vpop.f32.mrb[24].mxu0  ;;  %2661 = vmatprep.mubr.bf16.mxu1 %v2306_v0  ;;  %v2312_v18 = vsel %vm2239_vm2, %v2305_v34, %v2311_v9  ;;  %v10118_v56 = vsel %vm14238_vm1, %v2109_v41, %v2113_v42  ;;  %v2337_v13 = vrot.slane %v2187_v8, 2  ;;  %v2309_v16 = vrot.slane %v9985_v37, 2 }
 0x152   : > { %v10100_v49 = vadd.f32 %v9885_v62, %v1094_v24  ;;  %v1096_v10 = vpop.f32.mrb[25].mxu0 }
 0x153   : > { %v1552_v23 = vpop.f32.mrb[40].mxu1  ;;  %v1097_v11 = vpop.f32.mrb[26].mxu0  ;;  %v2310_v60 = vsel %vm2239_vm2, %v2303_v46, %v2309_v16  ;;  %v2349_v46 = vrot.slane %v2188_v61, 2 }
 0x154   : > { %v10104_v19 = vadd.f32 %v9892_v2, %v1097_v11  ;;  %v1554_v59 = vpop.f32.mrb[41].mxu1  ;;  %v1099_v0 = vpop.f32.mrb[27].mxu0  ;;  %v10109_v62 = vadd.f32 %v1552_v23, %v9932_v31  ;;  %v2119_v31 = vshll.u32 %v10048_v32, 16  ;;  %v2317_v23 = vrot.slane %v10118_v56, 2 }
 0x155   : > { %v1555_v24 = vpop.f32.mrb[42].mxu1  ;;  %v2338_v0 = vsel %vm2239_vm2, %v2331_v14, %v2337_v13  ;;  %v2127_v56 = vshll.u32 %v10055_v5, 16 }
 0x156   : > { %v1557_v45 = vpop.f32.mrb[43].mxu1  ;;  %8540 = vmatmul.mubr.bf16.gmra.mrb[132].mxu0 %v2326_v35  ;;  %v10115_v2 = vadd.f32 %v1555_v24, %v9942_v47  ;;  %v2117_v35 = vor.u32 %v2115_v50, %v2113_v42  ;;  %v2121_v59 = vrot.slane %v2119_v31, 1  ;;  %v8908_v42 = vld [vmem:[%s14215_s3 + $0x140] sm:$0xff]   ;;  %v2318_v14 = vsel %vm2239_vm2, %v2311_v9, %v2317_v23 }
 0x157   : > { %8543 = vmatprep.mubr.bf16.mxu0 %v2332_v30  ;;  %8551 = vmatprep.subr.bf16.mxu1 %v8908_v42  ;;  %v2315_v31 = vrot.slane %v10013_v26, 2 }
 0x158   : > { %2662 = vmatmul.mubr.bf16.gmra.mrb[148].mxu1 %v2304_v54  ;;  %v2344_v54 = vsel %vm2239_vm2, %v2337_v13, %v2343_v6 }
 0x159   : > { %v1102_v10 = vpop.f32.mrb[28].mxu0  ;;  %2669 = vmatprep.mubr.bf16.mxu1 %v2312_v18  ;;  %v10144_v18 = vsel %vm14238_vm1, %v2117_v35, %v2121_v59  ;;  %8552 = vmatpush3.bf16.msra.mxu1 %v8908_v42  ;;  %v2350_v35 = vsel %vm2239_vm2, %v2343_v6, %v2349_v46  ;;  %v8910_v6 = vld [vmem:[%s14215_s3 + $0xc8] sm:$0xff]   ;;  %v2131_v42 = vshrl.u32 %v10055_v5, 16 }
 0x15a   : > { %v10124_v34 = vadd.f32 %v9878_v12, %v1102_v10  ;;  %v1104_v47 = vpop.f32.mrb[29].mxu0  ;;  %v2323_v13 = vrot.slane %v10144_v18, 2 }
 0x15b   : > { %v1560_v11 = vpop.f32.mrb[44].mxu1  ;;  %v1105_v41 = vpop.f32.mrb[30].mxu0 }
 0x15c   : > { %v10129_v8 = vadd.f32 %v9889_v36, %v1105_v41  ;;  %v1562_v30 = vpop.f32.mrb[45].mxu1  ;;  %v1107_v24 = vpop.f32.mrb[31].mxu0  ;;  %v10133_v37 = vadd.f32 %v1560_v11, %v9964_v43  ;;  %v2123_v43 = vshrl.u32 %v10048_v32, 16  ;;  %v2129_v41 = vrot.slane %v2127_v56, 1 }
 0x15d   : > { %v1563_v12 = vpop.f32.mrb[46].mxu1 }
 0x15e   : > { %v1565_v45 = vpop.f32.mrb[47].mxu1  ;;  %8544 = vmatmul.mubr.bf16.gmra.mrb[136].mxu0 %v2338_v0  ;;  %v10141_v36 = vadd.f32 %v1563_v12, %v9971_v55  ;;  %v8909_v55 = vld [vmem:[%s14215_s3 + $0xc0] sm:$0xff]   ;;  %v2125_v61 = vor.u32 %v2123_v43, %v2121_v59  ;;  %v2316_v12 = vsel %vm2239_vm2, %v2309_v16, %v2315_v31 }
 0x15f   : > { %8547 = vmatprep.mubr.bf16.mxu0 %v2344_v54  ;;  %4872 = vmatpush1.bf16.msra.mxu0 %v8909_v55  ;;  %v10163_v54 = vld [vmem:[#allocation2] sm:$0xff]  ;;  %v2135_v45 = vshll.u32 %v10079_v21, 16 }
 0x160   : > { %2670 = vmatmul.mubr.bf16.gmra.mrb[152].mxu1 %v2310_v60  ;;  %4873 = vmatprep.subr.bf16.mxu0 %v10163_v54  ;;  %v2324_v60 = vsel %vm2239_vm2, %v2317_v23, %v2323_v13  ;;  %v8911_v23 = vld [vmem:[%s14215_s3 + $0xd0] sm:$0xff]  }
 0x161   : > { %v1110_v50 = vpop.f32.mrb[32].mxu0  ;;  %2677 = vmatprep.mubr.bf16.mxu1 %v2318_v14  ;;  %v2321_v14 = vrot.slane %v10020_v44, 2  ;;  %v2137_v55 = vrot.slane %v2135_v45, 1 }
 0x162   : > { %v1112_v9 = vpop.f32.mrb[33].mxu0  ;;  %v10154_v10 = vadd.f32 %v9914_v51, %v1110_v50  ;;  %v2133_v50 = vor.u32 %v2131_v42, %v2129_v41 }
 0x163   : > { %v1568_v47 = vpop.f32.mrb[48].mxu1  ;;  %v1113_v11 = vpop.f32.mrb[34].mxu0  ;;  %4874 = vmatpush1.bf16.msra.mxu0 %v8910_v6 }
 0x164   : > { %v1570_v0 = vpop.f32.mrb[49].mxu1  ;;  %v1115_v26 = vpop.f32.mrb[35].mxu0  ;;  %v10158_v30 = vadd.f32 %v9921_v1, %v1113_v11  ;;  %v10161_v24 = vadd.f32 %v1568_v47, %v9999_v28  ;;  %v2130_v28 = vsel %vm14238_vm1, %v2125_v61, %v2129_v41  ;;  %4875 = vmatprep.subr.bf16.mxu0 %v10163_v54 }
 0x165   : > { %v1571_v51 = vpop.f32.mrb[50].mxu1  ;;  %v2329_v18 = vrot.slane %v2130_v28, 2 }
 0x166   : > { %v1573_v59 = vpop.f32.mrb[51].mxu1  ;;  %8548 = vmatmul.mubr.bf16.gmra.mrb[140].mxu0 %v2350_v35  ;;  %v10172_v1 = vadd.f32 %v1571_v51, %v10006_v48  ;;  %v2322_v35 = vsel %vm2239_vm2, %v2315_v31, %v2321_v14  ;;  %v2143_v51 = vshll.u32 %v10087_v40, 16 }
 0x167   : > { %4876 = vmatpush1.bf16.msra.mxu0 %v8911_v23  ;;  %v2330_v0 = vsel %vm2239_vm2, %v2323_v13, %v2329_v18  ;;  %v8914_v13 = vld [vmem:[%s14215_s3 + $0xe0] sm:$0xff]  }
 0x168   : > { %2678 = vmatmul.mubr.bf16.gmra.mrb[156].mxu1 %v2316_v12  ;;  %4877 = vmatprep.subr.bf16.mxu0 %v10163_v54  ;;  %v2327_v12 = vrot.slane %v10048_v32, 2 }
 0x169   : > { %v1118_v16 = vpop.f32.mrb[36].mxu0  ;;  %2685 = vmatprep.mubr.bf16.mxu1 %v2324_v60  ;;  %v8913_v60 = vld [vmem:[%s14215_s3 + $0x148] sm:$0xff]  }
 0x16a   : > { %v1120_v48 = vpop.f32.mrb[37].mxu0  ;;  %v10183_v43 = vadd.f32 %v9904_v29, %v1118_v16  ;;  %v8912_v29 = vld [vmem:[%s14215_s3 + $0xd8] sm:$0xff]   ;;  %v2145_v16 = vrot.slane %v2143_v51, 1  ;;  %8553 = vmatprep.subr.bf16.mxu1 %v8913_v60 }
 0x16b   : > { %v1576_v56 = vpop.f32.mrb[52].mxu1  ;;  %v1121_v46 = vpop.f32.mrb[38].mxu0  ;;  %4878 = vmatpush1.bf16.msra.mxu0 %v8912_v29  ;;  %8554 = vmatpush3.bf16.msra.mxu1 %v8913_v60 }
 0x16c   : > { %v1578_v9 = vpop.f32.mrb[53].mxu1  ;;  %v1123_v47 = vpop.f32.mrb[39].mxu0  ;;  %v10186_v11 = vadd.f32 %v9918_v4, %v1121_v46  ;;  %v10189_v44 = vadd.f32 %v1576_v56, %v10034_v3  ;;  %v2138_v4 = vsel %vm14238_vm1, %v2133_v50, %v2137_v55  ;;  %v2139_v3 = vshrl.u32 %v10079_v21, 16  ;;  %4879 = vmatprep.subr.bf16.mxu0 %v10163_v54  ;;  %v8915_v50 = vld [vmem:[%s14215_s3 + $0xe8] sm:$0xff]  }
 0x16d   : > { %v1579_v61 = vpop.f32.mrb[54].mxu1  ;;  %v2335_v6 = vrot.slane %v2138_v4, 2  ;;  %v2328_v46 = vsel %vm2239_vm2, %v2321_v14, %v2327_v12  ;;  %v2333_v14 = vrot.slane %v10055_v5, 2 }
 0x16e   : > { %v1581_v41 = vpop.f32.mrb[55].mxu1  ;;  %v10198_v26 = vadd.f32 %v1579_v61, %v10041_v25  ;;  %v2141_v45 = vor.u32 %v2139_v3, %v2137_v55  ;;  %v8916_v61 = vld [vmem:[%s14215_s3 + $0xf0] sm:$0xff]  }
 0x16f   : > { %4880 = vmatpush1.bf16.msra.mxu0 %v8914_v13  ;;  %v2336_v9 = vsel %vm2239_vm2, %v2329_v18, %v2335_v6  ;;  %v2147_v18 = vshrl.u32 %v10087_v40, 16  ;;  %v2334_v13 = vsel %vm2239_vm2, %v2327_v12, %v2333_v14  ;;  %v8919_v12 = vld [vmem:[%s14215_s3 + $0x100] sm:$0xff]  }
 0x170   : > { %2686 = vmatmul.mubr.bf16.gmra.mrb[160].mxu1 %v2322_v35  ;;  %4881 = vmatprep.subr.bf16.mxu0 %v10163_v54 }
 0x171   : > { %v1126_v31 = vpop.f32.mrb[40].mxu0  ;;  %2693 = vmatprep.mubr.bf16.mxu1 %v2330_v0  ;;  %v2149_v60 = vor.u32 %v2147_v18, %v2145_v16 }
 0x172   : > { %v1128_v25 = vpop.f32.mrb[41].mxu0  ;;  %v10209_v59 = vadd.f32 %v9946_v22, %v1126_v31 }
 0x173   : > { %v1584_v28 = vpop.f32.mrb[56].mxu1  ;;  %v1129_v42 = vpop.f32.mrb[42].mxu0  ;;  %4882 = vmatpush1.bf16.msra.mxu0 %v8915_v50 }
 0x174   : > { %v1586_v23 = vpop.f32.mrb[57].mxu1  ;;  %v1131_v32 = vpop.f32.mrb[43].mxu0  ;;  %v10215_v48 = vadd.f32 %v9953_v17, %v1129_v42  ;;  %v10218_v56 = vadd.f32 %v1584_v28, %v10069_v20  ;;  %v2146_v20 = vsel %vm14238_vm1, %v2141_v45, %v2145_v16  ;;  %4883 = vmatprep.subr.bf16.mxu0 %v10163_v54  ;;  %v2347_v45 = vrot.slane %v2149_v60, 2 }
 0x175   : > { %v1587_v22 = vpop.f32.mrb[58].mxu1  ;;  %v2341_v29 = vrot.slane %v2146_v20, 2 }
 0x176   : > { %v1589_v55 = vpop.f32.mrb[59].mxu1  ;;  %v10227_v17 = vadd.f32 %v1587_v22, %v10074_v39 }
 0x177   : > { %4884 = vmatpush1.bf16.msra.mxu0 %v8916_v61  ;;  %v2342_v25 = vsel %vm2239_vm2, %v2335_v6, %v2341_v29  ;;  %v8907_v55 = vld [vmem:[%s9091_s16 + $0xa0] ss:$0 sps:$4 sm:$0x33]  }
 0x178   : > { %2694 = vmatmul.mubr.bf16.gmra.mrb[164].mxu1 %v2328_v46  ;;  %4885 = vmatprep.subr.bf16.mxu0 %v10163_v54  ;;  %v2345_v61 = vrot.slane %v8907_v55, 2 }
 0x179   : > { %v1134_v47 = vpop.f32.mrb[44].mxu0  ;;  %2701 = vmatprep.mubr.bf16.mxu1 %v2336_v9  ;;  %v8920_v9 = vld [vmem:[%s14215_s3 + $0x108] sm:$0xff]  }
 0x17a   : > { %v1136_v35 = vpop.f32.mrb[45].mxu0  ;;  %v10237_v39 = vadd.f32 %v9936_v15, %v1134_v47  ;;  %v8917_v15 = vld [vmem:[%s14215_s3 + $0xf8] sm:$0xff]   ;;  %v2939_v47 = vlaneseq }
 0x17b   : > { %v1592_v41 = vpop.f32.mrb[60].mxu1  ;;  %v1137_v0 = vpop.f32.mrb[46].mxu0  ;;  %4886 = vmatpush1.bf16.msra.mxu0 %v8917_v15  ;;  %v8921_v35 = vld [vmem:[%s14215_s3 + $0x110] sm:$0xff]  }
 0x17c   : > { %v1594_v4 = vpop.f32.mrb[61].mxu1  ;;  %v1139_v3 = vpop.f32.mrb[47].mxu0  ;;  %v10240_v51 = vadd.f32 %v9949_v53, %v1137_v0  ;;  %v10243_v5 = vadd.f32 %v1592_v41, %v10100_v49  ;;  %4887 = vmatprep.subr.bf16.mxu0 %v10163_v54  ;;  %v2339_v49 = vrot.slane %v10079_v21, 2  ;;  %v8922_v41 = vld [vmem:[%s14215_s3 + $0x158] sm:$0xff]  }
 0x17d   : > { %v1595_v31 = vpop.f32.mrb[62].mxu1 }
 0x17e   : > { %v1597_v40 = vpop.f32.mrb[63].mxu1  ;;  %v10252_v28 = vadd.f32 %v1595_v31, %v10104_v19  ;;  %v2340_v50 = vsel %vm2239_vm2, %v2333_v14, %v2339_v49 }
 0x17f   : > { %4888 = vmatpush1.bf16.msra.mxu0 %v8919_v12  ;;  %v2346_v40 = vsel %vm2239_vm2, %v2339_v49, %v2345_v61  ;;  %v8927_v61 = vld [vmem:[%s14215_s3 + $0x128] sm:$0xff]  }
 0x180   : > { %2702 = vmatmul.mubr.bf16.gmra.mrb[168].mxu1 %v2334_v13  ;;  %4889 = vmatprep.subr.bf16.mxu0 %v10163_v54 }
 0x181   : > { %v1142_v53 = vpop.f32.mrb[48].mxu0  ;;  %2709 = vmatprep.mubr.bf16.mxu1 %v2342_v25  ;;  %v8923_v25 = vld [vmem:[%s14215_s3 + $0x118] sm:$0xff]  }
 0x182   : > { %v1144_v42 = vpop.f32.mrb[49].mxu0  ;;  %v10260_v6 = vadd.f32 %v9975_v38, %v1142_v53  ;;  %v8918_v38 = vld [vmem:[%s14215_s3 + $0x150] sm:$0xff]  }
 0x183   : > { %v1600_v19 = vpop.f32.mrb[64].mxu1  ;;  %v1145_v16 = vpop.f32.mrb[50].mxu0  ;;  %8555 = vmatprep.subr.bf16.mxu1 %v8918_v38  ;;  %4890 = vmatpush1.bf16.msra.mxu0 %v8920_v9  ;;  %v8925_v42 = vld [vmem:[%s14215_s3 + $0x120] sm:$0xff]  }
 0x184   : > { %v1602_v23 = vpop.f32.mrb[65].mxu1  ;;  %v1147_v32 = vpop.f32.mrb[51].mxu0  ;;  %v10263_v22 = vadd.f32 %v9988_v52, %v1145_v16  ;;  %v10266_v46 = vadd.f32 %v1600_v19, %v10124_v34  ;;  %v2348_v52 = vsel %vm2239_vm2, %v2341_v29, %v2347_v45  ;;  %4891 = vmatprep.subr.bf16.mxu0 %v10163_v54  ;;  %8556 = vmatpush3.bf16.msra.mxu1 %v8918_v38 }
 0x185   : > { %v1603_v21 = vpop.f32.mrb[66].mxu1  ;;  %8557 = vmatprep.subr.bf16.mxu1 %v8922_v41 }
 0x186   : > { %v1605_v20 = vpop.f32.mrb[67].mxu1  ;;  %v10279_v34 = vadd.f32 %v1603_v21, %v10129_v8  ;;  %v10288_v8 = vshrl.u32 %v2939_v47, 7 }
 0x187   : > { %4892 = vmatpush1.bf16.msra.mxu0 %v8921_v35 }
 0x188   : > { %2710 = vmatmul.mubr.bf16.gmra.mrb[172].mxu1 %v2340_v50  ;;  %4893 = vmatprep.subr.bf16.mxu0 %v10163_v54  ;;  %v10311_v53 = vadd.s32 16, %v10288_v8  ;;  %v10315_v12 = vadd.s32 24, %v10288_v8  ;;  %v10331_v50 = vmul.u32.u64.low 3817748708, %v10288_v8  ;;  %v10332_v55 = vmul.u32.u64.high 3817748708, %v10288_v8, %v10331_v50 }
 0x189   : > { %v1150_v14 = vpop.f32.mrb[52].mxu0  ;;  %2717 = vmatprep.mubr.bf16.mxu1 %v2348_v52  ;;  %8558 = vmatpush3.bf16.msra.mxu1 %v8922_v41 }
 0x18a   : > { %v1152_v18 = vpop.f32.mrb[53].mxu0  ;;  %v10286_v29 = vadd.f32 %v9968_v27, %v1150_v14  ;;  %v10327_v16 = vmul.u32.u64.low 3817748708, %v10311_v53  ;;  %v10328_v23 = vmul.u32.u64.high 3817748708, %v10311_v53, %v10327_v16 }
 0x18b   : > { %v1608_v0 = vpop.f32.mrb[68].mxu1  ;;  %v1153_v4 = vpop.f32.mrb[54].mxu0  ;;  %4894 = vmatpush1.bf16.msra.mxu0 %v8923_v25  ;;  %v10342_v47 = vmul.u32.u64.low 3817748708, %v10315_v12  ;;  %v10343_v14 = vmul.u32.u64.high 3817748708, %v10315_v12, %v10342_v47  ;;  %v10355_v18 = vadd.s32 8, %v10288_v8  ;;  %v14454_v16 = vld [vmem:[#allocation3_spill] sm:$0xff] }
 0x18c   : > { %v10294_v3 = vadd.f32 %v1608_v0, %v10154_v10  ;;  %v1610_v31 = vpop.f32.mrb[69].mxu1  ;;  %v1155_v13 = vpop.f32.mrb[55].mxu0  ;;  %v10297_v15 = vadd.f32 %v9981_v57, %v1153_v4  ;;  %v8924_v10 = vld [vmem:[%s14215_s3 + $0x160] sm:$0xff]   ;;  %4895 = vmatprep.subr.bf16.mxu0 %v10163_v54  ;;  %v10359_v0 = vadd.s32 48, %v10288_v8  ;;  %v8929_v4 = vld [vmem:[%s14215_s3 + $0x130] sm:$0xff]  }
 0x18d   : > { %v1611_v27 = vpop.f32.mrb[70].mxu1  ;;  %8559 = vmatprep.subr.bf16.mxu1 %v8924_v10 }
 0x18e   : > { %v10308_v60 = vadd.f32 %v1611_v27, %v10158_v30  ;;  %v1613_v57 = vpop.f32.mrb[71].mxu1  ;;  %8560 = vmatpush3.bf16.msra.mxu1 %v8924_v10  ;;  %v8926_v30 = vld [vmem:[%s14215_s3 + $0x168] sm:$0xff]   ;;  %v3004_v27 = vshrl.u32 %v10328_v23, 4  ;;  %v2982_v10 = vshrl.u32 %v10332_v55, 4  ;;  %v10383_v23 = vadd.s32 32, %v10288_v8 }
 0x18f   : > { %4896 = vmatpush1.bf16.msra.mxu0 %v8925_v42  ;;  %8561 = vmatprep.subr.bf16.mxu1 %v8926_v30  ;;  %v10388_v50 = vmul.u32.u64.low 3817748708, %v10359_v0  ;;  %v10389_v55 = vmul.u32.u64.high 3817748708, %v10359_v0, %v10388_v50 }
 0x190   : > { %2718 = vmatmul.mubr.bf16.gmra.mrb[176].mxu1 %v2346_v40  ;;  %4897 = vmatprep.subr.bf16.mxu0 %v10163_v54  ;;  %v2983_v47 = vmul.u32 18, %v2982_v10  ;;  %v14460_v50 = vld [vmem:[#allocation7_spill] sm:$0xff] }
 0x191   : > { %v1158_v49 = vpop.f32.mrb[56].mxu0 }
 0x192   : > { %v1160_v45 = vpop.f32.mrb[57].mxu0  ;;  %v10324_v19 = vadd.f32 %v10008_v63, %v1158_v49  ;;  %8562 = vmatpush3.bf16.msra.mxu1 %v8926_v30  ;;  %v10373_v57 = vmul.u32.u64.low 3817748708, %v10355_v18  ;;  %v10374_v49 = vmul.u32.u64.high 3817748708, %v10355_v18, %v10373_v57  ;;  %v10418_v10 = vsub.s32 %v10288_v8, %v2983_v47 }
 0x193   : > { %v1616_v32 = vpop.f32.mrb[72].mxu1  ;;  %v1161_v21 = vpop.f32.mrb[58].mxu0  ;;  %4898 = vmatpush1.bf16.msra.mxu0 %v8927_v61  ;;  %v10399_v61 = vadd.s32 56, %v10288_v8 }
 0x194   : > { %v10335_v38 = vadd.f32 %v1616_v32, %v10183_v43  ;;  %v1618_v9 = vpop.f32.mrb[73].mxu1  ;;  %v1163_v20 = vpop.f32.mrb[59].mxu0  ;;  %v10338_v63 = vadd.f32 %v10022_v58, %v1161_v21  ;;  %v8928_v43 = vld [vmem:[%s14215_s3 + $0x170] sm:$0xff]   ;;  %4899 = vmatprep.subr.bf16.mxu0 %v10163_v54  ;;  %v3015_v21 = vshrl.u32 %v10343_v14, 4  ;;  %14458 = vst [vmem:[#allocation10_spill] sm:$0xff] %v10418_v10  ;;  %v2993_v57 = vshrl.u32 %v10374_v49, 4 }
 0x195   : > { %v1619_v52 = vpop.f32.mrb[74].mxu1  ;;  %8563 = vmatprep.subr.bf16.mxu1 %v8928_v43  ;;  %v3048_v49 = vshrl.u32 %v10389_v55, 4  ;;  %vm3372_vm5 = vcmp.ne.s32.totalorder %v10418_v10, 0  ;;  %vm3408_vm6 = vcmp.lt.s32.totalorder %v10418_v10, 0 }
 0x196   : > { %v10352_v35 = vadd.f32 %v1619_v52, %v10186_v11  ;;  %v1621_v58 = vpop.f32.mrb[75].mxu1  ;;  %8564 = vmatpush3.bf16.msra.mxu1 %v8928_v43  ;;  %v8930_v11 = vld [vmem:[%s14215_s3 + $0x178] sm:$0xff]   ;;  %v3005_v52 = vmul.u32 18, %v3004_v27  ;;  %v10402_v14 = vmul.u32.u64.low 3817748708, %v10383_v23  ;;  %v10403_v43 = vmul.u32.u64.high 3817748708, %v10383_v23, %v10402_v14  ;;  %vm10473_vm10 = vmand %vm3408_vm6, %vm3372_vm5 }
 0x197   : > { %4900 = vmatpush1.bf16.msra.mxu0 %v8929_v4  ;;  %8565 = vmatprep.subr.bf16.mxu1 %v8930_v11  ;;  %v10406_v58 = vadd.s32 40, %v10288_v8  ;;  %v3016_v4 = vmul.u32 18, %v3015_v21 }
 0x198   : > { %4901 = vmatprep.subr.bf16.mxu0 %v10163_v54  ;;  %v10415_v27 = vsub.s32 %v10311_v53, %v3005_v52 }
 0x199   : > { %v1166_v41 = vpop.f32.mrb[60].mxu0  ;;  %v10436_v47 = vsub.s32 %v10315_v12, %v3016_v4  ;;  %v2994_v12 = vmul.u32 18, %v2993_v57  ;;  %v3026_v4 = vshrl.u32 %v10403_v43, 4  ;;  %v14467_v43 = vmov 0 }
 0x19a   : > { %v1168_v31 = vpop.f32.mrb[61].mxu0  ;;  %v10368_v13 = vadd.f32 %v10003_v7, %v1166_v41  ;;  %8566 = vmatpush3.bf16.msra.mxu1 %v8930_v11  ;;  %vm3374_vm3 = vcmp.ne.s32.totalorder %v10415_v27, 0  ;;  %vm3410_vm4 = vcmp.lt.s32.totalorder %v10415_v27, 0  ;;  %v10454_v55 = vadd.s32 18, %v10415_v27 }
 0x19b   : > { %v1624_v40 = vpop.f32.mrb[76].mxu1  ;;  %v1169_v25 = vpop.f32.mrb[62].mxu0  ;;  %5694 = vmatprep.subr.bf16.mxu1 %v10163_v54  ;;  %v14456_v31 = vld [vmem:[#allocation5_spill] sm:$0xff]  ;;  %14461 = vst [vmem:[#allocation7_spill] sm:$0xff] %v10436_v47  ;;  %vm10457_vm7 = vmand %vm3410_vm4, %vm3374_vm3  ;;  %vm3375_vm8 = vcmp.ne.s32.totalorder %v10436_v47, 0  ;;  %vm3411_vm9 = vcmp.lt.s32.totalorder %v10436_v47, 0 }
 0x19c   : > { %v10377_v42 = vadd.f32 %v1624_v40, %v10209_v59  ;;  %v1626_v30 = vpop.f32.mrb[77].mxu1  ;;  %v1171_v45 = vpop.f32.mrb[63].mxu0  ;;  %v10380_v7 = vadd.f32 %v14454_v16, %v1169_v25  ;;  %v8931_v59 = vld [vmem:[%s14215_s3 + $0x138] sm:$0xff]   ;;  %14457 = vst [vmem:[#allocation5_spill] sm:$0xff] %v10415_v27  ;;  %v14468_v43 = vsel %vm10473_vm10, 4294967295, %v14467_v43  ;;  %vm10501_vm11 = vmand %vm3411_vm9, %vm3375_vm8 }
 0x19d   : > { %v1627_v32 = vpop.f32.mrb[78].mxu1  ;;  %4902 = vmatpush1.bf16.msra.mxu0 %v8931_v59  ;;  %v10422_v30 = vmul.u32.u64.low 3817748708, %v10399_v61  ;;  %v10423_v45 = vmul.u32.u64.high 3817748708, %v10399_v61, %v10422_v30 }
 0x19e   : > { %14453 = vst [vmem:[#allocation9_spill] sm:$0xff] %v10377_v42  ;;  %v10395_v9 = vadd.f32 %v1627_v32, %v10215_v48  ;;  %v1629_v20 = vpop.f32.mrb[79].mxu1  ;;  %v10409_v48 = vadd.s32 80, %v10288_v8  ;;  %v3049_v30 = vmul.u32 18, %v3048_v49 }
 0x19f   : > { %v10432_v53 = vmul.u32.u64.low 3817748708, %v10406_v58  ;;  %v10433_v20 = vmul.u32.u64.high 3817748708, %v10406_v58, %v10432_v53 }
 0x1a0   : > { %14455 = vst [vmem:[#allocation3_spill] sm:$0xff] %v10395_v9  ;;  %v14472_v9 = vld [vmem:[#allocation6_spill] sm:$0xff] }
 0x1a1   : > { %v1174_v41 = vpop.f32.mrb[64].mxu0 }
 0x1a2   : > { %v1176_v11 = vpop.f32.mrb[65].mxu0  ;;  %v10412_v54 = vadd.f32 %v14456_v31, %v1174_v41  ;;  %v10440_v14 = vmul.u32.u64.low 3817748708, %v10409_v48  ;;  %v10441_v41 = vmul.u32.u64.high 3817748708, %v10409_v48, %v10440_v14  ;;  %v10449_v31 = vadd.s32 64, %v10288_v8 }
 0x1a3   : > { %v1632_v40 = vpop.f32.mrb[80].mxu1  ;;  %v1177_v25 = vpop.f32.mrb[66].mxu0 }
 0x1a4   : > { %v10426_v16 = vadd.f32 %v1632_v40, %v10237_v39  ;;  %v1634_v32 = vpop.f32.mrb[81].mxu1  ;;  %v1179_v21 = vpop.f32.mrb[67].mxu0  ;;  %v10429_v59 = vadd.f32 %v14460_v50, %v1177_v25  ;;  %v10462_v25 = vadd.s32 18, %v10418_v10 }
 0x1a5   : > { %v1635_v52 = vpop.f32.mrb[82].mxu1  ;;  %v14466_v32 = vld [vmem:[#allocation4_spill] sm:$0xff]  ;;  %v10478_v50 = vmul.u32.u64.low 3817748708, %v10449_v31  ;;  %v10479_v53 = vmul.u32.u64.high 3817748708, %v10449_v31, %v10478_v50 }
 0x1a6   : > { %14459 = vst [vmem:[#allocation11_spill] sm:$0xff] %v10426_v16  ;;  %v10444_v39 = vadd.f32 %v1635_v52, %v10240_v51  ;;  %v1637_v11 = vpop.f32.mrb[83].mxu1  ;;  %14465 = vst [vmem:[#allocation13_spill] sm:$0xff] %v10462_v25  ;;  %v10482_v52 = vadd.s32 88, %v10288_v8  ;;  %v14473_v16 = vmov 0 }
 0x1a7   : > { %14469 = vst [vmem:[#allocation4_spill] sm:$0xff] %v14468_v43  ;;  %v10485_v11 = vadd.s32 18, %v10436_v47  ;;  %v14474_v16 = vsel %vm10501_vm11, 4294967295, %v14473_v16 }
 0x1a8   : > { %14462 = vst [vmem:[#allocation12_spill] sm:$0xff] %v10444_v39  ;;  %14475 = vst [vmem:[#allocation6_spill] sm:$0xff] %v14474_v16 }
 0x1a9   : > { %v1182_v51 = vpop.f32.mrb[68].mxu0  ;;  %14470 = vst [vmem:[#allocation14_spill] sm:$0xff] %v10485_v11  ;;  %v3070_v11 = vshrl.u32 %v10479_v53, 4 }
 0x1aa   : > { %v10467_v57 = vadd.f32 %v14466_v32, %v1182_v51  ;;  %v1184_v21 = vpop.f32.mrb[69].mxu0  ;;  %v10488_v51 = vsub.s32 %v10355_v18, %v2994_v12  ;;  %v3059_v32 = vshrl.u32 %v10423_v45, 4  ;;  %v3027_v18 = vmul.u32 18, %v3026_v4 }
 0x1ab   : > { %v1640_v49 = vpop.f32.mrb[84].mxu1  ;;  %v1185_v14 = vpop.f32.mrb[70].mxu0  ;;  %v3037_v12 = vshrl.u32 %v10433_v20, 4 }
 0x1ac   : > { %14471 = vst [vmem:[#allocation15_spill] sm:$0xff] %v10488_v51  ;;  %v10492_v21 = vadd.f32 %v1640_v49, %v10260_v6  ;;  %v10495_v39 = vadd.f32 %v14472_v9, %v1185_v14  ;;  %v1642_v50 = vpop.f32.mrb[85].mxu1  ;;  %v1187_v42 = vpop.f32.mrb[71].mxu0  ;;  %v10515_v9 = vsub.s32 %v10359_v0, %v3049_v30  ;;  %v3092_v49 = vshrl.u32 %v10441_v41, 4 }
 0x1ad   : > { %v1643_v45 = vpop.f32.mrb[86].mxu1  ;;  %v10522_v14 = vmul.u32.u64.low 3817748708, %v10482_v52  ;;  %v10523_v50 = vmul.u32.u64.high 3817748708, %v10482_v52, %v10522_v14  ;;  %v10526_v6 = vadd.s32 72, %v10288_v8  ;;  %vm3373_vm12 = vcmp.ne.s32.totalorder %v10488_v51, 0 }
 0x1ae   : > { %v10519_v4 = vadd.f32 %v1643_v45, %v10263_v22  ;;  %v1645_v20 = vpop.f32.mrb[87].mxu1  ;;  %v3060_v0 = vmul.u32 18, %v3059_v32  ;;  %v10534_v41 = vadd.s32 112, %v10288_v8  ;;  %vm3409_vm13 = vcmp.lt.s32.totalorder %v10488_v51, 0 }
 0x1af   : > { %v10538_v22 = vadd.s32 18, %v10488_v51  ;;  %v10541_v30 = vsub.s32 %v10383_v23, %v3027_v18  ;;  %v3038_v45 = vmul.u32 18, %v3037_v12  ;;  %vm3378_vm14 = vcmp.ne.s32.totalorder %v10515_v9, 0  ;;  %vm10576_vm2 = vmand %vm3409_vm13, %vm3373_vm12 }
 0x1b0   : > { %vm3414_vm15 = vcmp.lt.s32.totalorder %v10515_v9, 0  ;;  %v3093_v14 = vmul.u32 18, %v3092_v49  ;;  %v10546_v32 = vadd.s32 96, %v10288_v8  ;;  %v10560_v49 = vsub.s32 %v10399_v61, %v3060_v0 }
 0x1b1   : > { %14476 = vst [vmem:[#allocation16_spill] sm:$0xff] %v10538_v22  ;;  %14477 = vst [vmem:[#allocation17_spill] sm:$0xff] %v10541_v30  ;;  %v8465_v20 = vpop.f32.mrb[72].mxu0  ;;  %v10553_v16 = vmul.u32.u64.low 3817748708, %v10526_v6  ;;  %v10554_v23 = vmul.u32.u64.high 3817748708, %v10526_v6, %v10553_v16  ;;  %vm3376_vm3 = vcmp.ne.s32.totalorder %v10541_v30, 0  ;;  %v10582_v61 = vsub.s32 %v10406_v58, %v3038_v45 }
 0x1b2   : > { %v10549_v42 = vadd.f32 %v8465_v20, %v10109_v62  ;;  %v1721_v47 = vpop.f32.mrb[73].mxu0  ;;  %14480 = vst [vmem:[#allocation20_spill] sm:$0xff] %v10560_v49  ;;  %v10563_v25 = vmul.u32.u64.low 3817748708, %v10534_v41  ;;  %v10564_v43 = vmul.u32.u64.high 3817748708, %v10534_v41, %v10563_v25  ;;  %vm3412_vm4 = vcmp.lt.s32.totalorder %v10541_v30, 0  ;;  %vm10615_vm8 = vmand %vm3414_vm15, %vm3378_vm14 }
 0x1b3   : > { %v1648_v18 = vpop.f32.mrb[88].mxu1  ;;  %v10557_v12 = vadd.f32 %v1721_v47, %v10082_v33  ;;  %v8466_v10 = vpop.f32.mrb[74].mxu0  ;;  %v14482_v33 = vmov 0  ;;  %14485 = vst [vmem:[#allocation23_spill] sm:$0xff] %v10582_v61  ;;  %v10591_v25 = vsub.s32 %v10409_v48, %v3093_v14  ;;  %v3071_v45 = vmul.u32 18, %v3070_v11  ;;  %vm10631_vm13 = vmand %vm3412_vm4, %vm3376_vm3 }
 0x1b4   : > { %14478 = vst [vmem:[#allocation18_spill] sm:$0xff] %v10549_v42  ;;  %v10567_v62 = vadd.f32 %v1648_v18, %v10286_v29  ;;  %v1650_v53 = vpop.f32.mrb[89].mxu1  ;;  %v10570_v20 = vadd.f32 %v8466_v10, %v10115_v2  ;;  %v1724_v16 = vpop.f32.mrb[75].mxu0  ;;  %v14483_v33 = vsel %vm10576_vm2, 4294967295, %v14482_v33  ;;  %v8932_v29 = vld [vmem:[%s14215_s3 + $0x80] sm:$0xff]   ;;  %v14486_v10 = vld [vmem:[#allocation8_spill] sm:$0xff] }
 0x1b5   : > { %14479 = vst [vmem:[#allocation19_spill] sm:$0xff] %v10557_v12  ;;  %14484 = vst [vmem:[#allocation22_spill] sm:$0xff] %v14483_v33  ;;  %v1651_v2 = vpop.f32.mrb[90].mxu1  ;;  %v10588_v47 = vadd.f32 %v1724_v16, %v14486_v10  ;;  %v10594_v0 = vmul.u32.u64.low 3817748708, %v10546_v32  ;;  %v10595_v18 = vmul.u32.u64.high 3817748708, %v10546_v32, %v10594_v0  ;;  %8603 = vmatprep.subr.bf16.mxu0 %v8932_v29  ;;  %v10607_v14 = vadd.s32 18, %v10515_v9 }
 0x1b6   : > { %14481 = vst [vmem:[#allocation21_spill] sm:$0xff] %v10570_v20  ;;  %14488 = vst [vmem:[#allocation24_spill] sm:$0xff] %v10591_v25  ;;  %v10598_v53 = vadd.f32 %v1651_v2, %v10297_v15  ;;  %v1653_v58 = vpop.f32.mrb[91].mxu1  ;;  %v3103_v20 = vshrl.u32 %v10523_v50, 4  ;;  %vm3379_vm5 = vcmp.ne.s32.totalorder %v10560_v49, 0  ;;  %vm3415_vm6 = vcmp.lt.s32.totalorder %v10560_v49, 0 }
 0x1b7   : > { %14487 = vst [vmem:[#allocation8_spill] sm:$0xff] %v10588_v47  ;;  %v10620_v11 = vadd.s32 18, %v10541_v30  ;;  %vm3377_vm9 = vcmp.ne.s32.totalorder %v10582_v61, 0  ;;  %vm3413_vm12 = vcmp.lt.s32.totalorder %v10582_v61, 0  ;;  %v10625_v50 = vadd.s32 120, %v10288_v8  ;;  %vm10650_vm3 = vmand %vm3415_vm6, %vm3379_vm5 }
 0x1b8   : > { %v10636_v2 = vadd.s32 18, %v10560_v49  ;;  %v10639_v10 = vadd.s32 18, %v10582_v61  ;;  %vm3382_vm14 = vcmp.ne.s32.totalorder %v10591_v25, 0  ;;  %vm3418_vm15 = vcmp.lt.s32.totalorder %v10591_v25, 0  ;;  %vm10667_vm4 = vmand %vm3413_vm12, %vm3377_vm9 }
 0x1b9   : > { %v8469_v16 = vpop.f32.mrb[76].mxu0  ;;  %v14496_v48 = vmov 0  ;;  %v10655_v47 = vadd.s32 18, %v10591_v25  ;;  %v10658_v12 = vsub.s32 %v10449_v31, %v3071_v45  ;;  %v3104_v42 = vmul.u32 18, %v3103_v20  ;;  %vm10686_vm5 = vmand %vm3418_vm15, %vm3382_vm14 }
 0x1ba   : > { %14493 = vst [vmem:[#allocation25_spill] sm:$0xff] %v10636_v2  ;;  %14494 = vst [vmem:[#allocation26_spill] sm:$0xff] %v10639_v10  ;;  %v10644_v0 = vadd.f32 %v8469_v16, %v10161_v24  ;;  %v1737_v58 = vpop.f32.mrb[77].mxu0  ;;  %v14497_v48 = vsel %vm10650_vm3, 4294967295, %v14496_v48  ;;  %v3081_v22 = vshrl.u32 %v10554_v23, 4  ;;  %v3136_v33 = vshrl.u32 %v10564_v43, 4 }
 0x1bb   : > { %14498 = vst [vmem:[#allocation28_spill] sm:$0xff] %v14497_v48  ;;  %14499 = vst [vmem:[#allocation29_spill] sm:$0xff] %v10655_v47  ;;  %v1656_v51 = vpop.f32.mrb[92].mxu1  ;;  %v10661_v24 = vadd.f32 %v1737_v58, %v10133_v37  ;;  %v8470_v16 = vpop.f32.mrb[78].mxu0  ;;  %v10674_v31 = vadd.s32 104, %v10288_v8  ;;  %vm3380_vm6 = vcmp.ne.s32.totalorder %v10658_v12, 0 }
 0x1bc   : > { %14495 = vst [vmem:[#allocation27_spill] sm:$0xff] %v10644_v0  ;;  %v14501_v0 = vmov 0  ;;  %v10677_v20 = vadd.f32 %v1656_v51, %v10324_v19  ;;  %v1658_v37 = vpop.f32.mrb[93].mxu1  ;;  %v10680_v45 = vadd.f32 %v8470_v16, %v10172_v1  ;;  %v1740_v58 = vpop.f32.mrb[79].mxu0  ;;  %v3114_v51 = vshrl.u32 %v10595_v18, 4 }
 0x1bd   : > { %14500 = vst [vmem:[#allocation30_spill] sm:$0xff] %v10661_v24  ;;  %v14502_v0 = vsel %vm10667_vm4, 4294967295, %v14501_v0  ;;  %v14505_v24 = vmov 0  ;;  %v10691_v43 = vmul.u32.u64.low 3817748708, %v10625_v50  ;;  %v10692_v23 = vmul.u32.u64.high 3817748708, %v10625_v50, %v10691_v43  ;;  %v1659_v27 = vpop.f32.mrb[94].mxu1 }
 0x1be   : > { %14503 = vst [vmem:[#allocation31_spill] sm:$0xff] %v14502_v0  ;;  %14504 = vst [vmem:[#allocation32_spill] sm:$0xff] %v10680_v45  ;;  %v14506_v24 = vsel %vm10686_vm5, 4294967295, %v14505_v24  ;;  %v10695_v19 = vadd.f32 %v1740_v58, %v10141_v36  ;;  %v10703_v16 = vadd.s32 128, %v10288_v8  ;;  %v10706_v37 = vadd.f32 %v1659_v27, %v10338_v63  ;;  %v1661_v45 = vpop.f32.mrb[95].mxu1 }
 0x1bf   : > { %14507 = vst [vmem:[#allocation33_spill] sm:$0xff] %v14506_v24  ;;  %v10717_v43 = vsub.s32 %v10482_v52, %v3104_v42  ;;  %v3082_v18 = vmul.u32 18, %v3081_v22  ;;  %vm3416_vm9 = vcmp.lt.s32.totalorder %v10658_v12, 0  ;;  %v3137_v45 = vmul.u32 18, %v3136_v33 }
 0x1c0   : > { %14508 = vst [vmem:[#allocation34_spill] sm:$0xff] %v10695_v19  ;;  %v10730_v58 = vmul.u32.u64.low 3817748708, %v10674_v31  ;;  %v10731_v52 = vmul.u32.u64.high 3817748708, %v10674_v31, %v10730_v58  ;;  %v3115_v36 = vmul.u32 18, %v3114_v51  ;;  %v10738_v19 = vadd.s32 136, %v10288_v8  ;;  %vm10805_vm12 = vmand %vm3416_vm9, %vm3380_vm6 }
 0x1c1   : > { %14509 = vst [vmem:[#allocation35_spill] sm:$0xff] %v10717_v43  ;;  %v8473_v42 = vpop.f32.mrb[80].mxu0  ;;  %v10734_v1 = vmul.u32.u64.low 3817748708, %v10703_v16  ;;  %v10735_v63 = vmul.u32.u64.high 3817748708, %v10703_v16, %v10734_v1  ;;  %v10744_v25 = vadd.s32 18, %v10658_v12  ;;  %v10748_v33 = vadd.s32 144, %v10288_v8 }
 0x1c2   : > { %v10741_v27 = vadd.f32 %v8473_v42, %v10218_v56  ;;  %v1753_v22 = vpop.f32.mrb[81].mxu0  ;;  %v10755_v47 = vsub.s32 %v10526_v6, %v3082_v18  ;;  %v10758_v56 = vadd.s32 152, %v10288_v8  ;;  %v10774_v18 = vsub.s32 %v10546_v32, %v3115_v36  ;;  %v14692_v29 = vld [vmem:[#allocation28_spill] sm:$0xff] }
 0x1c3   : > { %v1664_v51 = vpop.f32.mrb[96].mxu1  ;;  %v10751_v58 = vadd.f32 %v1753_v22, %v10189_v44  ;;  %v8474_v1 = vpop.f32.mrb[82].mxu0  ;;  %v10767_v44 = vsub.s32 %v10534_v41, %v3137_v45  ;;  %v3147_v22 = vshrl.u32 %v10692_v23, 4  ;;  %v10788_v23 = vadd.s32 160, %v10288_v8 }
 0x1c4   : > { %14510 = vst [vmem:[#allocation36_spill] sm:$0xff] %v10741_v27  ;;  %14512 = vst [vmem:[#allocation38_spill] sm:$0xff] %v10755_v47  ;;  %v10761_v42 = vadd.f32 %v1664_v51, %v10368_v13  ;;  %v1666_v27 = vpop.f32.mrb[97].mxu1  ;;  %v10764_v24 = vadd.f32 %v8474_v1, %v10227_v17  ;;  %v1756_v61 = vpop.f32.mrb[83].mxu0  ;;  %v10777_v13 = vmul.u32.u64.low 3817748708, %v10738_v19  ;;  %v10778_v51 = vmul.u32.u64.high 3817748708, %v10738_v19, %v10777_v13 }
 0x1c5   : > { %14511 = vst [vmem:[#allocation37_spill] sm:$0xff] %v10751_v58  ;;  %14514 = vst [vmem:[#allocation40_spill] sm:$0xff] %v10767_v44  ;;  %v1667_v58 = vpop.f32.mrb[98].mxu1  ;;  %v10771_v6 = vadd.f32 %v1756_v61, %v10198_v26  ;;  %v10784_v41 = vmul.u32.u64.low 3817748708, %v10748_v33  ;;  %v10785_v45 = vmul.u32.u64.high 3817748708, %v10748_v33, %v10784_v41  ;;  %v10791_v26 = vadd.s32 18, %v10717_v43 }
 0x1c6   : > { %14513 = vst [vmem:[#allocation39_spill] sm:$0xff] %v10764_v24  ;;  %14516 = vst [vmem:[#allocation42_spill] sm:$0xff] %v10774_v18  ;;  %v10781_v17 = vadd.f32 %v1667_v58, %v10380_v7  ;;  %v1669_v27 = vpop.f32.mrb[99].mxu1  ;;  %vm3381_vm15 = vcmp.ne.s32.totalorder %v10755_v47, 0  ;;  %v10796_v32 = vadd.s32 18, %v10755_v47  ;;  %v3148_v7 = vmul.u32 18, %v3147_v22 }
 0x1c7   : > { %14515 = vst [vmem:[#allocation41_spill] sm:$0xff] %v10771_v6  ;;  %v3125_v61 = vshrl.u32 %v10731_v52, 4  ;;  %v14518_v58 = vmov 0  ;;  %v3158_v1 = vshrl.u32 %v10735_v63, 4  ;;  %vm14521_vm14 = vcmp.ne.s32.totalorder %v10717_v43, 0  ;;  %v14699_v15 = vld [vmem:[#allocation31_spill] sm:$0xff] }
 0x1c8   : > { %14517 = vst [vmem:[#allocation43_spill] sm:$0xff] %v10796_v32  ;;  %v14519_v58 = vsel %vm10805_vm12, 4294967295, %v14518_v58  ;;  %v10812_v13 = vmul.u32.u64.low 3817748708, %v10758_v56  ;;  %v10813_v27 = vmul.u32.u64.high 3817748708, %v10758_v56, %v10812_v13  ;;  %vm14522_vm0 = vcmp.lt.s32.totalorder %v10717_v43, 0 }
 0x1c9   : > { %v8477_v36 = vpop.f32.mrb[84].mxu0  ;;  %vm10822_vm6 = vmand %vm14522_vm0, %vm14521_vm14  ;;  %v14523_v41 = vmov 0  ;;  %vm3420_vm9 = vcmp.lt.s32.totalorder %v10774_v18, 0  ;;  %v10828_v63 = vmul.u32.u64.low 3817748708, %v10788_v23  ;;  %v10829_v6 = vmul.u32.u64.high 3817748708, %v10788_v23, %v10828_v63 }
 0x1ca   : > { %v10816_v22 = vadd.f32 %v8477_v36, %v10266_v46  ;;  %v1769_v52 = vpop.f32.mrb[85].mxu0  ;;  %v14524_v41 = vsel %vm10822_vm6, 4294967295, %v14523_v41  ;;  %vm14526_vm1 = vcmp.lt.s32.totalorder %v10755_v47, 0  ;;  %v14527_v36 = vmov 0 }
 0x1cb   : > { %v1672_v24 = vpop.f32.mrb[100].mxu1  ;;  %v10832_v13 = vadd.f32 %v1769_v52, %v10243_v5  ;;  %v8478_v46 = vpop.f32.mrb[86].mxu0  ;;  %vm10838_vm5 = vmand %vm14526_vm1, %vm3381_vm15  ;;  %v10846_v10 = vadd.s32 18, %v10774_v18  ;;  %v10849_v63 = vadd.s32 168, %v10288_v8  ;;  %vm14533_vm0 = vcmp.ne.s32.totalorder %v10767_v44, 0 }
 0x1cc   : > { %14520 = vst [vmem:[#allocation44_spill] sm:$0xff] %v10816_v22  ;;  %v14528_v36 = vsel %vm10838_vm5, 4294967295, %v14527_v36  ;;  %v10843_v22 = vadd.s32 18, %v10767_v44  ;;  %v10852_v5 = vadd.f32 %v1672_v24, %v10412_v54  ;;  %v1674_v52 = vpop.f32.mrb[101].mxu1  ;;  %v1772_v0 = vpop.f32.mrb[87].mxu0  ;;  %vm14534_vm1 = vcmp.lt.s32.totalorder %v10767_v44, 0 }
 0x1cd   : > { %14525 = vst [vmem:[#allocation45_spill] sm:$0xff] %v10832_v13  ;;  %14529 = vst [vmem:[#allocation46_spill] sm:$0xff] %v14528_v36  ;;  %v10855_v13 = vadd.f32 %v8478_v46, %v10279_v34  ;;  %v14535_v49 = vmov 0  ;;  %v10866_v2 = vsub.s32 %v10625_v50, %v3148_v7  ;;  %v3126_v48 = vmul.u32 18, %v3125_v61  ;;  %v1675_v30 = vpop.f32.mrb[102].mxu1 }
 0x1ce   : > { %14530 = vst [vmem:[#allocation47_spill] sm:$0xff] %v10843_v22  ;;  %14531 = vst [vmem:[#allocation48_spill] sm:$0xff] %v10846_v10  ;;  %v10869_v54 = vadd.f32 %v1772_v0, %v10252_v28  ;;  %vm14540_vm15 = vcmp.ne.s32.totalorder %v10774_v18, 0  ;;  %v14541_v50 = vmov 0  ;;  %v3169_v28 = vshrl.u32 %v10778_v51, 4  ;;  %v1677_v7 = vpop.f32.mrb[103].mxu1 }
 0x1cf   : > { %14532 = vst [vmem:[#allocation49_spill] sm:$0xff] %v10855_v13  ;;  %vm10861_vm14 = vmand %vm14534_vm1, %vm14533_vm0  ;;  %v10889_v0 = vadd.f32 %v1675_v30, %v10429_v59  ;;  %v3159_v46 = vmul.u32 18, %v3158_v1  ;;  %v3180_v52 = vshrl.u32 %v10785_v45, 4  ;;  %v10905_v59 = vadd.s32 176, %v10288_v8 }
 0x1d0   : > { %v14536_v49 = vsel %vm10861_vm14, 4294967295, %v14535_v49  ;;  %14538 = vst [vmem:[#allocation51_spill] sm:$0xff] %v10866_v2  ;;  %14539 = vst [vmem:[#allocation52_spill] sm:$0xff] %v10869_v54  ;;  %v10901_v34 = vmul.u32.u64.low 3817748708, %v10849_v63  ;;  %v10902_v51 = vmul.u32.u64.high 3817748708, %v10849_v63, %v10901_v34  ;;  %v10913_v45 = vsub.s32 %v10674_v31, %v3126_v48 }
 0x1d1   : > { %14537 = vst [vmem:[#allocation50_spill] sm:$0xff] %v14536_v49  ;;  %vm10883_vm0 = vmand %vm3420_vm9, %vm14540_vm15  ;;  %v10916_v1 = vadd.s32 184, %v10288_v8  ;;  %v8481_v7 = vpop.f32.mrb[88].mxu0  ;;  %v10920_v34 = vadd.s32 18, %v10866_v2  ;;  %v3170_v24 = vmul.u32 18, %v3169_v28  ;;  %v3191_v61 = vshrl.u32 %v10813_v27, 4 }
 0x1d2   : > { %v14542_v50 = vsel %vm10883_vm0, 4294967295, %v14541_v50  ;;  %14544 = vst [vmem:[#allocation54_spill] sm:$0xff] %v10913_v45  ;;  %v10924_v13 = vadd.f32 %v8481_v7, %v10335_v38  ;;  %v1785_v30 = vpop.f32.mrb[89].mxu0  ;;  %v10927_v54 = vsub.s32 %v10703_v16, %v3159_v46  ;;  %v3181_v48 = vmul.u32 18, %v3180_v52 }
 0x1d3   : > { %14543 = vst [vmem:[#allocation53_spill] sm:$0xff] %v14542_v50  ;;  %14545 = vst [vmem:[#allocation55_spill] sm:$0xff] %v10920_v34  ;;  %v3202_v31 = vshrl.u32 %v10829_v6, 4  ;;  %v1680_v44 = vpop.f32.mrb[104].mxu1  ;;  %v10931_v22 = vadd.f32 %v1785_v30, %v10294_v3  ;;  %v8482_v49 = vpop.f32.mrb[90].mxu0  ;;  %v10938_v27 = vadd.s32 192, %v10288_v8 }
 0x1d4   : > { %14546 = vst [vmem:[#allocation56_spill] sm:$0xff] %v10924_v13  ;;  %v10934_v18 = vmul.u32.u64.low 3817748708, %v10905_v59  ;;  %v10935_v28 = vmul.u32.u64.high 3817748708, %v10905_v59, %v10934_v18  ;;  %v10941_v38 = vadd.f32 %v1680_v44, %v10467_v57  ;;  %v1682_v16 = vpop.f32.mrb[105].mxu1  ;;  %v10944_v46 = vadd.f32 %v8482_v49, %v10352_v35  ;;  %v1788_v6 = vpop.f32.mrb[91].mxu0 }
 0x1d5   : > { %14547 = vst [vmem:[#allocation57_spill] sm:$0xff] %v10931_v22  ;;  %v10947_v52 = vmul.u32.u64.low 3817748708, %v10916_v1  ;;  %v10948_v3 = vmul.u32.u64.high 3817748708, %v10916_v1, %v10947_v52  ;;  %v1683_v30 = vpop.f32.mrb[106].mxu1  ;;  %v10951_v7 = vadd.f32 %v1788_v6, %v10308_v60  ;;  %v10955_v18 = vsub.s32 %v10738_v19, %v3170_v24 }
 0x1d6   : > { %14548 = vst [vmem:[#allocation58_spill] sm:$0xff] %v10944_v46  ;;  %v3192_v57 = vmul.u32 18, %v3191_v61  ;;  %v10958_v44 = vadd.f32 %v1683_v30, %v10495_v39  ;;  %v1685_v35 = vpop.f32.mrb[107].mxu1  ;;  %v10962_v49 = vadd.s32 18, %v10913_v45  ;;  %v10965_v16 = vsub.s32 %v10748_v33, %v3181_v48  ;;  %v14554_v48 = vld [vmem:[#allocation11_spill] sm:$0xff] }
 0x1d7   : > { %14549 = vst [vmem:[#allocation59_spill] sm:$0xff] %v10951_v7  ;;  %14550 = vst [vmem:[#allocation60_spill] sm:$0xff] %v10955_v18  ;;  %v3203_v60 = vmul.u32 18, %v3202_v31  ;;  %v3213_v6 = vshrl.u32 %v10902_v51, 4  ;;  %v10969_v52 = vmul.u32.u64.low 3817748708, %v10938_v27  ;;  %v10970_v19 = vmul.u32.u64.high 3817748708, %v10938_v27, %v10969_v52 }
 0x1d8   : > { %14551 = vst [vmem:[#allocation61_spill] sm:$0xff] %v10965_v16  ;;  %v10975_v39 = vadd.s32 18, %v10927_v54  ;;  %v10978_v24 = vadd.s32 200, %v10288_v8  ;;  %v10983_v33 = vadd.s32 18, %v10955_v18  ;;  %v10986_v51 = vsub.s32 %v10758_v56, %v3192_v57  ;;  %v14556_v52 = vld [vmem:[#allocation9_spill] sm:$0xff] }
 0x1d9   : > { %v8485_v61 = vpop.f32.mrb[92].mxu0  ;;  %v10994_v35 = vadd.s32 208, %v10288_v8  ;;  %vm14558_vm14 = vcmp.ne.s32.totalorder %v10866_v2, 0  ;;  %vm14559_vm1 = vcmp.lt.s32.totalorder %v10866_v2, 0  ;;  %v14560_v56 = vmov 0 }
 0x1da   : > { %14552 = vst [vmem:[#allocation62_spill] sm:$0xff] %v10983_v33  ;;  %14553 = vst [vmem:[#allocation63_spill] sm:$0xff] %v10986_v51  ;;  %v10989_v31 = vadd.f32 %v8485_v61, %v14554_v48  ;;  %v1801_v30 = vpop.f32.mrb[93].mxu0  ;;  %v11010_v57 = vsub.s32 %v10788_v23, %v3203_v60  ;;  %v3214_v61 = vmul.u32 18, %v3213_v6  ;;  %v3224_v48 = vshrl.u32 %v10935_v28, 4  ;;  %v14570_v28 = vld [vmem:[#allocation3_spill] sm:$0xff] }
 0x1db   : > { %v10997_v46 = vadd.f32 %v1801_v30, %v14556_v52  ;;  %v8486_v13 = vpop.f32.mrb[94].mxu0  ;;  %v10999_v7 = vpop.f32.mrb[108].mxu1  ;;  %vm11005_vm0 = vmand %vm14559_vm1, %vm14558_vm14  ;;  %vm14566_vm15 = vcmp.ne.s32.totalorder %v10913_v45, 0  ;;  %vm14567_vm9 = vcmp.lt.s32.totalorder %v10913_v45, 0  ;;  %v3235_v10 = vshrl.u32 %v10948_v3, 4  ;;  %v14773_v22 = vld [vmem:[#allocation55_spill] sm:$0xff] }
 0x1dc   : > { %14555 = vst [vmem:[#allocation11_spill] sm:$0xff] %v10989_v31  ;;  %v14561_v56 = vsel %vm11005_vm0, 4294967295, %v14560_v56  ;;  %14563 = vst [vmem:[#allocation65_spill] sm:$0xff] %v11010_v57  ;;  %v14564_v31 = vld [vmem:[#allocation12_spill] sm:$0xff]  ;;  %v1804_v52 = vpop.f32.mrb[95].mxu0  ;;  %vm14572_vm14 = vcmp.ne.s32.totalorder %v10927_v54, 0 }
 0x1dd   : > { %14557 = vst [vmem:[#allocation9_spill] sm:$0xff] %v10997_v46  ;;  %14562 = vst [vmem:[#allocation64_spill] sm:$0xff] %v14561_v56  ;;  %v11014_v30 = vadd.f32 %v8486_v13, %v14564_v31  ;;  %v2585_v46 = vpop.f32.mrb[109].mxu1  ;;  %v11026_v23 = vmul.u32.u64.low 3817748708, %v10978_v24  ;;  %v11027_v60 = vmul.u32.u64.high 3817748708, %v10978_v24, %v11026_v23  ;;  %v11030_v6 = vadd.f32 %v1804_v52, %v14570_v28 }
 0x1de   : > { %vm11020_vm5 = vmand %vm14567_vm9, %vm14566_vm15  ;;  %v11032_v13 = vpop.f32.mrb[110].mxu1  ;;  %vm14573_vm1 = vcmp.lt.s32.totalorder %v10927_v54, 0  ;;  %v14574_v46 = vmov 0  ;;  %vm3427_vm15 = vcmp.lt.s32.totalorder %v10986_v51, 0  ;;  %v11045_v3 = vadd.s32 216, %v10288_v8 }
 0x1df   : > { %14565 = vst [vmem:[#allocation12_spill] sm:$0xff] %v11014_v30  ;;  %14571 = vst [vmem:[#allocation3_spill] sm:$0xff] %v11030_v6  ;;  %v2588_v31 = vpop.f32.mrb[111].mxu1  ;;  %vm14576_vm12 = vcmp.ne.s32.totalorder %v10955_v18, 0  ;;  %vm14577_vm4 = vcmp.lt.s32.totalorder %v10955_v18, 0  ;;  %v14578_v52 = vmov 0 }
 0x1e0   : > { %vm11038_vm6 = vmand %vm14573_vm1, %vm14572_vm14  ;;  %v11056_v23 = vadd.s32 18, %v10965_v16  ;;  %v11059_v28 = vadd.s32 18, %v10986_v51  ;;  %v11062_v30 = vmul.u32.u64.low 3817748708, %v10994_v35  ;;  %v11063_v6 = vmul.u32.u64.high 3817748708, %v10994_v35, %v11062_v30 }
 0x1e1   : > { %v14575_v46 = vsel %vm11038_vm6, 4294967295, %v14574_v46  ;;  %vm11051_vm3 = vmand %vm14577_vm4, %vm14576_vm12  ;;  %vm14582_vm14 = vcmp.ne.s32.totalorder %v10965_v16, 0  ;;  %vm14583_vm1 = vcmp.lt.s32.totalorder %v10965_v16, 0  ;;  %v14584_v31 = vmov 0  ;;  %v8489_v43 = vpop.f32.mrb[96].mxu0 }
 0x1e2   : > { %v14579_v52 = vsel %vm11051_vm3, 4294967295, %v14578_v52  ;;  %14580 = vst [vmem:[#allocation66_spill] sm:$0xff] %v11056_v23  ;;  %14581 = vst [vmem:[#allocation67_spill] sm:$0xff] %v11059_v28  ;;  %vm3392_vm4 = vcmp.ne.s32.totalorder %v11010_v57, 0  ;;  %vm3428_vm12 = vcmp.lt.s32.totalorder %v11010_v57, 0  ;;  %v3225_v50 = vmul.u32 18, %v3224_v48 }
 0x1e3   : > { %vm11069_vm9 = vmand %vm14583_vm1, %vm14582_vm14  ;;  %v3246_v47 = vshrl.u32 %v10970_v19, 4  ;;  %vm14587_vm14 = vcmp.ne.s32.totalorder %v10986_v51, 0  ;;  %v14588_v36 = vmov 0  ;;  %v11091_v48 = vsub.s32 %v10849_v63, %v3214_v61  ;;  %v1817_v45 = vpop.f32.mrb[97].mxu0 }
 0x1e4   : > { %v14585_v31 = vsel %vm11069_vm9, 4294967295, %v14584_v31  ;;  %vm11086_vm1 = vmand %vm3427_vm15, %vm14587_vm14  ;;  %v3236_v19 = vmul.u32 18, %v3235_v10  ;;  %v11098_v2 = vadd.s32 18, %v11010_v57  ;;  %v11105_v56 = vadd.f32 %v8489_v43, %v10567_v62  ;;  %v8490_v61 = vpop.f32.mrb[98].mxu0  ;;  %v11129_v10 = vpop.f32.mrb[112].mxu1 }
 0x1e5   : > { %14586 = vst [vmem:[#allocation68_spill] sm:$0xff] %v14585_v31  ;;  %v14589_v36 = vsel %vm11086_vm1, 4294967295, %v14588_v36  ;;  %v11101_v32 = vmul.u32.u64.low 3817748708, %v11045_v3  ;;  %v11102_v34 = vmul.u32.u64.high 3817748708, %v11045_v3, %v11101_v32  ;;  %vm11119_vm15 = vmand %vm3428_vm12, %vm3392_vm4  ;;  %v11124_v62 = vadd.s32 224, %v10288_v8  ;;  %v1820_v23 = vpop.f32.mrb[99].mxu0 }
 0x1e6   : > { %14590 = vst [vmem:[#allocation69_spill] sm:$0xff] %v14589_v36  ;;  %14591 = vst [vmem:[#allocation70_spill] sm:$0xff] %v11098_v2  ;;  %v14593_v32 = vmov 0  ;;  %v11127_v43 = vadd.f32 %v1817_v45, %v10492_v21  ;;  %v11136_v30 = vsub.s32 %v10905_v59, %v3225_v50  ;;  %v11139_v16 = vadd.f32 %v8490_v61, %v10598_v53  ;;  %v2593_v31 = vpop.f32.mrb[113].mxu1  ;;  %v11159_v50 = vld [vmem:[#allocation2] sm:$0xf8] }
 0x1e7   : > { %14592 = vst [vmem:[#allocation71_spill] sm:$0xff] %v11105_v56  ;;  %v14594_v32 = vsel %vm11119_vm15, 4294967295, %v14593_v32  ;;  %v3247_v56 = vmul.u32 18, %v3246_v47  ;;  %v11143_v21 = vsub.s32 %v10916_v1, %v3236_v19  ;;  %v3257_v45 = vshrl.u32 %v11027_v60, 4  ;;  %v11149_v63 = vpop.f32.mrb[114].mxu1  ;;  %14599 = vst [vmem:[#allocation76_spill] sm:$0xff] %v11159_v50 }
 0x1e8   : > { %14595 = vst [vmem:[#allocation72_spill] sm:$0xff] %v14594_v32  ;;  %14596 = vst [vmem:[#allocation73_spill] sm:$0xff] %v11127_v43  ;;  %v11147_v43 = vadd.f32 %v1820_v23, %v10519_v4  ;;  %v11157_v53 = vadd.s32 18, %v11091_v48  ;;  %v2596_v59 = vpop.f32.mrb[115].mxu1  ;;  %v3268_v1 = vshrl.u32 %v11063_v6, 4  ;;  %v11167_v23 = vadd.s32 232, %v10288_v8 }
 0x1e9   : > { %14597 = vst [vmem:[#allocation74_spill] sm:$0xff] %v11139_v16  ;;  %v11163_v4 = vmul.u32.u64.low 3817748708, %v11124_v62  ;;  %v11164_v60 = vmul.u32.u64.high 3817748708, %v11124_v62, %v11163_v4  ;;  %v11172_v31 = vadd.s32 18, %v11136_v30  ;;  %v11175_v19 = vsub.s32 %v10938_v27, %v3247_v56 }
 0x1ea   : > { %14598 = vst [vmem:[#allocation75_spill] sm:$0xff] %v11147_v43  ;;  %v3258_v6 = vmul.u32 18, %v3257_v45  ;;  %v11179_v61 = vmul.u32.u64.low 3817748708, %v11167_v23  ;;  %v11180_v59 = vmul.u32.u64.high 3817748708, %v11167_v23, %v11179_v61  ;;  %v8493_v4 = vpop.f32.mrb[100].mxu0  ;;  %v11184_v47 = vadd.s32 18, %v11143_v21 }
 0x1eb   : > { %14600 = vst [vmem:[#allocation77_spill] sm:$0xff] %v11175_v19  ;;  %v3279_v16 = vshrl.u32 %v11102_v34, 4  ;;  %v3913_v43 = vshll.u32 %v11159_v50, 16  ;;  %v11189_v27 = vadd.f32 %v8493_v4, %v10761_v42  ;;  %v1833_v56 = vpop.f32.mrb[101].mxu0  ;;  %vm14602_vm12 = vcmp.ne.s32.totalorder %v11091_v48, 0  ;;  %v11206_v4 = vpop.f32.mrb[116].mxu1 }
 0x1ec   : > { %vm14603_vm4 = vcmp.lt.s32.totalorder %v11091_v48, 0  ;;  %v14604_v45 = vmov 0  ;;  %v3269_v61 = vmul.u32 18, %v3268_v1  ;;  %v2970_v57 = vadd.s32 240, %v10288_v8  ;;  %v8494_v42 = vpop.f32.mrb[102].mxu0 }
 0x1ed   : > { %14601 = vst [vmem:[#allocation78_spill] sm:$0xff] %v11189_v27  ;;  %vm11195_vm14 = vmand %vm14603_vm4, %vm14602_vm12  ;;  %v11201_v2 = vadd.s32 248, %v10288_v8  ;;  %v11204_v34 = vadd.f32 %v1833_v56, %v10677_v20  ;;  %vm14607_vm15 = vcmp.ne.s32.totalorder %v11136_v30, 0  ;;  %vm14608_vm1 = vcmp.lt.s32.totalorder %v11136_v30, 0  ;;  %v1836_v56 = vpop.f32.mrb[103].mxu0 }
 0x1ee   : > { %v14605_v45 = vsel %vm11195_vm14, 4294967295, %v14604_v45  ;;  %vm11212_vm4 = vmand %vm14608_vm1, %vm14607_vm15  ;;  %v14609_v27 = vmov 0  ;;  %vm3396_vm12 = vcmp.ne.s32.totalorder %v11175_v19, 0  ;;  %vm3432_vm9 = vcmp.lt.s32.totalorder %v11175_v19, 0 }
 0x1ef   : > { %14606 = vst [vmem:[#allocation79_spill] sm:$0xff] %v11204_v34  ;;  %v14610_v27 = vsel %vm11212_vm4, 4294967295, %v14609_v27  ;;  %v3290_v1 = vshrl.u32 %v11164_v60, 4  ;;  %v11220_v20 = vadd.f32 %v8494_v42, %v10781_v17  ;;  %v2601_v34 = vpop.f32.mrb[117].mxu1  ;;  %vm14612_vm3 = vcmp.ne.s32.totalorder %v11143_v21, 0 }
 0x1f0   : > { %vm14613_vm6 = vcmp.lt.s32.totalorder %v11143_v21, 0  ;;  %v14614_v32 = vmov 0  ;;  %v11231_v51 = vadd.s32 18, %v11175_v19  ;;  %v11234_v28 = vsub.s32 %v10978_v24, %v3258_v6  ;;  %v11240_v34 = vpop.f32.mrb[118].mxu1 }
 0x1f1   : > { %14611 = vst [vmem:[#allocation80_spill] sm:$0xff] %v11220_v20  ;;  %vm11226_vm0 = vmand %vm14613_vm6, %vm14612_vm3  ;;  %v3301_v60 = vshrl.u32 %v11180_v59, 4  ;;  %v11238_v17 = vadd.f32 %v1836_v56, %v10706_v37  ;;  %v3280_v42 = vmul.u32 18, %v3279_v16  ;;  %v2604_v18 = vpop.f32.mrb[119].mxu1  ;;  %v14619_v24 = vmov 0 }
 0x1f2   : > { %v14615_v32 = vsel %vm11226_vm0, 4294967295, %v14614_v32  ;;  %14616 = vst [vmem:[#allocation81_spill] sm:$0xff] %v11231_v51  ;;  %14617 = vst [vmem:[#allocation82_spill] sm:$0xff] %v11234_v28  ;;  %v11242_v20 = vmul.u32.u64.low 3817748708, %v2970_v57  ;;  %v11243_v36 = vmul.u32.u64.high 3817748708, %v2970_v57, %v11242_v20  ;;  %v11258_v37 = vsub.s32 %v10994_v35, %v3269_v61 }
 0x1f3   : > { %14618 = vst [vmem:[#allocation83_spill] sm:$0xff] %v11238_v17  ;;  %vm11253_vm3 = vmand %vm3432_vm9, %vm3396_vm12  ;;  %v11261_v16 = vmul.u32.u64.low 3817748708, %v11201_v2  ;;  %v11262_v6 = vmul.u32.u64.high 3817748708, %v11201_v2, %v11261_v16  ;;  %v3291_v20 = vmul.u32 18, %v3290_v1  ;;  %vm3397_vm6 = vcmp.ne.s32.totalorder %v11234_v28, 0  ;;  %v11299_v50 = vpop.f32.mrb[120].mxu1 }
 0x1f4   : > { %v14620_v24 = vsel %vm11253_vm3, 4294967295, %v14619_v24  ;;  %14622 = vst [vmem:[#allocation85_spill] sm:$0xff] %v11258_v37  ;;  %v3302_v56 = vmul.u32 18, %v3301_v60  ;;  %vm3433_vm9 = vcmp.lt.s32.totalorder %v11234_v28, 0  ;;  %v11275_v61 = vrot.slane %v3913_v43, 1  ;;  %v8497_v16 = vpop.f32.mrb[104].mxu0 }
 0x1f5   : > { %14621 = vst [vmem:[#allocation84_spill] sm:$0xff] %v14620_v24  ;;  %v11282_v33 = vadd.s32 18, %v11234_v28  ;;  %v11285_v1 = vsub.s32 %v11045_v3, %v3280_v42  ;;  %v3312_v60 = vshrl.u32 %v11243_v36, 4  ;;  %v11289_v59 = vadd.f32 %v8497_v16, %v10941_v38  ;;  %v1849_v35 = vpop.f32.mrb[105].mxu0  ;;  %vm11305_vm12 = vmand %vm3433_vm9, %vm3397_vm6  ;;  %v2609_v16 = vpop.f32.mrb[121].mxu1 }
 0x1f6   : > { %14623 = vst [vmem:[#allocation86_spill] sm:$0xff] %v11275_v61  ;;  %vm3398_vm1 = vcmp.ne.s32.totalorder %v11258_v37, 0  ;;  %vm3434_vm15 = vcmp.lt.s32.totalorder %v11258_v37, 0  ;;  %v11294_v43 = vadd.s32 18, %v11258_v37  ;;  %v11297_v18 = vadd.f32 %v1849_v35, %v10852_v5  ;;  %v8498_v61 = vpop.f32.mrb[106].mxu0 }
 0x1f7   : > { %14624 = vst [vmem:[#allocation87_spill] sm:$0xff] %v11282_v33  ;;  %14625 = vst [vmem:[#allocation88_spill] sm:$0xff] %v11285_v1  ;;  %v14629_v36 = vmov 0  ;;  %v11310_v38 = vsub.s32 %v11124_v62, %v3291_v20  ;;  %v11313_v3 = vsub.s32 %v11167_v23, %v3302_v56  ;;  %v3313_v42 = vmul.u32 18, %v3312_v60  ;;  %v1852_v35 = vpop.f32.mrb[107].mxu0  ;;  %v11328_v20 = vpop.f32.mrb[122].mxu1 }
 0x1f8   : > { %14626 = vst [vmem:[#allocation89_spill] sm:$0xff] %v11289_v59  ;;  %14627 = vst [vmem:[#allocation90_spill] sm:$0xff] %v11294_v43  ;;  %v14630_v36 = vsel %vm11305_vm12, 4294967295, %v14629_v36  ;;  %v11316_v5 = vadd.f32 %v8498_v61, %v10958_v44  ;;  %v3323_v59 = vshrl.u32 %v11262_v6, 4  ;;  %v11323_v17 = vadd.s32 264, %v10288_v8  ;;  %v2612_v23 = vpop.f32.mrb[123].mxu1 }
 0x1f9   : > { %14628 = vst [vmem:[#allocation91_spill] sm:$0xff] %v11297_v18  ;;  %14631 = vst [vmem:[#allocation92_spill] sm:$0xff] %v14630_v36  ;;  %v11320_v18 = vadd.s32 256, %v10288_v8  ;;  %v11326_v62 = vadd.f32 %v1852_v35, %v10889_v0  ;;  %vm3399_vm6 = vcmp.ne.s32.totalorder %v11285_v1, 0  ;;  %vm3435_vm9 = vcmp.lt.s32.totalorder %v11285_v1, 0  ;;  %v8517_v40 = vpop.f32.mrb[108].mxu0 }
 0x1fa   : > { %14632 = vst [vmem:[#allocation93_spill] sm:$0xff] %v11310_v38  ;;  %14633 = vst [vmem:[#allocation94_spill] sm:$0xff] %v11316_v5  ;;  %v11332_v44 = vsub.s32 %v2970_v57, %v3313_v42  ;;  %v14635_v0 = vmov 0  ;;  %v3324_v56 = vmul.u32 18, %v3323_v59  ;;  %v11351_v57 = vadd.s32 18, %v11285_v1  ;;  %v14639_v42 = vld [vmem:[#allocation5_spill] sm:$0xff] }
 0x1fb   : > { %14634 = vst [vmem:[#allocation95_spill] sm:$0xff] %v11326_v62  ;;  %vm11342_vm3 = vmand %vm3434_vm15, %vm3398_vm1  ;;  %v11347_v61 = vmul.u32.u64.low 3817748708, %v11320_v18  ;;  %v11348_v60 = vmul.u32.u64.high 3817748708, %v11320_v18, %v11347_v61  ;;  %vm3400_vm0 = vcmp.ne.s32.totalorder %v11310_v38, 0  ;;  %vm3436_vm12 = vcmp.lt.s32.totalorder %v11310_v38, 0  ;;  %v14653_v33 = vld [vmem:[#allocation14_spill] sm:$0xff] }
 0x1fc   : > { %v14636_v0 = vsel %vm11342_vm3, 4294967295, %v14635_v0  ;;  %14638 = vst [vmem:[#allocation97_spill] sm:$0xff] %v11351_v57  ;;  %vm3401_vm4 = vcmp.ne.s32.totalorder %v11313_v3, 0  ;;  %v14640_v35 = vsel %vm10457_vm7, %v10454_v55, %v14639_v42  ;;  %vm11365_vm15 = vmand %vm3435_vm9, %vm3399_vm6  ;;  %v14643_v16 = vmov 0  ;;  %v14647_v55 = vld [vmem:[#allocation13_spill] sm:$0xff]  ;;  %v14648_v42 = vld [vmem:[#allocation10_spill] sm:$0xff] }
 0x1fd   : > { %14637 = vst [vmem:[#allocation96_spill] sm:$0xff] %v14636_v0  ;;  %vm11361_vm1 = vcmp.lt.s32.totalorder %v14640_v35, 16  ;;  %v14644_v16 = vsel %vm11365_vm15, 4294967295, %v14643_v16  ;;  %v11371_v23 = vsub.s32 %v11201_v2, %v3324_v56  ;;  %v14649_v35 = vsel %vm10473_vm10, %v14647_v55, %v14648_v42  ;;  %v14654_v36 = vld [vmem:[#allocation7_spill] sm:$0xff]  ;;  %v2760_v55 = vpop.f32.mrb[109].mxu0  ;;  %vm11418_vm14 = vmand %vm3436_vm12, %vm3400_vm0  ;;  %v14711_v56 = vld [vmem:[#allocation30_spill] sm:$0xff] }
 0x1fe   : > { %14645 = vst [vmem:[#allocation5_spill] sm:$0xff] %v14644_v16  ;;  %v11374_v61 = vmul.u32.u64.low 3817748708, %v11323_v17  ;;  %v11375_v6 = vmul.u32.u64.high 3817748708, %v11323_v17, %v11374_v61  ;;  %vm11382_vm7 = vcmp.lt.s32.totalorder %v14649_v35, 16  ;;  %v14655_v2 = vsel %vm10501_vm11, %v14653_v33, %v14654_v36  ;;  %v14660_v36 = vld [vmem:[#allocation16_spill] sm:$0xff]  ;;  %v14661_v42 = vld [vmem:[#allocation15_spill] sm:$0xff] }
 0x1ff   : > { %vm11391_vm6 = vcmp.lt.s32.totalorder %v14655_v2, 16  ;;  %v11400_v61 = vadd.s32 18, %v11310_v38  ;;  %v2769_v28 = vadd.f32 %v8517_v40, %v11129_v10  ;;  %v14662_v35 = vsel %vm10576_vm2, %v14660_v36, %v14661_v42  ;;  %v11430_v40 = vld [vmem:[%s14214_s2] ss:$0 sm:$0xff]  ;;  %v8518_v36 = vpop.f32.mrb[110].mxu0  ;;  %v11433_v42 = vpop.f32.mrb[124].mxu1 }
 0x200   : > { %vm11410_vm11 = vcmp.lt.s32.totalorder %v14662_v35, 16  ;;  %v14665_v5 = vmov 0  ;;  %v11423_v10 = vadd.s32 18, %v11313_v3  ;;  %v2761_v33 = vadd.f32 %v2760_v55, %v10999_v7  ;;  %v14671_v55 = vld [vmem:[#allocation18_spill] sm:$0xff]  ;;  %v2763_v51 = vpop.f32.mrb[111].mxu0  ;;  %v2617_v16 = vpop.f32.mrb[125].mxu1 }
 0x201   : > { %14658 = vst [vmem:[#allocation4_spill] sm:$0xff] %v11400_v61  ;;  %v14666_v5 = vsel %vm11418_vm14, 4294967295, %v14665_v5  ;;  %vm14668_vm2 = vcmp.lt.s32.totalorder %v11313_v3, 0  ;;  %v14669_v37 = vmov 0  ;;  %v11448_v43 = vadd.s32 18, %v11332_v44  ;;  %v14682_v61 = vld [vmem:[#allocation8_spill] sm:$0xff] }
 0x202   : > { %14667 = vst [vmem:[#allocation13_spill] sm:$0xff] %v14666_v5  ;;  %vm11443_vm0 = vmand %vm14668_vm2, %vm3401_vm4  ;;  %v3334_v7 = vshrl.u32 %v11348_v60, 4  ;;  %v2905_v0 = vadd.f32 %v2769_v28, %v14671_v55  ;;  %v2772_v19 = vadd.f32 %v8518_v36, %v11149_v63  ;;  %vm14672_vm12 = vcmp.ne.s32.totalorder %v11332_v44, 0  ;;  %v14676_v60 = vld [vmem:[#allocation19_spill] sm:$0xff]  ;;  %v11467_v63 = vpop.f32.mrb[126].mxu1  ;;  %v14681_v55 = vld [vmem:[#allocation21_spill] sm:$0xff] }
 0x203   : > { %v14670_v37 = vsel %vm11443_vm0, 4294967295, %v14669_v37  ;;  %vm14673_vm10 = vcmp.lt.s32.totalorder %v11332_v44, 0  ;;  %v14674_v35 = vmov 0  ;;  %v11462_v1 = vadd.s32 18, %v11371_v23 }
 0x204   : > { %vm11457_vm9 = vmand %vm14673_vm10, %vm14672_vm12  ;;  %v3345_v57 = vshrl.u32 %v11375_v6, 4  ;;  %v2903_v24 = vadd.f32 %v2761_v33, %v14676_v60  ;;  %v2764_v28 = vadd.f32 %v2763_v51, %v11032_v13  ;;  %vm14677_vm4 = vcmp.ne.s32.totalorder %v11371_v23, 0  ;;  %v2620_v13 = vpop.f32.mrb[127].mxu1 }
 0x205   : > { %v14675_v35 = vsel %vm11457_vm9, 4294967295, %v14674_v35  ;;  %vm14678_vm10 = vcmp.lt.s32.totalorder %v11371_v23, 0  ;;  %v14679_v36 = vmov 0  ;;  %v3335_v6 = vmul.u32 18, %v3334_v7  ;;  %v14702_v7 = vld [vmem:[#allocation23_spill] sm:$0xff] }
 0x206   : > { %vm11477_vm2 = vmand %vm14678_vm10, %vm14677_vm4  ;;  %v3597_v33 = vadd.f32 %v11430_v40, %v2905_v0  ;;  %v2906_v51 = vadd.f32 %v2772_v19, %v14681_v55  ;;  %v3346_v16 = vmul.u32 18, %v3345_v57  ;;  %v3595_v38 = vadd.f32 %v11430_v40, %v2903_v24 }
 0x207   : > { %v14680_v36 = vsel %vm11477_vm2, 4294967295, %v14679_v36  ;;  %v2904_v5 = vadd.f32 %v2764_v28, %v14682_v61  ;;  %v11494_v0 = vsub.s32 %v11320_v18, %v3335_v6  ;;  %v14684_v57 = vsel %vm10615_vm8, %v10607_v14, %v10515_v9  ;;  %v14687_v61 = vld [vmem:[#allocation17_spill] sm:$0xff] }
 0x208   : > { %v3633_v19 = vmax.f32 %v3597_v33, 0.0  ;;  %v3598_v55 = vadd.f32 %v11430_v40, %v2906_v51  ;;  %vm11502_vm4 = vcmp.lt.s32.totalorder %v14684_v57, 16  ;;  %v14688_v28 = vsel %vm10631_vm13, %v10620_v11, %v14687_v61  ;;  %v8521_v33 = vpop.f32.mrb[112].mxu0  ;;  %v14694_v51 = vld [vmem:[#allocation25_spill] sm:$0xff]  ;;  %v14695_v11 = vld [vmem:[#allocation20_spill] sm:$0xff] }
 0x209   : > { %14683 = vst [vmem:[#allocation10_spill] sm:$0xff] %v11494_v0  ;;  %vm11511_vm10 = vcmp.lt.s32.totalorder %v14688_v28, 16  ;;  %v11520_v9 = vadd.s32 272, %v10288_v8  ;;  %v3631_v14 = vmax.f32 %v3595_v38, 0.0  ;;  %v3596_v6 = vadd.f32 %v11430_v40, %v2904_v5  ;;  %v2776_v38 = vpop.f32.mrb[113].mxu0  ;;  %v14701_v5 = vld [vmem:[#allocation26_spill] sm:$0xff] }
 0x20a   : > { %vm14693_vm8 = vnez %v14692_v29  ;;  %vm3404_vm12 = vcmp.ne.s32.totalorder %v11494_v0, 0  ;;  %vm3440_vm2 = vcmp.lt.s32.totalorder %v11494_v0, 0  ;;  %v3634_v61 = vmax.f32 %v3598_v55, 0.0 }
 0x20b   : > { %14691 = vst [vmem:[#allocation6_spill] sm:$0xff] %v11520_v9  ;;  %v14696_v13 = vsel %vm14693_vm8, %v14694_v51, %v14695_v11  ;;  %v2785_v28 = vadd.f32 %v8521_v33, %v11299_v50  ;;  %vm14700_vm9 = vnez %v14699_v15  ;;  %v11545_v51 = vsub.s32 %v11323_v17, %v3346_v16  ;;  %v8522_v15 = vpop.f32.mrb[114].mxu0  ;;  %v14708_v16 = vld [vmem:[#allocation27_spill] sm:$0xff] }
 0x20c   : > { %vm11528_vm13 = vcmp.lt.s32.totalorder %v14696_v13, 16  ;;  %v14703_v29 = vsel %vm14700_vm9, %v14701_v5, %v14702_v7  ;;  %v11548_v11 = vadd.s32 280, %v10288_v8  ;;  %v3741_v55 = vsel %vm11361_vm1, %v3633_v19, 0.0  ;;  %v2623_v13 = vpop.f32.mrb[128].mxu1  ;;  %v2779_v59 = vpop.f32.mrb[115].mxu0  ;;  %vm11566_vm1 = vmand %vm3440_vm2, %vm3404_vm12 }
 0x20d   : > { %vm11540_vm0 = vcmp.lt.s32.totalorder %v14703_v29, 16  ;;  %14706 = vst [vmem:[#allocation14_spill] sm:$0xff] %v11545_v51  ;;  %v3632_v50 = vmax.f32 %v3596_v6, 0.0  ;;  %v2777_v33 = vadd.f32 %v2776_v38, %v11206_v4  ;;  %v11554_v7 = vadd.s32 18, %v11494_v0  ;;  %v2625_v19 = vpop.f32.mrb[129].mxu1 }
 0x20e   : > { %14707 = vst [vmem:[#allocation7_spill] sm:$0xff] %v11548_v11  ;;  %v3739_v5 = vsel %vm11382_vm7, %v3631_v14, 0.0  ;;  %v3742_v17 = vsel %vm11391_vm6, %v3634_v61, 0.0  ;;  %v2909_v8 = vadd.f32 %v2785_v28, %v14708_v16  ;;  %v2788_v29 = vadd.f32 %v8522_v15, %v11328_v20  ;;  %v2626_v28 = vpop.f32.mrb[130].mxu1  ;;  %v14712_v15 = vld [vmem:[#allocation32_spill] sm:$0xff] }
 0x20f   : > { %v3778_v6 = vpack.c.bf16 %v3742_v17, %v3741_v55  ;;  %v3740_v62 = vsel %vm11410_vm11, %v3632_v50, 0.0  ;;  %v2907_v14 = vadd.f32 %v2777_v33, %v14711_v56  ;;  %v2780_v61 = vadd.f32 %v2779_v59, %v11240_v34  ;;  %v2628_v19 = vpop.f32.mrb[131].mxu1  ;;  %v14713_v17 = vld [vmem:[#allocation34_spill] sm:$0xff]  ;;  %v14714_v50 = vld [vmem:[#allocation33_spill] sm:$0xff]  ;;  %v14717_v56 = vld [vmem:[#allocation24_spill] sm:$0xff] }
 0x210   : > { %v3777_v20 = vpack.c.bf16 %v3740_v62, %v3739_v5  ;;  %v3601_v38 = vadd.f32 %v11430_v40, %v2909_v8  ;;  %v2910_v16 = vadd.f32 %v2788_v29, %v14712_v15  ;;  %vm3405_vm7 = vcmp.ne.s32.totalorder %v11545_v51, 0  ;;  %v14716_v33 = vld [vmem:[#allocation29_spill] sm:$0xff]  ;;  %v8525_v19 = vpop.f32.mrb[116].mxu0 }
 0x211   : > { %v11577_v11 = vrot.slane %v3778_v6, 4  ;;  %v3599_v55 = vadd.f32 %v11430_v40, %v2907_v14  ;;  %v2908_v2 = vadd.f32 %v2780_v61, %v14713_v17  ;;  %vm14715_vm6 = vnez %v14714_v50  ;;  %v14734_v50 = vld [vmem:[#allocation43_spill] sm:$0xff] }
 0x212   : > { %v14718_v34 = vsel %vm14715_vm6, %v14716_v33, %v14717_v56  ;;  %v3814_v29 = vrot.slane %v3777_v20, 4  ;;  %v3637_v59 = vmax.f32 %v3601_v38, 0.0  ;;  %v3602_v6 = vadd.f32 %v11430_v40, %v2910_v16  ;;  %v14726_v20 = vld [vmem:[#allocation35_spill] sm:$0xff] }
 0x213   : > { %vm11586_vm9 = vcmp.lt.s32.totalorder %v14718_v34, 16  ;;  %vm14721_vm11 = vnez %v14519_v58  ;;  %v3635_v61 = vmax.f32 %v3599_v55, 0.0  ;;  %v3600_v15 = vadd.f32 %v11430_v40, %v2908_v2  ;;  %v2792_v2 = vpop.f32.mrb[117].mxu0 }
 0x214   : > { %v14722_v62 = vsel %vm14721_vm11, %v10744_v25, %v10658_v12  ;;  %vm14725_vm8 = vnez %v14524_v41  ;;  %v11616_v12 = vmul.u32.u64.low 3817748708, %v11520_v9  ;;  %v11617_v25 = vmul.u32.u64.high 3817748708, %v11520_v9, %v11616_v12  ;;  %3868 = vst [vmem:[#allocation2 + $0x8] sm:$0xf0] %v3814_v29  ;;  %v14732_v41 = vld [vmem:[#allocation46_spill] sm:$0xff] }
 0x215   : > { %vm11600_vm2 = vcmp.lt.s32.totalorder %v14722_v62, 16  ;;  %v14727_v38 = vsel %vm14725_vm8, %v10791_v26, %v14726_v20  ;;  %vm14731_vm11 = vcmask 1043456   ;;  %v3638_v55 = vmax.f32 %v3602_v6, 0.0  ;;  %v14735_v26 = vld [vmem:[#allocation38_spill] sm:$0xff]  ;;  %v2631_v20 = vpop.f32.mrb[132].mxu1  ;;  %v14740_v12 = vld [vmem:[#allocation36_spill] sm:$0xff] }
 0x216   : > { %vm11611_vm6 = vcmp.lt.s32.totalorder %v14727_v38, 16  ;;  %14730 = vst [vmem:[#allocation22_spill] sm:$0xff] %v11617_v25  ;;  %v3816_v16 = vsel %vm14731_vm11, %v3814_v29, %v11577_v11  ;;  %v2801_v17 = vadd.f32 %v8525_v19, %v2623_v13  ;;  %vm14733_vm12 = vnez %v14732_v41  ;;  %v8526_v19 = vpop.f32.mrb[118].mxu0 }
 0x217   : > { %v14736_v33 = vsel %vm14733_vm12, %v14734_v50, %v14735_v26  ;;  %v11632_v34 = vadd.s32 18, %v11545_v51  ;;  %3869 = vst [vmem:[#allocation2 + $0x10] sm:$0xff] %v3816_v16  ;;  %v3745_v62 = vsel %vm11502_vm4, %v3637_v59, 0.0  ;;  %v3743_v13 = vsel %vm11511_vm10, %v3635_v61, 0.0  ;;  %v2795_v26 = vpop.f32.mrb[119].mxu0  ;;  %v14742_v59 = vld [vmem:[#allocation37_spill] sm:$0xff] }
 0x218   : > { %vm11627_vm8 = vcmp.lt.s32.totalorder %v14736_v33, 16  ;;  %v3636_v29 = vmax.f32 %v3600_v15, 0.0  ;;  %v2793_v6 = vadd.f32 %v2792_v2, %v11433_v42  ;;  %v3746_v38 = vsel %vm11528_vm13, %v3638_v55, 0.0  ;;  %v2633_v33 = vpop.f32.mrb[133].mxu1  ;;  %v14743_v55 = vld [vmem:[#allocation39_spill] sm:$0xff] }
 0x219   : > { %14739 = vst [vmem:[#allocation16_spill] sm:$0xff] %v11632_v34  ;;  %v2913_v41 = vadd.f32 %v2801_v17, %v14740_v12  ;;  %v2804_v50 = vadd.f32 %v8526_v19, %v2626_v28  ;;  %v11642_v8 = vshrl.u32 %v3816_v16, 16  ;;  %v3780_v24 = vpack.c.bf16 %v3746_v38, %v3745_v62  ;;  %v2634_v15 = vpop.f32.mrb[134].mxu1 }
 0x21a   : > { %v3744_v18 = vsel %vm11540_vm0, %v3636_v29, 0.0  ;;  %v2911_v61 = vadd.f32 %v2793_v6, %v14742_v59  ;;  %v2796_v42 = vadd.f32 %v2795_v26, %v11467_v63  ;;  %v2636_v17 = vpop.f32.mrb[135].mxu1  ;;  %v11650_v28 = vshll.u32 %v3816_v16, 16  ;;  %v14749_v29 = vld [vmem:[#allocation41_spill] sm:$0xff]  ;;  %v14754_v26 = vld [vmem:[#allocation42_spill] sm:$0xff] }
 0x21b   : > { %14741 = vst [vmem:[#allocation15_spill] sm:$0xff] %v11642_v8  ;;  %v3779_v2 = vpack.c.bf16 %v3744_v18, %v3743_v13  ;;  %v3605_v57 = vadd.f32 %v11430_v40, %v2913_v41  ;;  %v2914_v9 = vadd.f32 %v2804_v50, %v14743_v55  ;;  %vm14745_vm4 = vcmp.lt.s32.totalorder %v11545_v51, 0  ;;  %v14751_v41 = vld [vmem:[#allocation53_spill] sm:$0xff]  ;;  %v14753_v50 = vld [vmem:[#allocation48_spill] sm:$0xff]  ;;  %v11685_v17 = vld [vmem:[#allocation2 + $0x8] sm:$0xf0] }
 0x21c   : > { %14744 = vst [vmem:[#allocation18_spill] sm:$0xff] %v11650_v28  ;;  %vm11656_vm10 = vmand %vm14745_vm4, %vm3405_vm7  ;;  %v14746_v60 = vmov 0  ;;  %v3819_v62 = vrot.slane %v3780_v24, 4  ;;  %v3603_v63 = vadd.f32 %v11430_v40, %v2911_v61  ;;  %v2912_v13 = vadd.f32 %v2796_v42, %v14749_v29  ;;  %v14758_v42 = vld [vmem:[#allocation50_spill] sm:$0xff] }
 0x21d   : > { %v14747_v60 = vsel %vm11656_vm10, 4294967295, %v14746_v60  ;;  %v11662_v6 = vrot.slane %v3816_v16, 1  ;;  %v3817_v19 = vrot.slane %v3779_v2, 4  ;;  %v3641_v38 = vmax.f32 %v3605_v57, 0.0  ;;  %v8529_v16 = vpop.f32.mrb[120].mxu0  ;;  %v14760_v2 = vld [vmem:[#allocation47_spill] sm:$0xff]  ;;  %vm14766_vm4 = vmmov %vm14731_vm11 }
 0x21e   : > { %14748 = vst [vmem:[#allocation19_spill] sm:$0xff] %v14747_v60  ;;  %v3606_v12 = vadd.f32 %v11430_v40, %v2914_v9  ;;  %vm14752_vm0 = vnez %v14751_v41  ;;  %v3639_v59 = vmax.f32 %v3603_v63, 0.0  ;;  %v3604_v61 = vadd.f32 %v11430_v40, %v2912_v13  ;;  %v14761_v57 = vld [vmem:[#allocation40_spill] sm:$0xff]  ;;  %v14774_v63 = vld [vmem:[#allocation51_spill] sm:$0xff] }
 0x21f   : > { %14750 = vst [vmem:[#allocation21_spill] sm:$0xff] %v11662_v6  ;;  %v14755_v33 = vsel %vm14752_vm0, %v14753_v50, %v14754_v26  ;;  %vm14759_vm7 = vnez %v14758_v42  ;;  %v11688_v29 = vrot.slane %v11650_v28, 1  ;;  %v11696_v13 = vsel %vm14731_vm11, %v11577_v11, %v3817_v19  ;;  %v14767_v42 = vld [vmem:[#allocation54_spill] sm:$0xff]  ;;  %v14779_v60 = vld [vmem:[#allocation44_spill] sm:$0xff]  ;;  %vm14789_vm11 = vmmov %vm14766_vm4 }
 0x220   : > { %vm11670_vm13 = vcmp.lt.s32.totalorder %v14755_v33, 16  ;;  %v14762_v9 = vsel %vm14759_vm7, %v14760_v2, %v14761_v57  ;;  %v11699_v41 = vsel %vm14766_vm4, %v3817_v19, %v3819_v62  ;;  %v3749_v50 = vsel %vm11586_vm9, %v3641_v38, 0.0  ;;  %v2808_v33 = vpop.f32.mrb[121].mxu0  ;;  %3870 = vst [vmem:[#allocation2 + $0x18] sm:$0xff] %v11696_v13  ;;  %v2639_v19 = vpop.f32.mrb[136].mxu1 }
 0x221   : > { %vm11681_vm12 = vcmp.lt.s32.totalorder %v14762_v9, 16  ;;  %14765 = vst [vmem:[#allocation8_spill] sm:$0xff] %v11688_v29  ;;  %v3642_v26 = vmax.f32 %v3606_v12, 0.0  ;;  %v14768_v2 = vsel %vm11020_vm5, %v10962_v49, %v14767_v42  ;;  %3871 = vst [vmem:[#allocation2 + $0x20] sm:$0xff] %v11699_v41  ;;  %v3747_v11 = vsel %vm11600_vm2, %v3639_v59, 0.0  ;;  %v8530_v12 = vpop.f32.mrb[122].mxu0 }
 0x222   : > { %vm11708_vm0 = vcmp.lt.s32.totalorder %v14768_v2, 16  ;;  %v3640_v5 = vmax.f32 %v3604_v61, 0.0  ;;  %v2809_v38 = vadd.f32 %v2808_v33, %v2631_v20  ;;  %v14771_v9 = vld [vmem:[#allocation64_spill] sm:$0xff]  ;;  %v4085_v2 = vrot.slane %v11696_v13, 1  ;;  %v2641_v59 = vpop.f32.mrb[137].mxu1  ;;  %v2811_v61 = vpop.f32.mrb[123].mxu0 }
 0x223   : > { %vm14772_vm9 = vnez %v14771_v9  ;;  %v3750_v24 = vsel %vm11611_vm6, %v3642_v26, 0.0  ;;  %v2817_v14 = vadd.f32 %v8529_v16, %v2639_v19  ;;  %v4197_v20 = vrot.slane %v11685_v17, 1  ;;  %v2642_v25 = vpop.f32.mrb[138].mxu1 }
 0x224   : > { %v14775_v49 = vsel %vm14772_vm9, %v14773_v22, %v14774_v63  ;;  %v14319_v33 = vrot.slane %v11699_v41, 1  ;;  %v3782_v9 = vpack.c.bf16 %v3750_v24, %v3749_v50  ;;  %v3748_v63 = vsel %vm11627_vm8, %v3640_v5, 0.0  ;;  %v14778_v22 = vld [vmem:[#allocation45_spill] sm:$0xff]  ;;  %v2644_v26 = vpop.f32.mrb[139].mxu1  ;;  %v14782_v24 = vld [vmem:[#allocation52_spill] sm:$0xff] }
 0x225   : > { %vm11721_vm5 = vcmp.lt.s32.totalorder %v14775_v49, 16  ;;  %v2915_v49 = vadd.f32 %v2809_v38, %v14778_v22  ;;  %v2812_v51 = vadd.f32 %v2811_v61, %v2634_v15  ;;  %v3781_v34 = vpack.c.bf16 %v3748_v63, %v3747_v11  ;;  %v14784_v11 = vld [vmem:[#allocation49_spill] sm:$0xff]  ;;  %v14792_v26 = vld [vmem:[#allocation60_spill] sm:$0xff] }
 0x226   : > { %v2917_v0 = vadd.f32 %v2817_v14, %v14779_v60  ;;  %v2820_v58 = vadd.f32 %v8530_v12, %v2642_v25  ;;  %vm14780_vm2 = vcmask 1046528   ;;  %v3823_v19 = vrot.slane %v3782_v9, 4  ;;  %v11745_v14 = vpop.f32.mrb[124].mxu0 }
 0x227   : > { %v11736_v16 = vsel %vm14780_vm2, %v11662_v6, %v4085_v2  ;;  %v3607_v59 = vadd.f32 %v11430_v40, %v2915_v49  ;;  %v2916_v50 = vadd.f32 %v2812_v51, %v14782_v24  ;;  %vm14783_vm6 = vmmov %vm14780_vm2  ;;  %v3821_v5 = vrot.slane %v3781_v34, 4  ;;  %v2647_v49 = vpop.f32.mrb[140].mxu1  ;;  %v8936_v24 = vld [vmem:[%s14215_s3 + $0x8] sm:$0xff]  }
 0x228   : > { %14781 = vst [vmem:[#allocation17_spill] sm:$0xff] %v11736_v16  ;;  %v4198_v56 = vsel %vm14783_vm6, %v4197_v20, %v11662_v6  ;;  %v3609_v15 = vadd.f32 %v11430_v40, %v2917_v0  ;;  %v2918_v38 = vadd.f32 %v2820_v58, %v14784_v11  ;;  %vm14785_vm8 = vnez %v14575_v46  ;;  %v2824_v46 = vpop.f32.mrb[125].mxu0  ;;  %v2649_v11 = vpop.f32.mrb[141].mxu1 }
 0x229   : > { %v4283_v60 = vshrl.u32 %v4198_v56, 16  ;;  %v3643_v25 = vmax.f32 %v3607_v59, 0.0  ;;  %v3608_v12 = vadd.f32 %v11430_v40, %v2916_v50  ;;  %v14786_v61 = vsel %vm14785_vm8, %v10975_v39, %v10927_v54  ;;  %v11768_v58 = vpop.f32.mrb[126].mxu0  ;;  %vm14808_vm8 = vmmov %vm14766_vm4 }
 0x22a   : > { %vm11752_vm7 = vcmp.lt.s32.totalorder %v14786_v61, 16  ;;  %v4286_v34 = vshll.u32 %v4198_v56, 16  ;;  %v14318_v0 = vshrl.u32 %v11736_v16, 16  ;;  %v11758_v20 = vsel %vm14789_vm11, %v3819_v62, %v3821_v5  ;;  %v14791_v62 = vld [vmem:[#allocation62_spill] sm:$0xff] }
 0x22b   : > { %v11761_v9 = vsel %vm14766_vm4, %v3821_v5, %v3823_v19  ;;  %v3645_v63 = vmax.f32 %v3609_v15, 0.0  ;;  %v3610_v22 = vadd.f32 %v11430_v40, %v2918_v38  ;;  %vm4252_vm9 = vsmask.f32 4352  ;;  %3872 = vst [vmem:[#allocation2 + $0x28] sm:$0xff] %v11758_v20  ;;  %v2827_v38 = vpop.f32.mrb[127].mxu0 }
 0x22c   : > { %3873 = vst [vmem:[#allocation2 + $0x30] sm:$0xff] %v11761_v9  ;;  %v3751_v54 = vsel %vm11670_vm13, %v3643_v25, 0.0  ;;  %v3644_v39 = vmax.f32 %v3608_v12, 0.0  ;;  %vm14790_vm2 = vnez %v14579_v52  ;;  %v4285_v50 = vrot.slane %v4283_v60, 3  ;;  %v2650_v12 = vpop.f32.mrb[142].mxu1 }
 0x22d   : > { %v14793_v59 = vsel %vm14790_vm2, %v14791_v62, %v14792_v26  ;;  %v4288_v56 = vrot.slane %v4286_v34, 4  ;;  %v3753_v5 = vsel %vm11681_vm12, %v3645_v63, 0.0  ;;  %v3646_v18 = vmax.f32 %v3610_v22, 0.0  ;;  %v14798_v63 = vld [vmem:[#allocation57_spill] sm:$0xff] }
 0x22e   : > { %vm11775_vm6 = vcmp.lt.s32.totalorder %v14793_v59, 16  ;;  %v2825_v15 = vadd.f32 %v2824_v46, %v2647_v49  ;;  %v4293_v25 = vrot.slane %v14318_v0, 3  ;;  %v3752_v52 = vsel %vm11708_vm0, %v3644_v39, 0.0  ;;  %v2652_v49 = vpop.f32.mrb[143].mxu1 }
 0x22f   : > { %v4289_v61 = vor.u32 %v4288_v56, %v4285_v50  ;;  %v14317_v62 = vshll.u32 %v11736_v16, 16  ;;  %vm14796_vm13 = vcmask 1046528   ;;  %v3754_v55 = vsel %vm11721_vm5, %v3646_v18, 0.0  ;;  %v14799_v56 = vld [vmem:[#allocation59_spill] sm:$0xff]  ;;  %v14800_v18 = vld [vmem:[#allocation68_spill] sm:$0xff]  ;;  %vm14807_vm5 = vmmov %vm14766_vm4 }
 0x230   : > { %v11789_v60 = vsel %vm14796_vm13, %v4085_v2, %v14319_v33  ;;  %v3783_v34 = vpack.c.bf16 %v3752_v52, %v3751_v54  ;;  %v2919_v22 = vadd.f32 %v2825_v15, %v14798_v63  ;;  %v2828_v46 = vadd.f32 %v2827_v38, %v2650_v12  ;;  %v14803_v15 = vld [vmem:[#allocation61_spill] sm:$0xff]  ;;  %v11817_v63 = vpop.f32.mrb[128].mxu0  ;;  %vm14827_vm13 = vmmov %vm14807_vm5 }
 0x231   : > { %14797 = vst [vmem:[#allocation28_spill] sm:$0xff] %v11789_v60  ;;  %v3784_v26 = vpack.c.bf16 %v3754_v55, %v3753_v5  ;;  %v4296_v57 = vrot.slane %v14317_v62, 4  ;;  %v14316_v39 = vshrl.u32 %v11789_v60, 16  ;;  %v14315_v59 = vshll.u32 %v11789_v60, 16  ;;  %v14802_v5 = vld [vmem:[#allocation66_spill] sm:$0xff] }
 0x232   : > { %v3825_v50 = vrot.slane %v3783_v34, 4  ;;  %v3611_v2 = vadd.f32 %v11430_v40, %v2919_v22  ;;  %v2920_v11 = vadd.f32 %v2828_v46, %v14799_v56  ;;  %v3932_v42 = vor.u32 %v11642_v8, %v11688_v29  ;;  %v4165_v56 = vld [vmem:[#allocation2 + $0x8] sm:$0xf8]  ;;  %v8935_v62 = vld [vmem:[%s14215_s3] sm:$0xff]  }
 0x233   : > { %v11802_v54 = vrot.slane %v3784_v26, 4  ;;  %vm14801_vm12 = vnez %v14800_v18  ;;  %v4297_v12 = vor.u32 %v4296_v57, %v4293_v25  ;;  %v4315_v55 = vrot.slane %v14316_v39, 3  ;;  %v11826_v18 = vpop.f32.mrb[129].mxu0  ;;  %v2655_v57 = vpop.f32.mrb[144].mxu1 }
 0x234   : > { %v14804_v38 = vsel %vm14801_vm12, %v14802_v5, %v14803_v15  ;;  %v4318_v34 = vrot.slane %v14315_v59, 4  ;;  %v11820_v22 = vsel %vm14807_vm5, %v3823_v19, %v3825_v50  ;;  %v3647_v46 = vmax.f32 %v3611_v2, 0.0  ;;  %v14809_v5 = vld [vmem:[#allocation69_spill] sm:$0xff]  ;;  %v14811_v19 = vld [vmem:[#allocation67_spill] sm:$0xff] }
 0x235   : > { %vm11809_vm0 = vcmp.lt.s32.totalorder %v14804_v38, 16  ;;  %v3612_v49 = vadd.f32 %v11430_v40, %v2920_v11  ;;  %v11824_v26 = vshll.u32 %v11696_v13, 16  ;;  %v11830_v25 = vsel %vm14808_vm8, %v3825_v50, %v11802_v54  ;;  %3874 = vst [vmem:[#allocation2 + $0x38] sm:$0xff] %v11820_v22  ;;  %v14812_v15 = vld [vmem:[#allocation63_spill] sm:$0xff]  ;;  %v11846_v50 = vpop.f32.mrb[130].mxu0 }
 0x236   : > { %vm14810_vm11 = vnez %v14809_v5  ;;  %v4298_v38 = vsel %vm4252_vm9, %v4289_v61, %v4297_v12  ;;  %v11843_v59 = vor.u32 %v4318_v34, %v4315_v55  ;;  %v4171_v39 = vshrl.u32 %v11685_v17, 16  ;;  %3875 = vst [vmem:[#allocation2 + $0x40] sm:$0xff] %v11830_v25  ;;  %v2843_v55 = vpop.f32.mrb[131].mxu0  ;;  %v14837_v11 = vld [vmem:[#allocation3_spill] sm:$0xff] }
 0x237   : > { %v14813_v2 = vsel %vm14810_vm11, %v14811_v19, %v14812_v15  ;;  %v3755_v5 = vsel %vm11752_vm7, %v3647_v46, 0.0  ;;  %v3648_v19 = vmax.f32 %v3612_v49, 0.0  ;;  %v2833_v15 = vadd.f32 %v11745_v14, %v2655_v57  ;;  %8567 = vmatprep.mubr.bf16.mxu1 %v4298_v38  ;;  %v14816_v46 = vld [vmem:[#allocation56_spill] sm:$0xff]  ;;  %vm14840_vm11 = vmmov %vm14827_vm13 }
 0x238   : > { %vm11838_vm4 = vcmp.lt.s32.totalorder %v14813_v2, 16  ;;  %v2657_v2 = vpop.f32.mrb[145].mxu1  ;;  %v3936_v61 = vrot.slane %v11824_v26, 1  ;;  %v4320_v0 = vsel %vm4252_vm9, %v4297_v12, %v11843_v59  ;;  %v4173_v33 = vshll.u32 %v11685_v17, 16 }
 0x239   : > { %v2658_v34 = vpop.f32.mrb[146].mxu1  ;;  %v4254_v60 = vshrl.u32 %v4165_v56, 16  ;;  %v4257_v16 = vshll.u32 %v4165_v56, 16  ;;  %v3756_v51 = vsel %vm11775_vm6, %v3648_v19, 0.0  ;;  %v2921_v49 = vadd.f32 %v2833_v15, %v14816_v46  ;;  %8568 = vmatmul.mubr.bf16.vlgmr.msra.gmra.mrb[180].mxu1 %v4320_v0  ;;  %v14819_v19 = vld [vmem:[#allocation58_spill] sm:$0xff] }
 0x23a   : > { %v2836_v14 = vadd.f32 %v11768_v58, %v2658_v34  ;;  %vm14817_vm7 = vsmask.f32 7424  ;;  %v2660_v38 = vpop.f32.mrb[147].mxu1  ;;  %v3785_v2 = vpack.c.bf16 %v3756_v51, %v3755_v5  ;;  %v4175_v6 = vrot.slane %v4173_v33, 1  ;;  %5695 = vmatpush1.bf16.msra.mxu1 %v8935_v62  ;;  %v11880_v51 = vpop.f32.mrb[132].mxu0 }
 0x23b   : > { %v11864_v57 = vsel %vm14817_vm7, %v3932_v42, %v3936_v61  ;;  %v3613_v56 = vadd.f32 %v11430_v40, %v2921_v49  ;;  %v4256_v0 = vrot.slane %v4254_v60, 3  ;;  %v4259_v15 = vrot.slane %v4257_v16, 4  ;;  %v11873_v42 = vld [vmem:[#allocation2] sm:$0xff]  ;;  %v14820_v60 = vld [vmem:[#allocation72_spill] sm:$0xff]  ;;  %vm14828_vm12 = vmmov %vm14817_vm7 }
 0x23c   : > { %14818 = vst [vmem:[#allocation25_spill] sm:$0xff] %v11864_v57  ;;  %v14326_v12 = vshrl.u32 %v11864_v57, 16  ;;  %v14325_v17 = vshll.u32 %v11864_v57, 16  ;;  %v2922_v58 = vadd.f32 %v2836_v14, %v14819_v19  ;;  %5696 = vmatprep.subr.bf16.mxu1 %v11873_v42  ;;  %v3829_v33 = vrot.slane %v3785_v2, 4  ;;  %v14822_v38 = vld [vmem:[#allocation70_spill] sm:$0xff]  ;;  %v14823_v19 = vld [vmem:[#allocation65_spill] sm:$0xff] }
 0x23d   : > { %v4176_v5 = vor.u32 %v4175_v6, %v4171_v39  ;;  %v3649_v46 = vmax.f32 %v3613_v56, 0.0  ;;  %v4260_v14 = vor.u32 %v4259_v15, %v4256_v0  ;;  %v4262_v16 = vrot.slane %v11650_v28, 4  ;;  %v11893_v39 = vpop.f32.mrb[133].mxu0  ;;  %v2663_v15 = vpop.f32.mrb[148].mxu1 }
 0x23e   : > { %v4276_v34 = vrot.slane %v14326_v12, 3  ;;  %v4279_v62 = vrot.slane %v14325_v17, 4  ;;  %v3614_v49 = vadd.f32 %v11430_v40, %v2922_v58  ;;  %vm14821_vm2 = vnez %v14820_v60  ;;  %5697 = vmatpush1.bf16.msra.mxu1 %v8936_v24 }
 0x23f   : > { %v14824_v2 = vsel %vm14821_vm2, %v14822_v38, %v14823_v19  ;;  %v11897_v17 = vsel %vm14827_vm13, %v11802_v54, %v3829_v33  ;;  %v4177_v56 = vsel %vm14828_vm12, %v4176_v5, %v11688_v29  ;;  %v11904_v0 = vshrl.u32 %v11696_v13, 16  ;;  %v11915_v54 = vpop.f32.mrb[134].mxu0  ;;  %v8937_v5 = vld [vmem:[%s14215_s3 + $0x10] sm:$0xff]   ;;  %5698 = vmatprep.subr.bf16.mxu1 %v11873_v42 }
 0x240   : > { %vm11889_vm6 = vcmp.lt.s32.totalorder %v14824_v2, 16  ;;  %v11901_v58 = vor.u32 %v4279_v62, %v4276_v34  ;;  %vm14830_vm5 = vnez %v14605_v45  ;;  %3876 = vst [vmem:[#allocation2 + $0x48] sm:$0xff] %v11897_v17  ;;  %v3757_v13 = vsel %vm11809_vm0, %v3649_v46, 0.0  ;;  %vm14838_vm0 = vmmov %vm14817_vm7  ;;  %v8934_v38 = vld [vmem:[%s14215_s3 + $0x90] sm:$0xff]  }
 0x241   : > { %14829 = vst [vmem:[#allocation20_spill] sm:$0xff] %v11904_v0  ;;  %v14831_v60 = vsel %vm14830_vm5, %v11157_v53, %v11091_v48  ;;  %v3650_v45 = vmax.f32 %v3614_v49, 0.0  ;;  %v4266_v34 = vshrl.u32 %v4177_v56, 16  ;;  %v4269_v62 = vshll.u32 %v4177_v56, 16  ;;  %v2665_v48 = vpop.f32.mrb[149].mxu1  ;;  %v11923_v53 = vpop.f32.mrb[135].mxu0  ;;  %vm14859_vm5 = vmmov %vm14840_vm11 }
 0x242   : > { %vm11911_vm8 = vcmp.lt.s32.totalorder %v14831_v60, 16  ;;  %v14834_v19 = vrot.slane %v11642_v8, 3  ;;  %v3940_v2 = vor.u32 %v11904_v0, %v3936_v61  ;;  %v11932_v60 = vshll.u32 %v11699_v41, 16  ;;  %v2666_v46 = vpop.f32.mrb[150].mxu1  ;;  %v14836_v61 = vld [vmem:[#allocation9_spill] sm:$0xff]  ;;  %5699 = vmatpush1.bf16.msra.mxu1 %v8937_v5 }
 0x243   : > { %v2841_v52 = vadd.f32 %v11826_v18, %v2663_v15  ;;  %v3758_v49 = vsel %vm11838_vm4, %v3650_v45, 0.0  ;;  %v4268_v56 = vrot.slane %v4266_v34, 3  ;;  %v4271_v48 = vrot.slane %v4269_v62, 4  ;;  %v2668_v28 = vpop.f32.mrb[151].mxu1  ;;  %v8939_v18 = vld [vmem:[%s14215_s3 + $0x18] sm:$0xff]   ;;  %5700 = vmatprep.subr.bf16.mxu1 %v11873_v42  ;;  %v11957_v62 = vpop.f32.mrb[136].mxu0 }
 0x244   : > { %v11928_v24 = vor.u32 %v4262_v16, %v14834_v19  ;;  %14835 = vst [vmem:[#allocation31_spill] sm:$0xff] %v11932_v60  ;;  %v2844_v12 = vadd.f32 %v2843_v55, %v2666_v46  ;;  %v3786_v57 = vpack.c.bf16 %v3758_v49, %v3757_v13  ;;  %v14332_v19 = vrot.slane %v11932_v60, 1  ;;  %v11967_v49 = vpop.f32.mrb[137].mxu0 }
 0x245   : > { %v2923_v8 = vadd.f32 %v2841_v52, %v14836_v61  ;;  %v4272_v15 = vor.u32 %v4271_v48, %v4268_v56  ;;  %v4089_v34 = vrot.slane %v11758_v20, 1  ;;  %v14331_v28 = vrot.slane %v11761_v9, 1 }
 0x246   : > { %v4264_v16 = vsel %vm4252_vm9, %v4260_v14, %v11928_v24  ;;  %v2924_v45 = vadd.f32 %v2844_v12, %v14837_v11  ;;  %v11948_v55 = vrot.slane %v3786_v57, 4  ;;  %v11953_v14 = vsel %vm14838_vm0, %v3940_v2, %v14332_v19  ;;  %v8933_v2 = vld [vmem:[%s14215_s3 + $0x88] sm:$0xff]   ;;  %v2671_v11 = vpop.f32.mrb[152].mxu1  ;;  %5701 = vmatpush1.bf16.msra.mxu1 %v8939_v18  ;;  %v8999_v18 = vld [vmem:[%s14215_s3 + $0x80] sm:$0xff]  }
 0x247   : > { %14839 = vst [vmem:[#allocation26_spill] sm:$0xff] %v11953_v14  ;;  %v3615_v5 = vadd.f32 %v11430_v40, %v2923_v8  ;;  %v4299_v13 = vrot.slane %v11904_v0, 3  ;;  %v4281_v12 = vsel %vm4252_vm9, %v4272_v15, %v11901_v58  ;;  %v14333_v52 = vshrl.u32 %v11953_v14, 16  ;;  %5702 = vmatprep.subr.bf16.mxu1 %v11873_v42 }
 0x248   : > { %v14334_v46 = vshll.u32 %v11953_v14, 16  ;;  %v3616_v57 = vadd.f32 %v11430_v40, %v2924_v45  ;;  %v11971_v8 = vsel %vm14840_vm11, %v3829_v33, %v11948_v55  ;;  %4903 = vmatprep.mubr.bf16.mxu0 %v4281_v12  ;;  %v14841_v48 = vrot.slane %v11699_v41, 1  ;;  %v11983_v45 = vpop.f32.mrb[138].mxu0  ;;  %v8940_v33 = vld [vmem:[%s14215_s3 + $0x20] sm:$0xff]  }
 0x249   : > { %v3651_v56 = vmax.f32 %v3615_v5, 0.0  ;;  %vm14842_vm4 = vcmask 1046528   ;;  %3877 = vst [vmem:[#allocation2 + $0x50] sm:$0xff] %v11971_v8  ;;  %4904 = vmatmul.mubr.bf16.vlgmr.msra.gmra.mrb[144].mxu0 %v4264_v16  ;;  %v4306_v5 = vrot.slane %v14333_v52, 3  ;;  %v11994_v19 = vpop.f32.mrb[139].mxu0  ;;  %vm14847_vm2 = vnez %v14610_v27 }
 0x24a   : > { %v11976_v61 = vsel %vm14842_vm4, %v14841_v48, %v4089_v34  ;;  %vm14844_vm7 = vmmov %vm14842_vm4  ;;  %v4309_v12 = vrot.slane %v14334_v46, 4  ;;  %v3652_v48 = vmax.f32 %v3616_v57, 0.0  ;;  %8604 = vmatpush3.bf16.msra.mxu0 %v8999_v18  ;;  %v4300_v18 = vrot.slane %v11824_v26, 4  ;;  %5703 = vmatpush1.bf16.msra.mxu1 %v8940_v33 }
 0x24b   : > { %14843 = vst [vmem:[#allocation23_spill] sm:$0xff] %v11976_v61  ;;  %v11981_v15 = vsel %vm14844_vm7, %v4089_v34, %v14331_v28  ;;  %v2673_v28 = vpop.f32.mrb[153].mxu1  ;;  %v3759_v16 = vsel %vm11889_vm6, %v3651_v56, 0.0  ;;  %v14340_v52 = vshll.u32 %v11976_v61, 16  ;;  %v14846_v14 = vshrl.u32 %v11976_v61, 16  ;;  %8605 = vmatprep.subr.bf16.mxu0 %v8933_v2  ;;  %5704 = vmatprep.subr.bf16.mxu1 %v11873_v42 }
 0x24c   : > { %14845 = vst [vmem:[#allocation27_spill] sm:$0xff] %v11981_v15  ;;  %v14339_v46 = vshrl.u32 %v11981_v15, 16  ;;  %v2674_v34 = vpop.f32.mrb[154].mxu1  ;;  %v12005_v28 = vor.u32 %v4309_v12, %v4306_v5  ;;  %v3760_v0 = vsel %vm11911_vm8, %v3652_v48, 0.0  ;;  %v14848_v6 = vsel %vm14847_vm2, %v11172_v31, %v11136_v30  ;;  %vm14861_vm8 = vmmov %vm14838_vm0 }
 0x24d   : > { %v4337_v29 = vrot.slane %v14846_v14, 3  ;;  %vm12017_vm6 = vcmp.lt.s32.totalorder %v14848_v6, 16  ;;  %v2676_v57 = vpop.f32.mrb[155].mxu1  ;;  %v3787_v5 = vpack.c.bf16 %v3760_v0, %v3759_v16  ;;  %v4340_v14 = vrot.slane %v14340_v52, 4  ;;  %v8941_v0 = vld [vmem:[%s14215_s3 + $0x28] sm:$0xff]   ;;  %vm14865_vm0 = vmmov %vm14842_vm4 }
 0x24e   : > { %v4359_v27 = vrot.slane %v14339_v46, 3  ;;  %v14851_v12 = vshll.u32 %v11981_v15, 16  ;;  %vm14852_vm13 = vnez %v14615_v32  ;;  %v4311_v16 = vsel %vm4252_vm9, %v11901_v58, %v12005_v28  ;;  %8606 = vmatpush3.bf16.msra.mxu0 %v8933_v2  ;;  %v12059_v58 = vpop.f32.mrb[140].mxu0  ;;  %5705 = vmatpush1.bf16.msra.mxu1 %v8941_v0  ;;  %vm14867_vm11 = vmmov %vm14865_vm0  ;;  %v14872_v15 = vld [vmem:[#allocation77_spill] sm:$0xff] }
 0x24f   : > { %v14853_v31 = vsel %vm14852_vm13, %v11184_v47, %v11143_v21  ;;  %v12045_v57 = vor.u32 %v4300_v18, %v4299_v13  ;;  %v12048_v32 = vshrl.u32 %v11699_v41, 16  ;;  %v12051_v21 = vshll.u32 %v11758_v20, 16  ;;  %4911 = vmatprep.mubr.bf16.mxu0 %v4311_v16  ;;  %8607 = vmatprep.subr.bf16.mxu0 %v8934_v38  ;;  %vm14888_vm13 = vmmov %vm14859_vm5 }
 0x250   : > { %v4362_v30 = vrot.slane %v14851_v12, 4  ;;  %vm12035_vm12 = vcmp.lt.s32.totalorder %v14853_v31, 16  ;;  %v12054_v47 = vrot.slane %v3787_v5, 4  ;;  %v4341_v33 = vor.u32 %v4340_v14, %v4337_v29  ;;  %v12069_v29 = vpop.f32.mrb[141].mxu0  ;;  %v14860_v14 = vld [vmem:[#allocation11_spill] sm:$0xff]  ;;  %5706 = vmatprep.subr.bf16.mxu1 %v11873_v42 }
 0x251   : > { %14856 = vst [vmem:[#allocation30_spill] sm:$0xff] %v12048_v32  ;;  %14857 = vst [vmem:[#allocation32_spill] sm:$0xff] %v12051_v21  ;;  %v2849_v12 = vadd.f32 %v11817_v63, %v2671_v11  ;;  %v4302_v41 = vsel %vm4252_vm9, %v11928_v24, %v12045_v57  ;;  %v14858_v13 = vrot.slane %v11932_v60, 1  ;;  %v14341_v31 = vrot.slane %v12051_v21, 1  ;;  %v8938_v63 = vld [vmem:[%s14215_s3 + $0x98] sm:$0xff]  }
 0x252   : > { %v12056_v6 = vor.u32 %v4362_v30, %v4359_v27  ;;  %v2852_v5 = vadd.f32 %v11846_v50, %v2674_v34  ;;  %v12077_v2 = vsel %vm14859_vm5, %v11948_v55, %v12054_v47  ;;  %v4342_v24 = vsel %vm4252_vm9, %v11843_v59, %v4341_v33  ;;  %v2679_v34 = vpop.f32.mrb[156].mxu1  ;;  %v12084_v27 = vpop.f32.mrb[142].mxu0  ;;  %v8942_v30 = vld [vmem:[%s14215_s3 + $0x30] sm:$0xff]   ;;  %4912 = vmatmul.mubr.bf16.gmra.mrb[148].mxu0 %v4302_v41  ;;  %vm14893_vm5 = vmmov %vm14861_vm8 }
 0x253   : > { %v3948_v18 = vor.u32 %v12048_v32, %v14858_v13  ;;  %v2925_v50 = vadd.f32 %v2849_v12, %v14860_v14  ;;  %3878 = vst [vmem:[#allocation2 + $0x58] sm:$0xff] %v12077_v2  ;;  %8571 = vmatprep.mubr.bf16.mxu1 %v4342_v24  ;;  %v14863_v55 = vld [vmem:[#allocation12_spill] sm:$0xff]  ;;  %v14342_v12 = vrot.slane %v11830_v25, 1  ;;  %v2681_v0 = vpop.f32.mrb[157].mxu1  ;;  %v12098_v13 = vpop.f32.mrb[143].mxu0  ;;  %v4321_v46 = vrot.slane %v12048_v32, 3  ;;  %8608 = vmatpush3.bf16.msra.mxu0 %v8934_v38 }
 0x254   : > { %v4364_v11 = vsel %vm4252_vm9, %v4341_v33, %v12056_v6  ;;  %v2926_v16 = vadd.f32 %v2852_v5, %v14863_v55  ;;  %v4093_v33 = vrot.slane %v11820_v22, 1  ;;  %v14864_v55 = vrot.slane %v11761_v9, 1  ;;  %8609 = vmatprep.subr.bf16.mxu0 %v8938_v63  ;;  %v8943_v38 = vld [vmem:[%s14215_s3 + $0xa0] sm:$0xff]   ;;  %5707 = vmatpush1.bf16.msra.mxu1 %v8942_v30  ;;  %v14869_v32 = vld [vmem:[#allocation84_spill] sm:$0xff] }
 0x255   : > { %v12093_v59 = vsel %vm14861_vm8, %v3948_v18, %v14341_v31  ;;  %8572 = vmatmul.mubr.bf16.gmra.mrb[184].mxu1 %v4364_v11  ;;  %v3617_v41 = vadd.f32 %v11430_v40, %v2925_v50  ;;  %v2682_v18 = vpop.f32.mrb[158].mxu1  ;;  %v4322_v0 = vrot.slane %v11932_v60, 4  ;;  %5708 = vmatprep.subr.bf16.mxu1 %v11873_v42  ;;  %vm14870_vm4 = vnez %v14869_v32 }
 0x256   : > { %14862 = vst [vmem:[#allocation34_spill] sm:$0xff] %v12093_v59  ;;  %v14348_v14 = vshrl.u32 %v12093_v59, 16  ;;  %v14349_v24 = vshll.u32 %v12093_v59, 16  ;;  %v3618_v5 = vadd.f32 %v11430_v40, %v2926_v16  ;;  %v12108_v52 = vsel %vm14865_vm0, %v14864_v55, %v4093_v33  ;;  %v2684_v31 = vpop.f32.mrb[159].mxu1 }
 0x257   : > { %14866 = vst [vmem:[#allocation33_spill] sm:$0xff] %v12108_v52  ;;  %v12113_v11 = vsel %vm14867_vm11, %v4093_v33, %v14342_v12  ;;  %v3653_v55 = vmax.f32 %v3617_v41, 0.0  ;;  %v14353_v33 = vshrl.u32 %v12108_v52, 16  ;;  %v8944_v31 = vld [vmem:[%s14215_s3 + $0x38] sm:$0xff]   ;;  %8610 = vmatpush3.bf16.msra.mxu0 %v8938_v63  ;;  %v14876_v56 = vshll.u32 %v12108_v52, 16  ;;  %vm14912_vm11 = vmmov %vm14888_vm13 }
 0x258   : > { %14868 = vst [vmem:[#allocation29_spill] sm:$0xff] %v12113_v11  ;;  %v4328_v50 = vrot.slane %v14348_v14, 3  ;;  %v4331_v16 = vrot.slane %v14349_v24, 4  ;;  %v3654_v12 = vmax.f32 %v3618_v5, 0.0  ;;  %v14354_v60 = vshll.u32 %v12113_v11, 16  ;;  %v14871_v5 = vld [vmem:[#allocation81_spill] sm:$0xff]  ;;  %8611 = vmatprep.subr.bf16.mxu0 %v8943_v38  ;;  %5709 = vmatpush1.bf16.msra.mxu1 %v8944_v31 }
 0x259   : > { %v3761_v41 = vsel %vm12017_vm6, %v3653_v55, 0.0  ;;  %v4381_v30 = vrot.slane %v14353_v33, 3  ;;  %v12138_v24 = vor.u32 %v4322_v0, %v4321_v46  ;;  %v14873_v59 = vsel %vm14870_vm4, %v14871_v5, %v14872_v15  ;;  %v14878_v0 = vld [vmem:[#allocation92_spill] sm:$0xff]  ;;  %v14880_v15 = vld [vmem:[#allocation87_spill] sm:$0xff]  ;;  %5710 = vmatprep.subr.bf16.mxu1 %v11873_v42 }
 0x25a   : > { %v12132_v14 = vor.u32 %v4331_v16, %v4328_v50  ;;  %vm12145_vm7 = vcmp.lt.s32.totalorder %v14873_v59, 16  ;;  %v3762_v50 = vsel %vm12035_vm12, %v3654_v12, 0.0  ;;  %v4384_v16 = vrot.slane %v14876_v56, 4  ;;  %v14881_v59 = vld [vmem:[#allocation82_spill] sm:$0xff]  ;;  %vm14891_vm12 = vmmov %vm14865_vm0 }
 0x25b   : > { %v14877_v55 = vshrl.u32 %v12113_v11, 16  ;;  %v4406_v32 = vrot.slane %v14354_v60, 4  ;;  %vm14879_vm2 = vnez %v14878_v0  ;;  %v3788_v63 = vpack.c.bf16 %v3762_v50, %v3761_v41  ;;  %v8945_v0 = vld [vmem:[%s14215_s3 + $0x40] sm:$0xff]   ;;  %8612 = vmatpush3.bf16.msra.mxu0 %v8943_v38  ;;  %v8946_v38 = vld [vmem:[%s14215_s3 + $0x48] sm:$0xff]   ;;  %v14896_v11 = vld [vmem:[#allocation85_spill] sm:$0xff] }
 0x25c   : > { %v14882_v5 = vsel %vm14879_vm2, %v14880_v15, %v14881_v59  ;;  %v4333_v48 = vsel %vm4252_vm9, %v12005_v28, %v12132_v14  ;;  %v4324_v12 = vsel %vm4252_vm9, %v12045_v57, %v12138_v24  ;;  %v12173_v56 = vshrl.u32 %v11758_v20, 16  ;;  %5711 = vmatpush1.bf16.msra.mxu1 %v8945_v0  ;;  %vm14924_vm2 = vmmov %vm14893_vm5 }
 0x25d   : > { %v4403_v46 = vrot.slane %v14877_v55, 3  ;;  %vm12162_vm6 = vcmp.lt.s32.totalorder %v14882_v5, 16  ;;  %v12175_v55 = vpop.f32.mrb[160].mxu1  ;;  %4919 = vmatprep.mubr.bf16.mxu0 %v4333_v48  ;;  %v4385_v15 = vor.u32 %v4384_v16, %v4381_v30  ;;  %v12183_v28 = vshll.u32 %v11761_v9, 16  ;;  %v14887_v48 = vld [vmem:[#allocation73_spill] sm:$0xff]  ;;  %5712 = vmatprep.subr.bf16.mxu1 %v11873_v42 }
 0x25e   : > { %14885 = vst [vmem:[#allocation24_spill] sm:$0xff] %v12173_v56  ;;  %v2857_v41 = vadd.f32 %v11893_v39, %v2679_v34  ;;  %v2689_v57 = vpop.f32.mrb[161].mxu1  ;;  %v12187_v20 = vrot.slane %v3788_v63, 4  ;;  %4920 = vmatmul.mubr.bf16.gmra.mrb[152].mxu0 %v4324_v12  ;;  %v14886_v31 = vrot.slane %v12051_v21, 1  ;;  %v2860_v5 = vadd.f32 %v11923_v53, %v2682_v18  ;;  %v14889_v18 = vld [vmem:[#allocation75_spill] sm:$0xff] }
 0x25f   : > { %v12180_v59 = vor.u32 %v4406_v32, %v4403_v46  ;;  %v14355_v30 = vrot.slane %v11897_v17, 1  ;;  %v2690_v16 = vpop.f32.mrb[162].mxu1  ;;  %v8949_v46 = vld [vmem:[%s14215_s3 + $0xa8] sm:$0xff]   ;;  %v4386_v39 = vsel %vm4252_vm9, %v12056_v6, %v4385_v15  ;;  %v3960_v32 = vrot.slane %v12183_v28, 1 }
 0x260   : > { %v3956_v50 = vor.u32 %v12173_v56, %v14886_v31  ;;  %v2927_v63 = vadd.f32 %v2857_v41, %v14887_v48  ;;  %v2692_v12 = vpop.f32.mrb[163].mxu1  ;;  %v12206_v53 = vsel %vm14888_vm13, %v12054_v47, %v12187_v20  ;;  %8575 = vmatprep.mubr.bf16.mxu1 %v4386_v39  ;;  %v2928_v57 = vadd.f32 %v2860_v5, %v14889_v18  ;;  %v8954_v47 = vld [vmem:[%s14215_s3 + $0xb0] sm:$0xff]   ;;  %v14895_v48 = vld [vmem:[#allocation90_spill] sm:$0xff]  ;;  %vm14927_vm13 = vmmov %vm14912_vm11 }
 0x261   : > { %v4408_v34 = vsel %vm4252_vm9, %v4385_v15, %v12180_v59  ;;  %v14890_v6 = vrot.slane %v11830_v25, 1  ;;  %v4343_v31 = vrot.slane %v12173_v56, 3  ;;  %3879 = vst [vmem:[#allocation2 + $0x60] sm:$0xff] %v12206_v53  ;;  %8613 = vmatprep.subr.bf16.mxu0 %v8949_v46  ;;  %v12240_v60 = vshrl.u32 %v11761_v9, 16  ;;  %5713 = vmatpush1.bf16.msra.mxu1 %v8946_v38 }
 0x262   : > { %8576 = vmatmul.mubr.bf16.gmra.mrb[188].mxu1 %v4408_v34  ;;  %v12225_v41 = vsel %vm14893_vm5, %v3956_v50, %v3960_v32  ;;  %v3619_v5 = vadd.f32 %v11430_v40, %v2927_v63  ;;  %v3620_v18 = vadd.f32 %v11430_v40, %v2928_v57  ;;  %v14897_v12 = vsel %vm11342_vm3, %v14895_v48, %v14896_v11  ;;  %v12266_v48 = vpop.f32.mrb[164].mxu1  ;;  %v8951_v11 = vld [vmem:[%s14215_s3 + $0x68] sm:$0xff]  }
 0x263   : > { %v12214_v15 = vsel %vm14891_vm12, %v14890_v6, %v14355_v30  ;;  %v4344_v6 = vrot.slane %v12051_v21, 4  ;;  %vm12247_vm8 = vcmp.lt.s32.totalorder %v14897_v12, 16  ;;  %8614 = vmatpush3.bf16.msra.mxu0 %v8949_v46  ;;  %v14900_v57 = vshrl.u32 %v12225_v41, 16  ;;  %v14903_v30 = vld [vmem:[#allocation97_spill] sm:$0xff]  ;;  %v14904_v21 = vld [vmem:[#allocation88_spill] sm:$0xff]  ;;  %5714 = vmatprep.subr.bf16.mxu1 %v11873_v42 }
 0x264   : > { %14892 = vst [vmem:[#allocation35_spill] sm:$0xff] %v12214_v15  ;;  %v14358_v39 = vshrl.u32 %v12214_v15, 16  ;;  %v14361_v0 = vshll.u32 %v12214_v15, 16  ;;  %v3655_v34 = vmax.f32 %v3619_v5, 0.0  ;;  %v14905_v56 = vsel %vm11365_vm15, %v14903_v30, %v14904_v21  ;;  %v8947_v46 = vld [vmem:[%s14215_s3 + $0x50] sm:$0xff]   ;;  %8615 = vmatprep.subr.bf16.mxu0 %v8954_v47  ;;  %vm14909_vm15 = vmmov %vm14893_vm5 }
 0x265   : > { %v4350_v5 = vrot.slane %v14900_v57, 3  ;;  %v12255_v52 = vor.u32 %v4344_v6, %v4343_v31  ;;  %vm12262_vm3 = vcmp.lt.s32.totalorder %v14905_v56, 16  ;;  %v3964_v12 = vor.u32 %v12240_v60, %v3960_v32  ;;  %v2697_v56 = vpop.f32.mrb[165].mxu1  ;;  %v8955_v32 = vld [vmem:[%s14215_s3 + $0xb8] sm:$0xff]   ;;  %5715 = vmatpush1.bf16.msra.mxu1 %v8947_v46 }
 0x266   : > { %v4425_v50 = vrot.slane %v14358_v39, 3  ;;  %v4428_v63 = vrot.slane %v14361_v0, 4  ;;  %v14901_v39 = vshll.u32 %v12225_v41, 16  ;;  %v3656_v0 = vmax.f32 %v3620_v18, 0.0  ;;  %5716 = vmatprep.subr.bf16.mxu1 %v11873_v42 }
 0x267   : > { %v3763_v31 = vsel %vm12145_vm7, %v3655_v34, 0.0  ;;  %v12277_v21 = vshll.u32 %v11820_v22, 16  ;;  %v4346_v61 = vsel %vm4252_vm9, %v12138_v24, %v12255_v52  ;;  %v2865_v6 = vadd.f32 %v11880_v51, %v12175_v55  ;;  %v12289_v34 = vpop.f32.mrb[166].mxu1  ;;  %8616 = vmatpush3.bf16.msra.mxu0 %v8954_v47  ;;  %v14908_v24 = vld [vmem:[#allocation71_spill] sm:$0xff]  ;;  %v14910_v47 = vld [vmem:[#allocation74_spill] sm:$0xff] }
 0x268   : > { %v4353_v15 = vrot.slane %v14901_v39, 4  ;;  %v12273_v39 = vor.u32 %v4428_v63, %v4425_v50  ;;  %v3764_v38 = vsel %vm12162_vm6, %v3656_v0, 0.0  ;;  %v2868_v0 = vadd.f32 %v11915_v54, %v2690_v16  ;;  %v2700_v63 = vpop.f32.mrb[167].mxu1  ;;  %8617 = vmatprep.subr.bf16.mxu0 %v8955_v32  ;;  %vm14926_vm6 = vmmov %vm14865_vm0 }
 0x269   : > { %v3789_v50 = vpack.c.bf16 %v3764_v38, %v3763_v31  ;;  %v3968_v33 = vrot.slane %v12277_v21, 1  ;;  %v2929_v55 = vadd.f32 %v2865_v6, %v14908_v24  ;;  %v4099_v57 = vrot.slane %v11971_v8, 1  ;;  %v12321_v31 = vld [vmem:[%s14214_s2] ss:$0 sm:$0xff] }
 0x26a   : > { %v12280_v18 = vor.u32 %v4353_v15, %v4350_v5  ;;  %v4430_v15 = vsel %vm4252_vm9, %v12180_v59, %v12273_v39  ;;  %v4365_v5 = vrot.slane %v12240_v60, 3  ;;  %v8948_v59 = vld [vmem:[%s14215_s3 + $0x58] sm:$0xff]   ;;  %v4366_v9 = vrot.slane %v12183_v28, 4 }
 0x26b   : > { %8579 = vmatprep.mubr.bf16.mxu1 %v4430_v15  ;;  %v12308_v54 = vrot.slane %v3789_v50, 4  ;;  %v12311_v16 = vsel %vm14909_vm15, %v3964_v12, %v3968_v33  ;;  %v3621_v56 = vadd.f32 %v12321_v31, %v2929_v55  ;;  %v14911_v12 = vrot.slane %v11897_v17, 1  ;;  %8618 = vmatpush3.bf16.msra.mxu0 %v8955_v32  ;;  %v14914_v55 = vld [vmem:[#allocation4_spill] sm:$0xff]  ;;  %v12355_v32 = vpop.f32.mrb[168].mxu1  ;;  %vm14937_vm15 = vmmov %vm14924_vm2 }
 0x26c   : > { %v4355_v51 = vsel %vm4252_vm9, %v12132_v14, %v12280_v18  ;;  %v2930_v14 = vadd.f32 %v2868_v0, %v14910_v47  ;;  %v14366_v30 = vshrl.u32 %v12311_v16, 16  ;;  %v14393_v46 = vshll.u32 %v12311_v16, 16  ;;  %v14915_v47 = vld [vmem:[#allocation93_spill] sm:$0xff]  ;;  %5717 = vmatpush1.bf16.msra.mxu1 %v8948_v59  ;;  %6944 = vmatprep.subr.bf16.mxu0 %v11873_v42 }
 0x26d   : > { %4927 = vmatprep.mubr.bf16.mxu0 %v4355_v51  ;;  %v12329_v38 = vsel %vm14865_vm0, %v14911_v12, %v4099_v57  ;;  %v3657_v51 = vmax.f32 %v3621_v56, 0.0  ;;  %v12344_v24 = vor.u32 %v4366_v9, %v4365_v5  ;;  %5718 = vmatprep.subr.bf16.mxu1 %v11873_v42  ;;  %v2873_v40 = vadd.f32 %v11967_v49, %v12266_v48  ;;  %v14923_v48 = vld [vmem:[#allocation79_spill] sm:$0xff]  ;;  %v8953_v12 = vld [vmem:[%s14215_s3 + $0x78] sm:$0xff]  }
 0x26e   : > { %4928 = vmatmul.mubr.bf16.gmra.mrb[156].mxu0 %v4346_v61  ;;  %v12334_v61 = vsel %vm14912_vm11, %v12187_v20, %v12308_v54  ;;  %v3622_v6 = vadd.f32 %v12321_v31, %v2930_v14  ;;  %v14368_v50 = vshrl.u32 %v12329_v38, 16  ;;  %v14367_v15 = vshll.u32 %v12329_v38, 16 }
 0x26f   : > { %3880 = vst [vmem:[#allocation2 + $0x68] sm:$0xff] %v12334_v61  ;;  %v4372_v0 = vrot.slane %v14366_v30, 3  ;;  %v4375_v63 = vrot.slane %v14393_v46, 4  ;;  %v14916_v14 = vsel %vm11418_vm14, %v14914_v55, %v14915_v47  ;;  %v8950_v30 = vld [vmem:[%s14215_s3 + $0x60] sm:$0xff]   ;;  %v12366_v20 = vshrl.u32 %v11820_v22, 16  ;;  %v2705_v47 = vpop.f32.mrb[169].mxu1 }
 0x270   : > { %vm12351_vm4 = vcmp.lt.s32.totalorder %v14916_v14, 16  ;;  %v3658_v5 = vmax.f32 %v3622_v6, 0.0  ;;  %v4447_v9 = vrot.slane %v14368_v50, 3  ;;  %v4450_v56 = vrot.slane %v14367_v15, 4  ;;  %5719 = vmatpush1.bf16.msra.mxu1 %v8950_v30 }
 0x271   : > { %vm14919_vm14 = vnez %v14670_v37  ;;  %v12378_v6 = vor.u32 %v4375_v63, %v4372_v0  ;;  %v3765_v14 = vsel %vm12247_vm8, %v3657_v51, 0.0  ;;  %v4368_v22 = vsel %vm4252_vm9, %v12255_v52, %v12344_v24  ;;  %5720 = vmatprep.subr.bf16.mxu1 %v11873_v42 }
 0x272   : > { %v14920_v59 = vsel %vm14919_vm14, %v11423_v10, %v11313_v3  ;;  %v12386_v37 = vshll.u32 %v11830_v25, 16  ;;  %v12388_v3 = vpop.f32.mrb[170].mxu1  ;;  %v3766_v10 = vsel %vm12262_vm3, %v3658_v5, 0.0  ;;  %v3972_v0 = vor.u32 %v12366_v20, %v3968_v33  ;;  %vm14950_vm14 = vmmov %vm14924_vm2 }
 0x273   : > { %vm12373_vm7 = vcmp.lt.s32.totalorder %v14920_v59, 16  ;;  %v12392_v59 = vor.u32 %v4450_v56, %v4447_v9  ;;  %v2708_v63 = vpop.f32.mrb[171].mxu1  ;;  %v4377_v52 = vsel %vm4252_vm9, %v12280_v18, %v12378_v6  ;;  %v3790_v51 = vpack.c.bf16 %v3766_v10, %v3765_v14 }
 0x274   : > { %v3976_v47 = vrot.slane %v12386_v37, 1  ;;  %v2876_v15 = vadd.f32 %v11994_v19, %v12289_v34  ;;  %4935 = vmatprep.mubr.bf16.mxu0 %v4377_v52  ;;  %v2931_v33 = vadd.f32 %v2873_v40, %v14923_v48  ;;  %v4101_v18 = vrot.slane %v12077_v2, 1  ;;  %v14925_v34 = vld [vmem:[#allocation83_spill] sm:$0xff]  ;;  %v12438_v52 = vpop.f32.mrb[172].mxu1  ;;  %5721 = vmatpush1.bf16.msra.mxu1 %v8951_v11 }
 0x275   : > { %v4452_v49 = vsel %vm4252_vm9, %v12273_v39, %v12392_v59  ;;  %v4387_v5 = vrot.slane %v12366_v20, 3  ;;  %v12413_v9 = vrot.slane %v3790_v51, 4  ;;  %v4388_v56 = vrot.slane %v12277_v21, 4  ;;  %v8952_v51 = vld [vmem:[%s14215_s3 + $0x70] sm:$0xff]   ;;  %5722 = vmatprep.subr.bf16.mxu1 %v11873_v42 }
 0x276   : > { %8580 = vmatmul.mubr.bf16.gmra.mrb[192].mxu1 %v4452_v49  ;;  %4936 = vmatmul.mubr.bf16.gmra.mrb[160].mxu0 %v4368_v22  ;;  %v12416_v19 = vsel %vm14924_vm2, %v3972_v0, %v3976_v47  ;;  %v2932_v30 = vadd.f32 %v2876_v15, %v14925_v34  ;;  %v3623_v10 = vadd.f32 %v12321_v31, %v2931_v33  ;;  %v2713_v34 = vpop.f32.mrb[173].mxu1 }
 0x277   : > { %v14392_v39 = vshrl.u32 %v12416_v19, 16  ;;  %v14391_v14 = vshll.u32 %v12416_v19, 16  ;;  %v12428_v40 = vsel %vm14926_vm6, %v4099_v57, %v4101_v18  ;;  %v12433_v22 = vsel %vm14927_vm13, %v12308_v54, %v12413_v9  ;;  %vm14963_vm13 = vmmov %vm14865_vm0 }
 0x278   : > { %v3624_v15 = vadd.f32 %v12321_v31, %v2932_v30  ;;  %v14372_v0 = vshrl.u32 %v12428_v40, 16  ;;  %v14369_v63 = vshll.u32 %v12428_v40, 16  ;;  %3881 = vst [vmem:[#allocation2 + $0x70] sm:$0xff] %v12433_v22  ;;  %v3659_v49 = vmax.f32 %v3623_v10, 0.0  ;;  %5723 = vmatpush1.bf16.msra.mxu1 %v8952_v51 }
 0x279   : > { %v4394_v57 = vrot.slane %v14392_v39, 3  ;;  %v4397_v54 = vrot.slane %v14391_v14, 4  ;;  %v12448_v48 = vor.u32 %v4388_v56, %v4387_v5  ;;  %vm14928_vm12 = vnez %v14675_v35  ;;  %v12476_v35 = vpop.f32.mrb[174].mxu1  ;;  %5724 = vmatprep.subr.bf16.mxu1 %v11873_v42 }
 0x27a   : > { %v14929_v11 = vsel %vm14928_vm12, %v11448_v43, %v11332_v44  ;;  %v3660_v30 = vmax.f32 %v3624_v15, 0.0  ;;  %v4469_v50 = vrot.slane %v14372_v0, 3  ;;  %v4472_v5 = vrot.slane %v14369_v63, 4 }
 0x27b   : > { %vm12455_vm5 = vcmp.lt.s32.totalorder %v14929_v11, 16  ;;  %v12465_v56 = vshrl.u32 %v11830_v25, 16  ;;  %vm14932_vm8 = vnez %v14680_v36  ;;  %v4398_v10 = vor.u32 %v4397_v54, %v4394_v57  ;;  %v2716_v36 = vpop.f32.mrb[175].mxu1 }
 0x27c   : > { %v14933_v43 = vsel %vm14932_vm8, %v11462_v1, %v11371_v23  ;;  %v3767_v15 = vsel %vm12351_vm4, %v3659_v49, 0.0  ;;  %v4390_v25 = vsel %vm4252_vm9, %v12344_v24, %v12448_v48  ;;  %v12484_v11 = vshll.u32 %v11897_v17, 16  ;;  %5725 = vmatpush1.bf16.msra.mxu1 %v8953_v12 }
 0x27d   : > { %vm12472_vm3 = vcmp.lt.s32.totalorder %v14933_v43, 16  ;;  %v3768_v1 = vsel %vm12373_vm7, %v3660_v30, 0.0  ;;  %v4473_v23 = vor.u32 %v4472_v5, %v4469_v50  ;;  %v3980_v34 = vor.u32 %v12465_v56, %v3976_v47  ;;  %vm14953_vm7 = vmmov %vm14912_vm11 }
 0x27e   : > { %v2881_v57 = vadd.f32 %v11957_v62, %v12355_v32  ;;  %v4399_v24 = vsel %vm4252_vm9, %v12378_v6, %v4398_v10  ;;  %v3791_v54 = vpack.c.bf16 %v3768_v1, %v3767_v15  ;;  %v3984_v49 = vrot.slane %v12484_v11, 1  ;;  %v12503_v62 = vld [vmem:[%s14215_s3 + $0x200] sm:$0xff]   ;;  %v12523_v1 = vpop.f32.mrb[176].mxu1  ;;  %vm14960_vm6 = vmmov %vm14953_vm7 }
 0x27f   : > { %v2884_v55 = vadd.f32 %v11983_v45, %v12388_v3  ;;  %4943 = vmatprep.mubr.bf16.mxu0 %v4399_v24  ;;  %v4474_v50 = vsel %vm4252_vm9, %v12392_v59, %v4473_v23  ;;  %v14936_v32 = vld [vmem:[#allocation78_spill] sm:$0xff]  ;;  %v4103_v6 = vrot.slane %v12206_v53, 1  ;;  %v4409_v51 = vrot.slane %v12465_v56, 3  ;;  %v14938_v45 = vld [vmem:[#allocation80_spill] sm:$0xff]  ;;  %8655 = vmatprep.subr.bf16.mxu1 %v12503_v62 }
 0x280   : > { %v2933_v47 = vadd.f32 %v2881_v57, %v14936_v32  ;;  %v3841_v30 = vrot.slane %v3791_v54, 4  ;;  %8583 = vmatprep.mubr.bf16.mxu1 %v4474_v50  ;;  %4944 = vmatmul.mubr.bf16.gmra.mrb[164].mxu0 %v4390_v25  ;;  %v12511_v42 = vsel %vm14937_vm15, %v3980_v34, %v3984_v49  ;;  %v4410_v5 = vrot.slane %v12386_v37, 4  ;;  %v2721_v54 = vpop.f32.mrb[177].mxu1  ;;  %v14939_v50 = vld [vmem:[#allocation10_spill] sm:$0xff] }
 0x281   : > { %v2934_v3 = vadd.f32 %v2884_v55, %v14938_v45  ;;  %v14389_v43 = vshrl.u32 %v12511_v42, 16  ;;  %v14388_v59 = vshll.u32 %v12511_v42, 16  ;;  %v12521_v36 = vsel %vm14865_vm0, %v4101_v18, %v4103_v6  ;;  %v12547_v45 = vpop.f32.mrb[178].mxu1 }
 0x282   : > { %v3625_v15 = vadd.f32 %v12321_v31, %v2933_v47  ;;  %v12527_v25 = vsel %vm14912_vm11, %v12413_v9, %v3841_v30  ;;  %v14371_v57 = vshrl.u32 %v12521_v36, 16  ;;  %v14370_v24 = vshll.u32 %v12521_v36, 16  ;;  %v2724_v4 = vpop.f32.mrb[179].mxu1 }
 0x283   : > { %v3626_v34 = vadd.f32 %v12321_v31, %v2934_v3  ;;  %3882 = vst [vmem:[#allocation2 + $0x78] sm:$0xff] %v12527_v25  ;;  %v4416_v18 = vrot.slane %v14389_v43, 3  ;;  %v4419_v12 = vrot.slane %v14388_v59, 4  ;;  %v4411_v9 = vor.u32 %v4410_v5, %v4409_v51  ;;  %v14943_v4 = vld [vmem:[#allocation91_spill] sm:$0xff] }
 0x284   : > { %v3661_v55 = vmax.f32 %v3625_v15, 0.0  ;;  %v14940_v32 = vsel %vm11566_vm1, %v11554_v7, %v14939_v50  ;;  %v4491_v54 = vrot.slane %v14371_v57, 3  ;;  %v4494_v63 = vrot.slane %v14370_v24, 4 }
 0x285   : > { %vm12543_vm4 = vcmp.lt.s32.totalorder %v14940_v32, 16  ;;  %v3662_v3 = vmax.f32 %v3626_v34, 0.0  ;;  %v12554_v51 = vshrl.u32 %v11897_v17, 16  ;;  %v4420_v5 = vor.u32 %v4419_v12, %v4416_v18 }
 0x286   : > { %v3769_v7 = vsel %vm12455_vm5, %v3661_v55, 0.0  ;;  %v4412_v15 = vsel %vm4252_vm9, %v12448_v48, %v4411_v9  ;;  %v12561_v50 = vshll.u32 %v11971_v8, 16  ;;  %v4495_v32 = vor.u32 %v4494_v63, %v4491_v54  ;;  %v14945_v63 = vld [vmem:[#allocation16_spill] sm:$0xff] }
 0x287   : > { %v3770_v34 = vsel %vm12472_vm3, %v3662_v3, 0.0  ;;  %v3988_v24 = vor.u32 %v12554_v51, %v3984_v49  ;;  %v2889_v17 = vadd.f32 %v12069_v29, %v12438_v52  ;;  %v4421_v18 = vsel %vm4252_vm9, %v4398_v10, %v4420_v5  ;;  %v14946_v49 = vld [vmem:[#allocation14_spill] sm:$0xff]  ;;  %v14954_v29 = vld [vmem:[#allocation89_spill] sm:$0xff] }
 0x288   : > { %v3792_v12 = vpack.c.bf16 %v3770_v34, %v3769_v7  ;;  %v3992_v33 = vrot.slane %v12561_v50, 1  ;;  %v2892_v48 = vadd.f32 %v12098_v13, %v12476_v35  ;;  %4951 = vmatprep.mubr.bf16.mxu0 %v4421_v18  ;;  %v4496_v55 = vsel %vm4252_vm9, %v4473_v23, %v4495_v32  ;;  %v14951_v35 = vld [vmem:[#allocation95_spill] sm:$0xff] }
 0x289   : > { %v2935_v44 = vadd.f32 %v2889_v17, %v14943_v4  ;;  %v14947_v54 = vsel %vm11656_vm10, %v14945_v63, %v14946_v49  ;;  %v4105_v52 = vrot.slane %v12334_v61, 1  ;;  %8584 = vmatmul.mubr.bf16.gmra.mrb[196].mxu1 %v4496_v55  ;;  %4952 = vmatmul.mubr.bf16.gmra.mrb[168].mxu0 %v4412_v15  ;;  %v4431_v7 = vrot.slane %v12554_v51, 3  ;;  %vm14952_vm10 = vmmov %vm14865_vm0 }
 0x28a   : > { %vm12579_vm1 = vcmp.lt.s32.totalorder %v14947_v54, 16  ;;  %v3843_v10 = vrot.slane %v3792_v12, 4  ;;  %v12585_v13 = vsel %vm14950_vm14, %v3988_v24, %v3992_v33  ;;  %v2936_v23 = vadd.f32 %v2892_v48, %v14951_v35  ;;  %vm14967_vm14 = vmmov %vm14952_vm10 }
 0x28b   : > { %v14384_v34 = vshrl.u32 %v12585_v13, 16  ;;  %v14377_v17 = vshll.u32 %v12585_v13, 16  ;;  %v3627_v18 = vadd.f32 %v12321_v31, %v2935_v44  ;;  %v12595_v4 = vsel %vm14952_vm10, %v4103_v6, %v4105_v52 }
 0x28c   : > { %v12598_v15 = vsel %vm14953_vm7, %v3841_v30, %v3843_v10  ;;  %v3628_v24 = vadd.f32 %v12321_v31, %v2936_v23  ;;  %v14373_v12 = vshrl.u32 %v12595_v4, 16  ;;  %v14374_v48 = vshll.u32 %v12595_v4, 16  ;;  %vm14970_vm7 = vmmov %vm14960_vm6 }
 0x28d   : > { %3883 = vst [vmem:[#allocation2 + $0x80] sm:$0xff] %v12598_v15  ;;  %v4438_v55 = vrot.slane %v14384_v34, 3  ;;  %v4441_v44 = vrot.slane %v14377_v17, 4  ;;  %v3663_v3 = vmax.f32 %v3627_v18, 0.0  ;;  %v4432_v6 = vrot.slane %v12484_v11, 4 }
 0x28e   : > { %v3664_v63 = vmax.f32 %v3628_v24, 0.0  ;;  %v4513_v30 = vrot.slane %v14373_v12, 3  ;;  %v4516_v49 = vrot.slane %v14374_v48, 4  ;;  %v12614_v54 = vshrl.u32 %v11971_v8, 16 }
 0x28f   : > { %v4442_v35 = vor.u32 %v4441_v44, %v4438_v55  ;;  %v3771_v23 = vsel %vm12543_vm4, %v3663_v3, 0.0  ;;  %v4433_v57 = vor.u32 %v4432_v6, %v4431_v7  ;;  %v12619_v0 = vshll.u32 %v12077_v2, 16  ;;  %v14955_v6 = vld [vmem:[#allocation22_spill] sm:$0xff] }
 0x290   : > { %v3772_v18 = vsel %vm12579_vm1, %v3664_v63, 0.0  ;;  %v12623_v24 = vor.u32 %v4516_v49, %v4513_v30  ;;  %v3996_v12 = vor.u32 %v12614_v54, %v3992_v33  ;;  %v2897_v48 = vadd.f32 %v12059_v58, %v12523_v1  ;;  %v14956_v1 = vld [vmem:[#allocation7_spill] sm:$0xff]  ;;  %vm14966_vm1 = vmmov %vm14924_vm2 }
 0x291   : > { %v4443_v8 = vsel %vm4252_vm9, %v4420_v5, %v4442_v35  ;;  %v3793_v55 = vpack.c.bf16 %v3772_v18, %v3771_v23  ;;  %v4434_v47 = vsel %vm4252_vm9, %v4411_v9, %v4433_v57  ;;  %v4000_v7 = vrot.slane %v12619_v0, 1  ;;  %v14957_v23 = vld [vmem:[#allocation76_spill] sm:$0xff]  ;;  %vm14968_vm10 = vmmov %vm14966_vm1 }
 0x292   : > { %4959 = vmatprep.mubr.bf16.mxu0 %v4443_v8  ;;  %v4518_v44 = vsel %vm4252_vm9, %v4495_v32, %v12623_v24  ;;  %v2937_v3 = vadd.f32 %v2897_v48, %v14954_v29  ;;  %v3356_v63 = vshrl.u32 %v14955_v6, 4  ;;  %v2900_v33 = vadd.f32 %v12084_v27, %v12547_v45  ;;  %v14959_v8 = vld [vmem:[#allocation86_spill] sm:$0xff] }
 0x293   : > { %v12637_v30 = vrot.slane %v3793_v55, 4  ;;  %8587 = vmatprep.mubr.bf16.mxu1 %v4518_v44  ;;  %4960 = vmatmul.mubr.bf16.gmra.mrb[172].mxu0 %v4434_v47  ;;  %v12640_v58 = vsel %vm14924_vm2, %v3996_v12, %v4000_v7  ;;  %v12643_v9 = vmul.u32.u64.low 3817748708, %v14956_v1  ;;  %v12644_v5 = vmul.u32.u64.high 3817748708, %v14956_v1, %v12643_v9  ;;  %v14961_v55 = vld [vmem:[#allocation94_spill] sm:$0xff]  ;;  %vm14971_vm2 = vmmov %vm14963_vm13 }
 0x294   : > { %v14376_v32 = vshrl.u32 %v12640_v58, 16  ;;  %v14375_v48 = vshll.u32 %v12640_v58, 16  ;;  %v3357_v49 = vmul.u32 18, %v3356_v63  ;;  %v14958_v18 = vshrl.u32 %v14957_v23, 16  ;;  %v14962_v63 = vld [vmem:[#allocation6_spill] sm:$0xff] }
 0x295   : > { %v12655_v45 = vsel %vm14960_vm6, %v3843_v10, %v12637_v30  ;;  %v3629_v12 = vadd.f32 %v12321_v31, %v2937_v3  ;;  %v2938_v47 = vadd.f32 %v2900_v33, %v14961_v55  ;;  %v4107_v44 = vrot.slane %v12433_v22, 1  ;;  %vm14974_vm6 = vmmov %vm14971_vm2 }
 0x296   : > { %v12651_v27 = vor.u32 %v14959_v8, %v14958_v18  ;;  %3884 = vst [vmem:[#allocation2 + $0x88] sm:$0xff] %v12655_v45  ;;  %v4460_v29 = vrot.slane %v14376_v32, 3  ;;  %v4463_v6 = vrot.slane %v14375_v48, 4  ;;  %v3358_v9 = vsub.s32 %v14962_v63, %v3357_v49 }
 0x297   : > { %v4453_v23 = vrot.slane %v12614_v54, 3  ;;  %v3367_v10 = vshrl.u32 %v12644_v5, 4  ;;  %v3630_v3 = vadd.f32 %v12321_v31, %v2938_v47  ;;  %v12672_v33 = vsel %vm14963_vm13, %v4105_v52, %v4107_v44  ;;  %vm14977_vm13 = vmmov %vm14966_vm1 }
 0x298   : > { %v4454_v18 = vrot.slane %v12561_v50, 4  ;;  %v12675_v8 = vor.u32 %v4463_v6, %v4460_v29  ;;  %vm3406_vm12 = vcmp.ne.s32.totalorder %v3358_v9, 0  ;;  %vm3442_vm5 = vcmp.lt.s32.totalorder %v3358_v9, 0 }
 0x299   : > { %v3514_v55 = vadd.s32 18, %v3358_v9  ;;  %vm3478_vm8 = vmand %vm3442_vm5, %vm3406_vm12  ;;  %v3665_v49 = vmax.f32 %v3629_v12, 0.0  ;;  %v3368_v63 = vmul.u32 18, %v3367_v10  ;;  %v14379_v48 = vshrl.u32 %v12672_v33, 16 }
 0x29a   : > { %v14378_v5 = vshll.u32 %v12672_v33, 16  ;;  %v4465_v31 = vsel %vm4252_vm9, %v4442_v35, %v12675_v8  ;;  %v4455_v52 = vor.u32 %v4454_v18, %v4453_v23  ;;  %v12682_v32 = vshrl.u32 %v12077_v2, 16  ;;  %vm14980_vm12 = vmmov %vm14966_vm1 }
 0x29b   : > { %v3550_v47 = vsel %vm3478_vm8, %v3514_v55, %v3358_v9  ;;  %4967 = vmatprep.mubr.bf16.mxu0 %v4465_v31  ;;  %v3369_v29 = vsub.s32 %v14956_v1, %v3368_v63  ;;  %v3666_v6 = vmax.f32 %v3630_v3, 0.0  ;;  %v4535_v12 = vrot.slane %v14379_v48, 3  ;;  %vm14982_vm5 = vmmov %vm14971_vm2 }
 0x29c   : > { %v4538_v10 = vrot.slane %v14378_v5, 4  ;;  %vm3586_vm3 = vcmp.lt.s32.totalorder %v3550_v47, 16  ;;  %v4456_v17 = vsel %vm4252_vm9, %v4433_v57, %v4455_v52  ;;  %v4004_v35 = vor.u32 %v12682_v32, %v4000_v7  ;;  %vm14983_vm8 = vmmov %vm14971_vm2 }
 0x29d   : > { %v12692_v9 = vshll.u32 %v12206_v53, 16  ;;  %vm3407_vm15 = vcmp.ne.s32.totalorder %v3369_v29, 0  ;;  %vm3443_vm0 = vcmp.lt.s32.totalorder %v3369_v29, 0  ;;  %v3515_v2 = vadd.s32 18, %v3369_v29  ;;  %4968 = vmatmul.mubr.bf16.gmra.mrb[176].mxu0 %v4456_v17 }
 0x29e   : > { %v4539_v23 = vor.u32 %v4538_v10, %v4535_v12  ;;  %vm3479_vm11 = vmand %vm3443_vm0, %vm3407_vm15  ;;  %v4109_v3 = vrot.slane %v12527_v25, 1  ;;  %v4475_v18 = vrot.slane %v12682_v32, 3  ;;  %v4476_v55 = vrot.slane %v12619_v0, 4 }
 0x29f   : > { %14964 = vst [vmem:[#allocation46_spill] sm:$0xff] %v12692_v9  ;;  %v4008_v1 = vrot.slane %v12692_v9, 1  ;;  %v3773_v57 = vsel %vm3586_vm3, %v3665_v49, 0.0  ;;  %v3551_v63 = vsel %vm3479_vm11, %v3515_v2, %v3369_v29  ;;  %v12701_v31 = vshll.u32 %v12334_v61, 16  ;;  %vm14986_vm3 = vmmov %vm14966_vm1 }
 0x2a0   : > { %v4540_v7 = vsel %vm4252_vm9, %v12623_v24, %v4539_v23  ;;  %vm3587_vm4 = vcmp.lt.s32.totalorder %v3551_v63, 16  ;;  %v12707_v47 = vsel %vm14967_vm14, %v4107_v44, %v4109_v3  ;;  %v12710_v12 = vshrl.u32 %v12206_v53, 16  ;;  %vm14988_vm15 = vmmov %vm14966_vm1 }
 0x2a1   : > { %14965 = vst [vmem:[#allocation43_spill] sm:$0xff] %v12701_v31  ;;  %8588 = vmatmul.mubr.bf16.gmra.mrb[200].mxu1 %v4540_v7  ;;  %v12704_v17 = vsel %vm14966_vm1, %v4004_v35, %v4008_v1  ;;  %v3774_v10 = vsel %vm3587_vm4, %v3666_v6, 0.0  ;;  %v14382_v24 = vshrl.u32 %v12707_v47, 16  ;;  %v14383_v63 = vshll.u32 %v12707_v47, 16  ;;  %vm14990_vm11 = vmmov %vm14966_vm1 }
 0x2a2   : > { %v14380_v49 = vshrl.u32 %v12704_v17, 16  ;;  %v14381_v29 = vshll.u32 %v12704_v17, 16  ;;  %v3794_v2 = vpack.c.bf16 %v3774_v10, %v3773_v57  ;;  %v4477_v7 = vor.u32 %v4476_v55, %v4475_v18  ;;  %vm14995_vm4 = vmmov %vm14966_vm1 }
 0x2a3   : > { %v4012_v35 = vor.u32 %v12710_v12, %v4008_v1  ;;  %v4557_v6 = vrot.slane %v14382_v24, 3  ;;  %v4016_v5 = vrot.slane %v12701_v31, 1  ;;  %v4560_v57 = vrot.slane %v14383_v63, 4  ;;  %vm15005_vm14 = vmmov %vm14966_vm1 }
 0x2a4   : > { %v4482_v44 = vrot.slane %v14380_v49, 3  ;;  %v4485_v53 = vrot.slane %v14381_v29, 4  ;;  %v3847_v48 = vrot.slane %v3794_v2, 4  ;;  %v4111_v10 = vrot.slane %v12598_v15, 1 }
 0x2a5   : > { %v4497_v18 = vrot.slane %v12710_v12, 3  ;;  %v12729_v55 = vsel %vm14968_vm10, %v4012_v35, %v4016_v5  ;;  %v4498_v49 = vrot.slane %v12692_v9, 4  ;;  %v12733_v29 = vshrl.u32 %v12334_v61, 16  ;;  %vm15014_vm10 = vmmov %vm14971_vm2 }
 0x2a6   : > { %v4486_v1 = vor.u32 %v4485_v53, %v4482_v44  ;;  %v12737_v24 = vsel %vm14970_vm7, %v12637_v30, %v3847_v48  ;;  %3886 = vst [vmem:[#allocation2 + $0x98] sm:$0xf] %v3847_v48  ;;  %v4561_v2 = vor.u32 %v4560_v57, %v4557_v6  ;;  %v14386_v63 = vshrl.u32 %v12729_v55, 16  ;;  %vm15016_vm7 = vmmov %vm14971_vm2 }
 0x2a7   : > { %14969 = vst [vmem:[#allocation38_spill] sm:$0xff] %v12733_v29  ;;  %v14385_v34 = vshll.u32 %v12729_v55, 16  ;;  %3885 = vst [vmem:[#allocation2 + $0x90] sm:$0xff] %v12737_v24  ;;  %v4478_v44 = vsel %vm4252_vm9, %v4455_v52, %v4477_v7  ;;  %v12746_v61 = vsel %vm14971_vm2, %v4109_v3, %v4111_v10  ;;  %v4499_v53 = vor.u32 %v4498_v49, %v4497_v18 }
 0x2a8   : > { %v4487_v35 = vsel %vm4252_vm9, %v12675_v8, %v4486_v1  ;;  %v4562_v30 = vsel %vm4252_vm9, %v4539_v23, %v4561_v2  ;;  %v4504_v48 = vrot.slane %v14386_v63, 3  ;;  %v14387_v57 = vshrl.u32 %v12746_v61, 16 }
 0x2a9   : > { %4975 = vmatprep.mubr.bf16.mxu0 %v4487_v35  ;;  %v4507_v6 = vrot.slane %v14385_v34, 4  ;;  %8591 = vmatprep.mubr.bf16.mxu1 %v4562_v30  ;;  %v14390_v8 = vshll.u32 %v12746_v61, 16  ;;  %v4020_v52 = vor.u32 %v12733_v29, %v4016_v5  ;;  %v12757_v3 = vshll.u32 %v12433_v22, 16 }
 0x2aa   : > { %4976 = vmatmul.mubr.bf16.gmra.mrb[180].mxu0 %v4478_v44  ;;  %v12760_v49 = vrot.slane %v12655_v45, 1  ;;  %v4579_v18 = vrot.slane %v14387_v57, 3  ;;  %v4519_v35 = vrot.slane %v12733_v29, 3  ;;  %v4520_v34 = vrot.slane %v12701_v31, 4 }
 0x2ab   : > { %14972 = vst [vmem:[#allocation36_spill] sm:$0xff] %v12757_v3  ;;  %v4508_v23 = vor.u32 %v4507_v6, %v4504_v48  ;;  %v4582_v44 = vrot.slane %v14390_v8, 4  ;;  %v4500_v30 = vsel %vm4252_vm9, %v4477_v7, %v4499_v53  ;;  %v4024_v5 = vrot.slane %v12757_v3, 1 }
 0x2ac   : > { %14973 = vst [vmem:[#allocation37_spill] sm:$0xff] %v12760_v49  ;;  %v12772_v63 = vsel %vm14974_vm6, %v4111_v10, %v12760_v49  ;;  %v12778_v59 = vshrl.u32 %v12433_v22, 16  ;;  %v4521_v7 = vor.u32 %v4520_v34, %v4519_v35  ;;  %v12784_v14 = vshll.u32 %v12527_v25, 16  ;;  %vm15084_vm6 = vmmov %vm14966_vm1 }
 0x2ad   : > { %14975 = vst [vmem:[#allocation39_spill] sm:$0xff] %v12772_v63  ;;  %v4509_v48 = vsel %vm4252_vm9, %v4486_v1, %v4508_v23  ;;  %v14395_v6 = vshrl.u32 %v12772_v63, 16  ;;  %v14396_v57 = vshll.u32 %v12772_v63, 16  ;;  %v4583_v43 = vor.u32 %v4582_v44, %v4579_v18  ;;  %v4169_v10 = vld [vmem:[#allocation2 + $0x98] sm:$0x1f] }
 0x2ae   : > { %14976 = vst [vmem:[#allocation41_spill] sm:$0xff] %v12778_v59  ;;  %4983 = vmatprep.mubr.bf16.mxu0 %v4509_v48  ;;  %v12781_v8 = vsel %vm14977_vm13, %v4020_v52, %v4024_v5  ;;  %14979 = vst [vmem:[#allocation48_spill] sm:$0xff] %v12784_v14  ;;  %v4028_v52 = vor.u32 %v12778_v59, %v4024_v5  ;;  %v4032_v34 = vrot.slane %v12784_v14, 1  ;;  %v4199_v35 = vrot.slane %v12737_v24, 1 }
 0x2af   : > { %14978 = vst [vmem:[#allocation53_spill] sm:$0xff] %v12781_v8  ;;  %v14400_v39 = vshrl.u32 %v12781_v8, 16  ;;  %v14401_v1 = vshll.u32 %v12781_v8, 16  ;;  %v4601_v46 = vrot.slane %v14395_v6, 3  ;;  %v4604_v22 = vrot.slane %v14396_v57, 4 }
 0x2b0   : > { %v4584_v18 = vsel %vm4252_vm9, %v4561_v2, %v4583_v43  ;;  %v4201_v6 = vrot.slane %v4169_v10, 1  ;;  %v12801_v57 = vsel %vm14980_vm12, %v4028_v52, %v4032_v34  ;;  %v4200_v2 = vsel %vm14982_vm5, %v12760_v49, %v4199_v35  ;;  %vm15090_vm12 = vmmov %vm14966_vm1 }
 0x2b1   : > { %8592 = vmatmul.mubr.bf16.gmra.mrb[204].mxu1 %v4584_v18  ;;  %v4526_v44 = vrot.slane %v14400_v39, 3  ;;  %v4529_v48 = vrot.slane %v14401_v1, 4  ;;  %v4605_v31 = vor.u32 %v4604_v22, %v4601_v46  ;;  %14981 = vst [vmem:[#allocation42_spill] sm:$0xff] %v12801_v57  ;;  %v4541_v5 = vrot.slane %v12778_v59, 3  ;;  %vm15095_vm5 = vmmov %vm14966_vm1 }
 0x2b2   : > { %4984 = vmatmul.mubr.bf16.gmra.mrb[184].mxu0 %v4500_v30  ;;  %v4542_v29 = vrot.slane %v12757_v3, 4  ;;  %v14407_v39 = vshrl.u32 %v12801_v57, 16  ;;  %v14410_v1 = vshll.u32 %v12801_v57, 16  ;;  %v4522_v46 = vsel %vm4252_vm9, %v4499_v53, %v4521_v7  ;;  %v12819_v53 = vld [vmem:[#allocation2 + $0x8] sm:$0xff] }
 0x2b3   : > { %v4530_v18 = vor.u32 %v4529_v48, %v4526_v44  ;;  %v4606_v63 = vsel %vm4252_vm9, %v4583_v43, %v4605_v31  ;;  %v4621_v30 = vshrl.u32 %v4200_v2, 16  ;;  %v4624_v10 = vshll.u32 %v4200_v2, 16 }
 0x2b4   : > { %8595 = vmatprep.mubr.bf16.mxu1 %v4606_v63  ;;  %v4202_v22 = vsel %vm14983_vm8, %v4199_v35, %v4201_v6  ;;  %v4548_v59 = vrot.slane %v14407_v39, 3  ;;  %v4551_v44 = vrot.slane %v14410_v1, 4  ;;  %v12817_v63 = vor.u32 %v4542_v29, %v4541_v5  ;;  %vm15097_vm8 = vmmov %vm14966_vm1 }
 0x2b5   : > { %v4531_v52 = vsel %vm4252_vm9, %v4508_v23, %v4530_v18  ;;  %v4643_v43 = vshrl.u32 %v4202_v22, 16  ;;  %v4623_v48 = vrot.slane %v4621_v30, 3  ;;  %v4626_v3 = vrot.slane %v4624_v10, 4 }
 0x2b6   : > { %4991 = vmatprep.mubr.bf16.mxu0 %v4531_v52  ;;  %v4646_v8 = vshll.u32 %v4202_v22, 16  ;;  %v4552_v2 = vor.u32 %v4551_v44, %v4548_v59  ;;  %v12822_v35 = vshrl.u32 %v12527_v25, 16  ;;  %v12825_v23 = vshll.u32 %v12598_v15, 16 }
 0x2b7   : > { %v4645_v49 = vrot.slane %v4643_v43, 3  ;;  %v4627_v39 = vor.u32 %v4626_v3, %v4623_v48  ;;  %v4665_v1 = vshrl.u32 %v4201_v6, 16  ;;  %v4668_v9 = vshll.u32 %v4201_v6, 16 }
 0x2b8   : > { %14984 = vst [vmem:[#allocation50_spill] sm:$0xff] %v12822_v35  ;;  %14985 = vst [vmem:[#allocation47_spill] sm:$0xff] %v12825_v23  ;;  %v4648_v57 = vrot.slane %v4646_v8, 4  ;;  %v4553_v30 = vsel %vm4252_vm9, %v4530_v18, %v4552_v2  ;;  %v4036_v10 = vor.u32 %v12822_v35, %v4032_v34  ;;  %v4040_v29 = vrot.slane %v12825_v23, 1 }
 0x2b9   : > { %v3918_v5 = vshll.u32 %v12819_v53, 16  ;;  %v4628_v59 = vsel %vm4252_vm9, %v4605_v31, %v4627_v39  ;;  %v4667_v22 = vrot.slane %v4665_v1, 3  ;;  %v4670_v52 = vrot.slane %v4668_v9, 4 }
 0x2ba   : > { %4992 = vmatmul.mubr.bf16.gmra.mrb[188].mxu0 %v4522_v46  ;;  %v4649_v25 = vor.u32 %v4648_v57, %v4645_v49  ;;  %8596 = vmatmul.mubr.bf16.gmra.mrb[208].mxu1 %v4628_v59  ;;  %v4544_v8 = vsel %vm4252_vm9, %v4521_v7, %v12817_v63  ;;  %v12835_v3 = vsel %vm14986_vm3, %v4036_v10, %v4040_v29  ;;  %v3922_v34 = vshrl.u32 %v12819_v53, 16  ;;  %vm15100_vm3 = vmmov %vm14966_vm1 }
 0x2bb   : > { %4999 = vmatprep.mubr.bf16.mxu0 %v4553_v30  ;;  %14987 = vst [vmem:[#allocation40_spill] sm:$0xff] %v12835_v3  ;;  %v3920_v6 = vrot.slane %v3918_v5, 1  ;;  %v14413_v46 = vshrl.u32 %v12835_v3, 16  ;;  %v14415_v31 = vshll.u32 %v12835_v3, 16  ;;  %v4671_v57 = vor.u32 %v4670_v52, %v4667_v22  ;;  %v14989_v30 = vld [vmem:[#allocation8_spill] sm:$0xff] }
 0x2bc   : > { %v4650_v18 = vsel %vm4252_vm9, %v4627_v39, %v4649_v25  ;;  %v4563_v7 = vrot.slane %v12822_v35, 3  ;;  %v4564_v1 = vrot.slane %v12784_v14, 4  ;;  %vm5225_vm0 = vsmask.f32 5376  ;;  %v3889_v22 = vld [vmem:[#allocation2] sm:$0xfc] }
 0x2bd   : > { %8599 = vmatprep.mubr.bf16.mxu1 %v4650_v18  ;;  %v3921_v9 = vsel %vm14988_vm15, %v12651_v27, %v3920_v6  ;;  %v3924_v49 = vor.u32 %v3922_v34, %v3920_v6  ;;  %v4570_v44 = vrot.slane %v14413_v46, 3  ;;  %v4573_v39 = vrot.slane %v14415_v31, 4  ;;  %vm15103_vm15 = vmmov %vm14966_vm1 }
 0x2be   : > { %v5239_v43 = vshrl.u32 %v3921_v9, 16  ;;  %v4672_v48 = vsel %vm4252_vm9, %v4649_v25, %v4671_v57  ;;  %v5242_v59 = vshll.u32 %v3921_v9, 16  ;;  %v12853_v27 = vshrl.u32 %v12598_v15, 16 }
 0x2bf   : > { %v3929_v10 = vsel %vm14990_vm11, %v3924_v49, %v14989_v30  ;;  %v4574_v52 = vor.u32 %v4573_v39, %v4570_v44  ;;  %v4565_v35 = vor.u32 %v4564_v1, %v4563_v7  ;;  %v12857_v3 = vshll.u32 %v12655_v45, 16  ;;  %vm15104_vm11 = vmmov %vm15016_vm7 }
 0x2c0   : > { %14991 = vst [vmem:[#allocation54_spill] sm:$0xff] %v12853_v27  ;;  %v5241_v6 = vrot.slane %v5239_v43, 2  ;;  %v5247_v18 = vshrl.u32 %v3929_v10, 16  ;;  %v5250_v14 = vshll.u32 %v3929_v10, 16  ;;  %v5244_v46 = vrot.slane %v5242_v59, 3 }
 0x2c1   : > { %v4044_v31 = vor.u32 %v12853_v27, %v4040_v29  ;;  %14992 = vst [vmem:[#allocation64_spill] sm:$0xff] %v12857_v3  ;;  %v4575_v25 = vsel %vm4252_vm9, %v4552_v2, %v4574_v52  ;;  %v5227_v49 = vshrl.u32 %v3889_v22, 16  ;;  %v4048_v44 = vrot.slane %v12857_v3, 1  ;;  %v14993_v29 = vld [vmem:[#allocation25_spill] sm:$0xff] }
 0x2c2   : > { %5000 = vmatmul.mubr.bf16.gmra.mrb[192].mxu0 %v4544_v8  ;;  %v5249_v57 = vrot.slane %v5247_v18, 2  ;;  %v5252_v9 = vrot.slane %v5250_v14, 3  ;;  %8600 = vmatmul.mubr.bf16.gmra.mrb[212].mxu1 %v4672_v48  ;;  %v5245_v15 = vor.u32 %v5244_v46, %v5241_v6  ;;  %v5230_v39 = vshll.u32 %v3889_v22, 16 }
 0x2c3   : > { %5007 = vmatprep.mubr.bf16.mxu0 %v4575_v25  ;;  %v5234_v43 = vrot.slane %v3922_v34, 2  ;;  %v5229_v7 = vrot.slane %v5227_v49, 2  ;;  %v5235_v1 = vrot.slane %v3918_v5, 3  ;;  %v14994_v10 = vshrl.u32 %v14993_v29, 16 }
 0x2c4   : > { %v5253_v30 = vor.u32 %v5252_v9, %v5249_v57  ;;  %v12864_v8 = vsel %vm14995_vm4, %v4044_v31, %v4048_v44  ;;  %v5232_v2 = vrot.slane %v5230_v39, 3  ;;  %v14996_v14 = vshll.u32 %v14993_v29, 16  ;;  %v8961_v29 = vld [vmem:[%s14215_s3 + $0x208] sm:$0xff]   ;;  %vm15105_vm4 = vmmov %vm15016_vm7 }
 0x2c5   : > { %v5276_v59 = vrot.slane %v14994_v10, 2  ;;  %v4585_v48 = vrot.slane %v12853_v27, 3  ;;  %v14419_v22 = vshrl.u32 %v12864_v8, 16  ;;  %v14418_v34 = vshll.u32 %v12864_v8, 16 }
 0x2c6   : > { %v5277_v18 = vrot.slane %v14996_v14, 3  ;;  %v5254_v46 = vsel %vm5225_vm0, %v5245_v15, %v5253_v30  ;;  %v5236_v6 = vor.u32 %v5235_v1, %v5234_v43  ;;  %v5233_v5 = vor.u32 %v5232_v2, %v5229_v7  ;;  %v14998_v7 = vld [vmem:[#allocation15_spill] sm:$0xff]  ;;  %v15000_v14 = vld [vmem:[#allocation18_spill] sm:$0xff] }
 0x2c7   : > { %5726 = vmatprep.mubr.bf16.mxu1 %v5254_v46  ;;  %v4586_v57 = vrot.slane %v12825_v23, 4  ;;  %v4592_v31 = vrot.slane %v14419_v22, 3  ;;  %v4595_v9 = vrot.slane %v14418_v34, 4  ;;  %v12878_v49 = vshrl.u32 %v12655_v45, 16  ;;  %v15001_v46 = vld [vmem:[#allocation26_spill] sm:$0xff]  ;;  %v15004_v23 = vld [vmem:[#allocation20_spill] sm:$0xff] }
 0x2c8   : > { %v5278_v25 = vor.u32 %v5277_v18, %v5276_v59  ;;  %v14420_v15 = vshll.u32 %v12737_v24, 16  ;;  %v4566_v39 = vsel %vm4252_vm9, %v12817_v63, %v4565_v35  ;;  %v5237_v43 = vsel %vm5225_vm0, %v5233_v5, %v5236_v6 }
 0x2c9   : > { %14997 = vst [vmem:[#allocation55_spill] sm:$0xff] %v12878_v49  ;;  %v5272_v1 = vrot.slane %v14998_v7, 2  ;;  %v4596_v10 = vor.u32 %v4595_v9, %v4592_v31  ;;  %v12888_v59 = vor.u32 %v4586_v57, %v4585_v48  ;;  %v12891_v45 = vor.u32 %v12878_v49, %v4048_v44  ;;  %v12901_v31 = vld [vmem:[#allocation2 + $0x98] sm:$0xf]  ;;  %v8966_v9 = vld [vmem:[%s14215_s3 + $0x210] sm:$0xff]  }
 0x2ca   : > { %5008 = vmatmul.mubr.bf16.gmra.mrb[196].mxu0 %v4566_v39  ;;  %v4181_v2 = vrot.slane %v14420_v15, 1  ;;  %5727 = vmatmul.mubr.bf16.vlgmr.msra.gmra.mrb[216].mxu1 %v5237_v43  ;;  %v5279_v63 = vsel %vm5225_vm0, %v5253_v30, %v5278_v25  ;;  %v5273_v18 = vrot.slane %v15000_v14, 3  ;;  %v15002_v5 = vshrl.u32 %v15001_v46, 16 }
 0x2cb   : > { %14999 = vst [vmem:[#allocation51_spill] sm:$0xff] %v12891_v45  ;;  %v15003_v34 = vshll.u32 %v15001_v46, 16  ;;  %v4597_v48 = vsel %vm4252_vm9, %v4574_v52, %v4596_v10  ;;  %5734 = vmatprep.mubr.bf16.mxu1 %v5279_v63  ;;  %8656 = vmatpush3.bf16.msra.mxu1 %v12503_v62  ;;  %v4183_v43 = vshrl.u32 %v12737_v24, 16  ;;  %v14424_v52 = vshll.u32 %v12901_v31, 16 }
 0x2cc   : > { %v5288_v7 = vrot.slane %v15002_v5, 2  ;;  %v4182_v44 = vsel %vm14966_vm1, %v12891_v45, %v4181_v2  ;;  %5015 = vmatprep.mubr.bf16.mxu0 %v4597_v48  ;;  %8657 = vmatprep.subr.bf16.mxu1 %v8961_v29  ;;  %v5274_v46 = vor.u32 %v5273_v18, %v5272_v1  ;;  %v4607_v62 = vrot.slane %v12878_v49, 3  ;;  %v15006_v18 = vld [vmem:[#allocation34_spill] sm:$0xff] }
 0x2cd   : > { %v5289_v39 = vrot.slane %v15003_v34, 3  ;;  %v4612_v30 = vshrl.u32 %v4182_v44, 16  ;;  %v4615_v57 = vshll.u32 %v4182_v44, 16  ;;  %v4588_v34 = vsel %vm4252_vm9, %v4565_v35, %v12888_v59 }
 0x2ce   : > { %v4608_v48 = vrot.slane %v12857_v3, 4  ;;  %v4185_v44 = vor.u32 %v4183_v43, %v4181_v2  ;;  %v4189_v22 = vrot.slane %v14424_v52, 1  ;;  %v5275_v35 = vsel %vm5225_vm0, %v5236_v6, %v5274_v46  ;;  %v8971_v6 = vld [vmem:[%s14215_s3 + $0x218] sm:$0xff]  }
 0x2cf   : > { %v4614_v63 = vrot.slane %v4612_v30, 3  ;;  %v4617_v14 = vrot.slane %v4615_v57, 4  ;;  %v5290_v5 = vor.u32 %v5289_v39, %v5288_v7  ;;  %8658 = vmatpush3.bf16.msra.mxu1 %v8961_v29  ;;  %v5284_v27 = vrot.slane %v15004_v23, 2 }
 0x2d0   : > { %v5285_v45 = vrot.slane %v11824_v26, 3  ;;  %8659 = vmatprep.subr.bf16.mxu1 %v8966_v9  ;;  %v4190_v1 = vsel %vm15005_vm14, %v4185_v44, %v4189_v22  ;;  %v15007_v7 = vshrl.u32 %v15006_v18, 16  ;;  %v15008_v2 = vshll.u32 %v15006_v18, 16 }
 0x2d1   : > { %v4618_v15 = vor.u32 %v4617_v14, %v4614_v63  ;;  %v4191_v57 = vshrl.u32 %v12901_v31, 16  ;;  %v5291_v26 = vsel %vm5225_vm0, %v5278_v25, %v5290_v5  ;;  %v4634_v29 = vshrl.u32 %v4190_v1, 16  ;;  %v9001_v25 = vld [vmem:[#allocation2] sm:$0xf8] }
 0x2d2   : > { %5016 = vmatmul.mubr.bf16.gmra.mrb[200].mxu0 %v4588_v34  ;;  %v5300_v39 = vrot.slane %v15007_v7, 2  ;;  %v5301_v30 = vrot.slane %v15008_v2, 3  ;;  %5735 = vmatmul.mubr.bf16.gmra.mrb[220].mxu1 %v5275_v35  ;;  %v4637_v34 = vshll.u32 %v4190_v1, 16  ;;  %v4609_v63 = vor.u32 %v4608_v48, %v4607_v62 }
 0x2d3   : > { %v4619_v23 = vsel %vm4252_vm9, %v4596_v10, %v4618_v15  ;;  %5742 = vmatprep.mubr.bf16.mxu1 %v5291_v26  ;;  %v4193_v14 = vor.u32 %v4191_v57, %v4189_v22  ;;  %v4636_v44 = vrot.slane %v4634_v29, 3  ;;  %8660 = vmatpush3.bf16.msra.mxu1 %v8966_v9  ;;  %v5286_v7 = vor.u32 %v5285_v45, %v5284_v27  ;;  %v8976_v10 = vld [vmem:[%s14215_s3 + $0x220] sm:$0xff]  }
 0x2d4   : > { %5023 = vmatprep.mubr.bf16.mxu0 %v4619_v23  ;;  %v4639_v18 = vrot.slane %v4637_v34, 4  ;;  %v5302_v2 = vor.u32 %v5301_v30, %v5300_v39  ;;  %8661 = vmatprep.subr.bf16.mxu1 %v8971_v6  ;;  %v4080_v49 = vrot.slane %v9001_v25, 1  ;;  %v4610_v1 = vsel %vm4252_vm9, %v12888_v59, %v4609_v63  ;;  %v15010_v9 = vld [vmem:[#allocation30_spill] sm:$0xff]  ;;  %v15011_v30 = vld [vmem:[#allocation31_spill] sm:$0xff] }
 0x2d5   : > { %v4656_v52 = vshrl.u32 %v4193_v14, 16  ;;  %v4659_v3 = vshll.u32 %v4193_v14, 16  ;;  %v4629_v62 = vrot.slane %v4183_v43, 3  ;;  %v15009_v22 = vshll.u32 %v12737_v24, 16  ;;  %v8977_v24 = vld [vmem:[%s14215_s3 + $0x228] sm:$0xff]  }
 0x2d6   : > { %v4640_v35 = vor.u32 %v4639_v18, %v4636_v44  ;;  %v5296_v27 = vrot.slane %v15010_v9, 2  ;;  %v5297_v23 = vrot.slane %v15011_v30, 3  ;;  %v4081_v26 = vrot.slane %v12819_v53, 1 }
 0x2d7   : > { %v4630_v48 = vrot.slane %v15009_v22, 4  ;;  %v4658_v45 = vrot.slane %v4656_v52, 3  ;;  %v4661_v39 = vrot.slane %v4659_v3, 4  ;;  %8662 = vmatpush3.bf16.msra.mxu1 %v8971_v6  ;;  %v5287_v34 = vsel %vm5225_vm0, %v5274_v46, %v5286_v7 }
 0x2d8   : > { %v4641_v29 = vsel %vm4252_vm9, %v4618_v15, %v4640_v35  ;;  %v5303_v59 = vsel %vm5225_vm0, %v5290_v5, %v5302_v2  ;;  %8663 = vmatprep.subr.bf16.mxu1 %v8976_v10  ;;  %v15012_v3 = vshrl.u32 %v12225_v41, 16  ;;  %v15013_v53 = vshll.u32 %v12225_v41, 16  ;;  %v15015_v15 = vld [vmem:[#allocation21_spill] sm:$0xff]  ;;  %v8978_v41 = vld [vmem:[%s14215_s3 + $0x230] sm:$0xff]  }
 0x2d9   : > { %v4082_v6 = vsel %vm15014_vm10, %v4080_v49, %v4081_v26  ;;  %v4084_v46 = vsel %vm15016_vm7, %v4081_v26, %v15015_v15  ;;  %v4631_v5 = vor.u32 %v4630_v48, %v4629_v62  ;;  %v4662_v14 = vor.u32 %v4661_v39, %v4658_v45  ;;  %v15018_v48 = vld [vmem:[#allocation24_spill] sm:$0xff] }
 0x2da   : > { %5024 = vmatmul.mubr.bf16.gmra.mrb[204].mxu0 %v4610_v1  ;;  %5743 = vmatmul.mubr.bf16.gmra.mrb[224].mxu1 %v5287_v34  ;;  %v5312_v43 = vrot.slane %v15012_v3, 2  ;;  %v5313_v52 = vrot.slane %v15013_v53, 3  ;;  %v5298_v44 = vor.u32 %v5297_v23, %v5296_v27  ;;  %v5256_v18 = vshrl.u32 %v4082_v6, 16  ;;  %v15019_v45 = vld [vmem:[#allocation32_spill] sm:$0xff] }
 0x2db   : > { %5031 = vmatprep.mubr.bf16.mxu0 %v4641_v29  ;;  %5750 = vmatprep.mubr.bf16.mxu1 %v5303_v59  ;;  %v5259_v25 = vshll.u32 %v4082_v6, 16  ;;  %v5264_v1 = vshrl.u32 %v4084_v46, 16  ;;  %v5267_v22 = vshll.u32 %v4084_v46, 16  ;;  %v4632_v49 = vsel %vm4252_vm9, %v4609_v63, %v4631_v5 }
 0x2dc   : > { %8664 = vmatpush3.bf16.msra.mxu1 %v8976_v10  ;;  %v5314_v9 = vor.u32 %v5313_v52, %v5312_v43  ;;  %v4651_v30 = vrot.slane %v4191_v57, 3  ;;  %v15017_v26 = vshll.u32 %v12901_v31, 16  ;;  %v4663_v62 = vsel %vm4252_vm9, %v4640_v35, %v4662_v14  ;;  %v8979_v31 = vld [vmem:[%s14215_s3 + $0x238] sm:$0xff]  }
 0x2dd   : > { %8665 = vmatprep.subr.bf16.mxu1 %v8977_v24  ;;  %v5299_v10 = vsel %vm5225_vm0, %v5286_v7, %v5298_v44  ;;  %v5308_v27 = vrot.slane %v15018_v48, 2  ;;  %v5309_v39 = vrot.slane %v15019_v45, 3  ;;  %v5258_v23 = vrot.slane %v5256_v18, 2  ;;  %v15022_v14 = vld [vmem:[#allocation17_spill] sm:$0xff] }
 0x2de   : > { %v4652_v29 = vrot.slane %v15017_v26, 4  ;;  %v5261_v34 = vrot.slane %v5259_v25, 3  ;;  %v5266_v59 = vrot.slane %v5264_v1, 2  ;;  %v5269_v3 = vrot.slane %v5267_v22, 3 }
 0x2df   : > { %v5315_v57 = vsel %vm5225_vm0, %v5302_v2, %v5314_v9  ;;  %v15020_v63 = vshrl.u32 %v12311_v16, 16  ;;  %v15021_v35 = vshll.u32 %v12311_v16, 16  ;;  %v5310_v6 = vor.u32 %v5309_v39, %v5308_v27 }
 0x2e0   : > { %8666 = vmatpush3.bf16.msra.mxu1 %v8977_v24  ;;  %v4653_v43 = vor.u32 %v4652_v29, %v4651_v30  ;;  %v5262_v53 = vor.u32 %v5261_v34, %v5258_v23  ;;  %v5270_v52 = vor.u32 %v5269_v3, %v5266_v59  ;;  %v15023_v18 = vshrl.u32 %v15022_v14, 16  ;;  %v8957_v34 = vld [vmem:[%s14215_s3 + $0x180] sm:$0xff]  }
 0x2e1   : > { %8667 = vmatprep.subr.bf16.mxu1 %v8978_v41  ;;  %v5324_v7 = vrot.slane %v15020_v63, 2  ;;  %v5325_v24 = vrot.slane %v15021_v35, 3  ;;  %v15024_v2 = vshll.u32 %v15022_v14, 16  ;;  %v5311_v22 = vsel %vm5225_vm0, %v5298_v44, %v5310_v6 }
 0x2e2   : > { %5032 = vmatmul.mubr.bf16.gmra.mrb[208].mxu0 %v4632_v49  ;;  %5751 = vmatmul.mubr.bf16.gmra.mrb[228].mxu1 %v5299_v10  ;;  %v4654_v46 = vsel %vm4252_vm9, %v4631_v5, %v4653_v43  ;;  %v5280_v25 = vrot.slane %v15023_v18, 2  ;;  %v5271_v16 = vsel %vm5225_vm0, %v5262_v53, %v5270_v52  ;;  %v5321_v10 = vrot.slane %v12183_v28, 3  ;;  %vm15071_vm9 = vmmov %vm14971_vm2 }
 0x2e3   : > { %5039 = vmatprep.mubr.bf16.mxu0 %v4663_v62  ;;  %5758 = vmatprep.mubr.bf16.mxu1 %v5315_v57  ;;  %v5326_v15 = vor.u32 %v5325_v24, %v5324_v7  ;;  %v5281_v1 = vrot.slane %v15024_v2, 3  ;;  %v5320_v62 = vrot.slane %v12240_v60, 2  ;;  %v15028_v48 = vshrl.u32 %v12416_v19, 16  ;;  %v15030_v60 = vld [vmem:[#allocation23_spill] sm:$0xff]  ;;  %vm15083_vm2 = vmmov %vm14966_vm1 }
 0x2e4   : > { %8668 = vmatpush3.bf16.msra.mxu1 %v8978_v41  ;;  %v15025_v41 = vld [vmem:[#allocation28_spill] sm:$0xff]  ;;  %v15029_v44 = vshll.u32 %v12416_v19, 16  ;;  %v15032_v57 = vshll.u32 %v15030_v60, 16  ;;  %v15033_v7 = vld [vmem:[#allocation27_spill] sm:$0xff]  ;;  %v5332_v14 = vrot.slane %v12366_v20, 2  ;;  %v5333_v18 = vrot.slane %v12277_v21, 3  ;;  %vm15106_vm1 = vmmov %vm15105_vm4 }
 0x2e5   : > { %8669 = vmatprep.subr.bf16.mxu1 %v8979_v31  ;;  %v15026_v49 = vshrl.u32 %v15025_v41, 16  ;;  %v15027_v26 = vshll.u32 %v15025_v41, 16  ;;  %v5327_v5 = vsel %vm5225_vm0, %v5314_v9, %v5326_v15  ;;  %v5336_v27 = vrot.slane %v15028_v48, 2  ;;  %v8959_v21 = vld [vmem:[%s14215_s3 + $0x190] sm:$0xff]   ;;  %v15041_v48 = vld [vmem:[#allocation29_spill] sm:$0xff]  ;;  %vm15107_vm14 = vmmov %vm15083_vm2 }
 0x2e6   : > { %v5337_v45 = vrot.slane %v15029_v44, 3  ;;  %v5282_v39 = vor.u32 %v5281_v1, %v5280_v25  ;;  %v5322_v59 = vor.u32 %v5321_v10, %v5320_v62  ;;  %v5305_v63 = vrot.slane %v15032_v57, 3  ;;  %v13010_v25 = vld [vmem:[#allocation2] sm:$0xff]  ;;  %vm15108_vm10 = vmmov %vm15106_vm1 }
 0x2e7   : > { %v5292_v30 = vrot.slane %v15026_v49, 2  ;;  %v5293_v29 = vrot.slane %v15027_v26, 3  ;;  %v15034_v35 = vshrl.u32 %v15033_v7, 16  ;;  %v15035_v43 = vshll.u32 %v15033_v7, 16  ;;  %v15038_v26 = vld [vmem:[#allocation33_spill] sm:$0xff]  ;;  %vm15109_vm7 = vmmov %vm15106_vm1 }
 0x2e8   : > { %8670 = vmatpush3.bf16.msra.mxu1 %v8979_v31  ;;  %v5338_v3 = vor.u32 %v5337_v45, %v5336_v27  ;;  %v5283_v9 = vsel %vm5225_vm0, %v5270_v52, %v5282_v39  ;;  %v15031_v31 = vshrl.u32 %v15030_v60, 16  ;;  %v8958_v52 = vld [vmem:[%s14215_s3 + $0x188] sm:$0xff]   ;;  %v15036_v1 = vshrl.u32 %v12511_v42, 16 }
 0x2e9   : > { %v5294_v23 = vor.u32 %v5293_v29, %v5292_v30  ;;  %v5316_v24 = vrot.slane %v15034_v35, 2  ;;  %v5317_v53 = vrot.slane %v15035_v43, 3  ;;  %v5334_v20 = vor.u32 %v5333_v18, %v5332_v14 }
 0x2ea   : > { %5040 = vmatmul.mubr.bf16.gmra.mrb[212].mxu0 %v4654_v46  ;;  %5759 = vmatmul.mubr.bf16.gmra.mrb[232].mxu1 %v5311_v22  ;;  %v5304_v28 = vrot.slane %v15031_v31, 2  ;;  %v5323_v46 = vsel %vm5225_vm0, %v5310_v6, %v5322_v59  ;;  %v5339_v2 = vsel %vm5225_vm0, %v5326_v15, %v5338_v3  ;;  %v15037_v6 = vshll.u32 %v12511_v42, 16 }
 0x2eb   : > { %8619 = vmatprep.mubr.bf16.mxu0 %v5271_v16  ;;  %5766 = vmatprep.mubr.bf16.mxu1 %v5327_v5  ;;  %v5295_v19 = vsel %vm5225_vm0, %v5282_v39, %v5294_v23  ;;  %v5348_v16 = vrot.slane %v15036_v1, 2  ;;  %v5318_v49 = vor.u32 %v5317_v53, %v5316_v24  ;;  %v15039_v29 = vshrl.u32 %v15038_v26, 16  ;;  %v15046_v24 = vld [vmem:[#allocation35_spill] sm:$0xff] }
 0x2ec   : > { %v5349_v22 = vrot.slane %v15037_v6, 3  ;;  %v5306_v41 = vor.u32 %v5305_v63, %v5304_v28  ;;  %v15040_v42 = vshll.u32 %v15038_v26, 16  ;;  %v15042_v27 = vshrl.u32 %v15041_v48, 16  ;;  %v8963_v6 = vld [vmem:[%s14215_s3 + $0x1a8] sm:$0xff]  }
 0x2ed   : > { %v5328_v5 = vrot.slane %v15039_v29, 2  ;;  %v15043_v45 = vshll.u32 %v15041_v48, 16  ;;  %v5345_v60 = vrot.slane %v12386_v37, 3  ;;  %v15044_v28 = vshrl.u32 %v12585_v13, 16 }
 0x2ee   : > { %v5350_v30 = vor.u32 %v5349_v22, %v5348_v16  ;;  %v5307_v15 = vsel %vm5225_vm0, %v5294_v23, %v5306_v41  ;;  %v5329_v62 = vrot.slane %v15040_v42, 3  ;;  %v5319_v10 = vsel %vm5225_vm0, %v5306_v41, %v5318_v49  ;;  %v8960_v23 = vld [vmem:[%s14215_s3 + $0x198] sm:$0xff]  }
 0x2ef   : > { %v5340_v44 = vrot.slane %v15042_v27, 2  ;;  %v5341_v39 = vrot.slane %v15043_v45, 3  ;;  %v5360_v57 = vrot.slane %v15044_v28, 2  ;;  %v15045_v63 = vshll.u32 %v12585_v13, 16 }
 0x2f0   : > { %v5351_v31 = vsel %vm5225_vm0, %v5338_v3, %v5350_v30  ;;  %v15047_v43 = vshrl.u32 %v15046_v24, 16  ;;  %v15048_v13 = vshll.u32 %v15046_v24, 16  ;;  %v15049_v14 = vshrl.u32 %v12329_v38, 16 }
 0x2f1   : > { %v5342_v7 = vor.u32 %v5341_v39, %v5340_v44  ;;  %v5356_v22 = vrot.slane %v12554_v51, 2  ;;  %v5357_v41 = vrot.slane %v12484_v11, 3  ;;  %v8964_v51 = vld [vmem:[%s14215_s3 + $0x1b0] sm:$0xff]   ;;  %v15053_v42 = vshrl.u32 %v12428_v40, 16 }
 0x2f2   : > { %8620 = vmatmul.mubr.bf16.vlgmr.msra.gmra.mrb[216].mxu0 %v5283_v9  ;;  %5767 = vmatmul.mubr.bf16.gmra.mrb[236].mxu1 %v5323_v46  ;;  %v5344_v9 = vrot.slane %v12465_v56, 2  ;;  %v8962_v56 = vld [vmem:[%s14215_s3 + $0x1a0] sm:$0xff]   ;;  %v5352_v53 = vrot.slane %v15047_v43, 2  ;;  %v5353_v46 = vrot.slane %v15048_v13, 3  ;;  %v5364_v18 = vrot.slane %v15049_v14, 2 }
 0x2f3   : > { %8623 = vmatprep.mubr.bf16.mxu0 %v5295_v19  ;;  %6945 = vmatpush1.bf16.msra.mxu0 %v8957_v34  ;;  %v5335_v34 = vsel %vm5225_vm0, %v5322_v59, %v5334_v20  ;;  %v5361_v19 = vrot.slane %v15045_v63, 3  ;;  %v5330_v59 = vor.u32 %v5329_v62, %v5328_v5  ;;  %v5358_v11 = vor.u32 %v5357_v41, %v5356_v22  ;;  %v13126_v22 = vld [vmem:[#allocation2 + $0x18] sm:$0xff] }
 0x2f4   : > { %6946 = vmatprep.subr.bf16.mxu0 %v13010_v25  ;;  %5774 = vmatprep.mubr.bf16.mxu1 %v5339_v2  ;;  %v5346_v37 = vor.u32 %v5345_v60, %v5344_v9  ;;  %v15050_v2 = vshll.u32 %v12329_v38, 16  ;;  %v15051_v38 = vshrl.u32 %v12640_v58, 16  ;;  %v5376_v62 = vrot.slane %v15053_v42, 2 }
 0x2f5   : > { %v5362_v3 = vor.u32 %v5361_v19, %v5360_v57  ;;  %v5331_v35 = vsel %vm5225_vm0, %v5318_v49, %v5330_v59  ;;  %v15055_v27 = vshrl.u32 %v12521_v36, 16  ;;  %v15056_v45 = vshll.u32 %v12521_v36, 16 }
 0x2f6   : > { %v5365_v1 = vrot.slane %v15050_v2, 3  ;;  %v5347_v16 = vsel %vm5225_vm0, %v5334_v20, %v5346_v37  ;;  %v5354_v20 = vor.u32 %v5353_v46, %v5352_v53  ;;  %v5369_v9 = vrot.slane %v12561_v50, 3 }
 0x2f7   : > { %6947 = vmatpush1.bf16.msra.mxu0 %v8958_v52  ;;  %v5343_v52 = vsel %vm5225_vm0, %v5330_v59, %v5342_v7  ;;  %v5363_v49 = vsel %vm5225_vm0, %v5350_v30, %v5362_v3  ;;  %v5388_v44 = vrot.slane %v15055_v27, 2  ;;  %v5389_v39 = vrot.slane %v15056_v45, 3 }
 0x2f8   : > { %6948 = vmatprep.subr.bf16.mxu0 %v13010_v25  ;;  %v5366_v29 = vor.u32 %v5365_v1, %v5364_v18  ;;  %v5355_v5 = vsel %vm5225_vm0, %v5342_v7, %v5354_v20  ;;  %v15057_v36 = vshrl.u32 %v12704_v17, 16  ;;  %v15058_v28 = vshll.u32 %v12704_v17, 16  ;;  %v8967_v7 = vld [vmem:[%s14215_s3 + $0x1c0] sm:$0xff]  }
 0x2f9   : > { %v5390_v19 = vor.u32 %v5389_v39, %v5388_v44  ;;  %v5380_v59 = vrot.slane %v12682_v32, 2  ;;  %v15061_v24 = vshrl.u32 %v12672_v33, 16  ;;  %v15063_v13 = vshrl.u32 %v12729_v55, 16  ;;  %v15069_v44 = vld [vmem:[#allocation46_spill] sm:$0xff]  ;;  %v15070_v39 = vld [vmem:[#allocation37_spill] sm:$0xff] }
 0x2fa   : > { %8624 = vmatmul.mubr.bf16.gmra.mrb[220].mxu0 %v5307_v15  ;;  %5775 = vmatmul.mubr.bf16.gmra.mrb[240].mxu1 %v5335_v34  ;;  %v15052_v15 = vshll.u32 %v12640_v58, 16  ;;  %v15054_v58 = vshll.u32 %v12428_v40, 16  ;;  %v5367_v48 = vsel %vm5225_vm0, %v5354_v20, %v5366_v29  ;;  %v5359_v34 = vsel %vm5225_vm0, %v5346_v37, %v5358_v11 }
 0x2fb   : > { %8627 = vmatprep.mubr.bf16.mxu0 %v5319_v10  ;;  %6949 = vmatpush1.bf16.msra.mxu0 %v8959_v21  ;;  %v5372_v21 = vrot.slane %v15051_v38, 2  ;;  %v5368_v40 = vrot.slane %v12614_v54, 2  ;;  %v5385_v57 = vrot.slane %v15058_v28, 3  ;;  %v5381_v54 = vrot.slane %v12619_v0, 3  ;;  %v13132_v38 = vld [vmem:[#allocation2 + $0x10] sm:$0xe0] }
 0x2fc   : > { %6950 = vmatprep.subr.bf16.mxu0 %v13010_v25  ;;  %5782 = vmatprep.mubr.bf16.mxu1 %v5351_v31  ;;  %v5373_v26 = vrot.slane %v15052_v15, 3  ;;  %v5377_v10 = vrot.slane %v15054_v58, 3  ;;  %v5384_v31 = vrot.slane %v15057_v36, 2  ;;  %v5412_v32 = vrot.slane %v15061_v24, 2  ;;  %v8969_v15 = vld [vmem:[%s14215_s3 + $0x1d0] sm:$0xff]  }
 0x2fd   : > { %v5370_v50 = vor.u32 %v5369_v9, %v5368_v40  ;;  %v15062_v0 = vshll.u32 %v12672_v33, 16  ;;  %v5396_v46 = vrot.slane %v15063_v13, 2  ;;  %v13116_v2 = vor.u32 %v5381_v54, %v5380_v59  ;;  %v8968_v33 = vld [vmem:[%s14215_s3 + $0x1c8] sm:$0xff]   ;;  %v15072_v40 = vld [vmem:[#allocation53_spill] sm:$0xff] }
 0x2fe   : > { %v5374_v30 = vor.u32 %v5373_v26, %v5372_v21  ;;  %v5378_v63 = vor.u32 %v5377_v10, %v5376_v62  ;;  %v5386_v17 = vor.u32 %v5385_v57, %v5384_v31  ;;  %v15065_v26 = vshrl.u32 %v12707_v47, 16  ;;  %v15075_v31 = vld [vmem:[#allocation39_spill] sm:$0xff]  ;;  %v8970_v54 = vld [vmem:[%s14215_s3 + $0x1d8] sm:$0xff]  }
 0x2ff   : > { %6951 = vmatpush1.bf16.msra.mxu0 %v8960_v23  ;;  %v8965_v23 = vld [vmem:[%s14215_s3 + $0x1b8] sm:$0xff]   ;;  %v5413_v43 = vrot.slane %v15062_v0, 3  ;;  %v5371_v1 = vsel %vm5225_vm0, %v5358_v11, %v5370_v50  ;;  %v5383_v21 = vsel %vm5225_vm0, %v5370_v50, %v13116_v2  ;;  %v15067_v11 = vshrl.u32 %v12746_v61, 16  ;;  %v15078_v50 = vld [vmem:[#allocation38_spill] sm:$0xff] }
 0x300   : > { %6952 = vmatprep.subr.bf16.mxu0 %v13010_v25  ;;  %v5375_v60 = vsel %vm5225_vm0, %v5362_v3, %v5374_v30  ;;  %v15060_v3 = vshll.u32 %v12595_v4, 16  ;;  %v5379_v53 = vsel %vm5225_vm0, %v5366_v29, %v5378_v63  ;;  %v5391_v18 = vsel %vm5225_vm0, %v5378_v63, %v5390_v19 }
 0x301   : > { %v5424_v20 = vrot.slane %v15065_v26, 2  ;;  %v15066_v29 = vshll.u32 %v12707_v47, 16  ;;  %v15068_v58 = vshll.u32 %v12746_v61, 16  ;;  %v5392_v27 = vrot.slane %v12710_v12, 2 }
 0x302   : > { %8628 = vmatmul.mubr.bf16.gmra.mrb[224].mxu0 %v5331_v35  ;;  %5783 = vmatmul.mubr.bf16.gmra.mrb[244].mxu1 %v5347_v16  ;;  %v5401_v35 = vrot.slane %v15060_v3, 3  ;;  %v5387_v16 = vsel %vm5225_vm0, %v5374_v30, %v5386_v17  ;;  %v5436_v30 = vrot.slane %v15067_v11, 2  ;;  %v5393_v45 = vrot.slane %v15069_v44, 3 }
 0x303   : > { %8631 = vmatprep.mubr.bf16.mxu0 %v5343_v52  ;;  %6953 = vmatpush1.bf16.msra.mxu0 %v8962_v56  ;;  %v15059_v56 = vshrl.u32 %v12595_v4, 16  ;;  %v15064_v52 = vshll.u32 %v12729_v55, 16  ;;  %v3909_v4 = vld [vmem:[#allocation2 + $0x90] sm:$0xf]  ;;  %v13123_v55 = vor.u32 %v5413_v43, %v5412_v32  ;;  %v5437_v10 = vrot.slane %v15068_v58, 3 }
 0x304   : > { %6954 = vmatprep.subr.bf16.mxu0 %v13010_v25  ;;  %5790 = vmatprep.mubr.bf16.mxu1 %v5363_v49  ;;  %v13130_v49 = vrot.slane %v3909_v4, 1  ;;  %v15073_v9 = vshrl.u32 %v15072_v40, 16  ;;  %v15076_v28 = vshrl.u32 %v15075_v31, 16  ;;  %v15077_v12 = vshll.u32 %v15075_v31, 16  ;;  %v6048_v31 = vld [vmem:[#allocation2 + $0x10] sm:$0xf0] }
 0x305   : > { %v5400_v37 = vrot.slane %v15059_v56, 2  ;;  %v5397_v14 = vrot.slane %v15064_v52, 3  ;;  %v15079_v56 = vld [vmem:[#allocation43_spill] sm:$0xff]  ;;  %v6081_v4 = vshrl.u32 %v13126_v22, 16  ;;  %vm6325_vm13 = vsmask.f32 3328 }
 0x306   : > { %v5408_v61 = vrot.slane %v15073_v9, 2  ;;  %v5448_v57 = vrot.slane %v15076_v28, 2  ;;  %v5449_v63 = vrot.slane %v15077_v12, 3 }
 0x307   : > { %6955 = vmatpush1.bf16.msra.mxu0 %v8963_v6  ;;  %v5402_v6 = vor.u32 %v5401_v35, %v5400_v37  ;;  %v13128_v41 = vor.u32 %v5397_v14, %v5396_v46  ;;  %v5405_v37 = vrot.slane %v15079_v56, 3  ;;  %v8974_v56 = vld [vmem:[%s14215_s3 + $0x1f0] sm:$0xff]  }
 0x308   : > { %6956 = vmatprep.subr.bf16.mxu0 %v13010_v25 }
 0x309   : > { %v5403_v42 = vsel %vm5225_vm0, %v5390_v19, %v5402_v6  ;;  %v5415_v62 = vsel %vm5225_vm0, %v5402_v6, %v13123_v55  ;;  %v5399_v47 = vsel %vm5225_vm0, %v5386_v17, %v13128_v41  ;;  %v13170_v19 = vld [vmem:[#allocation2 + $0x20] sm:$0xff]  ;;  %v5491_v6 = vshll.u32 %v13130_v49, 16 }
 0x30a   : > { %8632 = vmatmul.mubr.bf16.gmra.mrb[228].mxu0 %v5355_v5  ;;  %5791 = vmatmul.mubr.bf16.gmra.mrb[248].mxu1 %v5359_v34  ;;  %v6077_v5 = vshll.u32 %v13126_v22, 16  ;;  %v4116_v34 = vsel %vm15071_vm9, %v15070_v39, %v13130_v49  ;;  %v15080_v17 = vld [vmem:[#allocation42_spill] sm:$0xff]  ;;  %v6089_v28 = vshrl.u32 %v13170_v19, 16  ;;  %vm15110_vm9 = vmmov %vm15083_vm2 }
 0x30b   : > { %8635 = vmatprep.mubr.bf16.mxu0 %v5367_v48  ;;  %6957 = vmatpush1.bf16.msra.mxu0 %v8964_v51  ;;  %v5425_v51 = vrot.slane %v15066_v29, 3  ;;  %v6072_v48 = vshll.u32 %v13132_v38, 16  ;;  %v15081_v3 = vshrl.u32 %v15080_v17, 16  ;;  %v5466_v0 = vshrl.u32 %v4116_v34, 16 }
 0x30c   : > { %6958 = vmatprep.subr.bf16.mxu0 %v13010_v25  ;;  %5798 = vmatprep.mubr.bf16.mxu1 %v5375_v60  ;;  %v15074_v60 = vshll.u32 %v15072_v40, 16  ;;  %v6079_v24 = vrot.slane %v6077_v5, 1  ;;  %v5469_v43 = vshll.u32 %v4116_v34, 16  ;;  %v5450_v29 = vor.u32 %v5449_v63, %v5448_v57  ;;  %v8973_v40 = vld [vmem:[%s14215_s3 + $0x1e8] sm:$0xff]  }
 0x30d   : > { %v5420_v35 = vrot.slane %v15081_v3, 2  ;;  %v6074_v46 = vrot.slane %v6072_v48, 1  ;;  %v5426_v14 = vor.u32 %v5425_v51, %v5424_v20  ;;  %v8972_v20 = vld [vmem:[%s14215_s3 + $0x1e0] sm:$0xff]  }
 0x30e   : > { %v5409_v36 = vrot.slane %v15074_v60, 3  ;;  %v6083_v11 = vor.u32 %v6081_v4, %v6079_v24 }
 0x30f   : > { %6959 = vmatpush1.bf16.msra.mxu0 %v8965_v23  ;;  %v13160_v23 = vpop.f32.mrb[180].mxu1  ;;  %v5427_v58 = vsel %vm5225_vm0, %v13123_v55, %v5426_v14 }
 0x310   : > { %6960 = vmatprep.subr.bf16.mxu0 %v13010_v25  ;;  %v13172_v59 = vpop.f32.mrb[181].mxu1  ;;  %v5410_v26 = vor.u32 %v5409_v36, %v5408_v61 }
 0x311   : > { %v13183_v32 = vpop.f32.mrb[182].mxu1 }
 0x312   : > { %8636 = vmatmul.mubr.bf16.gmra.mrb[232].mxu0 %v5379_v53  ;;  %5799 = vmatmul.mubr.bf16.gmra.mrb[252].mxu1 %v5371_v1  ;;  %v15082_v53 = vshll.u32 %v15080_v17, 16  ;;  %v13188_v52 = vpop.f32.mrb[183].mxu1  ;;  %v6085_v1 = vshll.u32 %v13170_v19, 16  ;;  %v5411_v34 = vsel %vm5225_vm0, %v13128_v41, %v5410_v26  ;;  %v15086_v17 = vld [vmem:[#allocation36_spill] sm:$0xff] }
 0x313   : > { %8639 = vmatprep.mubr.bf16.mxu0 %v5391_v18  ;;  %6961 = vmatpush1.bf16.msra.mxu0 %v8967_v7  ;;  %v5404_v7 = vrot.slane %v15078_v50, 2  ;;  %v5438_v18 = vor.u32 %v5437_v10, %v5436_v30  ;;  %v5468_v30 = vrot.slane %v5466_v0, 2  ;;  %v15085_v50 = vld [vmem:[#allocation41_spill] sm:$0xff]  ;;  %v5417_v3 = vrot.slane %v15086_v17, 3 }
 0x314   : > { %6962 = vmatprep.subr.bf16.mxu0 %v13010_v25  ;;  %5806 = vmatprep.mubr.bf16.mxu1 %v5387_v16  ;;  %v5421_v13 = vrot.slane %v15082_v53, 3  ;;  %v5488_v16 = vshrl.u32 %v13130_v49, 16  ;;  %v5471_v49 = vrot.slane %v5469_v43, 3  ;;  %v6087_v48 = vrot.slane %v6085_v1, 1 }
 0x315   : > { %v13200_v51 = vor.u32 %v5405_v37, %v5404_v7  ;;  %v5439_v10 = vsel %vm5225_vm0, %v5426_v14, %v5438_v18  ;;  %v5451_v55 = vsel %vm5225_vm0, %v5438_v18, %v5450_v29  ;;  %v5416_v7 = vrot.slane %v15085_v50, 2 }
 0x316   : > { %v5490_v44 = vrot.slane %v5488_v16, 2  ;;  %v6088_v9 = vsel %vm15084_vm6, %v6083_v11, %v6087_v48  ;;  %v5472_v61 = vor.u32 %v5471_v49, %v5468_v30  ;;  %v6330_v16 = vshll.u32 %v6048_v31, 16  ;;  %vm15113_vm6 = vmmov %vm15100_vm3 }
 0x317   : > { %6963 = vmatpush1.bf16.msra.mxu0 %v8968_v33  ;;  %v5394_v33 = vor.u32 %v5393_v45, %v5392_v27  ;;  %v5493_v45 = vrot.slane %v5491_v6, 3  ;;  %v6347_v63 = vshrl.u32 %v6088_v9, 16  ;;  %v13247_v6 = vld [vmem:[#allocation2 + $0x90] sm:$0x7]  ;;  %v6334_v11 = vrot.slane %v6081_v4, 4  ;;  %v8975_v4 = vld [vmem:[%s14215_s3 + $0x1f8] sm:$0xff]  }
 0x318   : > { %6964 = vmatprep.subr.bf16.mxu0 %v13010_v25  ;;  %v15093_v50 = vshrl.u32 %v12864_v8, 16 }
 0x319   : > { %v5395_v27 = vsel %vm5225_vm0, %v13116_v2, %v5394_v33  ;;  %v5407_v2 = vsel %vm5225_vm0, %v5394_v33, %v13200_v51  ;;  %v5494_v12 = vor.u32 %v5493_v45, %v5490_v44  ;;  %v6327_v33 = vshrl.u32 %v6048_v31, 16 }
 0x31a   : > { %8640 = vmatmul.mubr.bf16.gmra.mrb[236].mxu0 %v5403_v42  ;;  %5807 = vmatmul.mubr.bf16.gmra.mrb[0].mxu1 %v5383_v21  ;;  %v6070_v21 = vshrl.u32 %v13132_v38, 16  ;;  %v13205_v42 = vor.u32 %v5421_v13, %v5420_v35  ;;  %v15087_v35 = vld [vmem:[#allocation40_spill] sm:$0xff]  ;;  %v6091_v13 = vor.u32 %v6089_v28, %v6087_v48  ;;  %v6349_v49 = vrot.slane %v6347_v63, 4 }
 0x31b   : > { %8643 = vmatprep.mubr.bf16.mxu0 %v5415_v62  ;;  %6965 = vmatpush1.bf16.msra.mxu0 %v8969_v15  ;;  %v13195_v15 = vld [vmem:[#allocation2 + $0x28] sm:$0xff]  ;;  %v15089_v43 = vshll.u32 %v15087_v35, 16  ;;  %v5495_v48 = vsel %vm5225_vm0, %v5472_v61, %v5494_v12  ;;  %v4054_v45 = vshll.u32 %v13247_v6, 16 }
 0x31c   : > { %6966 = vmatprep.subr.bf16.mxu0 %v13010_v25  ;;  %5814 = vmatprep.mubr.bf16.mxu1 %v5399_v47  ;;  %v6075_v62 = vor.u32 %v6074_v46, %v6070_v21  ;;  %v6093_v47 = vshll.u32 %v13195_v15, 16  ;;  %v5423_v60 = vsel %vm5225_vm0, %v5410_v26, %v13205_v42  ;;  %v4905_v37 = vpop.f32.mrb[144].mxu0  ;;  %v5473_v46 = vsel %vm5225_vm0, %v5450_v29, %v5472_v61  ;;  %v13252_v29 = vld [vmem:[#allocation2 + $0x30] sm:$0xff]  ;;  %v15091_v61 = vld [vmem:[#allocation50_spill] sm:$0xff] }
 0x31d   : > { %v5433_v53 = vrot.slane %v15089_v43, 3  ;;  %v13245_v14 = vadd.f32 %v13172_v59, %v4905_v37  ;;  %v4907_v18 = vpop.f32.mrb[145].mxu0  ;;  %v4056_v37 = vrot.slane %v4054_v45, 1 }
 0x31e   : > { %v6080_v39 = vsel %vm15083_vm2, %v6075_v62, %v6079_v24  ;;  %v6095_v57 = vrot.slane %v6093_v47, 1  ;;  %v15088_v24 = vshrl.u32 %v15087_v35, 16  ;;  %vm15111_vm2 = vmmov %vm15106_vm1 }
 0x31f   : > { %6967 = vmatpush1.bf16.msra.mxu0 %v8970_v54  ;;  %v6339_v41 = vshrl.u32 %v6080_v39, 16  ;;  %v6342_v36 = vshll.u32 %v6080_v39, 16  ;;  %v6350_v54 = vshll.u32 %v6088_v9, 16  ;;  %v6332_v9 = vrot.slane %v6330_v16, 5 }
 0x320   : > { %6968 = vmatprep.subr.bf16.mxu0 %v13010_v25  ;;  %v5432_v0 = vrot.slane %v15088_v24, 2  ;;  %v6096_v30 = vsel %vm15090_vm12, %v6091_v13, %v6095_v57 }
 0x321   : > { %v6341_v21 = vrot.slane %v6339_v41, 4  ;;  %v6344_v26 = vrot.slane %v6342_v36, 5  ;;  %v6352_v59 = vrot.slane %v6350_v54, 5  ;;  %v6380_v39 = vshll.u32 %v6096_v30, 16  ;;  %v15092_v36 = vld [vmem:[#allocation48_spill] sm:$0xff] }
 0x322   : > { %8644 = vmatmul.mubr.bf16.gmra.mrb[240].mxu0 %v5427_v58  ;;  %5815 = vmatmul.mubr.bf16.gmra.mrb[4].mxu1 %v5395_v27  ;;  %v5418_v27 = vor.u32 %v5417_v3, %v5416_v7  ;;  %v13263_v44 = vor.u32 %v5433_v53, %v5432_v0  ;;  %v5428_v41 = vrot.slane %v15091_v61, 2  ;;  %v5429_v31 = vrot.slane %v15092_v36, 3 }
 0x323   : > { %8647 = vmatprep.mubr.bf16.mxu0 %v5439_v10  ;;  %6969 = vmatpush1.bf16.msra.mxu0 %v8972_v20  ;;  %v4908_v20 = vpop.f32.mrb[146].mxu0  ;;  %v6335_v10 = vrot.slane %v6077_v5, 5  ;;  %v6097_v5 = vshrl.u32 %v13195_v15, 16  ;;  %v6345_v12 = vor.u32 %v6344_v26, %v6341_v21  ;;  %v6353_v63 = vor.u32 %v6352_v59, %v6349_v49  ;;  %v15096_v49 = vld [vmem:[#allocation51_spill] sm:$0xff] }
 0x324   : > { %6970 = vmatprep.subr.bf16.mxu0 %v13010_v25  ;;  %5822 = vmatprep.mubr.bf16.mxu1 %v5411_v34  ;;  %v13255_v62 = vadd.f32 %v13188_v52, %v4908_v20  ;;  %v4910_v58 = vpop.f32.mrb[147].mxu0  ;;  %v6377_v52 = vshrl.u32 %v6096_v30, 16  ;;  %v6101_v34 = vshll.u32 %v13252_v29, 16  ;;  %v5444_v7 = vrot.slane %v15093_v50, 2 }
 0x325   : > { %v4913_v54 = vpop.f32.mrb[148].mxu0  ;;  %v6382_v24 = vrot.slane %v6380_v39, 5  ;;  %v13293_v18 = vor.u32 %v5429_v31, %v5428_v41  ;;  %v6354_v16 = vsel %vm6325_vm13, %v6345_v12, %v6353_v63  ;;  %v6105_v59 = vshrl.u32 %v13252_v29, 16  ;;  %v15098_v31 = vld [vmem:[#allocation54_spill] sm:$0xff] }
 0x326   : > { %v6379_v35 = vrot.slane %v6377_v52, 4  ;;  %v13287_v0 = vadd.f32 %v13160_v23, %v4913_v54  ;;  %v6103_v43 = vrot.slane %v6101_v34, 1  ;;  %v4058_v36 = vshrl.u32 %v13247_v6, 16 }
 0x327   : > { %6971 = vmatpush1.bf16.msra.mxu0 %v8973_v40  ;;  %v6329_v40 = vrot.slane %v6327_v33, 4  ;;  %v6372_v33 = vrot.slane %v6089_v28, 4  ;;  %v4057_v28 = vsel %vm15097_vm8, %v15096_v49, %v4056_v37  ;;  %v5440_v12 = vrot.slane %v15098_v31, 2  ;;  %vm15116_vm8 = vmmov %vm15100_vm3 }
 0x328   : > { %6972 = vmatprep.subr.bf16.mxu0 %v13010_v25  ;;  %v13284_v3 = vpop.f32.mrb[184].mxu1  ;;  %v5457_v61 = vshrl.u32 %v4057_v28, 16  ;;  %v5460_v41 = vshll.u32 %v4057_v28, 16  ;;  %v6416_v31 = vrot.slane %v6105_v59, 4 }
 0x329   : > { %v6333_v53 = vor.u32 %v6332_v9, %v6329_v40  ;;  %v5098_v13 = vpop.f32.mrb[185].mxu1  ;;  %v6107_v40 = vor.u32 %v6105_v59, %v6103_v43 }
 0x32a   : > { %8648 = vmatmul.mubr.bf16.gmra.mrb[244].mxu0 %v5451_v55  ;;  %5823 = vmatmul.mubr.bf16.gmra.mrb[8].mxu1 %v5407_v2  ;;  %v13269_v55 = vld [vmem:[#allocation2 + $0x38] sm:$0xff]  ;;  %v13273_v2 = vor.u32 %v6335_v10, %v6334_v11  ;;  %v13298_v23 = vpop.f32.mrb[186].mxu1  ;;  %v6244_v10 = vrot.slane %v13195_v15, 1 }
 0x32b   : > { %8651 = vmatprep.mubr.bf16.mxu0 %v5473_v46  ;;  %6973 = vmatpush1.bf16.msra.mxu0 %v8974_v56  ;;  %v6109_v17 = vshll.u32 %v13269_v55, 16  ;;  %v5101_v11 = vpop.f32.mrb[187].mxu1 }
 0x32c   : > { %6974 = vmatprep.subr.bf16.mxu0 %v13010_v25  ;;  %5830 = vmatprep.mubr.bf16.mxu1 %v5423_v60  ;;  %v6099_v25 = vor.u32 %v6097_v5, %v6095_v57  ;;  %v15094_v60 = vshll.u32 %v12864_v8, 16  ;;  %v4915_v57 = vpop.f32.mrb[149].mxu0  ;;  %v5419_v8 = vsel %vm5225_vm0, %v13200_v51, %v5418_v27  ;;  %v6373_v51 = vrot.slane %v6085_v1, 5 }
 0x32d   : > { %v4916_v46 = vpop.f32.mrb[150].mxu0  ;;  %v6111_v58 = vrot.slane %v6109_v17, 1  ;;  %v6337_v1 = vsel %vm6325_vm13, %v6333_v53, %v13273_v2  ;;  %v15101_v53 = vld [vmem:[#allocation55_spill] sm:$0xff] }
 0x32e   : > { %v5445_v56 = vrot.slane %v15094_v60, 3  ;;  %v13301_v21 = vadd.f32 %v13183_v32, %v4916_v46  ;;  %v4918_v26 = vpop.f32.mrb[151].mxu0  ;;  %v6104_v20 = vsel %vm15095_vm5, %v6099_v25, %v6103_v43  ;;  %v5435_v32 = vsel %vm5225_vm0, %v13205_v42, %v13263_v44  ;;  %v15099_v25 = vld [vmem:[#allocation47_spill] sm:$0xff] }
 0x32f   : > { %6975 = vmatpush1.bf16.msra.mxu0 %v8975_v4  ;;  %v5431_v4 = vsel %vm5225_vm0, %v5418_v27, %v13293_v18  ;;  %v6399_v52 = vshrl.u32 %v6104_v20, 16  ;;  %v6402_v39 = vshll.u32 %v6104_v20, 16  ;;  %v6374_v9 = vor.u32 %v6373_v51, %v6372_v33  ;;  %v15102_v20 = vld [vmem:[#allocation64_spill] sm:$0xff] }
 0x330   : > { %v13306_v30 = vor.u32 %v5445_v56, %v5444_v7  ;;  %v5441_v54 = vrot.slane %v15099_v25, 3  ;;  %v6112_v50 = vsel %vm15100_vm3, %v6107_v40, %v6111_v58  ;;  %v6394_v60 = vrot.slane %v6097_v5, 4 }
 0x331   : > { %v4921_v7 = vpop.f32.mrb[152].mxu0  ;;  %v6395_v56 = vrot.slane %v6093_v47, 5  ;;  %v6404_v57 = vrot.slane %v6402_v39, 5  ;;  %v5452_v46 = vrot.slane %v15101_v53, 2  ;;  %v6421_v26 = vshrl.u32 %v6112_v50, 16 }
 0x332   : > { %8652 = vmatmul.mubr.bf16.gmra.mrb[248].mxu0 %v5495_v48  ;;  %5831 = vmatmul.mubr.bf16.gmra.mrb[12].mxu1 %v5419_v8  ;;  %v13319_v48 = vor.u32 %v6382_v24, %v6379_v35  ;;  %v5447_v42 = vsel %vm5225_vm0, %v13263_v44, %v13306_v30  ;;  %v4060_v35 = vor.u32 %v4058_v36, %v4056_v37  ;;  %v13336_v24 = vld [vmem:[#allocation2 + $0x40] sm:$0xff]  ;;  %v6401_v44 = vrot.slane %v6399_v52, 4  ;;  %v4923_v8 = vpop.f32.mrb[153].mxu0 }
 0x333   : > { %6976 = vmatprep.mubr.bf16.mxu0 %v6354_v16  ;;  %5838 = vmatprep.mubr.bf16.mxu1 %v5435_v32  ;;  %v13338_v43 = vadd.f32 %v5098_v13, %v4921_v7  ;;  %v4924_v33 = vpop.f32.mrb[154].mxu0  ;;  %v5462_v16 = vrot.slane %v5460_v41, 3  ;;  %v6424_v51 = vshll.u32 %v6112_v50, 16  ;;  %v5453_v49 = vrot.slane %v15102_v20, 3 }
 0x334   : > { %v6384_v27 = vsel %vm6325_vm13, %v6353_v63, %v13319_v48  ;;  %v5459_v63 = vrot.slane %v5457_v61, 2  ;;  %v13343_v47 = vadd.f32 %v5101_v11, %v4924_v33  ;;  %v4926_v37 = vpop.f32.mrb[155].mxu0  ;;  %v6113_v13 = vshrl.u32 %v13269_v55, 16 }
 0x335   : > { %v13341_v5 = vpop.f32.mrb[188].mxu1  ;;  %v6117_v28 = vshll.u32 %v13336_v24, 16  ;;  %v13350_v52 = vor.u32 %v6395_v56, %v6394_v60  ;;  %v5479_v39 = vshrl.u32 %v4060_v35, 16  ;;  %v5482_v40 = vshll.u32 %v4060_v35, 16 }
 0x336   : > { %v13348_v32 = vpop.f32.mrb[189].mxu1  ;;  %v6375_v11 = vsel %vm6325_vm13, %v13273_v2, %v6374_v9  ;;  %v6405_v61 = vor.u32 %v6404_v57, %v6401_v44  ;;  %v6115_v25 = vor.u32 %v6113_v13, %v6111_v58  ;;  %v6426_v7 = vrot.slane %v6424_v51, 5  ;;  %v13370_v44 = vld [vmem:[#allocation2 + $0x48] sm:$0xff] }
 0x337   : > { %v13354_v41 = vpop.f32.mrb[190].mxu1  ;;  %v6240_v2 = vrot.slane %v13126_v22, 1  ;;  %v6242_v60 = vrot.slane %v13170_v19, 1  ;;  %v6397_v58 = vsel %vm6325_vm13, %v6374_v9, %v13350_v52  ;;  %v5481_v56 = vrot.slane %v5479_v39, 2 }
 0x338   : > { %v13356_v50 = vpop.f32.mrb[191].mxu1  ;;  %v5484_v35 = vrot.slane %v5482_v40, 3  ;;  %v6248_v57 = vrot.slane %v13269_v55, 1  ;;  %v6239_v22 = vrot.slane %v13132_v38, 1  ;;  %v13381_v9 = vrot.slane %v4058_v36, 2  ;;  %v13476_v55 = vld [vmem:[#allocation2 + $0x60] sm:$0xff] }
 0x339   : > { %v6243_v33 = vsel %vm15105_vm4, %v6240_v2, %v6242_v60  ;;  %v6125_v38 = vshll.u32 %v13370_v44, 16  ;;  %v13392_v36 = vrot.slane %v4054_v45, 3  ;;  %v6245_v20 = vsel %vm15106_vm1, %v6242_v60, %v6244_v10  ;;  %v13402_v45 = vld [vmem:[#allocation2 + $0x50] sm:$0xff] }
 0x33a   : > { %6977 = vmatmul.mubr.bf16.vlgmr.msra.gmra.mrb[252].mxu0 %v6337_v1  ;;  %5839 = vmatmul.mubr.bf16.gmra.mrb[16].mxu1 %v5431_v4  ;;  %v5442_v1 = vor.u32 %v5441_v54, %v5440_v12  ;;  %v6423_v4 = vrot.slane %v6421_v26, 4  ;;  %v6417_v12 = vrot.slane %v6101_v34, 5  ;;  %v13360_v54 = vor.u32 %v5453_v49, %v5452_v46 }
 0x33b   : > { %6984 = vmatprep.mubr.bf16.mxu0 %v6384_v27  ;;  %5846 = vmatprep.mubr.bf16.mxu1 %v5447_v42  ;;  %v5463_v27 = vor.u32 %v5462_v16, %v5459_v63  ;;  %v6119_v42 = vrot.slane %v6117_v28, 1  ;;  %v6406_v34 = vsel %vm6325_vm13, %v13319_v48, %v6405_v61  ;;  %v6241_v46 = vsel %vm15104_vm11, %v6239_v22, %v6240_v2  ;;  %vm15119_vm11 = vmmov %vm15113_vm6 }
 0x33c   : > { %v5443_v59 = vsel %vm5225_vm0, %v13293_v18, %v5442_v1  ;;  %v13379_v18 = vor.u32 %v6426_v7, %v6423_v4  ;;  %v13383_v53 = vor.u32 %v6417_v12, %v6416_v31  ;;  %v5455_v48 = vsel %vm5225_vm0, %v5442_v1, %v13360_v54 }
 0x33d   : > { %v6120_v8 = vsel %vm15103_vm15, %v6115_v25, %v6119_v42  ;;  %v5464_v19 = vsel %vm5225_vm0, %v13306_v30, %v5463_v27  ;;  %v5485_v16 = vor.u32 %v5484_v35, %v5481_v56  ;;  %v6438_v49 = vrot.slane %v6113_v13, 4 }
 0x33e   : > { %v6443_v30 = vshrl.u32 %v6120_v8, 16  ;;  %v6446_v26 = vshll.u32 %v6120_v8, 16  ;;  %v6439_v1 = vrot.slane %v6109_v17, 5  ;;  %v6356_v40 = vshrl.u32 %v6241_v46, 16 }
 0x33f   : > { %v6364_v31 = vshrl.u32 %v6243_v33, 16  ;;  %v6367_v6 = vshll.u32 %v6243_v33, 16  ;;  %v6121_v4 = vshrl.u32 %v13336_v24, 16  ;;  %v6127_v7 = vrot.slane %v6125_v38, 1 }
 0x340   : > { %v6246_v13 = vrot.slane %v13252_v29, 1  ;;  %v6445_v12 = vrot.slane %v6443_v30, 4  ;;  %v6448_v17 = vrot.slane %v6446_v26, 5  ;;  %v6386_v2 = vshrl.u32 %v6245_v20, 16 }
 0x341   : > { %v4929_v63 = vpop.f32.mrb[156].mxu0  ;;  %v6389_v60 = vshll.u32 %v6245_v20, 16  ;;  %v6123_v56 = vor.u32 %v6121_v4, %v6119_v42  ;;  %v6133_v35 = vshll.u32 %v13402_v45, 16  ;;  %v5476_v29 = vor.u32 %v13392_v36, %v13381_v9 }
 0x342   : > { %6985 = vmatmul.mubr.bf16.gmra.mrb[0].mxu0 %v6375_v11  ;;  %5847 = vmatmul.mubr.bf16.gmra.mrb[20].mxu1 %v5443_v59  ;;  %v13395_v51 = vadd.f32 %v13284_v3, %v4929_v63  ;;  %v4931_v37 = vpop.f32.mrb[157].mxu0  ;;  %v6359_v11 = vshll.u32 %v6241_v46, 16  ;;  %v6428_v59 = vsel %vm6325_vm13, %v6405_v61, %v13379_v18  ;;  %v6358_v8 = vrot.slane %v6356_v40, 4 }
 0x343   : > { %6992 = vmatprep.mubr.bf16.mxu0 %v6406_v34  ;;  %5854 = vmatprep.mubr.bf16.mxu1 %v5464_v19  ;;  %v4932_v39 = vpop.f32.mrb[158].mxu0  ;;  %v5486_v34 = vsel %vm5225_vm0, %v5463_v27, %v5485_v16  ;;  %v6366_v19 = vrot.slane %v6364_v31, 4  ;;  %v6369_v46 = vrot.slane %v6367_v6, 5  ;;  %v6128_v61 = vsel %vm15107_vm14, %v6123_v56, %v6127_v7  ;;  %vm15122_vm14 = vmmov %vm15113_vm6 }
 0x344   : > { %v13405_v25 = vadd.f32 %v13298_v23, %v4932_v39  ;;  %v4934_v3 = vpop.f32.mrb[159].mxu0  ;;  %v6419_v23 = vsel %vm6325_vm13, %v13350_v52, %v13383_v53  ;;  %v6361_v22 = vrot.slane %v6359_v11, 5  ;;  %v6247_v52 = vsel %vm15108_vm10, %v6244_v10, %v6246_v13 }
 0x345   : > { %v6388_v33 = vrot.slane %v6386_v2, 4  ;;  %v6391_v63 = vrot.slane %v6389_v60, 5  ;;  %v13428_v9 = vor.u32 %v6439_v1, %v6438_v49  ;;  %v6249_v15 = vsel %vm15109_vm7, %v6246_v13, %v6248_v57  ;;  %v13454_v60 = vld [vmem:[#allocation2 + $0x58] sm:$0xff] }
 0x346   : > { %v6129_v10 = vshrl.u32 %v13370_v44, 16  ;;  %v6465_v20 = vshrl.u32 %v6128_v61, 16  ;;  %v6468_v49 = vshll.u32 %v6128_v61, 16  ;;  %v6408_v1 = vshrl.u32 %v6247_v52, 16 }
 0x347   : > { %v6411_v39 = vshll.u32 %v6247_v52, 16  ;;  %v6362_v31 = vor.u32 %v6361_v22, %v6358_v8  ;;  %v6370_v6 = vor.u32 %v6369_v46, %v6366_v19  ;;  %v6250_v2 = vrot.slane %v13336_v24, 1 }
 0x348   : > { %v6131_v3 = vor.u32 %v6129_v10, %v6127_v7  ;;  %v6460_v56 = vrot.slane %v6121_v4, 4  ;;  %v6467_v8 = vrot.slane %v6465_v20, 4  ;;  %v6470_v7 = vrot.slane %v6468_v49, 5 }
 0x349   : > { %v13424_v42 = vpop.f32.mrb[192].mxu1  ;;  %v4937_v27 = vpop.f32.mrb[160].mxu0  ;;  %v6410_v22 = vrot.slane %v6408_v1, 4  ;;  %v6413_v19 = vrot.slane %v6411_v39, 5  ;;  %v6371_v46 = vsel %vm6325_vm13, %v6362_v31, %v6370_v6  ;;  %v6252_v61 = vrot.slane %v13370_v44, 1 }
 0x34a   : > { %6993 = vmatmul.mubr.bf16.gmra.mrb[4].mxu0 %v6397_v58  ;;  %5855 = vmatmul.mubr.bf16.gmra.mrb[24].mxu1 %v5455_v48  ;;  %v13426_v58 = vor.u32 %v6448_v17, %v6445_v12  ;;  %v13430_v16 = vpop.f32.mrb[193].mxu1  ;;  %v13433_v30 = vadd.f32 %v13348_v32, %v4937_v27  ;;  %v4939_v26 = vpop.f32.mrb[161].mxu0  ;;  %v6135_v48 = vrot.slane %v6133_v35, 1  ;;  %v6430_v12 = vshrl.u32 %v6249_v15, 16 }
 0x34b   : > { %7000 = vmatprep.mubr.bf16.mxu0 %v6428_v59  ;;  %5862 = vmatprep.mubr.bf16.mxu1 %v5486_v34  ;;  %v13441_v36 = vpop.f32.mrb[194].mxu1  ;;  %v4940_v37 = vpop.f32.mrb[162].mxu0  ;;  %v6433_v17 = vshll.u32 %v6249_v15, 16  ;;  %v6392_v59 = vor.u32 %v6391_v63, %v6388_v33  ;;  %v6141_v4 = vshll.u32 %v13454_v60, 16  ;;  %v6471_v63 = vor.u32 %v6470_v7, %v6467_v8 }
 0x34c   : > { %v13443_v40 = vpop.f32.mrb[195].mxu1  ;;  %v13446_v32 = vadd.f32 %v13356_v50, %v4940_v37  ;;  %v4942_v11 = vpop.f32.mrb[163].mxu0  ;;  %v6450_v13 = vsel %vm6325_vm13, %v13379_v18, %v13426_v58  ;;  %v6461_v50 = vrot.slane %v6117_v28, 5  ;;  %v6136_v34 = vsel %vm15110_vm9, %v6131_v3, %v6135_v48  ;;  %vm15125_vm9 = vmmov %vm15113_vm6 }
 0x34d   : > { %v5477_v18 = vsel %vm5225_vm0, %v13360_v54, %v5476_v29  ;;  %v6432_v24 = vrot.slane %v6430_v12, 4  ;;  %v6435_v28 = vrot.slane %v6433_v17, 5  ;;  %v6487_v52 = vshrl.u32 %v6136_v34, 16  ;;  %vm15112_vm0 = vmmov %vm15106_vm1 }
 0x34e   : > { %v6393_v27 = vsel %vm6325_vm13, %v6370_v6, %v6392_v59  ;;  %v6441_v54 = vsel %vm6325_vm13, %v13383_v53, %v13428_v9  ;;  %v6490_v33 = vshll.u32 %v6136_v34, 16  ;;  %v6414_v37 = vor.u32 %v6413_v19, %v6410_v22  ;;  %vm15114_vm12 = vmmov %vm15112_vm0 }
 0x34f   : > { %v13474_v20 = vor.u32 %v6461_v50, %v6460_v56  ;;  %v6137_v39 = vshrl.u32 %v13402_v45, 16  ;;  %v6143_v53 = vrot.slane %v6141_v4, 1  ;;  %v6489_v6 = vrot.slane %v6487_v52, 4  ;;  %vm15115_vm5 = vmmov %vm15112_vm0 }
 0x350   : > { %v6253_v3 = vsel %vm15112_vm0, %v6250_v2, %v6252_v61  ;;  %v6254_v17 = vrot.slane %v13402_v45, 1  ;;  %v6149_v56 = vshll.u32 %v13476_v55, 16  ;;  %v6472_v50 = vsel %vm6325_vm13, %v13426_v58, %v6471_v63  ;;  %vm15117_vm3 = vmmov %vm15112_vm0 }
 0x351   : > { %v6139_v12 = vor.u32 %v6137_v39, %v6135_v48  ;;  %v6482_v34 = vrot.slane %v6129_v10, 4  ;;  %v6483_v7 = vrot.slane %v6125_v38, 5  ;;  %v6415_v58 = vsel %vm6325_vm13, %v6392_v59, %v6414_v37  ;;  %vm15118_vm15 = vmmov %vm15112_vm0 }
 0x352   : > { %7001 = vmatmul.mubr.bf16.gmra.mrb[8].mxu0 %v6419_v23  ;;  %5863 = vmatmul.mubr.bf16.gmra.mrb[28].mxu1 %v5477_v18  ;;  %v6251_v23 = vsel %vm15111_vm2, %v6248_v57, %v6250_v2  ;;  %v6256_v2 = vrot.slane %v13454_v60, 1  ;;  %v6474_v18 = vshrl.u32 %v6253_v3, 16  ;;  %v6255_v10 = vsel %vm15114_vm12, %v6252_v61, %v6254_v17  ;;  %vm15120_vm4 = vmmov %vm15112_vm0 }
 0x353   : > { %7008 = vmatprep.mubr.bf16.mxu0 %v6450_v13  ;;  %8671 = vmatprep.mubr.bf16.mxu1 %v6371_v46  ;;  %v4945_v29 = vpop.f32.mrb[164].mxu0  ;;  %v6452_v49 = vshrl.u32 %v6251_v23, 16  ;;  %v6455_v1 = vshll.u32 %v6251_v23, 16  ;;  %v6492_v13 = vrot.slane %v6490_v33, 5  ;;  %v6144_v22 = vsel %vm15113_vm6, %v6139_v12, %v6143_v53  ;;  %vm15121_vm1 = vmmov %vm15112_vm0 }
 0x354   : > { %v13472_v26 = vadd.f32 %v13341_v5, %v4945_v29  ;;  %v4947_v15 = vpop.f32.mrb[165].mxu0  ;;  %v6436_v5 = vor.u32 %v6435_v28, %v6432_v24  ;;  %v6145_v24 = vshrl.u32 %v13454_v60, 16  ;;  %v13508_v44 = vrot.slane %v6149_v56, 1  ;;  %vm15123_vm10 = vmmov %vm15112_vm0 }
 0x355   : > { %v4948_v57 = vpop.f32.mrb[166].mxu0  ;;  %v6454_v8 = vrot.slane %v6452_v49, 4  ;;  %v6457_v48 = vrot.slane %v6455_v1, 5  ;;  %v13502_v46 = vor.u32 %v6492_v13, %v6489_v6  ;;  %v6509_v52 = vshrl.u32 %v6144_v22, 16  ;;  %vm15124_vm7 = vmmov %vm15112_vm0 }
 0x356   : > { %v13482_v11 = vadd.f32 %v13354_v41, %v4948_v57  ;;  %v4950_v31 = vpop.f32.mrb[167].mxu0  ;;  %v6463_v41 = vsel %vm6325_vm13, %v13428_v9, %v13474_v20  ;;  %v6437_v19 = vsel %vm6325_vm13, %v6414_v37, %v6436_v5  ;;  %v6477_v9 = vshll.u32 %v6253_v3, 16  ;;  %v13523_v57 = vld [vmem:[#allocation2 + $0x68] sm:$0xff]  ;;  %vm15126_vm2 = vmmov %vm15112_vm0 }
 0x357   : > { %v6512_v59 = vshll.u32 %v6144_v22, 16  ;;  %v6257_v23 = vsel %vm15115_vm5, %v6254_v17, %v6256_v2  ;;  %v6458_v33 = vor.u32 %v6457_v48, %v6454_v8  ;;  %v13519_v15 = vor.u32 %v6483_v7, %v6482_v34  ;;  %vm15127_vm12 = vmmov %vm15112_vm0 }
 0x358   : > { %v6147_v37 = vor.u32 %v6145_v24, %v6143_v53  ;;  %v6476_v31 = vrot.slane %v6474_v18, 4  ;;  %v6479_v6 = vrot.slane %v6477_v9, 5  ;;  %v6496_v3 = vshrl.u32 %v6255_v10, 16  ;;  %vm15130_vm5 = vmmov %vm15113_vm6 }
 0x359   : > { %v6499_v13 = vshll.u32 %v6255_v10, 16  ;;  %v6518_v34 = vshrl.u32 %v6257_v23, 16  ;;  %v6511_v8 = vrot.slane %v6509_v52, 4  ;;  %v6514_v48 = vrot.slane %v6512_v59, 5  ;;  %v13544_v52 = vld [vmem:[#allocation2 + $0x70] sm:$0xff] }
 0x35a   : > { %7009 = vmatmul.mubr.bf16.gmra.mrb[12].mxu0 %v6441_v54  ;;  %8672 = vmatmul.mubr.bf16.vlgmr.msra.gmra.mrb[32].mxu1 %v6393_v27  ;;  %v6258_v27 = vrot.slane %v13476_v55, 1  ;;  %v6152_v53 = vsel %vm15116_vm8, %v6147_v37, %v13508_v44  ;;  %v6521_v7 = vshll.u32 %v6257_v23, 16  ;;  %v6157_v18 = vshll.u32 %v13523_v57, 16  ;;  %vm15133_vm8 = vmmov %vm15130_vm5 }
 0x35b   : > { %7016 = vmatprep.mubr.bf16.mxu0 %v6472_v50  ;;  %8675 = vmatprep.mubr.bf16.mxu1 %v6415_v58  ;;  %v6459_v58 = vsel %vm6325_vm13, %v6436_v5, %v6458_v33  ;;  %v6498_v9 = vrot.slane %v6496_v3, 4  ;;  %v6501_v10 = vrot.slane %v6499_v13, 5  ;;  %v6485_v5 = vsel %vm6325_vm13, %v13474_v20, %v13519_v15 }
 0x35c   : > { %v13510_v38 = vpop.f32.mrb[196].mxu1  ;;  %v4953_v28 = vpop.f32.mrb[168].mxu0  ;;  %v6259_v22 = vsel %vm15117_vm3, %v6256_v2, %v6258_v27  ;;  %v6534_v2 = vshll.u32 %v6152_v53, 16  ;;  %v6480_v45 = vor.u32 %v6479_v6, %v6476_v31  ;;  %v6520_v23 = vrot.slane %v6518_v34, 4  ;;  %vm15135_vm3 = vmmov %vm15130_vm5 }
 0x35d   : > { %v13514_v54 = vpop.f32.mrb[197].mxu1  ;;  %v13517_v29 = vadd.f32 %v13430_v16, %v4953_v28  ;;  %v4955_v61 = vpop.f32.mrb[169].mxu0  ;;  %v6494_v16 = vsel %vm6325_vm13, %v6471_v63, %v13502_v46  ;;  %v6504_v63 = vrot.slane %v6137_v39, 4  ;;  %v6260_v28 = vrot.slane %v13523_v57, 1 }
 0x35e   : > { %v13525_v49 = vpop.f32.mrb[198].mxu1  ;;  %v4956_v1 = vpop.f32.mrb[170].mxu0  ;;  %v6540_v39 = vshrl.u32 %v6259_v22, 16  ;;  %v6543_v59 = vshll.u32 %v6259_v22, 16  ;;  %v6523_v61 = vrot.slane %v6521_v7, 5  ;;  %v6159_v3 = vrot.slane %v6157_v18, 1 }
 0x35f   : > { %v13529_v12 = vpop.f32.mrb[199].mxu1  ;;  %v13532_v17 = vadd.f32 %v13443_v40, %v4956_v1  ;;  %v4958_v50 = vpop.f32.mrb[171].mxu0  ;;  %v6505_v40 = vrot.slane %v6133_v35, 5  ;;  %v6515_v35 = vor.u32 %v6514_v48, %v6511_v8  ;;  %v6153_v1 = vshrl.u32 %v13476_v55, 16  ;;  %v13560_v22 = vld [vmem:[#allocation2 + $0x78] sm:$0xff] }
 0x360   : > { %v6262_v13 = vrot.slane %v13544_v52, 1  ;;  %v6502_v50 = vor.u32 %v6501_v10, %v6498_v9  ;;  %v6261_v31 = vsel %vm15118_vm15, %v6258_v27, %v6260_v28  ;;  %v6536_v34 = vrot.slane %v6534_v2, 5  ;;  %vm15137_vm15 = vmmov %vm15135_vm3 }
 0x361   : > { %v13549_v37 = vor.u32 %v6505_v40, %v6504_v63  ;;  %v6542_v8 = vrot.slane %v6540_v39, 4  ;;  %v6545_v48 = vrot.slane %v6543_v59, 5  ;;  %v6155_v7 = vor.u32 %v6153_v1, %v13508_v44 }
 0x362   : > { %7017 = vmatmul.mubr.bf16.gmra.mrb[16].mxu0 %v6463_v41  ;;  %8676 = vmatmul.mubr.bf16.gmra.mrb[36].mxu1 %v6437_v19  ;;  %v6531_v41 = vshrl.u32 %v6152_v53, 16  ;;  %v6524_v9 = vor.u32 %v6523_v61, %v6520_v23  ;;  %v6562_v27 = vshrl.u32 %v6261_v31, 16  ;;  %v14428_v44 = vshll.u32 %v13544_v52, 16 }
 0x363   : > { %7024 = vmatprep.mubr.bf16.mxu0 %v6494_v16  ;;  %8679 = vmatprep.mubr.bf16.mxu1 %v6459_v58  ;;  %v6481_v58 = vsel %vm6325_vm13, %v6458_v33, %v6480_v45  ;;  %v6160_v10 = vsel %vm15119_vm11, %v6155_v7, %v6159_v3  ;;  %v6503_v33 = vsel %vm6325_vm13, %v6480_v45, %v6502_v50  ;;  %v6264_v2 = vrot.slane %v13560_v22, 1 }
 0x364   : > { %v6533_v53 = vrot.slane %v6531_v41, 4  ;;  %v6263_v41 = vsel %vm15120_vm4, %v6260_v28, %v6262_v13  ;;  %v6546_v39 = vor.u32 %v6545_v48, %v6542_v8  ;;  %v6526_v59 = vrot.slane %v6145_v24, 4  ;;  %v13580_v28 = vld [vmem:[#allocation2 + $0x80] sm:$0xff] }
 0x365   : > { %v6527_v23 = vrot.slane %v6141_v4, 5  ;;  %v6553_v45 = vshrl.u32 %v6160_v10, 16  ;;  %v6556_v61 = vshll.u32 %v6160_v10, 16  ;;  %v6587_v24 = vshll.u32 %v6263_v41, 16 }
 0x366   : > { %v4961_v19 = vpop.f32.mrb[172].mxu0  ;;  %v6266_v8 = vrot.slane %v13580_v28, 1  ;;  %v6547_v48 = vsel %vm6325_vm13, %v6524_v9, %v6546_v39  ;;  %v6548_v7 = vrot.slane %v6153_v1, 4  ;;  %v14427_v1 = vshll.u32 %v13560_v22, 16 }
 0x367   : > { %v13556_v16 = vadd.f32 %v13424_v42, %v4961_v19  ;;  %v4963_v20 = vpop.f32.mrb[173].mxu0  ;;  %v6516_v42 = vsel %vm6325_vm13, %v13502_v46, %v6515_v35  ;;  %v13576_v46 = vor.u32 %v6536_v34, %v6533_v53  ;;  %v6584_v19 = vshrl.u32 %v6263_v41, 16 }
 0x368   : > { %v4964_v6 = vpop.f32.mrb[174].mxu0  ;;  %v6525_v20 = vsel %vm6325_vm13, %v6502_v50, %v6524_v9  ;;  %v6265_v34 = vsel %vm15121_vm1, %v6262_v13, %v6264_v2  ;;  %v6558_v13 = vrot.slane %v6556_v61, 5  ;;  %v6267_v61 = vsel %vm15123_vm10, %v6264_v2, %v6266_v8 }
 0x369   : > { %v13566_v63 = vadd.f32 %v13441_v36, %v4964_v6  ;;  %v4966_v40 = vpop.f32.mrb[175].mxu0  ;;  %v6507_v36 = vsel %vm6325_vm13, %v13519_v15, %v13549_v37  ;;  %v6161_v6 = vshrl.u32 %v13523_v57, 16  ;;  %v6167_v15 = vrot.slane %v14428_v44, 1 }
 0x36a   : > { %7025 = vmatmul.mubr.bf16.gmra.mrb[20].mxu0 %v6485_v5  ;;  %8680 = vmatmul.mubr.bf16.gmra.mrb[40].mxu1 %v6481_v58  ;;  %v6565_v5 = vshll.u32 %v6261_v31, 16  ;;  %v6564_v31 = vrot.slane %v6562_v27, 4  ;;  %v6538_v60 = vsel %vm6325_vm13, %v6515_v35, %v13576_v46  ;;  %v6555_v40 = vrot.slane %v6553_v45, 4 }
 0x36b   : > { %7032 = vmatprep.mubr.bf16.mxu0 %v6516_v42  ;;  %8683 = vmatprep.mubr.bf16.mxu1 %v6503_v33  ;;  %v6163_v50 = vor.u32 %v6161_v6, %v6159_v3  ;;  %v6586_v27 = vrot.slane %v6584_v19, 4  ;;  %v6606_v41 = vshrl.u32 %v6265_v34, 16  ;;  %v6609_v33 = vshll.u32 %v6265_v34, 16 }
 0x36c   : > { %v6567_v53 = vrot.slane %v6565_v5, 5  ;;  %v13599_v5 = vld [vmem:[#allocation2 + $0x88] sm:$0xff]  ;;  %v6549_v45 = vrot.slane %v6149_v56, 5  ;;  %v6628_v55 = vshrl.u32 %v6267_v61, 16  ;;  %v6631_v56 = vshll.u32 %v6267_v61, 16 }
 0x36d   : > { %v6168_v35 = vsel %vm15122_vm14, %v6163_v50, %v6167_v15  ;;  %v13614_v50 = vor.u32 %v6558_v13, %v6555_v40  ;;  %v6169_v2 = vshrl.u32 %v13544_v52, 16 }
 0x36e   : > { %v6568_v34 = vor.u32 %v6567_v53, %v6564_v31  ;;  %v6175_v31 = vrot.slane %v14427_v1, 1  ;;  %v6611_v53 = vrot.slane %v6609_v33, 5 }
 0x370   : > { %v4969_v4 = vpop.f32.mrb[176].mxu0  ;;  %v6569_v40 = vsel %vm6325_vm13, %v6546_v39, %v6568_v34  ;;  %v6630_v39 = vrot.slane %v6628_v55, 4  ;;  %v6570_v55 = vrot.slane %v6161_v6, 4 }
 0x371   : > { %v13596_v58 = vadd.f32 %v13514_v54, %v4969_v4  ;;  %v4971_v42 = vpop.f32.mrb[177].mxu0 }
 0x372   : > { %7033 = vmatmul.mubr.bf16.gmra.mrb[24].mxu0 %v6507_v36  ;;  %v4972_v10 = vpop.f32.mrb[178].mxu0  ;;  %8684 = vmatmul.mubr.bf16.gmra.mrb[44].mxu1 %v6525_v20  ;;  %v6589_v36 = vrot.slane %v6587_v24, 5  ;;  %v6575_v42 = vshrl.u32 %v6168_v35, 16  ;;  %v6268_v20 = vrot.slane %v13599_v5, 1 }
 0x373   : > { %7040 = vmatprep.mubr.bf16.mxu0 %v6538_v60  ;;  %v13605_v3 = vadd.f32 %v13529_v12, %v4972_v10  ;;  %v4974_v54 = vpop.f32.mrb[179].mxu0  ;;  %8687 = vmatprep.mubr.bf16.mxu1 %v6547_v48  ;;  %v6528_v60 = vor.u32 %v6527_v23, %v6526_v59  ;;  %v6578_v12 = vshll.u32 %v6168_v35, 16  ;;  %v13617_v10 = vld [vmem:[#allocation2 + $0x90] sm:$0xff]  ;;  %v6608_v23 = vrot.slane %v6606_v41, 4 }
 0x374   : > { %v13602_v9 = vpop.f32.mrb[200].mxu1  ;;  %v6590_v59 = vor.u32 %v6589_v36, %v6586_v27  ;;  %v13624_v48 = vor.u32 %v6549_v45, %v6548_v7  ;;  %v6171_v35 = vor.u32 %v6169_v2, %v6167_v15  ;;  %v13631_v54 = vld [vmem:[#allocation2 + $0x98] sm:$0xff]  ;;  %v6270_v61 = vrot.slane %v13617_v10, 1 }
 0x375   : > { %v13610_v19 = vpop.f32.mrb[201].mxu1  ;;  %v6529_v13 = vsel %vm6325_vm13, %v13549_v37, %v6528_v60  ;;  %v6560_v27 = vsel %vm6325_vm13, %v13576_v46, %v13614_v50  ;;  %v6577_v41 = vrot.slane %v6575_v42, 4  ;;  %v6580_v7 = vrot.slane %v6578_v12, 5 }
 0x376   : > { %v13612_v4 = vpop.f32.mrb[202].mxu1  ;;  %v6269_v33 = vsel %vm15124_vm7, %v6266_v8, %v6268_v20  ;;  %v6633_v36 = vrot.slane %v6631_v56, 5  ;;  %v6176_v37 = vsel %vm15125_vm9, %v6171_v35, %v6175_v31  ;;  %v14429_v15 = vshll.u32 %v13580_v28, 16 }
 0x377   : > { %v13619_v24 = vpop.f32.mrb[203].mxu1  ;;  %v6591_v45 = vsel %vm6325_vm13, %v6568_v34, %v6590_v59  ;;  %v6612_v1 = vor.u32 %v6611_v53, %v6608_v23  ;;  %v6272_v46 = vrot.slane %v13631_v54, 1  ;;  %v6650_v12 = vshrl.u32 %v6269_v33, 16 }
 0x378   : > { %v6653_v8 = vshll.u32 %v6269_v33, 16  ;;  %v6271_v56 = vsel %vm15126_vm2, %v6268_v20, %v6270_v61  ;;  %v6581_v34 = vor.u32 %v6580_v7, %v6577_v41  ;;  %v6597_v23 = vshrl.u32 %v6176_v37, 16 }
 0x379   : > { %v6600_v53 = vshll.u32 %v6176_v37, 16  ;;  %v6634_v44 = vor.u32 %v6633_v36, %v6630_v39  ;;  %v14430_v33 = vshrl.u32 %v13560_v22, 16  ;;  %v6183_v6 = vrot.slane %v14429_v15, 1 }
 0x37a   : > { %7041 = vmatmul.mubr.bf16.gmra.mrb[28].mxu0 %v6529_v13  ;;  %8688 = vmatmul.mubr.bf16.gmra.mrb[48].mxu1 %v6569_v40  ;;  %v6551_v13 = vsel %vm6325_vm13, %v6528_v60, %v13624_v48  ;;  %v6672_v41 = vshrl.u32 %v6271_v56, 16  ;;  %v6675_v7 = vshll.u32 %v6271_v56, 16  ;;  %v6652_v37 = vrot.slane %v6650_v12, 4 }
 0x37b   : > { %7048 = vmatprep.mubr.bf16.mxu0 %v6560_v27  ;;  %8691 = vmatprep.mubr.bf16.mxu1 %v6591_v45  ;;  %v6068_v27 = vld [vmem:[#allocation2 + $0xa0] sm:$0x3f]  ;;  %v6571_v45 = vrot.slane %v6157_v18, 5  ;;  %v6179_v39 = vor.u32 %v14430_v33, %v6175_v31  ;;  %v6613_v18 = vsel %vm6325_vm13, %v6590_v59, %v6612_v1  ;;  %v6582_v36 = vsel %vm6325_vm13, %v13614_v50, %v6581_v34 }
 0x37c   : > { %v13661_v57 = vrot.slane %v6068_v27, 1  ;;  %v6635_v31 = vsel %vm6325_vm13, %v6612_v1, %v6634_v44  ;;  %v6674_v59 = vrot.slane %v6672_v41, 4  ;;  %v15129_v33 = vshll.u32 %v13544_v52, 16 }
 0x37d   : > { %v4977_v42 = vpop.f32.mrb[180].mxu0  ;;  %v6184_v12 = vsel %vm15113_vm6, %v6179_v39, %v6183_v6 }
 0x37e   : > { %v13648_v35 = vadd.f32 %v13510_v38, %v4977_v42  ;;  %v4979_v40 = vpop.f32.mrb[181].mxu0  ;;  %v6273_v42 = vsel %vm15112_vm0, %v6270_v61, %v6272_v46  ;;  %v6619_v15 = vshrl.u32 %v6184_v12, 16  ;;  %v6622_v1 = vshll.u32 %v6184_v12, 16 }
 0x37f   : > { %v4980_v60 = vpop.f32.mrb[182].mxu0  ;;  %v6655_v40 = vrot.slane %v6653_v8, 5  ;;  %v6694_v61 = vshrl.u32 %v6273_v42, 16  ;;  %v14431_v8 = vshll.u32 %v13599_v5, 16 }
 0x380   : > { %v13656_v20 = vadd.f32 %v13525_v49, %v4980_v60  ;;  %v4982_v38 = vpop.f32.mrb[183].mxu0  ;;  %v6599_v49 = vrot.slane %v6597_v23, 4  ;;  %v6602_v60 = vrot.slane %v6600_v53, 5  ;;  %v6697_v53 = vshll.u32 %v6273_v42, 16 }
 0x381   : > { %v13666_v38 = vor.u32 %v6571_v45, %v6570_v55  ;;  %v6656_v23 = vor.u32 %v6655_v40, %v6652_v37  ;;  %v6275_v55 = vsel %vm15127_vm12, %v6272_v46, %v13661_v57  ;;  %v6696_v42 = vrot.slane %v6694_v61, 4 }
 0x382   : > { %7049 = vmatmul.mubr.bf16.gmra.mrb[32].mxu0 %v6551_v13  ;;  %8692 = vmatmul.mubr.bf16.gmra.mrb[52].mxu1 %v6613_v18  ;;  %v6677_v13 = vrot.slane %v6675_v7, 5  ;;  %v6603_v18 = vor.u32 %v6602_v60, %v6599_v49  ;;  %v6185_v40 = vshrl.u32 %v13580_v28, 16  ;;  %v6191_v46 = vrot.slane %v14431_v8, 1 }
 0x383   : > { %7056 = vmatprep.mubr.bf16.mxu0 %v6582_v36  ;;  %8695 = vmatprep.mubr.bf16.mxu1 %v6635_v31  ;;  %v6573_v37 = vsel %vm6325_vm13, %v13624_v48, %v13666_v38  ;;  %v6716_v60 = vshrl.u32 %v6275_v55, 16  ;;  %v6719_v12 = vshll.u32 %v6275_v55, 16  ;;  %v6593_v48 = vrot.slane %v15129_v33, 5 }
 0x384   : > { %v13670_v56 = vpop.f32.mrb[204].mxu1  ;;  %v6678_v49 = vor.u32 %v6677_v13, %v6674_v59  ;;  %v6187_v61 = vor.u32 %v6185_v40, %v6183_v6  ;;  %v6604_v8 = vsel %vm6325_vm13, %v6581_v34, %v6603_v18  ;;  %v14432_v13 = vshll.u32 %v13617_v10, 16 }
 0x385   : > { %v13673_v27 = vpop.f32.mrb[205].mxu1  ;;  %v4985_v50 = vpop.f32.mrb[184].mxu0  ;;  %v6718_v52 = vrot.slane %v6716_v60, 4  ;;  %v6721_v33 = vrot.slane %v6719_v12, 5  ;;  %v6741_v60 = vshll.u32 %v13661_v57, 16 }
 0x386   : > { %v13677_v45 = vpop.f32.mrb[206].mxu1  ;;  %v13680_v39 = vadd.f32 %v13610_v19, %v4985_v50  ;;  %v4987_v36 = vpop.f32.mrb[185].mxu0  ;;  %v6699_v50 = vrot.slane %v6697_v53, 5  ;;  %v6192_v59 = vsel %vm15130_vm5, %v6187_v61, %v6191_v46  ;;  %v6199_v12 = vrot.slane %v14432_v13, 1 }
 0x387   : > { %v13682_v41 = vpop.f32.mrb[207].mxu1  ;;  %v4988_v7 = vpop.f32.mrb[186].mxu0  ;;  %v6592_v36 = vrot.slane %v6169_v2, 4  ;;  %v6679_v2 = vsel %vm6325_vm13, %v6656_v23, %v6678_v49 }
 0x388   : > { %15128 = vst [vmem:[#allocation45_spill] sm:$0xff] %v13680_v39  ;;  %v13691_v19 = vadd.f32 %v13619_v24, %v4988_v7  ;;  %v4990_v31 = vpop.f32.mrb[187].mxu0  ;;  %v6621_v39 = vrot.slane %v6619_v15, 4  ;;  %v6624_v24 = vrot.slane %v6622_v1, 5  ;;  %v6657_v7 = vsel %vm6325_vm13, %v6634_v44, %v6656_v23 }
 0x389   : > { %v6700_v55 = vor.u32 %v6699_v50, %v6696_v42  ;;  %v6594_v6 = vor.u32 %v6593_v48, %v6592_v36  ;;  %v6738_v23 = vshrl.u32 %v13661_v57, 16  ;;  %v6193_v42 = vshrl.u32 %v13599_v5, 16 }
 0x38a   : > { %7057 = vmatmul.mubr.bf16.gmra.mrb[36].mxu0 %v6573_v37  ;;  %8696 = vmatmul.mubr.bf16.gmra.mrb[56].mxu1 %v6657_v7  ;;  %v6625_v44 = vor.u32 %v6624_v24, %v6621_v39  ;;  %v6644_v37 = vshll.u32 %v6192_v59, 16  ;;  %v6722_v39 = vor.u32 %v6721_v33, %v6718_v52  ;;  %v15131_v7 = vshrl.u32 %v13560_v22, 16 }
 0x38b   : > { %7064 = vmatprep.mubr.bf16.mxu0 %v6604_v8  ;;  %8699 = vmatprep.mubr.bf16.mxu1 %v6679_v2  ;;  %v6641_v8 = vshrl.u32 %v6192_v59, 16  ;;  %v6595_v48 = vsel %vm6325_vm13, %v13666_v38, %v6594_v6  ;;  %v15132_v59 = vshll.u32 %v13560_v22, 16  ;;  %v6701_v52 = vsel %vm6325_vm13, %v6678_v49, %v6700_v55 }
 0x38c   : > { %v6614_v57 = vrot.slane %v15131_v7, 4  ;;  %v6740_v38 = vrot.slane %v6738_v23, 4  ;;  %v6743_v33 = vrot.slane %v6741_v60, 5  ;;  %v6723_v7 = vsel %vm6325_vm13, %v6700_v55, %v6722_v39 }
 0x38d   : > { %v4993_v53 = vpop.f32.mrb[188].mxu0  ;;  %v13707_v1 = vpop.f32.mrb[208].mxu1  ;;  %v6615_v2 = vrot.slane %v15132_v59, 5 }
 0x38e   : > { %v13705_v34 = vadd.f32 %v13602_v9, %v4993_v53  ;;  %v4995_v15 = vpop.f32.mrb[189].mxu0  ;;  %v13709_v61 = vpop.f32.mrb[209].mxu1  ;;  %v6195_v53 = vor.u32 %v6193_v42, %v6191_v46  ;;  %v14434_v46 = vshrl.u32 %v13617_v10, 16 }
 0x38f   : > { %v4996_v31 = vpop.f32.mrb[190].mxu0  ;;  %v13719_v36 = vpop.f32.mrb[210].mxu1  ;;  %v6643_v15 = vrot.slane %v6641_v8, 4  ;;  %v6616_v59 = vor.u32 %v6615_v2, %v6614_v57 }
 0x390   : > { %v13717_v9 = vadd.f32 %v13612_v4, %v4996_v31  ;;  %v4998_v50 = vpop.f32.mrb[191].mxu0  ;;  %v13723_v24 = vpop.f32.mrb[211].mxu1  ;;  %v6626_v4 = vsel %vm6325_vm13, %v6603_v18, %v6625_v44  ;;  %v6646_v31 = vrot.slane %v6644_v37, 5  ;;  %v6203_v55 = vor.u32 %v14434_v46, %v6199_v12 }
 0x391   : > { %v6200_v50 = vsel %vm15133_vm8, %v6195_v53, %v6199_v12 }
 0x392   : > { %7065 = vmatmul.mubr.bf16.gmra.mrb[40].mxu0 %v6595_v48  ;;  %8700 = vmatmul.mubr.bf16.gmra.mrb[60].mxu1 %v6701_v52  ;;  %v14433_v48 = vshll.u32 %v13631_v54, 16  ;;  %v6647_v37 = vor.u32 %v6646_v31, %v6643_v15  ;;  %v6663_v23 = vshrl.u32 %v6200_v50, 16  ;;  %v6666_v60 = vshll.u32 %v6200_v50, 16 }
 0x393   : > { %7072 = vmatprep.mubr.bf16.mxu0 %v6626_v4  ;;  %8703 = vmatprep.mubr.bf16.mxu1 %v6723_v7  ;;  %v6744_v4 = vor.u32 %v6743_v33, %v6740_v38  ;;  %v6636_v31 = vrot.slane %v6185_v40, 4  ;;  %v15134_v38 = vshll.u32 %v13580_v28, 16  ;;  %v6209_v28 = vshrl.u32 %v13631_v54, 16 }
 0x394   : > { %v6207_v12 = vrot.slane %v14433_v48, 1  ;;  %v6665_v50 = vrot.slane %v6663_v23, 4 }
 0x395   : > { %v5001_v22 = vpop.f32.mrb[192].mxu0  ;;  %v13740_v49 = vpop.f32.mrb[212].mxu1  ;;  %v6637_v33 = vrot.slane %v15134_v38, 5 }
 0x396   : > { %v13738_v18 = vadd.f32 %v13673_v27, %v5001_v22  ;;  %v5003_v8 = vpop.f32.mrb[193].mxu0  ;;  %v13742_v52 = vpop.f32.mrb[213].mxu1  ;;  %v13751_v27 = vld [vmem:[#allocation2 + $0xa0] sm:$0x1f]  ;;  %v6617_v22 = vsel %vm6325_vm13, %v6594_v6, %v6616_v59  ;;  %v6208_v6 = vsel %vm15135_vm3, %v6203_v55, %v6207_v12  ;;  %v6211_v55 = vor.u32 %v6209_v28, %v6207_v12 }
 0x397   : > { %v5004_v53 = vpop.f32.mrb[194].mxu0  ;;  %v13749_v7 = vpop.f32.mrb[214].mxu1  ;;  %v6668_v8 = vrot.slane %v6666_v60, 5  ;;  %v6638_v13 = vor.u32 %v6637_v33, %v6636_v31  ;;  %v6685_v23 = vshrl.u32 %v6208_v6, 16  ;;  %v6688_v60 = vshll.u32 %v6208_v6, 16 }
 0x398   : > { %v13747_v57 = vadd.f32 %v13682_v41, %v5004_v53  ;;  %v5006_v2 = vpop.f32.mrb[195].mxu0  ;;  %v13754_v15 = vpop.f32.mrb[215].mxu1  ;;  %v6648_v41 = vsel %vm6325_vm13, %v6625_v44, %v6647_v37  ;;  %v6745_v53 = vsel %vm6325_vm13, %v6722_v39, %v6744_v4 }
 0x399   : > { %v6213_v2 = vshll.u32 %v13751_v27, 16  ;;  %v6669_v44 = vor.u32 %v6668_v8, %v6665_v50  ;;  %v6639_v50 = vsel %vm6325_vm13, %v6616_v59, %v6638_v13 }
 0x39a   : > { %7073 = vmatmul.mubr.bf16.gmra.mrb[44].mxu0 %v6617_v22  ;;  %8704 = vmatmul.mubr.bf16.gmra.mrb[64].mxu1 %v6745_v53 }
 0x39b   : > { %7080 = vmatprep.mubr.bf16.mxu0 %v6648_v41  ;;  %v6215_v31 = vrot.slane %v6213_v2, 1  ;;  %v6670_v6 = vsel %vm6325_vm13, %v6647_v37, %v6669_v44 }
 0x39d   : > { %v5009_v40 = vpop.f32.mrb[196].mxu0  ;;  %v5728_v48 = vpop.f32.mrb[216].mxu1 }
 0x39e   : > { %v13768_v38 = vadd.f32 %v13670_v56, %v5009_v40  ;;  %v5011_v22 = vpop.f32.mrb[197].mxu0  ;;  %v13771_v39 = vadd.f32 %v5728_v48, %v13245_v14  ;;  %v5730_v4 = vpop.f32.mrb[217].mxu1  ;;  %v6658_v14 = vrot.slane %v6193_v42, 4  ;;  %v15136_v48 = vshll.u32 %v13599_v5, 16 }
 0x39f   : > { %v5012_v46 = vpop.f32.mrb[198].mxu0  ;;  %v5731_v41 = vpop.f32.mrb[218].mxu1  ;;  %v6687_v40 = vrot.slane %v6685_v23, 4 }
 0x3a0   : > { %v13778_v33 = vadd.f32 %v13677_v45, %v5012_v46  ;;  %v5014_v56 = vpop.f32.mrb[199].mxu0  ;;  %v13782_v8 = vadd.f32 %v5731_v41, %v13255_v62  ;;  %v5733_v53 = vpop.f32.mrb[219].mxu1  ;;  %v6659_v12 = vrot.slane %v15136_v48, 5  ;;  %v6690_v45 = vrot.slane %v6688_v60, 5 }
 0x3a1   : > { %v6216_v46 = vsel %vm15137_vm15, %v6211_v55, %v6215_v31 }
 0x3a2   : > { %7081 = vmatmul.mubr.bf16.gmra.mrb[48].mxu0 %v6639_v50  ;;  %v6660_v59 = vor.u32 %v6659_v12, %v6658_v14  ;;  %v6691_v41 = vor.u32 %v6690_v45, %v6687_v40  ;;  %v6707_v42 = vshrl.u32 %v6216_v46, 16  ;;  %v6710_v53 = vshll.u32 %v6216_v46, 16 }
 0x3a3   : > { %7088 = vmatprep.mubr.bf16.mxu0 %v6670_v6  ;;  %v6217_v14 = vshrl.u32 %v13751_v27, 16  ;;  %v15138_v6 = vshrl.u32 %v13617_v10, 16 }
 0x3a4   : > { %v6709_v46 = vrot.slane %v6707_v42, 4 }
 0x3a5   : > { %v5017_v22 = vpop.f32.mrb[200].mxu0  ;;  %v5736_v56 = vpop.f32.mrb[220].mxu1  ;;  %v6680_v40 = vrot.slane %v15138_v6, 4 }
 0x3a6   : > { %v13791_v62 = vadd.f32 %v13709_v61, %v5017_v22  ;;  %v5019_v4 = vpop.f32.mrb[201].mxu0  ;;  %v13794_v50 = vadd.f32 %v5736_v56, %v13287_v0  ;;  %v5738_v37 = vpop.f32.mrb[221].mxu1  ;;  %v6661_v61 = vsel %vm6325_vm13, %v6638_v13, %v6660_v59  ;;  %v15139_v0 = vshll.u32 %v13617_v10, 16 }
 0x3a7   : > { %v5020_v5 = vpop.f32.mrb[202].mxu0  ;;  %v5739_v55 = vpop.f32.mrb[222].mxu1  ;;  %v6712_v22 = vrot.slane %v6710_v53, 5  ;;  %v6219_v4 = vor.u32 %v6217_v14, %v6215_v31 }
 0x3a8   : > { %v13797_v23 = vadd.f32 %v13723_v24, %v5020_v5  ;;  %v5022_v60 = vpop.f32.mrb[203].mxu0  ;;  %v13802_v48 = vadd.f32 %v5739_v55, %v13301_v21  ;;  %v5741_v12 = vpop.f32.mrb[223].mxu1  ;;  %v6681_v45 = vrot.slane %v15139_v0, 5  ;;  %v6692_v24 = vsel %vm6325_vm13, %v6669_v44, %v6691_v41 }
 0x3a9   : > { %v6713_v60 = vor.u32 %v6712_v22, %v6709_v46  ;;  %v6729_v55 = vshrl.u32 %v6219_v4, 16  ;;  %v6732_v12 = vshll.u32 %v6219_v4, 16  ;;  %v6702_v0 = vrot.slane %v6209_v28, 4 }
 0x3aa   : > { %7089 = vmatmul.mubr.bf16.gmra.mrb[52].mxu0 %v6661_v61  ;;  %v6682_v5 = vor.u32 %v6681_v45, %v6680_v40  ;;  %v15140_v45 = vshll.u32 %v13631_v54, 16 }
 0x3ab   : > { %7096 = vmatprep.mubr.bf16.mxu0 %v6692_v24  ;;  %v6731_v46 = vrot.slane %v6729_v55, 4 }
 0x3ac   : > { %v6683_v53 = vsel %vm6325_vm13, %v6660_v59, %v6682_v5  ;;  %v6703_v24 = vrot.slane %v15140_v45, 5 }
 0x3ad   : > { %v5025_v56 = vpop.f32.mrb[204].mxu0  ;;  %v5744_v37 = vpop.f32.mrb[224].mxu1 }
 0x3ae   : > { %v13810_v13 = vadd.f32 %v13707_v1, %v5025_v56  ;;  %v5027_v21 = vpop.f32.mrb[205].mxu0  ;;  %v13813_v10 = vadd.f32 %v5744_v37, %v13338_v43  ;;  %v5746_v61 = vpop.f32.mrb[225].mxu1  ;;  %v6714_v43 = vsel %vm6325_vm13, %v6691_v41, %v6713_v60  ;;  %v6704_v4 = vor.u32 %v6703_v24, %v6702_v0 }
 0x3af   : > { %v5028_v6 = vpop.f32.mrb[206].mxu0  ;;  %v5747_v42 = vpop.f32.mrb[226].mxu1 }
 0x3b0   : > { %v13816_v44 = vadd.f32 %v13719_v36, %v5028_v6  ;;  %v5030_v31 = vpop.f32.mrb[207].mxu0  ;;  %v13820_v1 = vadd.f32 %v5747_v42, %v13343_v47  ;;  %v5749_v40 = vpop.f32.mrb[227].mxu1  ;;  %v6734_v36 = vrot.slane %v6732_v12, 5  ;;  %v6705_v55 = vsel %vm6325_vm13, %v6682_v5, %v6704_v4 }
 0x3b1   : > { %v6724_v12 = vrot.slane %v6217_v14, 4 }
 0x3b2   : > { %7097 = vmatmul.mubr.bf16.gmra.mrb[56].mxu0 %v6683_v53  ;;  %v6735_v21 = vor.u32 %v6734_v36, %v6731_v46 }
 0x3b3   : > { %7104 = vmatprep.mubr.bf16.mxu0 %v6714_v43 }
 0x3b4   : > { %v6736_v53 = vsel %vm6325_vm13, %v6713_v60, %v6735_v21 }
 0x3b5   : > { %v5033_v22 = vpop.f32.mrb[208].mxu0  ;;  %v5752_v56 = vpop.f32.mrb[228].mxu1 }
 0x3b6   : > { %v13828_v59 = vadd.f32 %v13742_v52, %v5033_v22  ;;  %v5035_v47 = vpop.f32.mrb[209].mxu0  ;;  %v5753_v28 = vadd.f32 %v5752_v56, %v13395_v51  ;;  %v5754_v6 = vpop.f32.mrb[229].mxu1  ;;  %v6725_v52 = vrot.slane %v6213_v2, 5 }
 0x3b7   : > { %v5036_v37 = vpop.f32.mrb[210].mxu0  ;;  %v5755_v41 = vpop.f32.mrb[230].mxu1 }
 0x3b8   : > { %v13832_v54 = vadd.f32 %v13754_v15, %v5036_v37  ;;  %v5038_v61 = vpop.f32.mrb[211].mxu0  ;;  %v5756_v31 = vadd.f32 %v5755_v41, %v13405_v25  ;;  %v5757_v42 = vpop.f32.mrb[231].mxu1  ;;  %v6726_v40 = vor.u32 %v6725_v52, %v6724_v12 }
 0x3ba   : > { %7105 = vmatmul.mubr.bf16.gmra.mrb[60].mxu0 %v6705_v55  ;;  %v6727_v43 = vsel %vm6325_vm13, %v6704_v4, %v6726_v40  ;;  %vm7488_vm13 = vcmask 1044480  }
 0x3bb   : > { %7112 = vmatprep.mubr.bf16.mxu0 %v6736_v53 }
 0x3bd   : > { %v5041_v51 = vpop.f32.mrb[212].mxu0  ;;  %v5760_v45 = vpop.f32.mrb[232].mxu1 }
 0x3be   : > { %v13840_v15 = vadd.f32 %v13740_v49, %v5041_v51  ;;  %v5043_v0 = vpop.f32.mrb[213].mxu0  ;;  %v5761_v14 = vadd.f32 %v5760_v45, %v13433_v30  ;;  %v5762_v5 = vpop.f32.mrb[233].mxu1 }
 0x3bf   : > { %v5044_v24 = vpop.f32.mrb[214].mxu0  ;;  %v5763_v2 = vpop.f32.mrb[234].mxu1 }
 0x3c0   : > { %v13844_v25 = vadd.f32 %v13749_v7, %v5044_v24  ;;  %v5046_v27 = vpop.f32.mrb[215].mxu0  ;;  %v5764_v60 = vadd.f32 %v5763_v2, %v13446_v32  ;;  %v5765_v46 = vpop.f32.mrb[235].mxu1 }
 0x3c2   : > { %7113 = vmatmul.mubr.bf16.gmra.mrb[64].mxu0 %v6727_v43 }
 0x3c5   : > { %v8621_v36 = vpop.f32.mrb[216].mxu0  ;;  %v5768_v56 = vpop.f32.mrb[236].mxu1 }
 0x3c6   : > { %v13849_v49 = vadd.f32 %v8621_v36, %v13794_v50  ;;  %v5905_v22 = vpop.f32.mrb[217].mxu0  ;;  %v5769_v4 = vadd.f32 %v5768_v56, %v13472_v26  ;;  %v5770_v37 = vpop.f32.mrb[237].mxu1 }
 0x3c7   : > { %v13852_v47 = vadd.f32 %v5905_v22, %v13771_v39  ;;  %v8622_v30 = vpop.f32.mrb[218].mxu0  ;;  %v5771_v6 = vpop.f32.mrb[238].mxu1 }
 0x3c8   : > { %v13855_v7 = vadd.f32 %v8622_v30, %v13802_v48  ;;  %v5908_v21 = vpop.f32.mrb[219].mxu0  ;;  %v5772_v50 = vadd.f32 %v5771_v6, %v13482_v11  ;;  %v5773_v61 = vpop.f32.mrb[239].mxu1 }
 0x3c9   : > { %v13859_v32 = vadd.f32 %v5908_v21, %v13782_v8 }
 0x3cd   : > { %v8625_v41 = vpop.f32.mrb[220].mxu0  ;;  %v5776_v42 = vpop.f32.mrb[240].mxu1 }
 0x3ce   : > { %v13862_v55 = vadd.f32 %v8625_v41, %v5753_v28  ;;  %v5921_v39 = vpop.f32.mrb[221].mxu0  ;;  %v5777_v53 = vadd.f32 %v5776_v42, %v13517_v29  ;;  %v5778_v8 = vpop.f32.mrb[241].mxu1 }
 0x3cf   : > { %v13865_v12 = vadd.f32 %v5921_v39, %v13813_v10  ;;  %v8626_v48 = vpop.f32.mrb[222].mxu0  ;;  %v5779_v11 = vpop.f32.mrb[242].mxu1 }
 0x3d0   : > { %v13867_v52 = vadd.f32 %v8626_v48, %v5756_v31  ;;  %v5924_v26 = vpop.f32.mrb[223].mxu0  ;;  %v5780_v40 = vadd.f32 %v5779_v11, %v13532_v17  ;;  %v5781_v28 = vpop.f32.mrb[243].mxu1 }
 0x3d1   : > { %v13871_v51 = vadd.f32 %v5924_v26, %v13820_v1 }
 0x3d5   : > { %v8629_v0 = vpop.f32.mrb[224].mxu0  ;;  %v5784_v31 = vpop.f32.mrb[244].mxu1 }
 0x3d6   : > { %v13874_v45 = vadd.f32 %v8629_v0, %v5769_v4  ;;  %v5937_v10 = vpop.f32.mrb[225].mxu0  ;;  %v5785_v29 = vadd.f32 %v5784_v31, %v13556_v16  ;;  %v5786_v43 = vpop.f32.mrb[245].mxu1 }
 0x3d7   : > { %v13876_v24 = vadd.f32 %v5937_v10, %v5761_v14  ;;  %v8630_v5 = vpop.f32.mrb[226].mxu0  ;;  %v5787_v46 = vpop.f32.mrb[246].mxu1 }
 0x3d8   : > { %v13878_v27 = vadd.f32 %v8630_v5, %v5772_v50  ;;  %v5940_v2 = vpop.f32.mrb[227].mxu0  ;;  %v5788_v17 = vadd.f32 %v5787_v46, %v13566_v63  ;;  %v5789_v36 = vpop.f32.mrb[247].mxu1 }
 0x3d9   : > { %v13881_v1 = vadd.f32 %v5940_v2, %v5764_v60 }
 0x3dd   : > { %v8633_v22 = vpop.f32.mrb[228].mxu0  ;;  %v5792_v4 = vpop.f32.mrb[248].mxu1 }
 0x3de   : > { %v13884_v30 = vadd.f32 %v8633_v22, %v5785_v29  ;;  %v5953_v56 = vpop.f32.mrb[229].mxu0  ;;  %v5793_v16 = vadd.f32 %v5792_v4, %v13596_v58  ;;  %v5794_v50 = vpop.f32.mrb[249].mxu1 }
 0x3df   : > { %v13886_v14 = vadd.f32 %v5953_v56, %v5777_v53  ;;  %v8634_v21 = vpop.f32.mrb[230].mxu0  ;;  %v5795_v61 = vpop.f32.mrb[250].mxu1 }
 0x3e0   : > { %v13888_v37 = vadd.f32 %v8634_v21, %v5788_v17  ;;  %v5956_v6 = vpop.f32.mrb[231].mxu0  ;;  %v5796_v63 = vadd.f32 %v5795_v61, %v13605_v3  ;;  %v5797_v41 = vpop.f32.mrb[251].mxu1  ;;  %v15141_v17 = vld [vmem:[#allocation45_spill] sm:$0xff] }
 0x3e1   : > { %v13891_v60 = vadd.f32 %v5956_v6, %v5780_v40 }
 0x3e5   : > { %v8637_v39 = vpop.f32.mrb[232].mxu0  ;;  %v5800_v53 = vpop.f32.mrb[252].mxu1 }
 0x3e6   : > { %v5969_v48 = vpop.f32.mrb[233].mxu0  ;;  %v5801_v11 = vadd.f32 %v5800_v53, %v13648_v35  ;;  %v5802_v28 = vpop.f32.mrb[253].mxu1 }
 0x3e7   : > { %v13894_v42 = vadd.f32 %v5969_v48, %v5793_v16  ;;  %v8638_v26 = vpop.f32.mrb[234].mxu0  ;;  %v5803_v58 = vpop.f32.mrb[254].mxu1 }
 0x3e8   : > { %v5972_v8 = vpop.f32.mrb[235].mxu0  ;;  %v13899_v10 = vadd.f32 %v8637_v39, %v5801_v11  ;;  %v5804_v40 = vadd.f32 %v5803_v58, %v13656_v20  ;;  %v5805_v5 = vpop.f32.mrb[255].mxu1 }
 0x3e9   : > { %v13897_v0 = vadd.f32 %v5972_v8, %v5796_v63 }
 0x3ea   : > { %v13902_v3 = vadd.f32 %v8638_v26, %v5804_v40 }
 0x3ed   : > { %v8641_v31 = vpop.f32.mrb[236].mxu0  ;;  %v5808_v43 = vpop.f32.mrb[0].mxu1 }
 0x3ee   : > { %v5985_v2 = vpop.f32.mrb[237].mxu0  ;;  %v5809_v36 = vadd.f32 %v5808_v43, %v15141_v17  ;;  %v5810_v22 = vpop.f32.mrb[1].mxu1 }
 0x3ef   : > { %v8642_v29 = vpop.f32.mrb[238].mxu0  ;;  %v5811_v35 = vpop.f32.mrb[2].mxu1 }
 0x3f0   : > { %v5988_v46 = vpop.f32.mrb[239].mxu0  ;;  %v13905_v56 = vadd.f32 %v5985_v2, %v5809_v36  ;;  %v5812_v21 = vadd.f32 %v5811_v35, %v13691_v19  ;;  %v5813_v4 = vpop.f32.mrb[3].mxu1 }
 0x3f2   : > { %v13908_v6 = vadd.f32 %v5988_v46, %v5812_v21 }
 0x3f5   : > { %v8645_v20 = vpop.f32.mrb[240].mxu0  ;;  %v5816_v61 = vpop.f32.mrb[4].mxu1 }
 0x3f6   : > { %v6001_v16 = vpop.f32.mrb[241].mxu0  ;;  %v5817_v41 = vadd.f32 %v5816_v61, %v13705_v34  ;;  %v5818_v39 = vpop.f32.mrb[5].mxu1 }
 0x3f7   : > { %v8646_v50 = vpop.f32.mrb[242].mxu0  ;;  %v5819_v48 = vpop.f32.mrb[6].mxu1 }
 0x3f8   : > { %v6004_v63 = vpop.f32.mrb[243].mxu0  ;;  %v13911_v26 = vadd.f32 %v8641_v31, %v5817_v41  ;;  %v5820_v53 = vadd.f32 %v5819_v48, %v13717_v9  ;;  %v5821_v8 = vpop.f32.mrb[7].mxu1 }
 0x3fa   : > { %v13914_v11 = vadd.f32 %v8642_v29, %v5820_v53 }
 0x3fd   : > { %v8649_v19 = vpop.f32.mrb[244].mxu0  ;;  %v5824_v40 = vpop.f32.mrb[8].mxu1 }
 0x3fe   : > { %v6017_v28 = vpop.f32.mrb[245].mxu0  ;;  %v5825_v2 = vadd.f32 %v5824_v40, %v13738_v18  ;;  %v5826_v43 = vpop.f32.mrb[9].mxu1 }
 0x3ff   : > { %v8650_v58 = vpop.f32.mrb[246].mxu0  ;;  %v5827_v46 = vpop.f32.mrb[10].mxu1 }
 0x400   : > { %v6020_v5 = vpop.f32.mrb[247].mxu0  ;;  %v13917_v17 = vadd.f32 %v6001_v16, %v5825_v2  ;;  %v5828_v34 = vadd.f32 %v5827_v46, %v13747_v57  ;;  %v5829_v31 = vpop.f32.mrb[11].mxu1 }
 0x402   : > { %v13920_v36 = vadd.f32 %v6004_v63, %v5828_v34 }
 0x405   : > { %v8653_v9 = vpop.f32.mrb[248].mxu0  ;;  %v5832_v35 = vpop.f32.mrb[12].mxu1 }
 0x406   : > { %v6033_v22 = vpop.f32.mrb[249].mxu0  ;;  %v5833_v4 = vadd.f32 %v5832_v35, %v13768_v38  ;;  %v5834_v61 = vpop.f32.mrb[13].mxu1 }
 0x407   : > { %v13922_v29 = vpop.f32.mrb[250].mxu0  ;;  %v5835_v41 = vpop.f32.mrb[14].mxu1 }
 0x408   : > { %v6036_v21 = vpop.f32.mrb[251].mxu0  ;;  %v13925_v18 = vadd.f32 %v8645_v20, %v5833_v4  ;;  %v5836_v16 = vadd.f32 %v5835_v41, %v13778_v33  ;;  %v5837_v39 = vpop.f32.mrb[15].mxu1 }
 0x40a   : > { %v13928_v48 = vadd.f32 %v8646_v50, %v5836_v16 }
 0x40d   : > { %v13930_v57 = vpop.f32.mrb[252].mxu0  ;;  %v5840_v8 = vpop.f32.mrb[16].mxu1 }
 0x40e   : > { %v6980_v63 = vpop.f32.mrb[253].mxu0  ;;  %v5841_v2 = vadd.f32 %v5840_v8, %v13791_v62  ;;  %v5842_v43 = vpop.f32.mrb[17].mxu1 }
 0x40f   : > { %v13932_v53 = vpop.f32.mrb[254].mxu0  ;;  %v5843_v38 = vpop.f32.mrb[18].mxu1 }
 0x410   : > { %v6983_v40 = vpop.f32.mrb[255].mxu0  ;;  %v13935_v46 = vadd.f32 %v6017_v28, %v5841_v2  ;;  %v5844_v20 = vadd.f32 %v5843_v38, %v13797_v23  ;;  %v5845_v34 = vpop.f32.mrb[19].mxu1 }
 0x412   : > { %v13938_v33 = vadd.f32 %v6020_v5, %v5844_v20 }
 0x415   : > { %v6986_v50 = vpop.f32.mrb[0].mxu0  ;;  %v5848_v4 = vpop.f32.mrb[20].mxu1 }
 0x416   : > { %v6988_v31 = vpop.f32.mrb[1].mxu0  ;;  %v5849_v41 = vadd.f32 %v5848_v4, %v13810_v13  ;;  %v5850_v16 = vpop.f32.mrb[21].mxu1 }
 0x417   : > { %v13940_v35 = vpop.f32.mrb[2].mxu0  ;;  %v5851_v39 = vpop.f32.mrb[22].mxu1  ;;  %v8222_v16 = vld [vmem:[%s9091_s16 + $0x10] sm:$0xff]  }
 0x418   : > { %v6991_v61 = vpop.f32.mrb[3].mxu0  ;;  %v13943_v62 = vadd.f32 %v8649_v19, %v5849_v41  ;;  %v5852_v28 = vadd.f32 %v5851_v39, %v13816_v44  ;;  %v5853_v63 = vpop.f32.mrb[23].mxu1 }
 0x419   : > { %v7334_v63 = vld [vmem:[%s9091_s16 + $0x8] sm:$0xe] }
 0x41a   : > { %15142 = vst [vmem:[#allocation44_spill] sm:$0xff] %v13943_v62  ;;  %v13946_v8 = vadd.f32 %v8650_v58, %v5852_v28 }
 0x41c   : > { %15143 = vst [vmem:[#allocation52_spill] sm:$0xff] %v13946_v8  ;;  %v8226_v8 = vld [vmem:[%s9091_s16 + $0x30] sm:$0xff]  }
 0x41d   : > { %v13948_v23 = vpop.f32.mrb[4].mxu0  ;;  %v5856_v2 = vpop.f32.mrb[24].mxu1 }
 0x41e   : > { %v6996_v5 = vpop.f32.mrb[5].mxu0  ;;  %v5857_v38 = vadd.f32 %v5856_v2, %v13828_v59  ;;  %v5858_v13 = vpop.f32.mrb[25].mxu1 }
 0x41f   : > { %v13950_v40 = vpop.f32.mrb[6].mxu0  ;;  %v5859_v19 = vpop.f32.mrb[26].mxu1  ;;  %v7335_v5 = vld [vmem:[%s9091_s16 + $0xc] sm:$0xf]  ;;  %v8223_v13 = vld [vmem:[%s9091_s16 + $0x18] sm:$0xff]  }
 0x420   : > { %v6999_v43 = vpop.f32.mrb[7].mxu0  ;;  %v13953_v20 = vadd.f32 %v6033_v22, %v5857_v38  ;;  %v5860_v44 = vadd.f32 %v5859_v19, %v13832_v54  ;;  %v5861_v58 = vpop.f32.mrb[27].mxu1  ;;  %v8157_v38 = vunpack.c.h.bf16 %v8222_v16 }
 0x421   : > { %v8156_v43 = vunpack.c.l.bf16 %v8222_v16  ;;  %v7372_v58 = vunpack.c.l.bf16 %v7335_v5 }
 0x422   : > { %15144 = vst [vmem:[#allocation49_spill] sm:$0xff] %v13953_v20  ;;  %v13956_v34 = vadd.f32 %v6036_v21, %v5860_v44  ;;  %v7371_v44 = vunpack.c.l.bf16 %v7334_v63 }
 0x423   : > { %v7490_v5 = vrot.slane %v7372_v58, 3 }
 0x424   : > { %15145 = vst [vmem:[#allocation62_spill] sm:$0xff] %v13956_v34  ;;  %v7494_v34 = vrot.slane %v8157_v38, 3  ;;  %v7489_v63 = vrot.slane %v7371_v44, 3 }
 0x425   : > { %v13958_v31 = vpop.f32.mrb[8].mxu0  ;;  %v5864_v41 = vpop.f32.mrb[28].mxu1 }
 0x426   : > { %v7004_v4 = vpop.f32.mrb[9].mxu0  ;;  %v5865_v39 = vadd.f32 %v5864_v41, %v13840_v15  ;;  %v5866_v28 = vpop.f32.mrb[29].mxu1  ;;  %v8160_v15 = vunpack.c.l.bf16 %v8223_v13 }
 0x427   : > { %v13960_v61 = vpop.f32.mrb[10].mxu0  ;;  %v5867_v22 = vpop.f32.mrb[30].mxu1  ;;  %v8224_v4 = vld [vmem:[%s9091_s16 + $0x20] sm:$0xff]   ;;  %v7492_v28 = vrot.slane %v8156_v43, 3 }
 0x428   : > { %v7007_v59 = vpop.f32.mrb[11].mxu0  ;;  %v13966_v54 = vadd.f32 %v8653_v9, %v5865_v39  ;;  %v5868_v21 = vadd.f32 %v5867_v22, %v13844_v25  ;;  %v5869_v2 = vpop.f32.mrb[31].mxu1  ;;  %v8164_v25 = vunpack.c.l.bf16 %v8224_v4  ;;  %v8165_v16 = vunpack.c.h.bf16 %v8224_v4 }
 0x429   : > { %v13981_v2 = vld [vmem:[%s14216_s4] ss:$0 sm:$0xff] }
 0x42a   : > { %15146 = vst [vmem:[#allocation60_spill] sm:$0xff] %v13966_v54  ;;  %v13971_v19 = vadd.f32 %v13922_v29, %v5868_v21  ;;  %v7495_v54 = vsel %vm7488_vm13, %v7492_v28, %v7494_v34  ;;  %v7502_v20 = vrot.slane %v8165_v16, 3  ;;  %v7493_v16 = vsel %vm7488_vm13, %v7490_v5, %v7492_v28 }
 0x42c   : > { %15147 = vst [vmem:[#allocation57_spill] sm:$0xff] %v13971_v19 }
 0x42d   : > { %v13974_v59 = vpop.f32.mrb[12].mxu0  ;;  %v8673_v39 = vpop.f32.mrb[32].mxu1 }
 0x42e   : > { %v7012_v41 = vpop.f32.mrb[13].mxu0  ;;  %v7164_v29 = vadd.f32 %v8673_v39, %v6986_v50  ;;  %v7155_v21 = vpop.f32.mrb[33].mxu1  ;;  %v13988_v39 = vld [vmem:[%s9091_s16 + $0x28] sm:$0xff]  }
 0x42f   : > { %v13976_v9 = vpop.f32.mrb[14].mxu0  ;;  %v7156_v43 = vadd.f32 %v7155_v21, %v13930_v57  ;;  %v8674_v38 = vpop.f32.mrb[34].mxu1  ;;  %v7496_v41 = vrot.slane %v8160_v15, 3  ;;  %v7491_v15 = vsel %vm7488_vm13, %v7489_v63, %v7490_v5 }
 0x430   : > { %v7015_v22 = vpop.f32.mrb[15].mxu0  ;;  %v7300_v19 = vadd.f32 %v7164_v29, %v13849_v49  ;;  %v7167_v4 = vadd.f32 %v8674_v38, %v13940_v35  ;;  %v7158_v50 = vpop.f32.mrb[35].mxu1  ;;  %v8161_v29 = vunpack.c.h.bf16 %v8223_v13 }
 0x431   : > { %v7298_v44 = vadd.f32 %v7156_v43, %v13852_v47  ;;  %v7159_v58 = vadd.f32 %v7158_v50, %v13932_v53  ;;  %v7500_v22 = vrot.slane %v8164_v25, 3  ;;  %v7497_v21 = vsel %vm7488_vm13, %v7494_v34, %v7496_v41 }
 0x432   : > { %v7417_v57 = vadd.f32 %v13981_v2, %v7300_v19  ;;  %v7301_v49 = vadd.f32 %v7167_v4, %v13855_v7  ;;  %v8168_v47 = vunpack.c.l.bf16 %v13988_v39  ;;  %v8172_v43 = vunpack.c.l.bf16 %v8226_v8 }
 0x433   : > { %v7415_v35 = vadd.f32 %v13981_v2, %v7298_v44  ;;  %v7299_v62 = vadd.f32 %v7159_v58, %v13859_v32  ;;  %v7503_v63 = vsel %vm7488_vm13, %v7500_v22, %v7502_v20  ;;  %v7498_v58 = vrot.slane %v8161_v29, 3 }
 0x434   : > { %v7600_v53 = vadd.f32 %v7495_v54, %v7417_v57  ;;  %v7418_v25 = vadd.f32 %v13981_v2, %v7301_v49  ;;  %v8173_v54 = vunpack.c.h.bf16 %v8226_v8 }
 0x435   : > { %v7018_v38 = vpop.f32.mrb[16].mxu0  ;;  %v7598_v7 = vadd.f32 %v7491_v15, %v7415_v35  ;;  %v7416_v34 = vadd.f32 %v13981_v2, %v7299_v62  ;;  %v8677_v32 = vpop.f32.mrb[36].mxu1  ;;  %v7504_v35 = vrot.slane %v8168_v47, 3 }
 0x436   : > { %v7020_v19 = vpop.f32.mrb[17].mxu0  ;;  %v7636_v4 = vmax.f32 %v7600_v53, 0.0  ;;  %v7601_v50 = vadd.f32 %v7497_v21, %v7418_v25  ;;  %v7180_v5 = vadd.f32 %v8677_v32, %v13958_v31  ;;  %v7171_v44 = vpop.f32.mrb[37].mxu1  ;;  %v14015_v25 = vrot.slane %v8172_v43, 3  ;;  %v14018_v31 = vld [vmem:[%s9091_s16 + $0x38] sm:$0xff]  }
 0x437   : > { %v7021_v13 = vpop.f32.mrb[18].mxu0  ;;  %v7634_v57 = vmax.f32 %v7598_v7, 0.0  ;;  %v7599_v49 = vadd.f32 %v7493_v16, %v7416_v34  ;;  %v7172_v62 = vadd.f32 %v7171_v44, %v13948_v23  ;;  %v8678_v15 = vpop.f32.mrb[38].mxu1  ;;  %v7510_v7 = vrot.slane %v8173_v54, 3 }
 0x438   : > { %v7023_v28 = vpop.f32.mrb[19].mxu0  ;;  %7672 = vst [vmem:[%s14006_s10 + $0x10] sm:$0xff] %v7636_v4  ;;  %v7637_v19 = vmax.f32 %v7601_v50, 0.0  ;;  %v7304_v8 = vadd.f32 %v7180_v5, %v13862_v55  ;;  %v7183_v21 = vadd.f32 %v8678_v15, %v13960_v61  ;;  %v7174_v53 = vpop.f32.mrb[39].mxu1  ;;  %v7499_v34 = vsel %vm7488_vm13, %v7496_v41, %v7498_v58 }
 0x439   : > { %7670 = vst [vmem:[%s14006_s10] sm:$0xff] %v7634_v57  ;;  %v7635_v29 = vmax.f32 %v7599_v49, 0.0  ;;  %v7302_v16 = vadd.f32 %v7172_v62, %v13865_v12  ;;  %v7175_v23 = vadd.f32 %v7174_v53, %v13950_v40  ;;  %v8169_v61 = vunpack.c.h.bf16 %v13988_v39  ;;  %v8228_v57 = vld [vmem:[%s9091_s16 + $0x40] sm:$0xff]  }
 0x43a   : > { %7673 = vst [vmem:[%s14006_s10 + $0x18] sm:$0xff] %v7637_v19  ;;  %v7421_v47 = vadd.f32 %v13981_v2, %v7304_v8  ;;  %v7305_v55 = vadd.f32 %v7183_v21, %v13867_v52  ;;  %v7505_v32 = vsel %vm7488_vm13, %v7502_v20, %v7504_v35  ;;  %v8176_v40 = vunpack.c.l.bf16 %v14018_v31 }
 0x43b   : > { %7671 = vst [vmem:[%s14006_s10 + $0x8] sm:$0xff] %v7635_v29  ;;  %v7419_v43 = vadd.f32 %v13981_v2, %v7302_v16  ;;  %v7303_v12 = vadd.f32 %v7175_v23, %v13871_v51  ;;  %v7501_v41 = vsel %vm7488_vm13, %v7498_v58, %v7500_v22  ;;  %v7511_v20 = vsel %vm7488_vm13, %v14015_v25, %v7510_v7 }
 0x43c   : > { %v7604_v54 = vadd.f32 %v7503_v63, %v7421_v47  ;;  %v7422_v50 = vadd.f32 %v13981_v2, %v7305_v55  ;;  %v7506_v22 = vrot.slane %v8169_v61, 3  ;;  %v7512_v53 = vrot.slane %v8176_v40, 3  ;;  %v14047_v55 = vld [vmem:[%s9091_s16 + $0x48] sm:$0xff]  }
 0x43d   : > { %v14031_v4 = vpop.f32.mrb[20].mxu0  ;;  %v7602_v28 = vadd.f32 %v7499_v34, %v7419_v43  ;;  %v7420_v39 = vadd.f32 %v13981_v2, %v7303_v12  ;;  %v8681_v44 = vpop.f32.mrb[40].mxu1  ;;  %v8180_v34 = vunpack.c.l.bf16 %v8228_v57 }
 0x43e   : > { %v7028_v52 = vpop.f32.mrb[21].mxu0  ;;  %v7640_v51 = vmax.f32 %v7604_v54, 0.0  ;;  %v7605_v49 = vadd.f32 %v7505_v32, %v7422_v50  ;;  %v7196_v62 = vadd.f32 %v8681_v44, %v7018_v38  ;;  %v7187_v15 = vpop.f32.mrb[41].mxu1  ;;  %v8181_v32 = vunpack.c.h.bf16 %v8228_v57 }
 0x43f   : > { %v14038_v5 = vpop.f32.mrb[22].mxu0  ;;  %v7638_v58 = vmax.f32 %v7602_v28, 0.0  ;;  %v7603_v19 = vadd.f32 %v7501_v41, %v7420_v39  ;;  %v7188_v8 = vadd.f32 %v7187_v15, %v13974_v59  ;;  %v8682_v21 = vpop.f32.mrb[42].mxu1  ;;  %v7507_v12 = vsel %vm7488_vm13, %v7504_v35, %v7506_v22 }
 0x440   : > { %v7031_v63 = vpop.f32.mrb[23].mxu0  ;;  %7676 = vst [vmem:[%s14006_s10 + $0x30] sm:$0xff] %v7640_v51  ;;  %v7641_v29 = vmax.f32 %v7605_v49, 0.0  ;;  %v7308_v16 = vadd.f32 %v7196_v62, %v13874_v45  ;;  %v7199_v23 = vadd.f32 %v8682_v21, %v7021_v13  ;;  %v7190_v47 = vpop.f32.mrb[43].mxu1  ;;  %v8177_v45 = vunpack.c.h.bf16 %v14018_v31 }
 0x441   : > { %7674 = vst [vmem:[%s14006_s10 + $0x20] sm:$0xff] %v7638_v58  ;;  %v7639_v38 = vmax.f32 %v7603_v19, 0.0  ;;  %v7306_v61 = vadd.f32 %v7188_v8, %v13876_v24  ;;  %v7191_v43 = vadd.f32 %v7190_v47, %v13976_v9  ;;  %v7513_v54 = vsel %vm7488_vm13, %v7510_v7, %v7512_v53 }
 0x442   : > { %7677 = vst [vmem:[%s14006_s10 + $0x38] sm:$0xff] %v7641_v29  ;;  %v7425_v59 = vadd.f32 %v13981_v2, %v7308_v16  ;;  %v7309_v40 = vadd.f32 %v7199_v23, %v13878_v27  ;;  %v8184_v9 = vunpack.c.l.bf16 %v14047_v55  ;;  %v7509_v35 = vsel %vm7488_vm13, %v7506_v22, %v14015_v25 }
 0x443   : > { %7675 = vst [vmem:[%s14006_s10 + $0x28] sm:$0xff] %v7639_v38  ;;  %v7423_v13 = vadd.f32 %v13981_v2, %v7306_v61  ;;  %v7307_v24 = vadd.f32 %v7191_v43, %v13881_v1  ;;  %v7516_v57 = vrot.slane %v8180_v34, 3  ;;  %v7518_v7 = vrot.slane %v8181_v32, 3  ;;  %v8230_v61 = vld [vmem:[%s9091_s16 + $0x50] sm:$0xff]  }
 0x444   : > { %v7608_v41 = vadd.f32 %v7511_v20, %v7425_v59  ;;  %v7426_v52 = vadd.f32 %v13981_v2, %v7309_v40  ;;  %v7514_v62 = vrot.slane %v8177_v45, 3  ;;  %v7520_v19 = vrot.slane %v8184_v9, 3 }
 0x445   : > { %v7034_v50 = vpop.f32.mrb[24].mxu0  ;;  %v7606_v27 = vadd.f32 %v7507_v12, %v7423_v13  ;;  %v7424_v31 = vadd.f32 %v13981_v2, %v7307_v24  ;;  %v8685_v44 = vpop.f32.mrb[44].mxu1  ;;  %v7519_v47 = vsel %vm7488_vm13, %v7516_v57, %v7518_v7 }
 0x446   : > { %v7036_v28 = vpop.f32.mrb[25].mxu0  ;;  %v7644_v51 = vmax.f32 %v7608_v41, 0.0  ;;  %v7609_v1 = vadd.f32 %v7513_v54, %v7426_v52  ;;  %v7212_v63 = vadd.f32 %v8685_v44, %v7034_v50  ;;  %v7203_v20 = vpop.f32.mrb[45].mxu1  ;;  %v7515_v43 = vsel %vm7488_vm13, %v7512_v53, %v7514_v62 }
 0x447   : > { %v7037_v39 = vpop.f32.mrb[26].mxu0  ;;  %v7642_v15 = vmax.f32 %v7606_v27, 0.0  ;;  %v7607_v25 = vadd.f32 %v7509_v35, %v7424_v31  ;;  %v7204_v22 = vadd.f32 %v7203_v20, %v14031_v4  ;;  %v8686_v58 = vpop.f32.mrb[46].mxu1  ;;  %v7521_v12 = vsel %vm7488_vm13, %v7518_v7, %v7520_v19 }
 0x448   : > { %v7039_v49 = vpop.f32.mrb[27].mxu0  ;;  %7680 = vst [vmem:[%s14006_s10 + $0x50] sm:$0xff] %v7644_v51  ;;  %v7645_v8 = vmax.f32 %v7609_v1, 0.0  ;;  %v7312_v21 = vadd.f32 %v7212_v63, %v13884_v30  ;;  %v7215_v29 = vadd.f32 %v8686_v58, %v7037_v39  ;;  %v7206_v16 = vpop.f32.mrb[47].mxu1  ;;  %v8185_v30 = vunpack.c.h.bf16 %v14047_v55 }
 0x449   : > { %7678 = vst [vmem:[%s14006_s10 + $0x40] sm:$0xff] %v7642_v15  ;;  %v7643_v23 = vmax.f32 %v7607_v25, 0.0  ;;  %v7310_v34 = vadd.f32 %v7204_v22, %v13886_v14  ;;  %v7207_v38 = vadd.f32 %v7206_v16, %v14038_v5  ;;  %v7517_v13 = vsel %vm7488_vm13, %v7514_v62, %v7516_v57 }
 0x44a   : > { %7681 = vst [vmem:[%s14006_s10 + $0x58] sm:$0xff] %v7645_v8  ;;  %v7429_v4 = vadd.f32 %v13981_v2, %v7312_v21  ;;  %v7313_v32 = vadd.f32 %v7215_v29, %v13888_v37  ;;  %v8188_v53 = vunpack.c.l.bf16 %v8230_v61  ;;  %v7522_v28 = vrot.slane %v8185_v30, 3 }
 0x44b   : > { %7679 = vst [vmem:[%s14006_s10 + $0x48] sm:$0xff] %v7643_v23  ;;  %v7427_v59 = vadd.f32 %v13981_v2, %v7310_v34  ;;  %v7311_v14 = vadd.f32 %v7207_v38, %v13891_v60  ;;  %v8231_v60 = vld [vmem:[%s9091_s16 + $0x58] sm:$0xff]   ;;  %v8189_v57 = vunpack.c.h.bf16 %v8230_v61 }
 0x44c   : > { %v7612_v5 = vadd.f32 %v7519_v47, %v7429_v4  ;;  %v7430_v45 = vadd.f32 %v13981_v2, %v7313_v32  ;;  %v7524_v51 = vrot.slane %v8188_v53, 3  ;;  %v8192_v62 = vunpack.c.l.bf16 %v8231_v60  ;;  %v8232_v32 = vld [vmem:[%s9091_s16 + $0x60] sm:$0xff]  }
 0x44d   : > { %v7042_v40 = vpop.f32.mrb[28].mxu0  ;;  %v7610_v37 = vadd.f32 %v7515_v43, %v7427_v59  ;;  %v7428_v55 = vadd.f32 %v13981_v2, %v7311_v14  ;;  %v8689_v24 = vpop.f32.mrb[48].mxu1  ;;  %v7523_v15 = vsel %vm7488_vm13, %v7520_v19, %v7522_v28  ;;  %v7526_v58 = vrot.slane %v8189_v57, 3  ;;  %v8233_v57 = vld [vmem:[%s9091_s16 + $0x68] sm:$0xff]  }
 0x44e   : > { %v7044_v54 = vpop.f32.mrb[29].mxu0  ;;  %v7648_v9 = vmax.f32 %v7612_v5, 0.0  ;;  %v7613_v41 = vadd.f32 %v7521_v12, %v7430_v45  ;;  %v7219_v35 = vpop.f32.mrb[49].mxu1  ;;  %v7525_v29 = vsel %vm7488_vm13, %v7522_v28, %v7524_v51  ;;  %v7528_v34 = vrot.slane %v8192_v62, 3 }
 0x44f   : > { %v7045_v50 = vpop.f32.mrb[30].mxu0  ;;  %v7646_v27 = vmax.f32 %v7610_v37, 0.0  ;;  %v7611_v31 = vadd.f32 %v7517_v13, %v7428_v55  ;;  %v7220_v39 = vadd.f32 %v7219_v35, %v7042_v40  ;;  %v8690_v44 = vpop.f32.mrb[50].mxu1  ;;  %v8193_v40 = vunpack.c.h.bf16 %v8231_v60 }
 0x450   : > { %v7047_v52 = vpop.f32.mrb[31].mxu0  ;;  %7684 = vst [vmem:[%s14006_s10 + $0x70] sm:$0xff] %v7648_v9  ;;  %v7649_v7 = vmax.f32 %v7613_v41, 0.0  ;;  %v7222_v1 = vpop.f32.mrb[51].mxu1  ;;  %v8196_v54 = vunpack.c.l.bf16 %v8232_v32 }
 0x451   : > { %7682 = vst [vmem:[%s14006_s10 + $0x60] sm:$0xff] %v7646_v27  ;;  %v7647_v49 = vmax.f32 %v7611_v31, 0.0  ;;  %v7314_v63 = vadd.f32 %v7220_v39, %v13894_v42  ;;  %v7223_v20 = vadd.f32 %v7222_v1, %v7045_v50  ;;  %v7530_v50 = vrot.slane %v8193_v40, 3 }
 0x452   : > { %7685 = vst [vmem:[%s14006_s10 + $0x78] sm:$0xff] %v7649_v7  ;;  %v7532_v35 = vrot.slane %v8196_v54, 3  ;;  %v8197_v1 = vunpack.c.h.bf16 %v8232_v32 }
 0x453   : > { %7683 = vst [vmem:[%s14006_s10 + $0x68] sm:$0xff] %v7647_v49  ;;  %v7431_v25 = vadd.f32 %v13981_v2, %v7314_v63  ;;  %v7315_v8 = vadd.f32 %v7223_v20, %v13897_v0  ;;  %v7527_v0 = vsel %vm7488_vm13, %v7524_v51, %v7526_v58  ;;  %v7531_v7 = vsel %vm7488_vm13, %v7528_v34, %v7530_v50 }
 0x454   : > { %v7533_v62 = vsel %vm7488_vm13, %v7530_v50, %v7532_v35 }
 0x455   : > { %v7050_v22 = vpop.f32.mrb[32].mxu0  ;;  %v7614_v23 = vadd.f32 %v7523_v15, %v7431_v25  ;;  %v7432_v42 = vadd.f32 %v13981_v2, %v7315_v8  ;;  %v8693_v38 = vpop.f32.mrb[52].mxu1  ;;  %v8200_v15 = vunpack.c.l.bf16 %v8233_v57 }
 0x456   : > { %v7228_v21 = vadd.f32 %v8689_v24, %v7050_v22  ;;  %v7052_v16 = vpop.f32.mrb[33].mxu0  ;;  %v7235_v43 = vpop.f32.mrb[53].mxu1 }
 0x457   : > { %v7053_v47 = vpop.f32.mrb[34].mxu0  ;;  %v7650_v30 = vmax.f32 %v7614_v23, 0.0  ;;  %v7615_v59 = vadd.f32 %v7525_v29, %v7432_v42  ;;  %v8694_v12 = vpop.f32.mrb[54].mxu1  ;;  %v7536_v42 = vrot.slane %v8200_v15, 3 }
 0x458   : > { %v7316_v19 = vadd.f32 %v7228_v21, %v13899_v10  ;;  %v7231_v61 = vadd.f32 %v8690_v44, %v7053_v47  ;;  %v7055_v4 = vpop.f32.mrb[35].mxu0  ;;  %v7238_v45 = vpop.f32.mrb[55].mxu1  ;;  %v7529_v10 = vsel %vm7488_vm13, %v7526_v58, %v7528_v34  ;;  %v7534_v58 = vrot.slane %v8197_v1, 3 }
 0x459   : > { %7686 = vst [vmem:[%s14006_s10 + $0x80] sm:$0xff] %v7650_v30  ;;  %v7651_v13 = vmax.f32 %v7615_v59, 0.0 }
 0x45a   : > { %v7433_v14 = vadd.f32 %v13981_v2, %v7316_v19  ;;  %v7317_v5 = vadd.f32 %v7231_v61, %v13902_v3  ;;  %v7535_v32 = vsel %vm7488_vm13, %v7532_v35, %v7534_v58  ;;  %v8235_v35 = vld [vmem:[%s9091_s16 + $0x78] sm:$0xff]  }
 0x45b   : > { %7687 = vst [vmem:[%s14006_s10 + $0x88] sm:$0xff] %v7651_v13 }
 0x45c   : > { %v7616_v53 = vadd.f32 %v7527_v0, %v7433_v14  ;;  %v7434_v37 = vadd.f32 %v13981_v2, %v7317_v5  ;;  %v8201_v0 = vunpack.c.h.bf16 %v8233_v57 }
 0x45d   : > { %v7058_v55 = vpop.f32.mrb[36].mxu0  ;;  %v14106_v28 = vpop.f32.mrb[56].mxu1 }
 0x45e   : > { %v7652_v24 = vmax.f32 %v7616_v53, 0.0  ;;  %v7617_v9 = vadd.f32 %v7529_v10, %v7434_v37  ;;  %v7236_v41 = vadd.f32 %v7235_v43, %v7058_v55  ;;  %v7060_v52 = vpop.f32.mrb[37].mxu0  ;;  %v7251_v44 = vpop.f32.mrb[57].mxu1  ;;  %v8234_v43 = vld [vmem:[%s9091_s16 + $0x70] sm:$0xff]   ;;  %v7538_v13 = vrot.slane %v8201_v0, 3 }
 0x45f   : > { %v7061_v3 = vpop.f32.mrb[38].mxu0  ;;  %v14112_v51 = vpop.f32.mrb[58].mxu1 }
 0x460   : > { %7688 = vst [vmem:[%s14006_s10 + $0x90] sm:$0xff] %v7652_v24  ;;  %v7653_v60 = vmax.f32 %v7617_v9, 0.0  ;;  %v7318_v27 = vadd.f32 %v7236_v41, %v13905_v56  ;;  %v7239_v31 = vadd.f32 %v7238_v45, %v7061_v3  ;;  %v7063_v39 = vpop.f32.mrb[39].mxu0  ;;  %v7254_v20 = vpop.f32.mrb[59].mxu1 }
 0x462   : > { %7689 = vst [vmem:[%s14006_s10 + $0x98] sm:$0xff] %v7653_v60  ;;  %v7435_v49 = vadd.f32 %v13981_v2, %v7318_v27  ;;  %v7319_v63 = vadd.f32 %v7239_v31, %v13908_v6  ;;  %v7539_v60 = vsel %vm7488_vm13, %v7536_v42, %v7538_v13  ;;  %v8205_v31 = vunpack.c.h.bf16 %v8234_v43 }
 0x464   : > { %v7618_v56 = vadd.f32 %v7531_v7, %v7435_v49  ;;  %v7436_v25 = vadd.f32 %v13981_v2, %v7319_v63  ;;  %v8208_v7 = vunpack.c.l.bf16 %v8235_v35 }
 0x465   : > { %v7066_v22 = vpop.f32.mrb[40].mxu0  ;;  %v14119_v47 = vpop.f32.mrb[60].mxu1 }
 0x466   : > { %v7654_v8 = vmax.f32 %v7618_v56, 0.0  ;;  %v7619_v21 = vadd.f32 %v7533_v62, %v7436_v25  ;;  %v7244_v29 = vadd.f32 %v8693_v38, %v7066_v22  ;;  %v7068_v16 = vpop.f32.mrb[41].mxu0  ;;  %v14123_v4 = vpop.f32.mrb[61].mxu1 }
 0x467   : > { %v7069_v23 = vpop.f32.mrb[42].mxu0  ;;  %v14127_v30 = vpop.f32.mrb[62].mxu1  ;;  %v8236_v16 = vld [vmem:[%s9091_s16 + $0x80] sm:$0xff]  }
 0x468   : > { %7690 = vst [vmem:[%s14006_s10 + $0xa0] sm:$0xff] %v7654_v8  ;;  %v7655_v6 = vmax.f32 %v7619_v21, 0.0  ;;  %v7320_v34 = vadd.f32 %v7244_v29, %v13911_v26  ;;  %v7247_v19 = vadd.f32 %v8694_v12, %v7069_v23  ;;  %v7071_v61 = vpop.f32.mrb[43].mxu0  ;;  %v14132_v40 = vpop.f32.mrb[63].mxu1  ;;  %v7537_v26 = vsel %vm7488_vm13, %v7534_v58, %v7536_v42 }
 0x469   : > { %v8204_v12 = vunpack.c.l.bf16 %v8234_v43  ;;  %v7544_v58 = vrot.slane %v8208_v7, 3  ;;  %v8209_v42 = vunpack.c.h.bf16 %v8235_v35 }
 0x46a   : > { %7691 = vst [vmem:[%s14006_s10 + $0xa8] sm:$0xff] %v7655_v6  ;;  %v7437_v38 = vadd.f32 %v13981_v2, %v7320_v34  ;;  %v7321_v59 = vadd.f32 %v7247_v19, %v13914_v11  ;;  %v8212_v19 = vunpack.c.l.bf16 %v8236_v16 }
 0x46b   : > { %v7540_v50 = vrot.slane %v8204_v12, 3 }
 0x46c   : > { %v7620_v14 = vadd.f32 %v7535_v32, %v7437_v38  ;;  %v7438_v5 = vadd.f32 %v13981_v2, %v7321_v59  ;;  %v7548_v12 = vrot.slane %v8212_v19, 3 }
 0x46d   : > { %v7074_v45 = vpop.f32.mrb[44].mxu0  ;;  %v14136_v24 = vpop.f32.mrb[64].mxu1 }
 0x46e   : > { %v7656_v10 = vmax.f32 %v7620_v14, 0.0  ;;  %v7621_v54 = vadd.f32 %v7537_v26, %v7438_v5  ;;  %v7252_v53 = vadd.f32 %v7251_v44, %v7074_v45  ;;  %v7076_v37 = vpop.f32.mrb[45].mxu0  ;;  %v14140_v3 = vpop.f32.mrb[65].mxu1 }
 0x46f   : > { %v7077_v55 = vpop.f32.mrb[46].mxu0  ;;  %v14144_v27 = vpop.f32.mrb[66].mxu1 }
 0x470   : > { %7692 = vst [vmem:[%s14006_s10 + $0xb0] sm:$0xff] %v7656_v10  ;;  %v7657_v11 = vmax.f32 %v7621_v54, 0.0  ;;  %v7322_v9 = vadd.f32 %v7252_v53, %v13917_v17  ;;  %v7255_v41 = vadd.f32 %v7254_v20, %v7077_v55  ;;  %v7079_v52 = vpop.f32.mrb[47].mxu0  ;;  %v14149_v57 = vpop.f32.mrb[67].mxu1  ;;  %v7541_v17 = vsel %vm7488_vm13, %v7538_v13, %v7540_v50  ;;  %v8237_v13 = vld [vmem:[%s9091_s16 + $0x88] sm:$0xff]  }
 0x471   : > { %v7542_v20 = vrot.slane %v8205_v31, 3  ;;  %v8213_v54 = vunpack.c.h.bf16 %v8236_v16  ;;  %v8216_v55 = vunpack.c.l.bf16 %v8237_v13 }
 0x472   : > { %7693 = vst [vmem:[%s14006_s10 + $0xb8] sm:$0xff] %v7657_v11  ;;  %v7439_v39 = vadd.f32 %v13981_v2, %v7322_v9  ;;  %v7323_v44 = vadd.f32 %v7255_v41, %v13920_v36 }
 0x473   : > { %v7543_v23 = vsel %vm7488_vm13, %v7540_v50, %v7542_v20  ;;  %v7545_v34 = vsel %vm7488_vm13, %v7542_v20, %v7544_v58  ;;  %v7552_v31 = vrot.slane %v8216_v55, 3 }
 0x474   : > { %v7622_v1 = vadd.f32 %v7539_v60, %v7439_v39  ;;  %v7440_v49 = vadd.f32 %v13981_v2, %v7323_v44 }
 0x475   : > { %v7082_v63 = vpop.f32.mrb[48].mxu0 }
 0x476   : > { %v7658_v62 = vmax.f32 %v7622_v1, 0.0  ;;  %v7623_v15 = vadd.f32 %v7541_v17, %v7440_v49  ;;  %v7260_v56 = vadd.f32 %v14106_v28, %v7082_v63  ;;  %v7084_v25 = vpop.f32.mrb[49].mxu0  ;;  %v8238_v1 = vld [vmem:[%s9091_s16 + $0x90] sm:$0xff]   ;;  %v8217_v63 = vunpack.c.h.bf16 %v8237_v13 }
 0x477   : > { %v7085_v22 = vpop.f32.mrb[50].mxu0 }
 0x478   : > { %7694 = vst [vmem:[%s14006_s10 + $0xc0] sm:$0xff] %v7658_v62  ;;  %v7659_v36 = vmax.f32 %v7623_v15, 0.0  ;;  %v7324_v8 = vadd.f32 %v7260_v56, %v13925_v18  ;;  %v7263_v21 = vadd.f32 %v14112_v51, %v7085_v22  ;;  %v7087_v29 = vpop.f32.mrb[51].mxu0  ;;  %v7546_v51 = vrot.slane %v8209_v42, 3  ;;  %v15149_v62 = vld [vmem:[#allocation52_spill] sm:$0xff] }
 0x479   : > { %v8220_v56 = vunpack.c.l.bf16 %v8238_v1 }
 0x47a   : > { %7695 = vst [vmem:[%s14006_s10 + $0xc8] sm:$0xff] %v7659_v36  ;;  %v7441_v6 = vadd.f32 %v13981_v2, %v7324_v8  ;;  %v7325_v28 = vadd.f32 %v7263_v21, %v13928_v48  ;;  %v7547_v10 = vsel %vm7488_vm13, %v7544_v58, %v7546_v51  ;;  %v7549_v37 = vsel %vm7488_vm13, %v7546_v51, %v7548_v12 }
 0x47c   : > { %v7624_v61 = vadd.f32 %v7543_v23, %v7441_v6  ;;  %v7442_v18 = vadd.f32 %v13981_v2, %v7325_v28  ;;  %v7556_v23 = vrot.slane %v8220_v56, 3  ;;  %v15150_v6 = vld [vmem:[#allocation49_spill] sm:$0xff] }
 0x47d   : > { %v7090_v43 = vpop.f32.mrb[52].mxu0 }
 0x47e   : > { %v7660_v32 = vmax.f32 %v7624_v61, 0.0  ;;  %v7625_v0 = vadd.f32 %v7545_v34, %v7442_v18  ;;  %v7268_v38 = vadd.f32 %v14123_v4, %v7090_v43  ;;  %v7092_v59 = vpop.f32.mrb[53].mxu0  ;;  %v7370_v61 = vld [vmem:[%s9091_s16 + $0x98] sm:$0x3]  ;;  %v8221_v43 = vunpack.c.h.bf16 %v8238_v1 }
 0x47f   : > { %v7093_v26 = vpop.f32.mrb[54].mxu0 }
 0x480   : > { %7696 = vst [vmem:[%s14006_s10 + $0xd0] sm:$0xff] %v7660_v32  ;;  %v7661_v14 = vmax.f32 %v7625_v0, 0.0  ;;  %v7326_v48 = vadd.f32 %v7268_v38, %v13935_v46  ;;  %v7271_v5 = vadd.f32 %v14132_v40, %v7093_v26  ;;  %v7095_v45 = vpop.f32.mrb[55].mxu0  ;;  %v7550_v40 = vrot.slane %v8213_v54, 3  ;;  %v15151_v32 = vld [vmem:[#allocation62_spill] sm:$0xff] }
 0x481   : > { %v7407_v38 = vunpack.c.l.bf16 %v7370_v61 }
 0x482   : > { %7697 = vst [vmem:[%s14006_s10 + $0xd8] sm:$0xff] %v7661_v14  ;;  %v7443_v53 = vadd.f32 %v13981_v2, %v7326_v48  ;;  %v7327_v4 = vadd.f32 %v7271_v5, %v13938_v33  ;;  %v15148_v33 = vld [vmem:[#allocation44_spill] sm:$0xff]  ;;  %v7551_v49 = vsel %vm7488_vm13, %v7548_v12, %v7550_v40  ;;  %v7553_v15 = vsel %vm7488_vm13, %v7550_v40, %v7552_v31 }
 0x484   : > { %v7626_v50 = vadd.f32 %v7547_v10, %v7443_v53  ;;  %v7444_v46 = vadd.f32 %v13981_v2, %v7327_v4  ;;  %v7560_v10 = vrot.slane %v7407_v38, 3  ;;  %v15152_v53 = vld [vmem:[#allocation60_spill] sm:$0xff] }
 0x485   : > { %v7098_v11 = vpop.f32.mrb[56].mxu0 }
 0x486   : > { %v7662_v9 = vmax.f32 %v7626_v50, 0.0  ;;  %v7627_v41 = vadd.f32 %v7549_v37, %v7444_v46  ;;  %v7276_v52 = vadd.f32 %v14119_v47, %v7098_v11  ;;  %v7100_v35 = vpop.f32.mrb[57].mxu0  ;;  %v15153_v11 = vld [vmem:[#allocation57_spill] sm:$0xff] }
 0x487   : > { %v7101_v60 = vpop.f32.mrb[58].mxu0 }
 0x488   : > { %7698 = vst [vmem:[%s14006_s10 + $0xe0] sm:$0xff] %v7662_v9  ;;  %v7663_v39 = vmax.f32 %v7627_v41, 0.0  ;;  %v7328_v44 = vadd.f32 %v7276_v52, %v15148_v33  ;;  %v7279_v17 = vadd.f32 %v14127_v30, %v7101_v60  ;;  %v7103_v7 = vpop.f32.mrb[59].mxu0  ;;  %v7554_v30 = vrot.slane %v8217_v63, 3 }
 0x48a   : > { %7699 = vst [vmem:[%s14006_s10 + $0xe8] sm:$0xff] %v7663_v39  ;;  %v7445_v20 = vadd.f32 %v13981_v2, %v7328_v44  ;;  %v7329_v47 = vadd.f32 %v7279_v17, %v15149_v62  ;;  %v7555_v18 = vsel %vm7488_vm13, %v7552_v31, %v7554_v30  ;;  %v7557_v0 = vsel %vm7488_vm13, %v7554_v30, %v7556_v23 }
 0x48c   : > { %v7628_v25 = vadd.f32 %v7551_v49, %v7445_v20  ;;  %v7446_v22 = vadd.f32 %v13981_v2, %v7329_v47 }
 0x48d   : > { %v7106_v58 = vpop.f32.mrb[60].mxu0 }
 0x48e   : > { %v7664_v36 = vmax.f32 %v7628_v25, 0.0  ;;  %v7629_v8 = vadd.f32 %v7553_v15, %v7446_v22  ;;  %v7284_v21 = vadd.f32 %v14140_v3, %v7106_v58  ;;  %v7108_v29 = vpop.f32.mrb[61].mxu0 }
 0x48f   : > { %v7109_v16 = vpop.f32.mrb[62].mxu0 }
 0x490   : > { %7700 = vst [vmem:[%s14006_s10 + $0xf0] sm:$0xff] %v7664_v36  ;;  %v7665_v42 = vmax.f32 %v7629_v8, 0.0  ;;  %v7330_v28 = vadd.f32 %v7284_v21, %v15150_v6  ;;  %v7287_v34 = vadd.f32 %v14149_v57, %v7109_v16  ;;  %v7111_v19 = vpop.f32.mrb[63].mxu0  ;;  %v7558_v57 = vrot.slane %v8221_v43, 3 }
 0x492   : > { %7701 = vst [vmem:[%s14006_s10 + $0xf8] sm:$0xff] %v7665_v42  ;;  %v7447_v51 = vadd.f32 %v13981_v2, %v7330_v28  ;;  %v7331_v3 = vadd.f32 %v7287_v34, %v15151_v32  ;;  %v7559_v50 = vsel %vm7488_vm13, %v7556_v23, %v7558_v57 }
 0x494   : > { %v7630_v59 = vadd.f32 %v7555_v18, %v7447_v51  ;;  %v7448_v26 = vadd.f32 %v13981_v2, %v7331_v3 }
 0x495   : > { %v7114_v12 = vpop.f32.mrb[64].mxu0 }
 0x496   : > { %v7666_v14 = vmax.f32 %v7630_v59, 0.0  ;;  %v7631_v48 = vadd.f32 %v7557_v0, %v7448_v26  ;;  %v7292_v5 = vadd.f32 %v14136_v24, %v7114_v12  ;;  %v7116_v45 = vpop.f32.mrb[65].mxu0  ;;  %v7561_v24 = vsel %vm7488_vm13, %v7558_v57, %v7560_v10 }
 0x497   : > { %v7117_v13 = vpop.f32.mrb[66].mxu0 }
 0x498   : > { %7702 = vst [vmem:[%s14006_s10 + $0x100] sm:$0xff] %v7666_v14  ;;  %v7667_v54 = vmax.f32 %v7631_v48, 0.0  ;;  %v7332_v4 = vadd.f32 %v7292_v5, %v15152_v53  ;;  %v7295_v37 = vadd.f32 %v14144_v27, %v7117_v13  ;;  %v7119_v55 = vpop.f32.mrb[67].mxu0 }
 0x49a   : > { %7703 = vst [vmem:[%s14006_s10 + $0x108] sm:$0xff] %v7667_v54  ;;  %v7449_v46 = vadd.f32 %v13981_v2, %v7332_v4  ;;  %v7333_v40 = vadd.f32 %v7295_v37, %v15153_v11 }
 0x49c   : > { %v7632_v9 = vadd.f32 %v7559_v50, %v7449_v46  ;;  %v7450_v41 = vadd.f32 %v13981_v2, %v7333_v40 }
 0x49e   : > { %v7668_v52 = vmax.f32 %v7632_v9, 0.0  ;;  %v7633_v35 = vadd.f32 %v7561_v24, %v7450_v41 }
 0x4a0   : > { %7704 = vst [vmem:[%s14006_s10 + $0x110] sm:$0xff] %v7668_v52  ;;  %v7669_v60 = vmax.f32 %v7633_v35, 0.0 }
 0x4a2   : > { %7705 = vst [vmem:[%s14006_s10 + $0x118] sm:$0xff] %v7669_v60 }
 0x4a3 PF: > { %s15_s18 = sadd.s32 1, %s9009_s18  }
 0x4a4   : > { %p12_p4 = scmp.ge.s32.totalorder %s15_s18, 4  }
 0x4a6   :  { %14 = sbr.rel (!%p12_p4) target bundleno = 1 (0x1), region = 74 }

</bundles_post_ra>
